<compile_context>
chip_gen: v7x
topology: tpu7x:2x2x1
jax: 0.10.0
libtpu: 0.0.40
codegen_flags: <defaults>
</compile_context>

<pallas_src>
import functools

import jax
import jax.numpy as jnp
from jax.experimental import pallas as pl
from jax.experimental.pallas import tpu as pltpu


_VMEM_LIMIT = 48 * 1024 * 1024   # explicit scoped-VMEM cap: > v5e's 16 MiB default,
                                 # < v7x's 64 MiB physical VMEM.


def _full_spec_2d(shape):
    """BlockSpec for an operand replicated across a 2-D grid (exact grid-arg lambda)."""
    zeros = (0,) * len(shape)
    return pl.BlockSpec(shape, lambda i, j: zeros)


# ----------------------------------------------------------------------------
# Kernel 1: GrayscaleCNN conv3x3 + ReLU + global mean pool, transposed layout.
# patches block: (9, p_chunk) -- pixels on lanes.  conv as 9 VPU broadcast-FMAs.
# Grid: (batch, pixel_chunk); pixel axis is an 'arbitrary' reduction accumulated
# in a (C,1) VMEM scratch, finalized (mean) on the last chunk.
# ----------------------------------------------------------------------------
def gray_pool_kernel(patches_ref, cwT_ref, cbT_ref, out_ref, acc_ref, *, n_pixels):
    j = pl.program_id(1)
    p_chunk = patches_ref.shape[1]

    @pl.when(j == 0)
    def _():
        acc_ref[...] = jnp.zeros_like(acc_ref)

    patches = patches_ref[...]                          # (9, p_chunk)
    cwT = cwT_ref[...]                                  # (C, 9)
    # conv3x3 as 9 unrolled VPU broadcast-FMAs (keeps the MXU out of the gray path)
    act = cwT[:, 0:1] * patches[0:1, :]                 # (C, p_chunk)
    for k in range(1, 9):
        act = act + cwT[:, k:k + 1] * patches[k:k + 1, :]
    act = jnp.maximum(act + cbT_ref[...], 0.0)

    # mask zero-padded tail pixel columns so the pooled mean stays exact
    col = j * p_chunk + jax.lax.broadcasted_iota(jnp.int32, (1, p_chunk), 1)
    act = jnp.where(col < n_pixels, act, 0.0)
    acc_ref[...] += jnp.sum(act, axis=1, keepdims=True)  # (C, 1)

    @pl.when(j == pl.num_programs(1) - 1)
    def _():
        out_ref[...] = acc_ref[...] * (1.0 / n_pixels)    # pooled mean, (C, 1)


def gray_pool(patches_T, conv_w, conv_b, *, p_chunk=65536):
    """patches_T: (B, 9, P) -> pooled conv features (B, C)."""
    B, K, P = patches_T.shape
    C = conv_w.shape[1]
    p_chunk_eff = min(p_chunk, pl.cdiv(P, 128) * 128)     # lane dim multiple of 128
    P_pad = pl.cdiv(P, p_chunk_eff) * p_chunk_eff
    if P_pad != P:
        patches_T = jnp.pad(patches_T, ((0, 0), (0, 0), (0, P_pad - P)))

    kernel = functools.partial(gray_pool_kernel, n_pixels=P)
    pooled = pl.pallas_call(
        kernel,
        out_shape=jax.ShapeDtypeStruct((B, C, 1), jnp.float32),
        grid_spec=pltpu.PrefetchScalarGridSpec(
            num_scalar_prefetch=0,
            grid=(B, P_pad // p_chunk_eff),
            in_specs=[
                pl.BlockSpec((None, K, p_chunk_eff), lambda b, j: (b, 0, j)),
                _full_spec_2d((C, 9)),      # conv_w^T
                _full_spec_2d((C, 1)),      # conv_b^T
            ],
            out_specs=pl.BlockSpec((None, C, 1), lambda b, j: (b, 0, 0)),
            scratch_shapes=[pltpu.VMEM((C, 1), jnp.float32)],
        ),
        compiler_params=pltpu.CompilerParams(
            dimension_semantics=("parallel", "arbitrary"),
            vmem_limit_bytes=_VMEM_LIMIT),
    )(patches_T, conv_w.T, conv_b.reshape(C, 1))
    return pooled[:, :, 0]                                # (B, C)


# ----------------------------------------------------------------------------
# Kernel 2: fused per-location pipeline, transposed (locations on lanes).
#   Fourier features (2 VPU FMAs + one sin pass, cos = sin(z + pi/2))
#   -> compression (one K=128 matmul + hoisted per-image gray bias)
#   -> semantic MLP head (narrow (nc, tile) lane-dense output, no lane padding).
# ----------------------------------------------------------------------------
def location_pipeline_kernel(loc_ref, gbias_ref, bf_ref, phase_ref, w1T_ref,
                             w2T_ref, b2T_ref, w3T_ref, b3T_ref, out_ref,
                             *, matmul_dtype):
    loc = loc_ref[...]                                    # (2, T)
    bf = bf_ref[...]                                      # (128, 2)  (Bf^T stacked twice)
    # Fourier projection: K=2 contraction -> two VPU broadcast-FMAs (MXU stays free).
    z = bf[:, 0:1] * loc[0:1, :] + bf[:, 1:2] * loc[1:2, :]          # (128, T)
    # rows 0..63 -> sin(z), rows 64..127 -> sin(z + pi/2) = cos(z)
    fourier = jnp.sin(z + phase_ref[...]).astype(matmul_dtype)        # (128, T)

    # CompressionLayer: relu(W1^T @ [sin|cos] + (gray @ W1g + b1))   (gray term hoisted)
    h1 = (jnp.dot(w1T_ref[...], fourier, preferred_element_type=jnp.float32)
          + gbias_ref[...])                               # (128, T) + (128, 1)
    h1 = jnp.maximum(h1, 0.0).astype(matmul_dtype)

    # ComplexSemanticNet: Linear -> ReLU -> Linear
    h2 = jnp.maximum(
        jnp.dot(w2T_ref[...], h1, preferred_element_type=jnp.float32) + b2T_ref[...],
        0.0).astype(matmul_dtype)                         # (64, T)
    out_ref[...] = (jnp.dot(w3T_ref[...], h2, preferred_element_type=jnp.float32)
                    + b3T_ref[...])                       # (nc, T)


def location_pipeline(loc_T, gray_bias, params, *, tile, matmul_dtype=jnp.float32):
    """loc_T: (B, 2, L_pad) (L_pad % tile == 0), gray_bias: (B, 128, 1) -> (B, nc, L_pad)."""
    B, _, L_pad = loc_T.shape
    F = params["bf"].shape[1]                             # 64
    nc = params["w3"].shape[1]

    bfT = params["bf"].T.astype(jnp.float32)              # (64, 2)
    bf128T = jnp.concatenate([bfT, bfT], axis=0)          # (128, 2)
    phase = jnp.concatenate(
        [jnp.zeros((F, 1), jnp.float32),
         jnp.full((F, 1), jnp.pi / 2, jnp.float32)], axis=0)          # (128, 1)
    w1T = params["w1l"].T.astype(matmul_dtype)            # (128, 128)
    w2T = params["w2"].T.astype(matmul_dtype)             # (64, 128)
    b2T = params["b2"].reshape(-1, 1)                     # (64, 1)
    w3T = params["w3"].T.astype(matmul_dtype)             # (nc, 64)
    b3T = params["b3"].reshape(-1, 1)                     # (nc, 1)

    kernel = functools.partial(location_pipeline_kernel, matmul_dtype=matmul_dtype)
    return pl.pallas_call(
        kernel,
        out_shape=jax.ShapeDtypeStruct((B, nc, L_pad), jnp.float32),
        grid_spec=pltpu.PrefetchScalarGridSpec(
            num_scalar_prefetch=0,
            # L-tile axis first so v7x megacore shards the long axis, not tiny B.
            grid=(L_pad // tile, B),
            in_specs=[
                pl.BlockSpec((None, 2, tile), lambda j, b: (b, 0, j)),     # locations^T
                pl.BlockSpec((None, 128, 1), lambda j, b: (b, 0, 0)),      # gray bias col
                _full_spec_2d(bf128T.shape),
                _full_spec_2d(phase.shape),
                _full_spec_2d(w1T.shape),
                _full_spec_2d(w2T.shape),
                _full_spec_2d(b2T.shape),
                _full_spec_2d(w3T.shape),
                _full_spec_2d(b3T.shape),
            ],
            out_specs=pl.BlockSpec((None, nc, tile), lambda j, b: (b, 0, j)),
        ),
        compiler_params=pltpu.CompilerParams(
            dimension_semantics=("parallel", "parallel"),
            vmem_limit_bytes=_VMEM_LIMIT),
    )(loc_T, gray_bias, bf128T, phase, w1T, w2T, b2T, w3T, b3T)


# ----------------------------------------------------------------------------
# Glue: im2col for the 3x3 conv (padding=1, stride=1), transposed (pixels on lanes).
# ----------------------------------------------------------------------------
def im2col_3x3_T(gray_images):
    # TODO(synk): for very large images, replace im2col's 9x blowup with an in-kernel
    #             shifted-slice conv over the raw (H, W) image block.
    B, _, H, W = gray_images.shape
    x = gray_images[:, 0]                                 # (B, H, W)
    xp = jnp.pad(x, ((0, 0), (1, 1), (1, 1)))
    cols = [xp[:, dy:dy + H, dx:dx + W] for dy in range(3) for dx in range(3)]
    return jnp.stack(cols, axis=1).reshape(B, 9, H * W)   # (B, 9, P)


# ----------------------------------------------------------------------------
# Full model forward (Pallas for hot paths, JAX glue for tiny per-image FCs).
# On v6e/v7x set matmul_dtype=jnp.bfloat16 (f32 accumulation kept in-kernel).
# ----------------------------------------------------------------------------
@functools.partial(jax.jit, static_argnames=("tile", "p_chunk", "matmul_dtype"))
def semantic_expert_forward(locations, gray_images, params, *,
                            tile=2048, p_chunk=65536, matmul_dtype=jnp.float32):
    B, L, _ = locations.shape
    nc = params["w3"].shape[1]

    # Gray path: Pallas conv + pool, then tiny per-image FCs (a few KFLOPs) in plain XLA.
    patches_T = im2col_3x3_T(gray_images)                            # (B, 9, P)
    pooled = gray_pool(patches_T, params["conv_w"], params["conv_b"],
                       p_chunk=p_chunk)                              # (B, C)
    gray_feat = pooled @ params["gfc_w"] + params["gfc_b"]           # (B, 128)
    # Hoisted compression-layer gray term: one per image, broadcast over all locations.
    gray_bias = (gray_feat @ params["w1g"] + params["b1"])[..., None]  # (B, 128, 1)

    # Location path: lane-dense transposed pipeline.
    tile_eff = min(tile, pl.cdiv(L, 128) * 128)
    L_pad = pl.cdiv(L, tile_eff) * tile_eff
    loc_T = jnp.swapaxes(locations, 1, 2)                            # (B, 2, L)
    if L_pad != L:
        loc_T = jnp.pad(loc_T, ((0, 0), (0, 0), (0, L_pad - L)))
    logits_T = location_pipeline(loc_T, gray_bias, params,
                                 tile=tile_eff, matmul_dtype=matmul_dtype)  # (B, nc, L_pad)

    # Narrow (nc-wide, unpadded-lane) transpose back to the module's (B*L, nc) output.
    if L_pad != L:
        logits_T = logits_T[:, :, :L]
    return jnp.swapaxes(logits_T, 1, 2).reshape(B * L, nc)


# ----------------------------------------------------------------------------
# Pure-JAX reference (correctness check).
# ----------------------------------------------------------------------------
def reference_forward(locations, gray_images, params):
    B, L, _ = locations.shape
    patches_T = im2col_3x3_T(gray_images)                            # (B, 9, P)
    act = jnp.maximum(jnp.einsum("bkp,kc->bpc", patches_T, params["conv_w"])
                      + params["conv_b"][None, :, :], 0.0)
    pooled = jnp.mean(act, axis=1)
    gray_feat = pooled @ params["gfc_w"] + params["gfc_b"]

    loc_flat = locations.reshape(B * L, 2)
    z = loc_flat @ params["bf"]
    fourier = jnp.concatenate([jnp.sin(z), jnp.cos(z)], axis=-1)
    gray_exp = jnp.broadcast_to(gray_feat[:, None, :], (B, L, 128)).reshape(B * L, 128)
    h1 = jnp.maximum(fourier @ params["w1l"] + gray_exp @ params["w1g"] + params["b1"], 0.0)
    h2 = jnp.maximum(h1 @ params["w2"] + params["b2"], 0.0)
    return h2 @ params["w3"] + params["b3"]


def init_params(key, num_classes, conv_c=8):
    ks = jax.random.split(key, 10)
    scale = lambda fan_in: 1.0 / jnp.sqrt(fan_in)
    return {
        # Fourier frequency matrix (fixed, Gaussian)
        "bf": jax.random.normal(ks[0], (2, 64), jnp.float32) * 2.0,
        # GrayscaleCNN
        "conv_w": jax.random.normal(ks[1], (9, conv_c), jnp.float32) * scale(9),
        "conv_b": jnp.zeros((1, conv_c), jnp.float32),
        "gfc_w": jax.random.normal(ks[2], (conv_c, 128), jnp.float32) * scale(conv_c),
        "gfc_b": jnp.zeros((1, 128), jnp.float32),
        # CompressionLayer (256 -> 128), split into location / gray input halves
        "w1l": jax.random.normal(ks[3], (128, 128), jnp.float32) * scale(256),
        "w1g": jax.random.normal(ks[4], (128, 128), jnp.float32) * scale(256),
        "b1": jnp.zeros((1, 128), jnp.float32),
        # ComplexSemanticNet
        "w2": jax.random.normal(ks[5], (128, 64), jnp.float32) * scale(128),
        "b2": jnp.zeros((1, 64), jnp.float32),
        "w3": jax.random.normal(ks[6], (64, num_classes), jnp.float32) * scale(64),
        "b3": jnp.zeros((1, num_classes), jnp.float32),
    }


if __name__ == "__main__":
    key = jax.random.PRNGKey(0)
    k_loc, k_img, k_par = jax.random.split(key, 3)

    B, H, W = 2, 16, 16            # small stand-in for (224, 224)
    L = H * W                      # locations = one per pixel
    num_classes = 16

    locations = jax.random.uniform(k_loc, (B, L, 2), jnp.float32)          # (B, L, 2)
    gray_images = jax.random.normal(k_img, (B, 1, H, W), jnp.float32)      # NCHW
    params = init_params(k_par, num_classes)

    logits = semantic_expert_forward(locations, gray_images, params)
    jax.block_until_ready(logits)

    ref = reference_forward(locations, gray_images, params)
    assert logits.shape == (B * L, num_classes)
    assert jnp.allclose(logits, ref, atol=2e-4, rtol=2e-4), "kernel mismatch vs reference"

    print("KERNEL_OK")
</pallas_src>

<mosaic_0001>
module attributes {stable_mosaic.version = 11 : i64} {
  func.func @gray_pool_kernel(%arg0: i32, %arg1: i32, %arg2: memref<1x9x256xf32, #tpu.memory_space<vmem>>, %arg3: memref<8x9xf32, #tpu.memory_space<vmem>>, %arg4: memref<8x1xf32, #tpu.memory_space<vmem>>, %arg5: memref<1x8x1xf32, #tpu.memory_space<vmem>>, %arg6: memref<8x1xf32, #tpu.memory_space<vmem>>) attributes {dimension_semantics = [#tpu.dimension_semantics<parallel>, #tpu.dimension_semantics<arbitrary>], iteration_bounds = array<i64: 2, 1>, scalar_prefetch = 0 : i64, scratch_operands = 1 : i64, tpu.core_type = #tpu.core_type<tc>, window_params = [{transform_indices = @transform_0, window_bounds = array<i64: 1, 9, 256>}, {pipeline_mode = #tpu.pipeline_mode<synchronous>, transform_indices = @transform_1, window_bounds = array<i64: 8, 9>}, {pipeline_mode = #tpu.pipeline_mode<synchronous>, transform_indices = @transform_2, window_bounds = array<i64: 8, 1>}, {transform_indices = @transform_3, window_bounds = array<i64: 1, 8, 1>}]} {
    %c0_i32 = arith.constant 0 : i32
    %0 = arith.cmpi eq, %arg1, %c0_i32 : i32
    %1 = arith.extui %0 : i1 to i32
    %c0_i32_0 = arith.constant 0 : i32
    %2 = arith.cmpi ne, %1, %c0_i32_0 : i32
    scf.if %2 {
      %cst_16 = arith.constant 0.000000e+00 : f32
      %82 = vector.broadcast %cst_16 : f32 to vector<8x1xf32>
      %c0_17 = arith.constant 0 : index
      %c0_18 = arith.constant 0 : index
      %83 = vector.load %arg6[%c0_17, %c0_18] : memref<8x1xf32, #tpu.memory_space<vmem>>, vector<8x1xf32>
      tpu.vector_store %arg6[%c0_17, %c0_18], %82 {strides = array<i32>} : memref<8x1xf32, #tpu.memory_space<vmem>>, vector<8x1xf32>,
    } else {
    }
    %c0 = arith.constant 0 : index
    %c0_1 = arith.constant 0 : index
    %c0_2 = arith.constant 0 : index
    %3 = vector.load %arg2[%c0, %c0_1, %c0_2] : memref<1x9x256xf32, #tpu.memory_space<vmem>>, vector<1x9x256xf32>
    %4 = vector.shape_cast %3 : vector<1x9x256xf32> to vector<9x256xf32>
    %c0_3 = arith.constant 0 : index
    %c0_4 = arith.constant 0 : index
    %5 = vector.load %arg3[%c0_3, %c0_4] : memref<8x9xf32, #tpu.memory_space<vmem>>, vector<8x9xf32>
    %6 = vector.extract_strided_slice %5 {offsets = [0, 0], sizes = [8, 1], strides = [1, 1]} : vector<8x9xf32> to vector<8x1xf32>
    %7 = vector.extract_strided_slice %4 {offsets = [0, 0], sizes = [1, 256], strides = [1, 1]} : vector<9x256xf32> to vector<1x256xf32>
    %8 = vector.broadcast %6 : vector<8x1xf32> to vector<8x256xf32>
    %9 = vector.broadcast %7 : vector<1x256xf32> to vector<8x256xf32>
    %10 = arith.mulf %8, %9 : vector<8x256xf32>
    %11 = vector.extract_strided_slice %5 {offsets = [0, 1], sizes = [8, 1], strides = [1, 1]} : vector<8x9xf32> to vector<8x1xf32>
    %12 = vector.extract_strided_slice %4 {offsets = [1, 0], sizes = [1, 256], strides = [1, 1]} : vector<9x256xf32> to vector<1x256xf32>
    %13 = vector.broadcast %11 : vector<8x1xf32> to vector<8x256xf32>
    %14 = vector.broadcast %12 : vector<1x256xf32> to vector<8x256xf32>
    %15 = arith.mulf %13, %14 : vector<8x256xf32>
    %16 = arith.addf %10, %15 : vector<8x256xf32>
    %17 = vector.extract_strided_slice %5 {offsets = [0, 2], sizes = [8, 1], strides = [1, 1]} : vector<8x9xf32> to vector<8x1xf32>
    %18 = vector.extract_strided_slice %4 {offsets = [2, 0], sizes = [1, 256], strides = [1, 1]} : vector<9x256xf32> to vector<1x256xf32>
    %19 = vector.broadcast %17 : vector<8x1xf32> to vector<8x256xf32>
    %20 = vector.broadcast %18 : vector<1x256xf32> to vector<8x256xf32>
    %21 = arith.mulf %19, %20 : vector<8x256xf32>
    %22 = arith.addf %16, %21 : vector<8x256xf32>
    %23 = vector.extract_strided_slice %5 {offsets = [0, 3], sizes = [8, 1], strides = [1, 1]} : vector<8x9xf32> to vector<8x1xf32>
    %24 = vector.extract_strided_slice %4 {offsets = [3, 0], sizes = [1, 256], strides = [1, 1]} : vector<9x256xf32> to vector<1x256xf32>
    %25 = vector.broadcast %23 : vector<8x1xf32> to vector<8x256xf32>
    %26 = vector.broadcast %24 : vector<1x256xf32> to vector<8x256xf32>
    %27 = arith.mulf %25, %26 : vector<8x256xf32>
    %28 = arith.addf %22, %27 : vector<8x256xf32>
    %29 = vector.extract_strided_slice %5 {offsets = [0, 4], sizes = [8, 1], strides = [1, 1]} : vector<8x9xf32> to vector<8x1xf32>
    %30 = vector.extract_strided_slice %4 {offsets = [4, 0], sizes = [1, 256], strides = [1, 1]} : vector<9x256xf32> to vector<1x256xf32>
    %31 = vector.broadcast %29 : vector<8x1xf32> to vector<8x256xf32>
    %32 = vector.broadcast %30 : vector<1x256xf32> to vector<8x256xf32>
    %33 = arith.mulf %31, %32 : vector<8x256xf32>
    %34 = arith.addf %28, %33 : vector<8x256xf32>
    %35 = vector.extract_strided_slice %5 {offsets = [0, 5], sizes = [8, 1], strides = [1, 1]} : vector<8x9xf32> to vector<8x1xf32>
    %36 = vector.extract_strided_slice %4 {offsets = [5, 0], sizes = [1, 256], strides = [1, 1]} : vector<9x256xf32> to vector<1x256xf32>
    %37 = vector.broadcast %35 : vector<8x1xf32> to vector<8x256xf32>
    %38 = vector.broadcast %36 : vector<1x256xf32> to vector<8x256xf32>
    %39 = arith.mulf %37, %38 : vector<8x256xf32>
    %40 = arith.addf %34, %39 : vector<8x256xf32>
    %41 = vector.extract_strided_slice %5 {offsets = [0, 6], sizes = [8, 1], strides = [1, 1]} : vector<8x9xf32> to vector<8x1xf32>
    %42 = vector.extract_strided_slice %4 {offsets = [6, 0], sizes = [1, 256], strides = [1, 1]} : vector<9x256xf32> to vector<1x256xf32>
    %43 = vector.broadcast %41 : vector<8x1xf32> to vector<8x256xf32>
    %44 = vector.broadcast %42 : vector<1x256xf32> to vector<8x256xf32>
    %45 = arith.mulf %43, %44 : vector<8x256xf32>
    %46 = arith.addf %40, %45 : vector<8x256xf32>
    %47 = vector.extract_strided_slice %5 {offsets = [0, 7], sizes = [8, 1], strides = [1, 1]} : vector<8x9xf32> to vector<8x1xf32>
    %48 = vector.extract_strided_slice %4 {offsets = [7, 0], sizes = [1, 256], strides = [1, 1]} : vector<9x256xf32> to vector<1x256xf32>
    %49 = vector.broadcast %47 : vector<8x1xf32> to vector<8x256xf32>
    %50 = vector.broadcast %48 : vector<1x256xf32> to vector<8x256xf32>
    %51 = arith.mulf %49, %50 : vector<8x256xf32>
    %52 = arith.addf %46, %51 : vector<8x256xf32>
    %53 = vector.extract_strided_slice %5 {offsets = [0, 8], sizes = [8, 1], strides = [1, 1]} : vector<8x9xf32> to vector<8x1xf32>
    %54 = vector.extract_strided_slice %4 {offsets = [8, 0], sizes = [1, 256], strides = [1, 1]} : vector<9x256xf32> to vector<1x256xf32>
    %55 = vector.broadcast %53 : vector<8x1xf32> to vector<8x256xf32>
    %56 = vector.broadcast %54 : vector<1x256xf32> to vector<8x256xf32>
    %57 = arith.mulf %55, %56 : vector<8x256xf32>
    %58 = arith.addf %52, %57 : vector<8x256xf32>
    %c0_5 = arith.constant 0 : index
    %c0_6 = arith.constant 0 : index
    %59 = vector.load %arg4[%c0_5, %c0_6] : memref<8x1xf32, #tpu.memory_space<vmem>>, vector<8x1xf32>
    %60 = vector.broadcast %59 : vector<8x1xf32> to vector<8x256xf32>
    %61 = arith.addf %58, %60 : vector<8x256xf32>
    %cst = arith.constant 0.000000e+00 : f32
    %62 = vector.broadcast %cst : f32 to vector<8x256xf32>
    %63 = arith.maximumf %61, %62 : vector<8x256xf32>
    %c256_i32 = arith.constant 256 : i32
    %64 = arith.muli %arg1, %c256_i32 : i32
    %65 = tpu.iota {dimensions = array<i32: 1>} : vector<1x256xi32>
    %66 = vector.broadcast %64 : i32 to vector<1x256xi32>
    %67 = arith.addi %66, %65 : vector<1x256xi32>
    %c256_i32_7 = arith.constant 256 : i32
    %68 = vector.broadcast %c256_i32_7 : i32 to vector<1x256xi32>
    %69 = arith.cmpi slt, %67, %68 : vector<1x256xi32>
    %cst_8 = arith.constant 0.000000e+00 : f32
    %70 = vector.shape_cast %69 : vector<1x256xi1> to vector<1x256xi1>
    %71 = vector.broadcast %70 : vector<1x256xi1> to vector<8x256xi1>
    %72 = vector.broadcast %cst_8 : f32 to vector<8x256xf32>
    %73 = arith.select %71, %63, %72 : vector<8x256xi1>, vector<8x256xf32>
    %c0_9 = arith.constant 0 : index
    %c0_10 = arith.constant 0 : index
    %74 = vector.load %arg6[%c0_9, %c0_10] : memref<8x1xf32, #tpu.memory_space<vmem>>, vector<8x1xf32>
    %cst_11 = arith.constant dense<0.000000e+00> : vector<8xf32>
    %75 = vector.multi_reduction <add>, %73, %cst_11 [1] : vector<8x256xf32> to vector<8xf32>
    %76 = vector.shape_cast %75 : vector<8xf32> to vector<8x1xf32>
    %77 = arith.addf %74, %76 : vector<8x1xf32>
    %c0_12 = arith.constant 0 : index
    %c0_13 = arith.constant 0 : index
    %78 = vector.load %arg6[%c0_12, %c0_13] : memref<8x1xf32, #tpu.memory_space<vmem>>, vector<8x1xf32>
    tpu.vector_store %arg6[%c0_12, %c0_13], %77 {strides = array<i32>} : memref<8x1xf32, #tpu.memory_space<vmem>>, vector<8x1xf32>,
    %c0_i32_14 = arith.constant 0 : i32
    %79 = arith.cmpi eq, %arg1, %c0_i32_14 : i32
    %80 = arith.extui %79 : i1 to i32
    %c0_i32_15 = arith.constant 0 : i32
    %81 = arith.cmpi ne, %80, %c0_i32_15 : i32
    scf.if %81 {
      %c0_16 = arith.constant 0 : index
      %c0_17 = arith.constant 0 : index
      %82 = vector.load %arg6[%c0_16, %c0_17] : memref<8x1xf32, #tpu.memory_space<vmem>>, vector<8x1xf32>
      %cst_18 = arith.constant 3.906250e-03 : f32
      %83 = vector.broadcast %cst_18 : f32 to vector<8x1xf32>
      %84 = arith.mulf %82, %83 : vector<8x1xf32>
      %c0_19 = arith.constant 0 : index
      %c0_20 = arith.constant 0 : index
      %c0_21 = arith.constant 0 : index
      %85 = vector.load %arg5[%c0_19, %c0_20, %c0_21] : memref<1x8x1xf32, #tpu.memory_space<vmem>>, vector<1x8x1xf32>
      %86 = vector.shape_cast %85 : vector<1x8x1xf32> to vector<8x1xf32>
      %87 = vector.shape_cast %84 : vector<8x1xf32> to vector<1x8x1xf32>
      tpu.vector_store %arg5[%c0_19, %c0_20, %c0_21], %87 {strides = array<i32>} : memref<1x8x1xf32, #tpu.memory_space<vmem>>, vector<1x8x1xf32>,
    } else {
    }
    return
  }
  func.func @transform_0(%arg0: i32, %arg1: i32) -> (i32, i32, i32) {
    %c0_i32 = arith.constant 0 : i32
    %c0_i32_0 = arith.constant 0 : i32
    return %arg0, %c0_i32, %arg1 : i32, i32, i32
  }
  func.func @transform_1(%arg0: i32, %arg1: i32) -> (i32, i32) {
    %c0_i32 = arith.constant 0 : i32
    %c0_i32_0 = arith.constant 0 : i32
    %c0_i32_1 = arith.constant 0 : i32
    return %c0_i32, %c0_i32_0 : i32, i32
  }
  func.func @transform_2(%arg0: i32, %arg1: i32) -> (i32, i32) {
    %c0_i32 = arith.constant 0 : i32
    %c0_i32_0 = arith.constant 0 : i32
    %c0_i32_1 = arith.constant 0 : i32
    return %c0_i32, %c0_i32_0 : i32, i32
  }
  func.func @transform_3(%arg0: i32, %arg1: i32) -> (i32, i32, i32) {
    %c0_i32 = arith.constant 0 : i32
    %c0_i32_0 = arith.constant 0 : i32
    %c0_i32_1 = arith.constant 0 : i32
    return %arg0, %c0_i32, %c0_i32_0 : i32, i32, i32
  }
}

module attributes {stable_mosaic.version = 11 : i64} {
  func.func @location_pipeline_kernel(%arg0: i32, %arg1: i32, %arg2: memref<1x2x256xf32, #tpu.memory_space<vmem>>, %arg3: memref<1x128x1xf32, #tpu.memory_space<vmem>>, %arg4: memref<128x2xf32, #tpu.memory_space<vmem>>, %arg5: memref<128x1xf32, #tpu.memory_space<vmem>>, %arg6: memref<128x128xf32, #tpu.memory_space<vmem>>, %arg7: memref<64x128xf32, #tpu.memory_space<vmem>>, %arg8: memref<64x1xf32, #tpu.memory_space<vmem>>, %arg9: memref<16x64xf32, #tpu.memory_space<vmem>>, %arg10: memref<16x1xf32, #tpu.memory_space<vmem>>, %arg11: memref<1x16x256xf32, #tpu.memory_space<vmem>>) attributes {dimension_semantics = [#tpu.dimension_semantics<parallel>, #tpu.dimension_semantics<parallel>], iteration_bounds = array<i64: 1, 2>, scalar_prefetch = 0 : i64, scratch_operands = 0 : i64, tpu.core_type = #tpu.core_type<tc>, window_params = [{transform_indices = @transform_0, window_bounds = array<i64: 1, 2, 256>}, {transform_indices = @transform_1, window_bounds = array<i64: 1, 128, 1>}, {pipeline_mode = #tpu.pipeline_mode<synchronous>, transform_indices = @transform_2, window_bounds = array<i64: 128, 2>}, {pipeline_mode = #tpu.pipeline_mode<synchronous>, transform_indices = @transform_3, window_bounds = array<i64: 128, 1>}, {pipeline_mode = #tpu.pipeline_mode<synchronous>, transform_indices = @transform_4, window_bounds = array<i64: 128, 128>}, {pipeline_mode = #tpu.pipeline_mode<synchronous>, transform_indices = @transform_5, window_bounds = array<i64: 64, 128>}, {pipeline_mode = #tpu.pipeline_mode<synchronous>, transform_indices = @transform_6, window_bounds = array<i64: 64, 1>}, {pipeline_mode = #tpu.pipeline_mode<synchronous>, transform_indices = @transform_7, window_bounds = array<i64: 16, 64>}, {pipeline_mode = #tpu.pipeline_mode<synchronous>, transform_indices = @transform_8, window_bounds = array<i64: 16, 1>}, {transform_indices = @transform_9, window_bounds = array<i64: 1, 16, 256>}]} {
    %c0 = arith.constant 0 : index
    %c0_0 = arith.constant 0 : index
    %c0_1 = arith.constant 0 : index
    %0 = vector.load %arg2[%c0, %c0_0, %c0_1] : memref<1x2x256xf32, #tpu.memory_space<vmem>>, vector<1x2x256xf32>
    %1 = vector.shape_cast %0 : vector<1x2x256xf32> to vector<2x256xf32>
    %c0_2 = arith.constant 0 : index
    %c0_3 = arith.constant 0 : index
    %2 = vector.load %arg4[%c0_2, %c0_3] : memref<128x2xf32, #tpu.memory_space<vmem>>, vector<128x2xf32>
    %3 = vector.extract_strided_slice %2 {offsets = [0, 0], sizes = [128, 1], strides = [1, 1]} : vector<128x2xf32> to vector<128x1xf32>
    %4 = vector.extract_strided_slice %1 {offsets = [0, 0], sizes = [1, 256], strides = [1, 1]} : vector<2x256xf32> to vector<1x256xf32>
    %5 = vector.broadcast %3 : vector<128x1xf32> to vector<128x256xf32>
    %6 = vector.broadcast %4 : vector<1x256xf32> to vector<128x256xf32>
    %7 = arith.mulf %5, %6 : vector<128x256xf32>
    %8 = vector.extract_strided_slice %2 {offsets = [0, 1], sizes = [128, 1], strides = [1, 1]} : vector<128x2xf32> to vector<128x1xf32>
    %9 = vector.extract_strided_slice %1 {offsets = [1, 0], sizes = [1, 256], strides = [1, 1]} : vector<2x256xf32> to vector<1x256xf32>
    %10 = vector.broadcast %8 : vector<128x1xf32> to vector<128x256xf32>
    %11 = vector.broadcast %9 : vector<1x256xf32> to vector<128x256xf32>
    %12 = arith.mulf %10, %11 : vector<128x256xf32>
    %13 = arith.addf %7, %12 : vector<128x256xf32>
    %c0_4 = arith.constant 0 : index
    %c0_5 = arith.constant 0 : index
    %14 = vector.load %arg5[%c0_4, %c0_5] : memref<128x1xf32, #tpu.memory_space<vmem>>, vector<128x1xf32>
    %15 = vector.broadcast %14 : vector<128x1xf32> to vector<128x256xf32>
    %16 = arith.addf %13, %15 : vector<128x256xf32>
    %17 = math.sin %16 : vector<128x256xf32>
    %c0_6 = arith.constant 0 : index
    %c0_7 = arith.constant 0 : index
    %18 = vector.load %arg6[%c0_6, %c0_7] : memref<128x128xf32, #tpu.memory_space<vmem>>, vector<128x128xf32>
    %cst = arith.constant dense<0.000000e+00> : vector<128x256xf32>
    %19 = tpu.matmul %18, %17, %cst {dimension_numbers = #tpu.dot_dimension_numbers<[1], [0], [0], [1], [0, 0, 1, 1], [], []>} : vector<128x128xf32>, vector<128x256xf32>, vector<128x256xf32> -> vector<128x256xf32>
    %c0_8 = arith.constant 0 : index
    %c0_9 = arith.constant 0 : index
    %c0_10 = arith.constant 0 : index
    %20 = vector.load %arg3[%c0_8, %c0_9, %c0_10] : memref<1x128x1xf32, #tpu.memory_space<vmem>>, vector<1x128x1xf32>
    %21 = vector.shape_cast %20 : vector<1x128x1xf32> to vector<128x1xf32>
    %22 = vector.broadcast %21 : vector<128x1xf32> to vector<128x256xf32>
    %23 = arith.addf %19, %22 : vector<128x256xf32>
    %cst_11 = arith.constant 0.000000e+00 : f32
    %24 = vector.broadcast %cst_11 : f32 to vector<128x256xf32>
    %25 = arith.maximumf %23, %24 : vector<128x256xf32>
    %c0_12 = arith.constant 0 : index
    %c0_13 = arith.constant 0 : index
    %26 = vector.load %arg7[%c0_12, %c0_13] : memref<64x128xf32, #tpu.memory_space<vmem>>, vector<64x128xf32>
    %cst_14 = arith.constant dense<0.000000e+00> : vector<64x256xf32>
    %27 = tpu.matmul %26, %25, %cst_14 {dimension_numbers = #tpu.dot_dimension_numbers<[1], [0], [0], [1], [0, 0, 1, 1], [], []>} : vector<64x128xf32>, vector<128x256xf32>, vector<64x256xf32> -> vector<64x256xf32>
    %c0_15 = arith.constant 0 : index
    %c0_16 = arith.constant 0 : index
    %28 = vector.load %arg8[%c0_15, %c0_16] : memref<64x1xf32, #tpu.memory_space<vmem>>, vector<64x1xf32>
    %29 = vector.broadcast %28 : vector<64x1xf32> to vector<64x256xf32>
    %30 = arith.addf %27, %29 : vector<64x256xf32>
    %cst_17 = arith.constant 0.000000e+00 : f32
    %31 = vector.broadcast %cst_17 : f32 to vector<64x256xf32>
    %32 = arith.maximumf %30, %31 : vector<64x256xf32>
    %c0_18 = arith.constant 0 : index
    %c0_19 = arith.constant 0 : index
    %33 = vector.load %arg9[%c0_18, %c0_19] : memref<16x64xf32, #tpu.memory_space<vmem>>, vector<16x64xf32>
    %cst_20 = arith.constant dense<0.000000e+00> : vector<16x256xf32>
    %34 = tpu.matmul %33, %32, %cst_20 {dimension_numbers = #tpu.dot_dimension_numbers<[1], [0], [0], [1], [0, 0, 1, 1], [], []>} : vector<16x64xf32>, vector<64x256xf32>, vector<16x256xf32> -> vector<16x256xf32>
    %c0_21 = arith.constant 0 : index
    %c0_22 = arith.constant 0 : index
    %35 = vector.load %arg10[%c0_21, %c0_22] : memref<16x1xf32, #tpu.memory_space<vmem>>, vector<16x1xf32>
    %36 = vector.broadcast %35 : vector<16x1xf32> to vector<16x256xf32>
    %37 = arith.addf %34, %36 : vector<16x256xf32>
    %c0_23 = arith.constant 0 : index
    %c0_24 = arith.constant 0 : index
    %c0_25 = arith.constant 0 : index
    %38 = vector.load %arg11[%c0_23, %c0_24, %c0_25] : memref<1x16x256xf32, #tpu.memory_space<vmem>>, vector<1x16x256xf32>
    %39 = vector.shape_cast %38 : vector<1x16x256xf32> to vector<16x256xf32>
    %40 = vector.shape_cast %37 : vector<16x256xf32> to vector<1x16x256xf32>
    tpu.vector_store %arg11[%c0_23, %c0_24, %c0_25], %40 {strides = array<i32>} : memref<1x16x256xf32, #tpu.memory_space<vmem>>, vector<1x16x256xf32>,
    return
  }
  func.func @transform_0(%arg0: i32, %arg1: i32) -> (i32, i32, i32) {
    %c0_i32 = arith.constant 0 : i32
    %c0_i32_0 = arith.constant 0 : i32
    return %arg1, %c0_i32, %arg0 : i32, i32, i32
  }
  func.func @transform_1(%arg0: i32, %arg1: i32) -> (i32, i32, i32) {
    %c0_i32 = arith.constant 0 : i32
    %c0_i32_0 = arith.constant 0 : i32
    %c0_i32_1 = arith.constant 0 : i32
    return %arg1, %c0_i32, %c0_i32_0 : i32, i32, i32
  }
  func.func @transform_2(%arg0: i32, %arg1: i32) -> (i32, i32) {
    %c0_i32 = arith.constant 0 : i32
    %c0_i32_0 = arith.constant 0 : i32
    %c0_i32_1 = arith.constant 0 : i32
    return %c0_i32, %c0_i32_0 : i32, i32
  }
  func.func @transform_3(%arg0: i32, %arg1: i32) -> (i32, i32) {
    %c0_i32 = arith.constant 0 : i32
    %c0_i32_0 = arith.constant 0 : i32
    %c0_i32_1 = arith.constant 0 : i32
    return %c0_i32, %c0_i32_0 : i32, i32
  }
  func.func @transform_4(%arg0: i32, %arg1: i32) -> (i32, i32) {
    %c0_i32 = arith.constant 0 : i32
    %c0_i32_0 = arith.constant 0 : i32
    %c0_i32_1 = arith.constant 0 : i32
    return %c0_i32, %c0_i32_0 : i32, i32
  }
  func.func @transform_5(%arg0: i32, %arg1: i32) -> (i32, i32) {
    %c0_i32 = arith.constant 0 : i32
    %c0_i32_0 = arith.constant 0 : i32
    %c0_i32_1 = arith.constant 0 : i32
    return %c0_i32, %c0_i32_0 : i32, i32
  }
  func.func @transform_6(%arg0: i32, %arg1: i32) -> (i32, i32) {
    %c0_i32 = arith.constant 0 : i32
    %c0_i32_0 = arith.constant 0 : i32
    %c0_i32_1 = arith.constant 0 : i32
    return %c0_i32, %c0_i32_0 : i32, i32
  }
  func.func @transform_7(%arg0: i32, %arg1: i32) -> (i32, i32) {
    %c0_i32 = arith.constant 0 : i32
    %c0_i32_0 = arith.constant 0 : i32
    %c0_i32_1 = arith.constant 0 : i32
    return %c0_i32, %c0_i32_0 : i32, i32
  }
  func.func @transform_8(%arg0: i32, %arg1: i32) -> (i32, i32) {
    %c0_i32 = arith.constant 0 : i32
    %c0_i32_0 = arith.constant 0 : i32
    %c0_i32_1 = arith.constant 0 : i32
    return %c0_i32, %c0_i32_0 : i32, i32
  }
  func.func @transform_9(%arg0: i32, %arg1: i32) -> (i32, i32, i32) {
    %c0_i32 = arith.constant 0 : i32
    %c0_i32_0 = arith.constant 0 : i32
    return %arg1, %c0_i32, %arg0 : i32, i32, i32
  }
}

</mosaic_0001>

<bundles_post_ra>
// kernel: semantic_expert_forward.2
= control target key start
LH: loop header
LB: loop body
LE: loop exit
PB: predicated region body
PF: predicated region fallthrough
CT: control target
= control target key end

     0   :  { %s568_s12 = smov 0   ;;  %s570_s13 = smov 0   ;;  %s624_s0 = inlined_call_operand.vmem [shape: f32[2,9,256], index: 0, kind: input, shape index: {}]   ;;  %s625_s1 = inlined_call_operand.vmem [shape: f32[8,9], index: 1, kind: input, shape index: {}]   ;;  %s626_s2 = inlined_call_operand.vmem [shape: f32[8,1], index: 2, kind: input, shape index: {}]   ;;  %s627_s3 = inlined_call_operand.vmem [shape: f32[2,8,1], index: 3, kind: output, shape index: {}]  }
   0x1   :  { %s572_s14 = smov 0  }
   0x2 LB: > { %s25_s15 = sadd.s32 1, %s532_s13  ;;  %p460_p0 = scmp.ge.s32.totalorder %s536_s14, 1  ;;  %s536_s14 = sphi %s572_s14, %s13_s14   ;;  %s532_s13 = sphi %s570_s13, %s629_s13   ;;  %s528_s12 = sphi %s568_s12, %s628_s12  }
   0x3   : > { %p27_p1 = scmp.ge.s32.totalorder %s25_s15, 2  ;;  %p156_p2 = scmp.lt.s32.totalorder %s536_s14, 3 }
   0x5   : > { %s631_s15 = smov (%p27_p1, %s25_s15), 0  ;;  %p157_p3 = pnand %p460_p0, %p156_p2 }
   0x6   : > { %v207_v0 = vld [vmem:[%s625_s1] sm:$0xff] (!%p157_p3)  ;;  %v538_v1 = vmov (!%p157_p3), 2   ;;  %v539_v2 = vmov (!%p157_p3), 0   ;;  %v540_v3 = vmov (!%p157_p3), 3   ;;  %v541_v4 = vmov (!%p157_p3), 1   ;;  %p184_p4 = scmp.lt.s32.totalorder (!%p157_p3), %s528_s12, 1 }
   0x7   : > { %160 = sbr.rel (%p157_p3) target bundleno = 323 (0x143), region = 32  ;;  %505 = vset.pattern.permute.xlu1 (!%p157_p3), %v538_v1  ;;  %503 = vset.pattern.permute.xlu0 (!%p157_p3), %v539_v2  ;;  %v542_v5 = vmov (!%p157_p3), 4   ;;  %v543_v6 = vmov (!%p157_p3), 5   ;;  %v544_v7 = vmov (!%p157_p3), 6   ;;  %v545_v8 = vmov (!%p157_p3), 8   ;;  %v351_v10 = vld [vmem:[%s626_s2] sm:$0xff] (!%p157_p3) }
   0x8   : > { %240 = vperm.xlu1 (!%p157_p3), %505, %v207_v0   ;;  %210 = vperm.xlu0 (!%p157_p3), %503, %v207_v0   ;;  %v546_v9 = vmov (!%p157_p3), 7   ;;  %vm201_vm0 = vcmask (!%p157_p3), 7168   ;;  %v547_v11 = vmov (!%p157_p3), 0.0   ;;  %v213_v12 = vlaneseq (!%p157_p3) }
   0x9   : > { %202 = vst.msk [vmem:[#allocation2] sm:$0xff] (!%p157_p3), %vm201_vm0, %v547_v11 }
   0xa   : > { %v214_v13 = vshrl.u32 (!%p157_p3), %v213_v12, 7 }
   0xc   : > { %506 = vset.pattern.permute.xlu1 (!%p157_p3), %v540_v3  ;;  %504 = vset.pattern.permute.xlu0 (!%p157_p3), %v541_v4  ;;  %v215_v14 = vsub.s32 (!%p157_p3), 0, %v214_v13  ;;  %v229_v15 = vsub.s32 (!%p157_p3), 1, %v214_v13  ;;  %v245_v16 = vsub.s32 (!%p157_p3), 2, %v214_v13  ;;  %v261_v21 = vsub.s32 (!%p157_p3), 3, %v214_v13 }
   0xd   : > { %256 = vperm.xlu1 (!%p157_p3), %506, %v207_v0   ;;  %224 = vperm.xlu0 (!%p157_p3), %504, %v207_v0   ;;  %v277_v26 = vsub.s32 (!%p157_p3), 4, %v214_v13  ;;  %v293_v33 = vsub.s32 (!%p157_p3), 5, %v214_v13  ;;  %v309_v46 = vsub.s32 (!%p157_p3), 6, %v214_v13  ;;  %v325_v57 = vsub.s32 (!%p157_p3), 7, %v214_v13 }
   0xe   : > { %s633_s12 = smov (!%p184_p4, %s528_s12), 1 }
   0xf   : > { %s468_s20 = sshll.u32 %s633_s12, 5  ;;  %s463_s24 = sshll.u32 %s633_s12, 3 }
  0x10   : > { %s603_s23 = scalar_lea.vmem %s624_s0, %s468_s20  ;;  %s196_s27 = scalar_lea.vmem %s627_s3, %s463_s24 }
  0x11   : > { %507 = vset.pattern.permute.xlu1 %v542_v5  ;;  %508 = vset.pattern.permute.xlu0 %v543_v6  ;;  %v203_v19 = vld [vmem:[%s603_s23] sm:$0xff]  ;;  %v204_v20 = vld [vmem:[%s603_s23 + $0x8] sm:$0xff] }
  0x12   : > { %272 = vperm.xlu1 %507, %v207_v0   ;;  %288 = vperm.xlu0 %508, %v207_v0   ;;  %v216_v22 = vrot.slane %v203_v19, %v215_v14  ;;  %v220_v23 = vrot.slane %v204_v20, %v215_v14  ;;  %v230_v24 = vrot.slane %v203_v19, %v229_v15 }
  0x13   : > { %v234_v25 = vrot.slane %v204_v20, %v229_v15  ;;  %v246_v27 = vrot.slane %v203_v19, %v245_v16  ;;  %v250_v28 = vrot.slane %v204_v20, %v245_v16  ;;  %v262_v30 = vrot.slane %v203_v19, %v261_v21 }
  0x14   : > { %v266_v31 = vrot.slane %v204_v20, %v261_v21  ;;  %v278_v38 = vrot.slane %v203_v19, %v277_v26  ;;  %v282_v39 = vrot.slane %v204_v20, %v277_v26  ;;  %v294_v44 = vrot.slane %v203_v19, %v293_v33 }
  0x15   : > { %v298_v45 = vrot.slane %v204_v20, %v293_v33  ;;  %v310_v60 = vrot.slane %v203_v19, %v309_v46  ;;  %v314_v61 = vrot.slane %v204_v20, %v309_v46  ;;  %v326_v1 = vrot.slane %v203_v19, %v325_v57 }
  0x16   : > { %509 = vset.pattern.permute.xlu1 %v544_v7  ;;  %511 = vset.pattern.permute.xlu0 %v545_v8  ;;  %v464_v8 = vld [vmem:[%s603_s23 + $0x10] ss:$0 sm:$0xff] }
  0x17   : > { %304 = vperm.xlu1 %509, %v207_v0   ;;  %336 = vperm.xlu0 %511, %v207_v0  }
  0x1b   : > { %510 = vset.pattern.permute.xlu1 %v546_v9  ;;  %513 = vset.pattern.permute.xlu0 %v539_v2  ;;  %v465_v9 = vld [vmem:[%s603_s23 + $0x18] ss:$0 sm:$0xff] }
  0x1c   : > { %320 = vperm.xlu1 %510, %v207_v0  }
  0x20   : > { %512 = vset.pattern.permute.xlu1 %v539_v2  ;;  %v330_v2 = vrot.slane %v204_v20, %v325_v57 }
  0x21   : > { %354 = vperm.xlu1 %512, %v351_v10  }
  0x87   : > { %v241_v17 = vpop.permute.xlu1 %240  ;;  %v211_v18 = vpop.permute.xlu0 %210 }
  0x88   : > { %v221_v34 = vmul.f32 %v216_v22, %v211_v18  ;;  %v222_v35 = vmul.f32 %v220_v23, %v211_v18  ;;  %v251_v40 = vmul.f32 %v246_v27, %v241_v17  ;;  %v252_v41 = vmul.f32 %v250_v28, %v241_v17  ;;  %v376_v27 = vld [vmem:[#allocation2] sm:$0xff] }
  0x8c   : > { %v257_v29 = vpop.permute.xlu1 %256  ;;  %v225_v32 = vpop.permute.xlu0 %224 }
  0x8d   : > { %v235_v36 = vmul.f32 %v230_v24, %v225_v32  ;;  %v236_v37 = vmul.f32 %v234_v25, %v225_v32  ;;  %v267_v47 = vmul.f32 %v262_v30, %v257_v29  ;;  %v268_v48 = vmul.f32 %v266_v31, %v257_v29 }
  0x8f   : > { %v237_v42 = vadd.f32 %v235_v36, %v221_v34  ;;  %v238_v43 = vadd.f32 %v236_v37, %v222_v35 }
  0x91   : > { %v253_v49 = vadd.f32 %v251_v40, %v237_v42  ;;  %v254_v50 = vadd.f32 %v252_v41, %v238_v43  ;;  %v273_v51 = vpop.permute.xlu1 %272  ;;  %v289_v52 = vpop.permute.xlu0 %288 }
  0x92   : > { %v283_v53 = vmul.f32 %v278_v38, %v273_v51  ;;  %v284_v54 = vmul.f32 %v282_v39, %v273_v51  ;;  %v299_v58 = vmul.f32 %v294_v44, %v289_v52  ;;  %v300_v59 = vmul.f32 %v298_v45, %v289_v52 }
  0x93   : > { %v269_v55 = vadd.f32 %v267_v47, %v253_v49  ;;  %v270_v56 = vadd.f32 %v268_v48, %v254_v50 }
  0x95   : > { %v285_v62 = vadd.f32 %v283_v53, %v269_v55  ;;  %v286_v63 = vadd.f32 %v284_v54, %v270_v56 }
  0x96   : > { %v305_v0 = vpop.permute.xlu1 %304  ;;  %v337_v7 = vpop.permute.xlu0 %336 }
  0x97   : > { %v301_v3 = vadd.f32 %v299_v58, %v285_v62  ;;  %v302_v4 = vadd.f32 %v300_v59, %v286_v63  ;;  %v315_v5 = vmul.f32 %v310_v60, %v305_v0  ;;  %v316_v6 = vmul.f32 %v314_v61, %v305_v0 }
  0x98   : > { %v347_v11 = vmul.f32 %v464_v8, %v337_v7  ;;  %v348_v12 = vmul.f32 %v465_v9, %v337_v7 }
  0x99   : > { %v317_v13 = vadd.f32 %v315_v5, %v301_v3  ;;  %v318_v14 = vadd.f32 %v316_v6, %v302_v4 }
  0x9b   : > { %v321_v10 = vpop.permute.xlu1 %320 }
  0x9c   : > { %v331_v15 = vmul.f32 %v326_v1, %v321_v10  ;;  %v332_v16 = vmul.f32 %v330_v2, %v321_v10 }
  0x9e   : > { %v333_v17 = vadd.f32 %v331_v15, %v317_v13  ;;  %v334_v18 = vadd.f32 %v332_v16, %v318_v14 }
  0xa0   : > { %v349_v21 = vadd.f32 %v347_v11, %v333_v17  ;;  %v350_v19 = vadd.f32 %v348_v12, %v334_v18  ;;  %v355_v20 = vpop.permute.xlu1 %354 }
  0xa2   : > { %v357_v22 = vadd.f32 %v355_v20, %v349_v21  ;;  %v358_v23 = vadd.f32 %v355_v20, %v350_v19 }
  0xa4   : > { %v359_v24 = vmax.f32 %v357_v22, 0.0  ;;  %v360_v25 = vmax.f32 %v358_v23, 0.0 }
  0xa6   : > { %v377_v26 = vadd.f32 %v360_v25, %v359_v24 }
  0xa8   : > { %378 = vadd.xlane.f32.xlu1 %v377_v26 }
 0x135   : > { %v379_v28 = vpop.xlane.xlu1 %378 }
 0x136   : > { %v380_v29 = vadd.f32 %v379_v28, %v376_v27 }
 0x138   : > { %382 = vst.msk [vmem:[#allocation2] sm:$0xff] %vm201_vm0, %v380_v29 }
 0x13f   : > { %v386_v30 = vld [vmem:[#allocation2] sm:$0xff] }
 0x140   : > { %v387_v31 = vmul.f32 0.00390625, %v386_v30 }
 0x142   : > { %388 = vst.msk [vmem:[%s196_s27] sm:$0xff] %vm201_vm0, %v387_v31 }
 0x143 PF: > { %s13_s14 = sadd.s32 1, %s536_s14   ;;  %s628_s12 = smov %s532_s13 }
 0x144   : > { %p10_p5 = scmp.ge.s32.totalorder %s13_s14, 4   ;;  %s629_s13 = smov %s631_s15 }
 0x146   :  { %12 = sbr.rel (!%p10_p5) target bundleno = 2 (0x2), region = 70 }

// kernel: semantic_expert_forward.3
= control target key start
LH: loop header
LB: loop body
LE: loop exit
PB: predicated region body
PF: predicated region fallthrough
CT: control target
= control target key end

     0   :  { %s5449_s30 = smov 0   ;;  %s5451_s10 = smov 0   ;;  %s10305_s0 = inlined_call_operand.vmem [shape: f32[2,2,256], index: 0, kind: input, shape index: {}]   ;;  %s10306_s1 = inlined_call_operand.vmem [shape: f32[2,128,1], index: 1, kind: input, shape index: {}]   ;;  %s10307_s2 = inlined_call_operand.vmem [shape: f32[128,2], index: 2, kind: input, shape index: {}]   ;;  %s10308_s3 = inlined_call_operand.vmem [shape: f32[128,1], index: 3, kind: input, shape index: {}]   ;;  %s10309_s4 = inlined_call_operand.vmem [shape: f32[128,128], index: 4, kind: input, shape index: {}]   ;;  %s10310_s5 = inlined_call_operand.vmem [shape: f32[64,128], index: 5, kind: input, shape index: {}]   ;;  %s10311_s6 = inlined_call_operand.vmem [shape: f32[64,1], index: 6, kind: input, shape index: {}]   ;;  %s10312_s7 = inlined_call_operand.vmem [shape: f32[16,64], index: 7, kind: input, shape index: {}]   ;;  %s10313_s8 = inlined_call_operand.vmem [shape: f32[16,1], index: 8, kind: input, shape index: {}]   ;;  %s10314_s9 = inlined_call_operand.vmem [shape: f32[2,16,256], index: 9, kind: output, shape index: {}]  }
   0x1   :  { %s5453_s11 = smov 0  }
   0x2 LB: > { %s28_s12 = sadd.s32 1, %s5384_s10  ;;  %p4837_p0 = scmp.ge.s32.totalorder %s5388_s11, 1  ;;  %s5388_s11 = sphi %s5453_s11, %s19_s11   ;;  %s5384_s10 = sphi %s5451_s10, %s11204_s10   ;;  %s5380_s30 = sphi %s5449_s30, %s11203_s30  }
   0x3   : > { %p29_p1 = scmp.ge.s32.totalorder %s28_s12, 2  ;;  %p318_p2 = scmp.lt.s32.totalorder %s5388_s11, 3 }
   0x5   : > { %s11206_s12 = smov (%p29_p1, %s28_s12), 0  ;;  %p319_p3 = pnand %p4837_p0, %p318_p2 }
   0x7   : > { %322 = sbr.rel (%p319_p3) target bundleno = 1799 (0x707), region = 56 }
   0xe   : > { %v395_v0 = vld [vmem:[%s10307_s2 + $0x10] sm:$0xff]  ;;  %v393_v1 = vld [vmem:[%s10307_s2] sm:$0xff]  ;;  %p368_p4 = scmp.lt.s32.totalorder %s5380_s30, 1  ;;  %v490_v2 = vlaneseq  ;;  %v5390_v3 = vmov 1   ;;  %v394_v6 = vld [vmem:[%s10307_s2 + $0x8] sm:$0xff]  ;;  %v5391_v14 = vmov 0  }
   0xf   : > { %5222 = vset.pattern.permute.xlu0 %v5390_v3  ;;  %5220 = vset.pattern.permute.xlu1 %v5390_v3  ;;  %v397_v5 = vld [vmem:[%s10307_s2 + $0x20] sm:$0xff]  ;;  %v399_v9 = vld [vmem:[%s10307_s2 + $0x30] sm:$0xff]  ;;  %v396_v10 = vld [vmem:[%s10307_s2 + $0x18] sm:$0xff] }
  0x10   : > { %549 = vperm.xlu0 %5222, %v395_v0   ;;  %541 = vperm.xlu1 %5220, %v393_v1   ;;  %s11208_s30 = smov (!%p368_p4, %s5380_s30), 1  ;;  %v5477_v4 = vshrl.u32 %v490_v2, 7  ;;  %v401_v15 = vld [vmem:[%s10307_s2 + $0x40] sm:$0xff]  ;;  %v403_v18 = vld [vmem:[%s10307_s2 + $0x50] sm:$0xff]  ;;  %v398_v22 = vld [vmem:[%s10307_s2 + $0x28] sm:$0xff] }
  0x11   : > { %s4976_s21 = sshll.u32 %s11208_s30, 2  ;;  %v686_v19 = vld [vmem:[%s10308_s3] sm:$0xff]  ;;  %v5534_v21 = vld [vmem:[%s10307_s2 + $0x70] sm:$0xff]  ;;  %v687_v24 = vld [vmem:[%s10308_s3 + $0x8] sm:$0xff]  ;;  %s4977_s27 = sshll.u32 %s11208_s30, 7 }
  0x12   : > { %s375_s24 = scalar_lea.vmem %s10305_s0, %s4976_s21  ;;  %v5490_v7 = vsub.s32 1, %v5477_v4  ;;  %v5493_v8 = vsub.s32 0, %v5477_v4  ;;  %v5527_v20 = vld [vmem:[%s10307_s2 + $0x60] sm:$0xff]  ;;  %v688_v23 = vld [vmem:[%s10308_s3 + $0x10] sm:$0xff]  ;;  %v689_v25 = vld [vmem:[%s10308_s3 + $0x18] sm:$0xff]  ;;  %s5582_s15 = scalar_lea.vmem %s10306_s1, %s4977_s27  ;;  %v496_v57 = vsub.s32 2, %v5477_v4 }
  0x13   : > { %v5501_v11 = vld [vmem:[%s375_s24] sm:$0xf]  ;;  %v400_v26 = vld [vmem:[%s10307_s2 + $0x38] sm:$0xff]  ;;  %v691_v27 = vld [vmem:[%s10308_s3 + $0x28] sm:$0xff]  ;;  %v610_v60 = vsub.s32 3, %v5477_v4  ;;  %s4978_s22 = sshll.u32 %s11208_s30, 5 }
  0x14   : > { %557 = vperm.xlu0 %5222, %v397_v5   ;;  %545 = vperm.xlu1 %5220, %v394_v6   ;;  %v607_v12 = vrot.slane %v5501_v11, %v5490_v7  ;;  %v493_v13 = vrot.slane %v5501_v11, %v5493_v8  ;;  %v693_v28 = vld [vmem:[%s10308_s3 + $0x38] sm:$0xff]  ;;  %v690_v29 = vld [vmem:[%s10308_s3 + $0x20] sm:$0xff]  ;;  %v695_v30 = vld [vmem:[%s10308_s3 + $0x48] sm:$0xff]  ;;  %v497_v62 = vrot.slane %v5501_v11, %v496_v57  ;;  %s390_s25 = scalar_lea.vmem %s10314_s9, %s4978_s22 }
  0x15   : > { %v697_v31 = vld [vmem:[%s10308_s3 + $0x58] sm:$0xff]  ;;  %v402_v32 = vld [vmem:[%s10307_s2 + $0x48] sm:$0xff]  ;;  %v4158_v34 = vld [vmem:[%s5582_s15] sm:$0xff] }
  0x16   : > { %v5512_v16 = vrot.slane %v607_v12, %v5490_v7  ;;  %v5515_v17 = vrot.slane %v493_v13, %v5493_v8  ;;  %v699_v33 = vld [vmem:[%s10308_s3 + $0x68] sm:$0xff]  ;;  %v692_v35 = vld [vmem:[%s10308_s3 + $0x30] sm:$0xff]  ;;  %v4162_v37 = vld [vmem:[%s5582_s15 + $0x20] sm:$0xff] }
  0x17   : > { %v4160_v36 = vld [vmem:[%s5582_s15 + $0x10] sm:$0xff]  ;;  %v404_v38 = vld [vmem:[%s10307_s2 + $0x58] sm:$0xff]  ;;  %v4166_v40 = vld [vmem:[%s5582_s15 + $0x40] sm:$0xff] }
  0x18   : > { %565 = vperm.xlu0 %5222, %v399_v9   ;;  %5221 = vset.pattern.permute.xlu1 %v5391_v14  ;;  %10626 = vst [vmem:[#allocation2_spill] sm:$0xff] %v5512_v16  ;;  %10627 = vst [vmem:[#allocation3_spill] sm:$0xff] %v5515_v17  ;;  %v4164_v39 = vld [vmem:[%s5582_s15 + $0x30] sm:$0xff]  ;;  %v694_v42 = vld [vmem:[%s10308_s3 + $0x40] sm:$0xff] }
  0x19   : > { %426 = vperm.xlu1 %5221, %v396_v10   ;;  %v4168_v41 = vld [vmem:[%s5582_s15 + $0x50] sm:$0xff]  ;;  %v4170_v43 = vld [vmem:[%s5582_s15 + $0x60] sm:$0xff]  ;;  %v406_v45 = vld [vmem:[%s10307_s2 + $0x68] sm:$0xff] }
  0x1a   : > { %v4172_v44 = vld [vmem:[%s5582_s15 + $0x70] sm:$0xff]  ;;  %v4455_v46 = vld [vmem:[%s10311_s6] sm:$0xff]  ;;  %v408_v51 = vld [vmem:[%s10307_s2 + $0x78] sm:$0xff] }
  0x1b   : > { %v4457_v47 = vld [vmem:[%s10311_s6 + $0x10] sm:$0xff]  ;;  %v4459_v49 = vld [vmem:[%s10311_s6 + $0x20] sm:$0xff]  ;;  %v701_v61 = vld [vmem:[%s10308_s3 + $0x78] sm:$0xff] }
  0x1c   : > { %573 = vperm.xlu0 %5222, %v401_v15   ;;  %v696_v48 = vld [vmem:[%s10308_s3 + $0x50] sm:$0xff]  ;;  %v4634_v52 = vld [vmem:[%s10313_s8] sm:$0xff]  ;;  %v4159_v2 = vld [vmem:[%s5582_s15 + $0x8] sm:$0xff] }
  0x1d   : > { %5223 = vset.pattern.permute.xlu1 %v5390_v3  ;;  %v4461_v50 = vld [vmem:[%s10311_s6 + $0x30] sm:$0xff]  ;;  %v698_v53 = vld [vmem:[%s10308_s3 + $0x60] sm:$0xff] }
  0x1e   : > { %553 = vperm.xlu1 %5223, %v396_v10   ;;  %v700_v56 = vld [vmem:[%s10308_s3 + $0x70] sm:$0xff] }
  0x20   : > { %581 = vperm.xlu0 %5222, %v403_v18  }
  0x22   : > { %5224 = vset.pattern.permute.xlu1 %v5391_v14 }
  0x23   : > { %704 = vperm.xlu1 %5224, %v686_v19  }
  0x24   : > { %589 = vperm.xlu0 %5222, %v5527_v20  }
  0x27   : > { %431 = vperm.xlu1 %5224, %v397_v5  }
  0x28   : > { %597 = vperm.xlu0 %5222, %v5534_v21  }
  0x2b   : > { %436 = vperm.xlu1 %5224, %v398_v22  }
  0x2c   : > { %5235 = vset.pattern.permute.xlu0 %v5391_v14 }
  0x2d   : > { %411 = vperm.xlu0 %5235, %v393_v1  }
  0x2f   : > { %5225 = vset.pattern.permute.xlu1 %v5390_v3 }
  0x30   : > { %561 = vperm.xlu1 %5225, %v398_v22  }
  0x31   : > { %416 = vperm.xlu0 %5235, %v394_v6   ;;  %v4161_v6 = vld [vmem:[%s5582_s15 + $0x18] sm:$0xff] }
  0x34   : > { %5226 = vset.pattern.permute.xlu1 %v5391_v14 }
  0x35   : > { %421 = vperm.xlu0 %5235, %v395_v0   ;;  %714 = vperm.xlu1 %5226, %v688_v23   ;;  %v611_v0 = vrot.slane %v5501_v11, %v610_v60  ;;  %v4167_v23 = vld [vmem:[%s5582_s15 + $0x48] sm:$0xff] }
  0x37   : > { %v5661_v4 = vrot.slane %v611_v0, %v5490_v7 }
  0x39   : > { %709 = vperm.xlu0 %5235, %v687_v24   ;;  %441 = vperm.xlu1 %5226, %v399_v9   ;;  %10629 = vst [vmem:[#allocation5_spill] sm:$0xff] %v5661_v4 }
  0x3d   : > { %719 = vperm.xlu0 %5235, %v689_v25   ;;  %446 = vperm.xlu1 %5226, %v400_v26  }
  0x41   : > { %729 = vperm.xlu0 %5235, %v691_v27   ;;  %5227 = vset.pattern.permute.xlu1 %v5390_v3 }
  0x42   : > { %569 = vperm.xlu1 %5227, %v400_v26   ;;  %v4169_v26 = vld [vmem:[%s5582_s15 + $0x58] sm:$0xff] }
  0x45   : > { %739 = vperm.xlu0 %5235, %v693_v28  }
  0x46   : > { %5228 = vset.pattern.permute.xlu1 %v5391_v14 }
  0x47   : > { %724 = vperm.xlu1 %5228, %v690_v29  }
  0x49   : > { %749 = vperm.xlu0 %5235, %v695_v30  }
  0x4b   : > { %451 = vperm.xlu1 %5228, %v401_v15  }
  0x4d   : > { %759 = vperm.xlu0 %5235, %v697_v31  }
  0x4f   : > { %456 = vperm.xlu1 %5228, %v402_v32  }
  0x51   : > { %769 = vperm.xlu0 %5235, %v699_v33  }
  0x53   : > { %5229 = vset.pattern.permute.xlu1 %v5390_v3 }
  0x54   : > { %577 = vperm.xlu1 %5229, %v402_v32  }
  0x55   : > { %4176 = vperm.xlu0 %5235, %v4158_v34  }
  0x58   : > { %5230 = vset.pattern.permute.xlu1 %v5391_v14 }
  0x59   : > { %734 = vperm.xlu1 %5230, %v692_v35   ;;  %4186 = vperm.xlu0 %5235, %v4160_v36  }
  0x5d   : > { %461 = vperm.xlu1 %5230, %v403_v18   ;;  %4196 = vperm.xlu0 %5235, %v4162_v37  }
  0x61   : > { %466 = vperm.xlu1 %5230, %v404_v38   ;;  %4206 = vperm.xlu0 %5235, %v4164_v39  }
  0x65   : > { %5231 = vset.pattern.permute.xlu1 %v5390_v3  ;;  %4216 = vperm.xlu0 %5235, %v4166_v40  }
  0x66   : > { %585 = vperm.xlu1 %5231, %v404_v38   ;;  %v4171_v38 = vld [vmem:[%s5582_s15 + $0x68] sm:$0xff] }
  0x69   : > { %4226 = vperm.xlu0 %5235, %v4168_v41  }
  0x6a   : > { %5232 = vset.pattern.permute.xlu1 %v5391_v14 }
  0x6b   : > { %744 = vperm.xlu1 %5232, %v694_v42  }
  0x6d   : > { %4236 = vperm.xlu0 %5235, %v4170_v43  }
  0x6f   : > { %471 = vperm.xlu1 %5232, %v5527_v20   ;;  %v4165_v20 = vld [vmem:[%s5582_s15 + $0x38] sm:$0xff] }
  0x71   : > { %4246 = vperm.xlu0 %5235, %v4172_v44  }
  0x73   : > { %476 = vperm.xlu1 %5232, %v406_v45  }
  0x75   : > { %4465 = vperm.xlu0 %5235, %v4455_v46  }
  0x77   : > { %5233 = vset.pattern.permute.xlu1 %v5390_v3 }
  0x78   : > { %593 = vperm.xlu1 %5233, %v406_v45  }
  0x79   : > { %4475 = vperm.xlu0 %5235, %v4457_v47  }
  0x7c   : > { %5234 = vset.pattern.permute.xlu1 %v5391_v14 }
  0x7d   : > { %754 = vperm.xlu1 %5234, %v696_v48   ;;  %4485 = vperm.xlu0 %5235, %v4459_v49   ;;  %v4173_v49 = vld [vmem:[%s5582_s15 + $0x78] sm:$0xff] }
  0x81   : > { %481 = vperm.xlu1 %5234, %v5534_v21   ;;  %4495 = vperm.xlu0 %5235, %v4461_v50  }
  0x85   : > { %486 = vperm.xlu1 %5234, %v408_v51   ;;  %4638 = vperm.xlu0 %5235, %v4634_v52  }
  0x89   : > { %5236 = vset.pattern.permute.xlu1 %v5390_v3  ;;  %v5656_v3 = vrot.slane %v497_v62, %v5493_v8  ;;  %v4458_v62 = vld [vmem:[%s10311_s6 + $0x18] sm:$0xff] }
  0x8a   : > { %601 = vperm.xlu1 %5236, %v408_v51  }
  0x8b   : > { %10628 = vst [vmem:[#allocation4_spill] sm:$0xff] %v5656_v3 }
  0x8e   : > { %5237 = vset.pattern.permute.xlu1 %v5391_v14  ;;  %v4163_v14 = vld [vmem:[%s5582_s15 + $0x28] sm:$0xff] }
  0x8f   : > { %764 = vperm.xlu1 %5237, %v698_v53   ;;  %v5638_v54 = vpop.permute.xlu1 %541  ;;  %v550_v55 = vpop.permute.xlu0 %549 }
  0x90   : > { %v622_v27 = vmul.f32 %v5512_v16, %v5638_v54  ;;  %v626_v45 = vmul.f32 %v5512_v16, %v550_v55  ;;  %v627_v46 = vmul.f32 %v5661_v4, %v550_v55 }
  0x93   : > { %774 = vperm.xlu1 %5237, %v700_v56   ;;  %v5644_v58 = vpop.permute.xlu1 %545  ;;  %v558_v59 = vpop.permute.xlu0 %557 }
  0x94   : > { %v630_v29 = vmul.f32 %v5512_v16, %v558_v59  ;;  %v631_v30 = vmul.f32 %v5661_v4, %v558_v59  ;;  %v624_v39 = vmul.f32 %v5512_v16, %v5644_v58  ;;  %v4456_v59 = vld [vmem:[%s10311_s6 + $0x8] sm:$0xff] }
  0x97   : > { %779 = vperm.xlu1 %5237, %v701_v61   ;;  %v5651_v63 = vpop.permute.xlu0 %565 }
  0x98   : > { %v427_v1 = vpop.permute.xlu1 %426 }
  0x99   : > { %v514_v10 = vmul.f32 %v5515_v17, %v427_v1  ;;  %v515_v12 = vmul.f32 %v5656_v3, %v427_v1 }
  0x9b   : > { %4181 = vperm.xlu1 %5237, %v4159_v2   ;;  %v5658_v5 = vpop.permute.xlu0 %573 }
  0x9d   : > { %v554_v9 = vpop.permute.xlu1 %553 }
  0x9e   : > { %v628_v11 = vmul.f32 %v5512_v16, %v554_v9  ;;  %v629_v13 = vmul.f32 %v5661_v4, %v554_v9 }
  0x9f   : > { %4191 = vperm.xlu1 %5237, %v4161_v6   ;;  %v5668_v8 = vpop.permute.xlu0 %581  ;;  %v4460_v6 = vld [vmem:[%s10311_s6 + $0x28] sm:$0xff] }
  0xa0   : > { %v5671_v15 = vadd.f32 %v628_v11, %v514_v10  ;;  %v5673_v7 = vadd.f32 %v629_v13, %v515_v12 }
  0xa2   : > { %v5675_v18 = vpop.permute.xlu1 %704 }
  0xa3   : > { %4201 = vperm.xlu1 %5237, %v4163_v14   ;;  %v5677_v19 = vpop.permute.xlu0 %589 }
  0xa6   : > { %v432_v21 = vpop.permute.xlu1 %431 }
  0xa7   : > { %4211 = vperm.xlu1 %5237, %v4165_v20   ;;  %v5680_v22 = vpop.permute.xlu0 %597  ;;  %v516_v31 = vmul.f32 %v5515_v17, %v432_v21  ;;  %v517_v32 = vmul.f32 %v5656_v3, %v432_v21  ;;  %v10328_v21 = vmov 920167782  }
  0xa9   : > { %v5714_v43 = vadd.f32 %v630_v29, %v516_v31  ;;  %v5716_v44 = vadd.f32 %v631_v30, %v517_v32  ;;  %v10317_v30 = vmov 2102212464   ;;  %v10319_v32 = vmov 2475754826  }
  0xaa   : > { %v5683_v24 = vpop.permute.xlu1 %436 }
  0xab   : > { %4221 = vperm.xlu1 %5237, %v4167_v23   ;;  %v518_v35 = vmul.f32 %v5515_v17, %v5683_v24 }
  0xac   : > { %v5685_v25 = vpop.permute.xlu0 %411 }
  0xad   : > { %v508_v28 = vmul.f32 %v5515_v17, %v5685_v25 }
  0xaf   : > { %v654_v33 = vadd.f32 %v622_v27, %v508_v28  ;;  %v5696_v34 = vpop.permute.xlu1 %561  ;;  %4231 = vperm.xlu1 %5237, %v4169_v26   ;;  %v10326_v26 = vmov 1326507024  }
  0xb0   : > { %v632_v36 = vmul.f32 %v5512_v16, %v5696_v34  ;;  %v5702_v37 = vpop.permute.xlu0 %416 }
  0xb1   : > { %v5708_v40 = vadd.f32 %v5675_v18, %v654_v33  ;;  %v510_v41 = vmul.f32 %v5515_v17, %v5702_v37 }
  0xb2   : > { %v5712_v42 = vadd.f32 %v632_v36, %v518_v35  ;;  %v10324_v35 = vmov 2131351028  }
  0xb3   : > { %10630 = vst [vmem:[#allocation6_spill] sm:$0xff] %v5708_v40  ;;  %4241 = vperm.xlu1 %5237, %v4171_v38   ;;  %v656_v47 = vadd.f32 %v624_v39, %v510_v41 }
  0xb4   : > { %v422_v48 = vpop.permute.xlu0 %421  ;;  %v715_v56 = vpop.permute.xlu1 %714 }
  0xb5   : > { %v512_v50 = vmul.f32 %v5515_v17, %v422_v48  ;;  %v513_v51 = vmul.f32 %v5656_v3, %v422_v48 }
  0xb7   : > { %v658_v52 = vadd.f32 %v626_v45, %v512_v50  ;;  %v659_v53 = vadd.f32 %v627_v46, %v513_v51  ;;  %4251 = vperm.xlu1 %5237, %v4173_v49   ;;  %v10322_v46 = vmov 683565275  }
  0xb8   : > { %v5723_v57 = vpop.permute.xlu0 %709 }
  0xb9   : > { %v5728_v60 = vadd.f32 %v715_v56, %v658_v52  ;;  %v5731_v55 = vadd.f32 %v5723_v57, %v656_v47  ;;  %v5737_v0 = vadd.f32 %v715_v56, %v659_v53 }
  0xbb   : > { %10631 = vst [vmem:[#allocation7_spill] sm:$0xff] %v5728_v60  ;;  %10632 = vst [vmem:[#allocation8_spill] sm:$0xff] %v5731_v55  ;;  %4470 = vperm.xlu1 %5237, %v4456_v59   ;;  %v1233_v61 = vand.u32 2139095040, %v5728_v60  ;;  %v1337_v10 = vand.u32 2139095040, %v5737_v0  ;;  %v10315_v28 = vand.u32 2147483647, %v5728_v60 }
  0xbc   : > { %10633 = vst [vmem:[#allocation9_spill] sm:$0xff] %v5737_v0  ;;  %v5758_v52 = vpop.permute.xlu0 %719 }
  0xbd   : > { %v1234_v1 = vshrl.u32 %v1233_v61, 23  ;;  %v1338_v13 = vshrl.u32 %v1337_v10, 23  ;;  %v1237_v51 = vand.u32 8388607, %v10315_v28 }
  0xbf   : > { %4480 = vperm.xlu1 %5237, %v4458_v62   ;;  %v4860_v2 = vadd.s32 4294967169, %v1234_v1  ;;  %v4864_v20 = vadd.s32 4294967169, %v1338_v13  ;;  %v5767_v1 = vadd.f32 %v5758_v52, %v5671_v15 }
  0xc1   : > { %v1240_v9 = vadd.s32 1, %v4860_v2  ;;  %v1344_v45 = vadd.s32 1, %v4864_v20  ;;  %10634 = vst [vmem:[#allocation10_spill] sm:$0xff] %v5767_v1  ;;  %v1238_v2 = vor.u32 8388608, %v1237_v51  ;;  %v1441_v15 = vand.u32 2139095040, %v5767_v1 }
  0xc2   : > { %v10316_v51 = vand.u32 2147483647, %v5737_v0 }
  0xc3   : > { %4490 = vperm.xlu1 %5237, %v4460_v6   ;;  %vm1241_vm0 = vcmp.gt.s32.totalorder %v1240_v9, 0  ;;  %vm1345_vm2 = vcmp.gt.s32.totalorder %v1344_v45, 0 }
  0xc4   : > { %v1242_v12 = vsel %vm1241_vm0, %v1240_v9, 0  ;;  %v1346_v10 = vsel %vm1345_vm2, %v1344_v45, 0 }
  0xc5   : > { %v1244_v11 = vand.u32 31, %v1242_v12  ;;  %v5746_v29 = vshrl.u32 %v1242_v12, 5  ;;  %v1348_v20 = vand.u32 31, %v1346_v10 }
  0xc7   : > { %v1245_v14 = vsub.s32 32, %v1244_v11  ;;  %v1256_v31 = vshll.u32 %v10317_v30, %v1244_v11  ;;  %v1259_v39 = vshll.u32 %v10328_v21, %v1244_v11  ;;  %v1247_v47 = vshll.u32 %v10322_v46, %v1244_v11 }
  0xc8   : > { %v1250_v48 = vshll.u32 %v10319_v32, %v1244_v11  ;;  %v1253_v49 = vshll.u32 %v10324_v35, %v1244_v11  ;;  %vm1265_vm1 = vcmp.lt.s32.totalorder %v5746_v29, 4  ;;  %vm1262_vm3 = vcmp.lt.s32.totalorder %v5746_v29, 1 }
  0xc9   : > { %v1257_v23 = vshrl.u32 %v10328_v21, %v1245_v14  ;;  %v1260_v27 = vshrl.u32 %v10326_v26, %v1245_v14  ;;  %v1248_v33 = vshrl.u32 %v10319_v32, %v1245_v14  ;;  %v1251_v36 = vshrl.u32 %v10324_v35, %v1245_v14 }
  0xca   : > { %v1254_v38 = vshrl.u32 %v10317_v30, %v1245_v14  ;;  %vm1264_vm4 = vcmp.lt.s32.totalorder %v5746_v29, 3  ;;  %vm1263_vm5 = vcmp.lt.s32.totalorder %v5746_v29, 2  ;;  %v1246_v45 = vshrl.u32 %v10322_v46, %v1245_v14 }
  0xcb   : > { %v1258_v41 = vor.u32 %v1257_v23, %v1256_v31  ;;  %v1261_v50 = vor.u32 %v1260_v27, %v1259_v39  ;;  %v1249_v53 = vor.u32 %v1248_v33, %v1247_v47  ;;  %v1252_v56 = vor.u32 %v1251_v36, %v1250_v48 }
  0xcc   : > { %v1255_v59 = vor.u32 %v1254_v38, %v1253_v49  ;;  %v1278_v27 = vshll.u32 %v1238_v2, 8  ;;  %v1442_v36 = vshrl.u32 %v1441_v15, 23  ;;  %v1360_v14 = vshll.u32 %v10317_v30, %v1348_v20 }
  0xcd   : > { %v1271_v61 = vsel %vm1265_vm1, %v1258_v41, 920167782  ;;  %v1275_v62 = vsel %vm1265_vm1, %v1261_v50, 1326507024  ;;  %v1270_v6 = vsel %vm1262_vm3, %v1249_v53, %v1252_v56  ;;  %v1266_v50 = vsel %vm1262_vm3, %v1246_v45, %v1249_v53 }
  0xce   : > { %v1272_v9 = vsel %vm1264_vm4, %v1255_v59, %v1271_v61  ;;  %v1274_v12 = vsel %vm1262_vm3, %v1252_v56, %v1255_v59  ;;  %v1276_v11 = vsel %vm1264_vm4, %v1258_v41, %v1275_v62  ;;  %v1349_v41 = vsub.s32 32, %v1348_v20 }
  0xcf   : > { %v1273_v13 = vsel %vm1263_vm5, %v1270_v6, %v1272_v9  ;;  %v1277_v23 = vsel %vm1263_vm5, %v1274_v12, %v1276_v11  ;;  %v1267_v47 = vsel %vm1265_vm1, %v1255_v59, 2102212464  ;;  %v4868_v48 = vadd.s32 4294967169, %v1442_v36 }
  0xd0   : > { %v5785_v31 = vmul.u32.u64.low %v1278_v27, %v1273_v13  ;;  %v5786_v33 = vmul.u32.u64.high %v1278_v27, %v1273_v13, %v5785_v31  ;;  %v5789_v38 = vmul.u32.u64.low %v1278_v27, %v1277_v23  ;;  %v5790_v39 = vmul.u32.u64.high %v1278_v27, %v1277_v23, %v5789_v38 }
  0xd1   : > { %v1361_v49 = vshrl.u32 %v10328_v21, %v1349_v41  ;;  %v5799_v61 = vshrl.u32 %v1346_v10, 5  ;;  %v1268_v62 = vsel %vm1264_vm4, %v1252_v56, %v1267_v47  ;;  %v1352_v2 = vshrl.u32 %v10319_v32, %v1349_v41 }
  0xd2   : > { %v1364_v6 = vshrl.u32 %v10326_v26, %v1349_v41  ;;  %v1288_v59 = vadd.s32 1, %v5786_v33  ;;  %v1355_v9 = vshrl.u32 %v10324_v35, %v1349_v41  ;;  %v1358_v12 = vshrl.u32 %v10317_v30, %v1349_v41 }
  0xd3   : > { %v1448_v53 = vadd.s32 1, %v4868_v48  ;;  %vm1287_vm6 = vc.u32 %v5790_v39, %v5785_v31  ;;  %v1351_v10 = vshll.u32 %v10322_v46, %v1348_v20  ;;  %v1362_v11 = vor.u32 %v1361_v49, %v1360_v14 }
  0xd4   : > { %v1363_v56 = vshll.u32 %v10328_v21, %v1348_v20  ;;  %v1269_v15 = vsel %vm1263_vm5, %v1266_v50, %v1268_v62  ;;  %v1354_v13 = vshll.u32 %v10319_v32, %v1348_v20  ;;  %v1357_v23 = vshll.u32 %v10324_v35, %v1348_v20 }
  0xd5   : > { %v1341_v36 = vand.u32 8388607, %v10316_v51  ;;  %v1353_v38 = vor.u32 %v1352_v2, %v1351_v10  ;;  %vm1449_vm7 = vcmp.gt.s32.totalorder %v1448_v53, 0  ;;  %v1289_v47 = vsel %vm1287_vm6, %v1288_v59, %v5786_v33 }
  0xd6   : > { %v1365_v45 = vor.u32 %v1364_v6, %v1363_v56  ;;  %v1356_v48 = vor.u32 %v1355_v9, %v1354_v13  ;;  %v1359_v28 = vor.u32 %v1358_v12, %v1357_v23  ;;  %vm1369_vm8 = vcmp.lt.s32.totalorder %v5799_v61, 4 }
  0xd7   : > { %v1285_v49 = vmul.u32 %v1278_v27, %v1269_v15  ;;  %v1375_v29 = vsel %vm1369_vm8, %v1362_v11, 920167782  ;;  %v1450_v50 = vsel %vm1449_vm7, %v1448_v53, 0  ;;  %v509_v20 = vmul.f32 %v5656_v3, %v5685_v25 }
  0xd8   : > { %vm1366_vm9 = vcmp.lt.s32.totalorder %v5799_v61, 1  ;;  %vm1368_vm10 = vcmp.lt.s32.totalorder %v5799_v61, 3  ;;  %v1379_v33 = vsel %vm1369_vm8, %v1365_v45, 1326507024  ;;  %v1342_v2 = vor.u32 8388608, %v1341_v36 }
  0xd9   : > { %v1290_v62 = vadd.s32 %v1289_v47, %v1285_v49  ;;  %v1374_v14 = vsel %vm1366_vm9, %v1353_v38, %v1356_v48  ;;  %v1376_v27 = vsel %vm1368_vm10, %v1359_v28, %v1375_v29  ;;  %v1452_v6 = vand.u32 31, %v1450_v50 }
  0xda   : > { %v623_v59 = vmul.f32 %v5661_v4, %v5638_v54  ;;  %vm1367_vm11 = vcmp.lt.s32.totalorder %v5799_v61, 2  ;;  %v1378_v25 = vsel %vm1366_vm9, %v1356_v48, %v1359_v28  ;;  %v1380_v9 = vsel %vm1368_vm10, %v1362_v11, %v1379_v33 }
  0xdb   : > { %v1291_v53 = vadd.s32 536870912, %v1290_v62  ;;  %v1377_v10 = vsel %vm1367_vm11, %v1374_v14, %v1376_v27  ;;  %v5842_v56 = vshll.u32 %v1342_v2, 8  ;;  %v5846_v15 = vadd.f32 %v5758_v52, %v5673_v7 }
  0xdc   : > { %v655_v12 = vadd.f32 %v623_v59, %v509_v20  ;;  %v5848_v54 = vsub.s32 32, %v1452_v6  ;;  %v1381_v13 = vsel %vm1367_vm11, %v1378_v25, %v1380_v9  ;;  %v1350_v47 = vshrl.u32 %v10322_v46, %v1349_v41 }
  0xdd   : > { %10635 = vst [vmem:[#allocation11_spill] sm:$0xff] %v5846_v15  ;;  %v5853_v23 = vmul.u32.u64.low %v5842_v56, %v1377_v10  ;;  %v5854_v36 = vmul.u32.u64.high %v5842_v56, %v1377_v10, %v5853_v23  ;;  %v5860_v45 = vshrl.u32 %v1291_v53, 30  ;;  %v1371_v7 = vsel %vm1369_vm8, %v1359_v28, 2102212464 }
  0xde   : > { %v5858_v11 = vadd.f32 %v5675_v18, %v655_v12  ;;  %v5866_v52 = vmul.u32.u64.low %v5842_v56, %v1381_v13  ;;  %v5867_v49 = vmul.u32.u64.high %v5842_v56, %v1381_v13, %v5866_v52  ;;  %v1465_v29 = vshrl.u32 %v10328_v21, %v5848_v54 }
  0xdf   : > { %10637 = vst [vmem:[#allocation13_spill] sm:$0xff] %v5860_v45  ;;  %v1545_v20 = vand.u32 2139095040, %v5846_v15  ;;  %v817_v33 = vand.u32 2139095040, %v5708_v40  ;;  %v10321_v18 = vand.u32 2147483647, %v5767_v1  ;;  %v1468_v2 = vshrl.u32 %v10326_v26, %v5848_v54  ;;  %v4462_v52 = vld [vmem:[%s10311_s6 + $0x38] sm:$0xff] }
  0xe0   : > { %10636 = vst [vmem:[#allocation12_spill] sm:$0xff] %v5858_v11  ;;  %v1370_v41 = vsel %vm1366_vm9, %v1350_v47, %v1353_v38  ;;  %v1372_v28 = vsel %vm1368_vm10, %v1356_v48, %v1371_v7  ;;  %v5880_v14 = vshrl.u32 %v1450_v50, 5  ;;  %v1464_v27 = vshll.u32 %v10317_v30, %v1452_v6  ;;  %4500 = vperm.xlu1 %5237, %v4462_v52  }
  0xe1   : > { %v1456_v59 = vshrl.u32 %v10319_v32, %v5848_v54  ;;  %v1459_v25 = vshrl.u32 %v10324_v35, %v5848_v54  ;;  %v1462_v9 = vshrl.u32 %v10317_v30, %v5848_v54  ;;  %v1467_v12 = vshll.u32 %v10328_v21, %v1452_v6 }
  0xe2   : > { %v921_v38 = vand.u32 2139095040, %v5858_v11  ;;  %v1293_v53 = vshll.u32 %v5860_v45, 30  ;;  %v1466_v48 = vor.u32 %v1465_v29, %v1464_v27  ;;  %v1546_v50 = vshrl.u32 %v1545_v20, 23 }
  0xe3   : > { %v1455_v10 = vshll.u32 %v10322_v46, %v1452_v6  ;;  %v1458_v13 = vshll.u32 %v10319_v32, %v1452_v6  ;;  %v1461_v47 = vshll.u32 %v10324_v35, %v1452_v6  ;;  %v1469_v7 = vor.u32 %v1468_v2, %v1467_v12 }
  0xe4   : > { %v1373_v51 = vsel %vm1367_vm11, %v1370_v41, %v1372_v28  ;;  %v1392_v30 = vadd.s32 1, %v5854_v36  ;;  %v1445_v29 = vand.u32 8388607, %v10321_v18  ;;  %vm1473_vm12 = vcmp.lt.s32.totalorder %v5880_v14, 4 }
  0xe5   : > { %v5903_v20 = vor.u32 %v1456_v59, %v1455_v10  ;;  %v5905_v27 = vor.u32 %v1459_v25, %v1458_v13  ;;  %v1463_v32 = vor.u32 %v1462_v9, %v1461_v47  ;;  %v5908_v6 = vsub.s32 %v1290_v62, %v1293_v53  ;;  %v4635_v25 = vld [vmem:[%s10313_s8 + $0x8] sm:$0xff] }
  0xe6   : > { %vm1391_vm13 = vc.u32 %v5867_v49, %v5853_v23  ;;  %v1479_v61 = vsel %vm1473_vm12, %v1466_v48, 920167782  ;;  %v4872_v2 = vadd.s32 4294967169, %v1546_v50  ;;  %v818_v41 = vshrl.u32 %v817_v33, 23  ;;  %4643 = vperm.xlu1 %5237, %v4635_v25  }
  0xe7   : > { %v922_v28 = vshrl.u32 %v921_v38, 23  ;;  %v1483_v59 = vsel %vm1473_vm12, %v1469_v7, 1326507024  ;;  %v511_v62 = vmul.f32 %v5656_v3, %v5702_v37  ;;  %v1389_v9 = vmul.u32 %v5842_v56, %v1373_v51 }
  0xe8   : > { %vm1470_vm14 = vcmp.lt.s32.totalorder %v5880_v14, 1  ;;  %vm1472_vm15 = vcmp.lt.s32.totalorder %v5880_v14, 3  ;;  %v1393_v33 = vsel %vm1391_vm13, %v1392_v30, %v5854_v36  ;;  %v1446_v12 = vor.u32 8388608, %v1445_v29 }
  0xe9   : > { %v1478_v38 = vsel %vm1470_vm14, %v5903_v20, %v5905_v27  ;;  %v1480_v53 = vsel %vm1472_vm15, %v1463_v32, %v1479_v61  ;;  %v1296_v37 = vsub.s32 0, %v5908_v6  ;;  %v1482_v51 = vsel %vm1470_vm14, %v5905_v27, %v1463_v32 }
  0xea   : > { %v1484_v56 = vsel %vm1472_vm15, %v1466_v48, %v1483_v59  ;;  %v1552_v50 = vadd.s32 1, %v4872_v2  ;;  %v4844_v30 = vadd.s32 4294967169, %v818_v41  ;;  %v4848_v36 = vadd.s32 4294967169, %v922_v28 }
  0xeb   : > { %vm1471_vm0 = vcmp.lt.s32.totalorder %v5880_v14, 2  ;;  %v625_v10 = vmul.f32 %v5661_v4, %v5644_v58  ;;  %v5940_v13 = vadd.s32 %v1393_v33, %v1389_v9  ;;  %v5946_v7 = vmul.f32 %v5512_v16, %v5651_v63 }
  0xec   : > { %v1481_v47 = vsel %vm1471_vm0, %v1478_v38, %v1480_v53  ;;  %v1025_v52 = vand.u32 2139095040, %v5731_v55  ;;  %v1485_v48 = vsel %vm1471_vm0, %v1482_v51, %v1484_v56  ;;  %v5951_v29 = vshll.u32 %v1446_v12, 8 }
  0xed   : > { %10638 = vst [vmem:[#allocation14_spill] sm:$0xff] %v5946_v7  ;;  %v5955_v61 = vmul.f32 %v5661_v4, %v5651_v63  ;;  %v4861_v58 = vmin.u32 %v1296_v37, %v5908_v6  ;;  %v657_v2 = vadd.f32 %v625_v10, %v511_v62  ;;  %vm1553_vm1 = vcmp.gt.s32.totalorder %v1552_v50, 0 }
  0xee   : > { %v824_v41 = vadd.s32 1, %v4844_v30  ;;  %v928_v28 = vadd.s32 1, %v4848_v36  ;;  %v5959_v59 = vmul.u32.u64.low %v5951_v29, %v1481_v47  ;;  %v5960_v25 = vmul.u32.u64.high %v5951_v29, %v1481_v47, %v5959_v59 }
  0xef   : > { %10639 = vst [vmem:[#allocation15_spill] sm:$0xff] %v5955_v61  ;;  %v1395_v9 = vadd.s32 536870912, %v5940_v13  ;;  %v5965_v33 = vadd.f32 %v5723_v57, %v657_v2  ;;  %v5968_v12 = vmul.u32.u64.low %v5951_v29, %v1485_v48  ;;  %v5969_v63 = vmul.u32.u64.high %v5951_v29, %v1485_v48, %v5968_v12 }
  0xf0   : > { %v5973_v62 = vmul.f32 %v5512_v16, %v5658_v5  ;;  %v5977_v38 = vmul.f32 %v5661_v4, %v5658_v5  ;;  %v1026_v53 = vshrl.u32 %v1025_v52, 23  ;;  %v1554_v37 = vsel %vm1553_vm1, %v1552_v50, 0  ;;  %v730_v52 = vpop.permute.xlu0 %729  ;;  %v442_v12 = vpop.permute.xlu1 %441 }
  0xf1   : > { %10640 = vst [vmem:[#allocation16_spill] sm:$0xff] %v5965_v33  ;;  %v5981_v51 = vmul.f32 %v5512_v16, %v5668_v8  ;;  %v5985_v57 = vmul.f32 %v5661_v4, %v5668_v8  ;;  %v5989_v56 = vmul.f32 %v5512_v16, %v5677_v19  ;;  %v1298_v30 = vclz %v4861_v58 }
  0xf2   : > { %10641 = vst [vmem:[#allocation17_spill] sm:$0xff] %v5973_v62  ;;  %10642 = vst [vmem:[#allocation18_spill] sm:$0xff] %v5977_v38  ;;  %v5993_v36 = vmul.f32 %v5661_v4, %v5677_v19  ;;  %vm825_vm2 = vcmp.gt.s32.totalorder %v824_v41, 0  ;;  %vm929_vm3 = vcmp.gt.s32.totalorder %v928_v28, 0  ;;  %v1475_v5 = vsel %vm1473_vm12, %v1463_v32, 2102212464 }
  0xf3   : > { %10643 = vst [vmem:[#allocation19_spill] sm:$0xff] %v5981_v51  ;;  %10644 = vst [vmem:[#allocation20_spill] sm:$0xff] %v5985_v57  ;;  %v5997_v50 = vshrl.u32 %v1395_v9, 30  ;;  %v1129_v10 = vand.u32 2139095040, %v5965_v33  ;;  %v1454_v8 = vshrl.u32 %v10322_v46, %v5848_v54  ;;  %v1556_v47 = vand.u32 31, %v1554_v37 }
  0xf4   : > { %10645 = vst [vmem:[#allocation21_spill] sm:$0xff] %v5989_v56  ;;  %10646 = vst [vmem:[#allocation22_spill] sm:$0xff] %v5993_v36  ;;  %v6004_v48 = vmul.f32 %v5512_v16, %v5680_v22  ;;  %v6008_v19 = vmul.f32 %v5661_v4, %v5680_v22  ;;  %v633_v32 = vmul.f32 %v5661_v4, %v5696_v34  ;;  %v4852_v58 = vadd.s32 4294967169, %v1026_v53 }
  0xf5   : > { %10647 = vst [vmem:[#allocation23_spill] sm:$0xff] %v5997_v50  ;;  %v519_v2 = vmul.f32 %v5656_v3, %v5683_v24  ;;  %v4862_v9 = vadd.s32 4294967294, %v1298_v30  ;;  %v1474_v54 = vsel %vm1470_vm14, %v1454_v8, %v5903_v20  ;;  %v1476_v18 = vsel %vm1472_vm15, %v5905_v27, %v1475_v5 }
  0xf6   : > { %10648 = vst [vmem:[#allocation24_spill] sm:$0xff] %v6004_v48  ;;  %10649 = vst [vmem:[#allocation25_spill] sm:$0xff] %v6008_v19  ;;  %v826_v22 = vsel %vm825_vm2, %v824_v41, 0  ;;  %v930_v46 = vsel %vm929_vm3, %v928_v28, 0  ;;  %v1496_v34 = vadd.s32 1, %v5960_v25  ;;  %v6024_v53 = vadd.f32 %v730_v52, %v5712_v42 }
  0xf7   : > { %v1397_v24 = vshll.u32 %v5997_v50, 30  ;;  %v1130_v30 = vshrl.u32 %v1129_v10, 23  ;;  %vm1495_vm4 = vc.u32 %v5969_v63, %v5959_v59  ;;  %v6029_v20 = vsub.s32 32, %v1556_v47 }
  0xf8   : > { %10650 = vst [vmem:[#allocation26_spill] sm:$0xff] %v6024_v53  ;;  %v1032_v8 = vadd.s32 1, %v4852_v58  ;;  %v6032_v27 = vmul.f32 %v5515_v17, %v442_v12  ;;  %v1477_v41 = vsel %vm1471_vm0, %v1474_v54, %v1476_v18  ;;  %v665_v28 = vadd.f32 %v633_v32, %v519_v2 }
  0xf9   : > { %v6036_v5 = vshrl.u32 %v826_v22, 5  ;;  %v6038_v42 = vand.u32 31, %v826_v22  ;;  %vm4863_vm5 = vcmp.lt.s32.totalorder %v4862_v9, 0  ;;  %v6041_v10 = vmul.f32 %v5656_v3, %v442_v12 }
  0xfa   : > { %10651 = vst [vmem:[#allocation27_spill] sm:$0xff] %v6032_v27  ;;  %v6043_v35 = vshrl.u32 %v930_v46, 5  ;;  %v6045_v26 = vand.u32 31, %v930_v46  ;;  %v1497_v58 = vsel %vm1495_vm4, %v1496_v34, %v5960_v25  ;;  %v1857_v21 = vand.u32 2139095040, %v6024_v53 }
  0xfb   : > { %10652 = vst [vmem:[#allocation28_spill] sm:$0xff] %v6036_v5  ;;  %10653 = vst [vmem:[#allocation29_spill] sm:$0xff] %v6038_v42  ;;  %v6050_v14 = vsub.s32 %v5940_v13, %v1397_v24  ;;  %v4856_v18 = vadd.s32 4294967169, %v1130_v30  ;;  %v1493_v32 = vmul.u32 %v5951_v29, %v1477_v41  ;;  %v10657_v2 = vmov 920167782  }
  0xfc   : > { %10654 = vst [vmem:[#allocation30_spill] sm:$0xff] %v6041_v10  ;;  %10655 = vst [vmem:[#allocation31_spill] sm:$0xff] %v6043_v35  ;;  %v1569_v54 = vshrl.u32 %v10657_v2, %v6029_v20  ;;  %v6055_v22 = vsel %vm4863_vm5, 0, %v4862_v9  ;;  %vm1033_vm6 = vcmp.gt.s32.totalorder %v1032_v8, 0  ;;  %v10658_v46 = vmov 1326507024   ;;  %v740_v10 = vpop.permute.xlu0 %739 }
  0xfd   : > { %10656 = vst [vmem:[#allocation32_spill] sm:$0xff] %v6045_v26  ;;  %v1572_v45 = vshrl.u32 %v10658_v46, %v6029_v20  ;;  %v6060_v25 = vadd.s32 %v1497_v58, %v1493_v32  ;;  %v6062_v34 = vshrl.u32 %v1554_v37, 5  ;;  %v10659_v13 = vmov 2475754826  }
  0xfe   : > { %v1560_v24 = vshrl.u32 %v10659_v13, %v6029_v20  ;;  %v10660_v30 = vmov 2102212464   ;;  %v10661_v41 = vmov 2131351028   ;;  %v1571_v12 = vshll.u32 %v10657_v2, %v1556_v47 }
  0xff   : > { %v1568_v29 = vshll.u32 %v10660_v30, %v1556_v47  ;;  %v1563_v19 = vshrl.u32 %v10661_v41, %v6029_v20  ;;  %v1566_v9 = vshrl.u32 %v10660_v30, %v6029_v20  ;;  %v1858_v48 = vshrl.u32 %v1857_v21, 23 }
 0x100   : > { %v1400_v50 = vsub.s32 0, %v6050_v14  ;;  %v1034_v58 = vsel %vm1033_vm6, %v1032_v8, 0  ;;  %v10662_v32 = vmov 683565275   ;;  %v1562_v5 = vshll.u32 %v10659_v13, %v1556_v47 }
 0x101   : > { %v1559_v37 = vshll.u32 %v10662_v32, %v1556_v47  ;;  %v1570_v55 = vor.u32 %v1569_v54, %v1568_v29  ;;  %v1565_v40 = vshll.u32 %v10661_v41, %v1556_v47  ;;  %v1573_v36 = vor.u32 %v1572_v45, %v1571_v12 }
 0x102   : > { %v6076_v56 = vadd.f32 %v730_v52, %v665_v28  ;;  %v1306_v33 = vsub.s32 4294967266, %v6055_v22  ;;  %v1499_v35 = vadd.s32 536870912, %v6060_v25  ;;  %v10664_v11 = vand.u32 2147483647, %v5846_v15 }
 0x103   : > { %v6082_v57 = vor.u32 %v1560_v24, %v1559_v37  ;;  %v6084_v8 = vor.u32 %v1563_v19, %v1562_v5  ;;  %v1567_v51 = vor.u32 %v1566_v9, %v1565_v40  ;;  %vm1577_vm7 = vcmp.lt.s32.totalorder %v6062_v34, 4 }
 0x104   : > { %10663 = vst [vmem:[#allocation33_spill] sm:$0xff] %v6076_v56  ;;  %v1549_v21 = vand.u32 8388607, %v10664_v11  ;;  %v4884_v54 = vadd.s32 4294967169, %v1858_v48  ;;  %v6088_v47 = vsub.s32 32, %v6038_v42  ;;  %v6091_v45 = vsub.s32 32, %v6045_v26 }
 0x105   : > { %v6093_v52 = vand.u32 31, %v1034_v58  ;;  %v1583_v28 = vsel %vm1577_vm7, %v1570_v55, 920167782  ;;  %v4865_v11 = vmin.u32 %v1400_v50, %v6050_v14  ;;  %v1136_v12 = vadd.s32 1, %v4856_v18 }
 0x106   : > { %10665 = vst [vmem:[#allocation34_spill] sm:$0xff] %v6088_v47  ;;  %10666 = vst [vmem:[#allocation35_spill] sm:$0xff] %v6091_v45  ;;  %v1587_v40 = vsel %vm1577_vm7, %v1573_v36, 1326507024  ;;  %v1961_v19 = vand.u32 2139095040, %v6076_v56  ;;  %v6101_v48 = vshrl.u32 %v1499_v35, 30 }
 0x107   : > { %10667 = vst [vmem:[#allocation36_spill] sm:$0xff] %v6093_v52  ;;  %v1550_v5 = vor.u32 8388608, %v1549_v21  ;;  %vm1574_vm8 = vcmp.lt.s32.totalorder %v6062_v34, 1  ;;  %vm1576_vm9 = vcmp.lt.s32.totalorder %v6062_v34, 3  ;;  %v1307_v24 = vadd.s32 127, %v1306_v33 }
 0x108   : > { %10668 = vst [vmem:[#allocation37_spill] sm:$0xff] %v6101_v48  ;;  %v1582_v29 = vsel %vm1574_vm8, %v6082_v57, %v6084_v8  ;;  %v1584_v50 = vsel %vm1576_vm9, %v1567_v51, %v1583_v28  ;;  %v1864_v18 = vadd.s32 1, %v4884_v54  ;;  %v1302_v36 = vsub.s32 32, %v6055_v22 }
 0x109   : > { %v6113_v35 = vsub.s32 32, %v6093_v52  ;;  %v1586_v9 = vsel %vm1574_vm8, %v6084_v8, %v1567_v51  ;;  %v1588_v33 = vsel %vm1576_vm9, %v1570_v55, %v1587_v40  ;;  %v1402_v37 = vclz %v4865_v11 }
 0x10a   : > { %vm1137_vm10 = vcmp.gt.s32.totalorder %v1136_v12, 0  ;;  %vm1575_vm11 = vcmp.lt.s32.totalorder %v6062_v34, 2  ;;  %v1962_v21 = vshrl.u32 %v1961_v19, 23  ;;  %v1286_v54 = vadd.s32 %v5785_v31, %v5790_v39 }
 0x10b   : > { %10669 = vst [vmem:[#allocation38_spill] sm:$0xff] %v6113_v35  ;;  %v6123_v28 = vshrl.u32 %v1034_v58, 5  ;;  %v1501_v42 = vshll.u32 %v6101_v48, 30  ;;  %v1585_v47 = vsel %vm1575_vm11, %v1582_v29, %v1584_v50  ;;  %v1308_v26 = vshll.u32 %v1307_v24, 23 }
 0x10c   : > { %v1589_v45 = vsel %vm1575_vm11, %v1586_v9, %v1588_v33  ;;  %v6130_v55 = vshll.u32 %v1550_v5, 8  ;;  %vm1865_vm12 = vcmp.gt.s32.totalorder %v1864_v18, 0  ;;  %v1303_v11 = vshll.u32 %v5908_v6, %v6055_v22  ;;  %v447_v9 = vpop.permute.xlu1 %446 }
 0x10d   : > { %10670 = vst [vmem:[#allocation39_spill] sm:$0xff] %v6123_v28  ;;  %v1304_v40 = vshrl.u32 %v1286_v54, %v1302_v36  ;;  %v1049_v31 = vshrl.u32 %v10657_v2, %v6113_v35  ;;  %v1138_v39 = vsel %vm1137_vm10, %v1136_v12, 0  ;;  %v4866_v58 = vadd.s32 4294967294, %v1402_v37 }
 0x10e   : > { %v6137_v19 = vmul.u32.u64.low %v6130_v55, %v1585_v47  ;;  %v6138_v48 = vmul.u32.u64.high %v6130_v55, %v1585_v47, %v6137_v19  ;;  %v4888_v24 = vadd.s32 4294967169, %v1962_v21  ;;  %v6142_v29 = vsub.s32 %v6060_v25, %v1501_v42 }
 0x10f   : > { %v6145_v5 = vmul.u32.u64.low %v6130_v55, %v1589_v45  ;;  %v6146_v50 = vmul.u32.u64.high %v6130_v55, %v1589_v45, %v6145_v5  ;;  %v1866_v6 = vsel %vm1865_vm12, %v1864_v18, 0  ;;  %v1309_v22 = vor.u32 4788187, %v1308_v26 }
 0x110   : > { %10671 = vst [vmem:[#allocation40_spill] sm:$0xff] %v6137_v19  ;;  %v1048_v36 = vshll.u32 %v10660_v30, %v6093_v52  ;;  %v6152_v12 = vshll.u32 %v10657_v2, %v6093_v52  ;;  %v6156_v47 = vshrl.u32 %v10658_v46, %v6113_v35  ;;  %v1305_v42 = vor.u32 %v1304_v40, %v1303_v11 }
 0x111   : > { %10672 = vst [vmem:[#allocation41_spill] sm:$0xff] %v6146_v50  ;;  %v1390_v25 = vadd.s32 %v5853_v23, %v5867_v49  ;;  %v6160_v45 = vand.u32 31, %v1138_v39  ;;  %v1579_v26 = vsel %vm1577_vm7, %v1567_v51, 2102212464  ;;  %vm4867_vm13 = vcmp.lt.s32.totalorder %v4866_v58, 0 }
 0x112   : > { %v1558_v18 = vshrl.u32 %v10662_v32, %v6029_v20  ;;  %v1868_v33 = vand.u32 31, %v1866_v6  ;;  %v1968_v37 = vadd.s32 1, %v4888_v24  ;;  %v6166_v21 = vor.u32 %v1049_v31, %v1048_v36 }
 0x113   : > { %10673 = vst [vmem:[#allocation42_spill] sm:$0xff] %v6160_v45  ;;  %vm10439_vm14 = vcmp.lt.s32.totalorder %v6123_v28, 4  ;;  %v6169_v54 = vshrl.u32 %v1138_v39, 5  ;;  %v1504_v11 = vsub.s32 0, %v6142_v29  ;;  %v1310_v23 = vand.u32 2147483647, %v1309_v22 }
 0x114   : > { %10674 = vst [vmem:[#allocation43_spill] sm:$0xff] %v6166_v21  ;;  %v1578_v51 = vsel %vm1574_vm8, %v1558_v18, %v6082_v57  ;;  %v1580_v20 = vsel %vm1576_vm9, %v6084_v8, %v1579_v26  ;;  %v1312_v40 = vcvt.s32.f32 %v1305_v42  ;;  %v6180_v31 = vsel %vm4867_vm13, 0, %v4866_v58  ;;  %v570_v57 = vpop.permute.xlu1 %569 }
 0x115   : > { %10675 = vst [vmem:[#allocation44_spill] sm:$0xff] %v6169_v54  ;;  %v6183_v39 = vsub.s32 32, %v6160_v45  ;;  %v6187_v24 = vshll.u32 %v10660_v30, %v6160_v45  ;;  %v1600_v5 = vadd.s32 1, %v6138_v48  ;;  %v6191_v36 = vsub.s32 32, %v1868_v33 }
 0x116   : > { %vm1969_vm15 = vcmp.gt.s32.totalorder %v1968_v37, 0  ;;  %v6196_v8 = vsel %vm10439_vm14, %v6166_v21, 920167782  ;;  %v4869_v58 = vmin.u32 %v1504_v11, %v6142_v29  ;;  %v1581_v42 = vsel %vm1575_vm11, %v1578_v51, %v1580_v20 }
 0x117   : > { %10676 = vst [vmem:[#allocation45_spill] sm:$0xff] %v6183_v39  ;;  %10677 = vst [vmem:[#allocation46_spill] sm:$0xff] %v6187_v24  ;;  %vm1599_vm0 = vc.u32 %v6146_v50, %v6137_v19  ;;  %v6203_v26 = vmul.f32 %v1312_v40, %v1310_v23  ;;  %v1406_v18 = vsub.s32 32, %v6180_v31  ;;  %v1410_v22 = vsub.s32 4294967266, %v6180_v31 }
 0x118   : > { %10678 = vst [vmem:[#allocation47_spill] sm:$0xff] %v6196_v8  ;;  %v522_v21 = vmul.f32 %v5515_v17, %v447_v9  ;;  %v523_v8 = vmul.f32 %v5656_v3, %v447_v9  ;;  %v1970_v11 = vsel %vm1969_vm15, %v1968_v37, 0  ;;  %v636_v34 = vmul.f32 %v5512_v16, %v570_v57 }
 0x119   : > { %v1597_v51 = vmul.u32 %v6130_v55, %v1581_v42  ;;  %v1601_v20 = vsel %vm1599_vm0, %v1600_v5, %v6138_v48  ;;  %v10679_v23 = vand.u32 2147483647, %v6024_v53  ;;  %v1881_v52 = vshrl.u32 %v10657_v2, %v6191_v36 }
 0x11a   : > { %v1506_v49 = vclz %v4869_v58  ;;  %v1880_v35 = vshll.u32 %v10660_v30, %v1868_v33  ;;  %v637_v9 = vmul.f32 %v5661_v4, %v570_v57  ;;  %v1872_v37 = vshrl.u32 %v10659_v13, %v6191_v36 }
 0x11b   : > { %v1861_v40 = vand.u32 8388607, %v10679_v23  ;;  %v1875_v55 = vshrl.u32 %v10661_v41, %v6191_v36  ;;  %v1884_v48 = vshrl.u32 %v10658_v46, %v6191_v36  ;;  %v1972_v5 = vand.u32 31, %v1970_v11 }
 0x11c   : > { %v6227_v42 = vadd.s32 %v1601_v20, %v1597_v51  ;;  %v6229_v23 = vshrl.u32 %v1866_v6, 5  ;;  %v1878_v58 = vshrl.u32 %v10660_v30, %v6191_v36  ;;  %v668_v38 = vadd.f32 %v636_v34, %v522_v21 }
 0x11d   : > { %v1871_v57 = vshll.u32 %v10662_v32, %v1868_v33  ;;  %v1874_v62 = vshll.u32 %v10659_v13, %v1868_v33  ;;  %v1882_v4 = vor.u32 %v1881_v52, %v1880_v35  ;;  %v1883_v61 = vshll.u32 %v10657_v2, %v1868_v33 }
 0x11e   : > { %v6236_v16 = vshrl.u32 %v1390_v25, %v1406_v18  ;;  %v6238_v3 = vadd.s32 127, %v1410_v22  ;;  %v1877_v51 = vshll.u32 %v10661_v41, %v1868_v33  ;;  %v669_v6 = vadd.f32 %v637_v9, %v523_v8 }
 0x11f   : > { %v6241_v20 = vor.u32 %v1872_v37, %v1871_v57  ;;  %v6243_v17 = vor.u32 %v1875_v55, %v1874_v62  ;;  %v1885_v21 = vor.u32 %v1884_v48, %v1883_v61  ;;  %v6245_v34 = vsub.s32 32, %v1972_v5 }
 0x120   : > { %v1862_v53 = vor.u32 8388608, %v1861_v40  ;;  %v6247_v54 = vor.u32 %v1878_v58, %v1877_v51  ;;  %vm1889_vm1 = vcmp.lt.s32.totalorder %v6229_v23, 4  ;;  %v6250_v52 = vadd.f32 %v740_v10, %v668_v38 }
 0x121   : > { %v6252_v35 = vadd.s32 4294967294, %v1506_v49  ;;  %v1603_v25 = vadd.s32 536870912, %v6227_v42  ;;  %v1895_v33 = vsel %vm1889_vm1, %v1882_v4, 920167782  ;;  %v10681_v62 = vand.u32 2147483647, %v6076_v56 }
 0x122   : > { %10680 = vst [vmem:[#allocation48_spill] sm:$0xff] %v6250_v52  ;;  %vm1886_vm2 = vcmp.lt.s32.totalorder %v6229_v23, 1  ;;  %vm1887_vm3 = vcmp.lt.s32.totalorder %v6229_v23, 2  ;;  %vm1888_vm4 = vcmp.lt.s32.totalorder %v6229_v23, 3  ;;  %v6264_v61 = vadd.f32 %v740_v10, %v669_v6 }
 0x123   : > { %v6259_v22 = vand.u32 8388607, %v10681_v62  ;;  %v1894_v38 = vsel %vm1886_vm2, %v6241_v20, %v6243_v17  ;;  %v1899_v49 = vsel %vm1889_vm1, %v1885_v21, 1326507024  ;;  %v1985_v8 = vshrl.u32 %v10657_v2, %v6245_v34 }
 0x124   : > { %10682 = vst [vmem:[#allocation49_spill] sm:$0xff] %v6264_v61  ;;  %v1988_v18 = vshrl.u32 %v10658_v46, %v6245_v34  ;;  %v1896_v40 = vsel %vm1888_vm4, %v6247_v54, %v1895_v33  ;;  %v1898_v10 = vsel %vm1886_vm2, %v6243_v17, %v6247_v54  ;;  %v1984_v9 = vshll.u32 %v10660_v30, %v1972_v5 }
 0x125   : > { %v2273_v37 = vand.u32 2139095040, %v6250_v52  ;;  %v1976_v55 = vshrl.u32 %v10659_v13, %v6245_v34  ;;  %v1979_v48 = vshrl.u32 %v10661_v41, %v6245_v34  ;;  %v1982_v58 = vshrl.u32 %v10660_v30, %v6245_v34 }
 0x126   : > { %v1987_v57 = vshll.u32 %v10657_v2, %v1972_v5  ;;  %v1900_v51 = vsel %vm1888_vm4, %v1882_v4, %v1899_v49  ;;  %v6294_v6 = vshrl.u32 %v1970_v11, 5  ;;  %v1975_v21 = vshll.u32 %v10662_v32, %v1972_v5 }
 0x127   : > { %v2274_v33 = vshrl.u32 %v2273_v37, 23  ;;  %v1978_v62 = vshll.u32 %v10659_v13, %v1972_v5  ;;  %v1981_v56 = vshll.u32 %v10661_v41, %v1972_v5  ;;  %v1986_v15 = vor.u32 %v1985_v8, %v1984_v9 }
 0x128   : > { %v1989_v1 = vor.u32 %v1988_v18, %v1987_v57  ;;  %v1897_v7 = vsel %vm1887_vm3, %v1894_v38, %v1896_v40  ;;  %v6301_v27 = vshll.u32 %v1862_v53, 8  ;;  %v1966_v24 = vor.u32 8388608, %v6259_v22 }
 0x129   : > { %v4900_v19 = vadd.s32 4294967169, %v2274_v33  ;;  %v1901_v4 = vsel %vm1887_vm3, %v1898_v10, %v1900_v51  ;;  %v1977_v11 = vor.u32 %v1976_v55, %v1975_v21  ;;  %v6306_v49 = vor.u32 %v1979_v48, %v1978_v62 }
 0x12a   : > { %v1983_v37 = vor.u32 %v1982_v58, %v1981_v56  ;;  %v6308_v50 = vshrl.u32 %v1603_v25, 30  ;;  %vm1993_vm5 = vcmp.lt.s32.totalorder %v6294_v6, 4  ;;  %v2377_v8 = vand.u32 2139095040, %v6264_v61 }
 0x12b   : > { %v2280_v5 = vadd.s32 1, %v4900_v19  ;;  %v6313_v53 = vmul.u32.u64.low %v6301_v27, %v1897_v7  ;;  %v6314_v38 = vmul.u32.u64.high %v6301_v27, %v1897_v7, %v6313_v53  ;;  %v1999_v22 = vsel %vm1993_vm5, %v1986_v15, 920167782 }
 0x12c   : > { %10683 = vst [vmem:[#allocation50_spill] sm:$0xff] %v6308_v50  ;;  %v2003_v18 = vsel %vm1993_vm5, %v1989_v1, 1326507024  ;;  %v6322_v56 = vmul.u32.u64.low %v6301_v27, %v1901_v4  ;;  %v6323_v25 = vmul.u32.u64.high %v6301_v27, %v1901_v4, %v6322_v56  ;;  %vm1990_vm6 = vcmp.lt.s32.totalorder %v6294_v6, 1 }
 0x12d   : > { %vm2281_vm7 = vcmp.gt.s32.totalorder %v2280_v5, 0  ;;  %vm1992_vm8 = vcmp.lt.s32.totalorder %v6294_v6, 3  ;;  %v1998_v7 = vsel %vm1990_vm6, %v1977_v11, %v6306_v49  ;;  %v2002_v19 = vsel %vm1990_vm6, %v6306_v49, %v1983_v37 }
 0x12e   : > { %v2282_v40 = vsel %vm2281_vm7, %v2280_v5, 0  ;;  %v2000_v1 = vsel %vm1992_vm8, %v1983_v37, %v1999_v22  ;;  %v2004_v10 = vsel %vm1992_vm8, %v1986_v15, %v2003_v18  ;;  %v2378_v55 = vshrl.u32 %v2377_v8, 23 }
 0x12f   : > { %v2284_v9 = vand.u32 31, %v2282_v40  ;;  %v10684_v48 = vor.u32 %v6156_v47, %v6152_v12  ;;  %v6346_v57 = vshll.u32 %v10657_v2, %v6160_v45  ;;  %vm4871_vm9 = vcmp.lt.s32.totalorder %v6252_v35, 0 }
 0x130   : > { %v1605_v51 = vshll.u32 %v6308_v50, 30  ;;  %v10686_v15 = vshll.u32 %v6050_v14, %v6180_v31  ;;  %v1891_v12 = vsel %vm1889_vm1, %v6247_v54, 2102212464  ;;  %vm1991_vm10 = vcmp.lt.s32.totalorder %v6294_v6, 2 }
 0x131   : > { %v6342_v58 = vsel %vm10439_vm14, %v10684_v48, 1326507024  ;;  %v1412_v47 = vshll.u32 %v6238_v3, 23  ;;  %v1870_v62 = vshrl.u32 %v10662_v32, %v6191_v36  ;;  %v2001_v4 = vsel %vm1991_vm10, %v1998_v7, %v2000_v1 }
 0x132   : > { %10685 = vst [vmem:[#allocation51_spill] sm:$0xff] %v6342_v58  ;;  %v6355_v33 = vor.u32 %v6236_v16, %v10686_v15  ;;  %v2005_v14 = vsel %vm1991_vm10, %v2002_v19, %v2004_v10  ;;  %v6369_v16 = vsel %vm4871_vm9, 0, %v6252_v35  ;;  %v6371_v31 = vshll.u32 %v1966_v24, 8 }
 0x133   : > { %v6373_v5 = vsub.s32 32, %v2284_v9  ;;  %v4904_v54 = vadd.s32 4294967169, %v2378_v55  ;;  %v6376_v8 = vsub.s32 %v6227_v42, %v1605_v51  ;;  %v1890_v3 = vsel %vm1886_vm2, %v1870_v62, %v6241_v20 }
 0x134   : > { %v1892_v36 = vsel %vm1888_vm4, %v6243_v17, %v1891_v12  ;;  %v1912_v22 = vadd.s32 1, %v6314_v38  ;;  %v6386_v35 = vmul.u32.u64.low %v6371_v31, %v2005_v14  ;;  %v6387_v24 = vmul.u32.u64.high %v6371_v31, %v2005_v14, %v6386_v35 }
 0x135   : > { %v6390_v18 = vmul.u32.u64.low %v6371_v31, %v2001_v4  ;;  %v6391_v56 = vmul.u32.u64.high %v6371_v31, %v2001_v4, %v6390_v18  ;;  %v6394_v42 = vor.u32 4788187, %v1412_v47  ;;  %v6398_v20 = vadd.s32 %v5959_v59, %v5969_v63  ;;  %v6441_v35 = vpop.permute.xlu1 %724 }
 0x136   : > { %vm1911_vm11 = vc.u32 %v6323_v25, %v6313_v53  ;;  %v1974_v17 = vshrl.u32 %v10662_v32, %v6245_v34  ;;  %v10377_v19 = vand.u32 2147483647, %v6250_v52  ;;  %v2297_v1 = vshrl.u32 %v10657_v2, %v6373_v5  ;;  %v10713_v52 = vld [vmem:[#allocation10_spill] sm:$0xff] }
 0x137   : > { %v2384_v10 = vadd.s32 1, %v4904_v54  ;;  %v1608_v55 = vsub.s32 0, %v6376_v8  ;;  %v1893_v59 = vsel %vm1887_vm3, %v1890_v3, %v1892_v36  ;;  %v1995_v63 = vsel %vm1993_vm5, %v1983_v37, 2102212464 }
 0x138   : > { %v2300_v48 = vshrl.u32 %v10658_v46, %v6373_v5  ;;  %v1913_v51 = vsel %vm1911_vm11, %v1912_v22, %v6314_v38  ;;  %v1994_v34 = vsel %vm1990_vm6, %v1974_v17, %v1977_v11  ;;  %v6418_v15 = vshrl.u32 %v2282_v40, 5 }
 0x139   : > { %v2296_v12 = vshll.u32 %v10660_v30, %v2284_v9  ;;  %v2288_v47 = vshrl.u32 %v10659_v13, %v6373_v5  ;;  %v2291_v23 = vshrl.u32 %v10661_v41, %v6373_v5  ;;  %v2294_v37 = vshrl.u32 %v10660_v30, %v6373_v5 }
 0x13a   : > { %v2299_v62 = vshll.u32 %v10657_v2, %v2284_v9  ;;  %v1996_v38 = vsel %vm1992_vm8, %v6306_v49, %v1995_v63  ;;  %v2277_v11 = vand.u32 8388607, %v10377_v19  ;;  %vm2385_vm12 = vcmp.gt.s32.totalorder %v2384_v10, 0 }
 0x13b   : > { %v2298_v40 = vor.u32 %v2297_v1, %v2296_v12  ;;  %v2287_v4 = vshll.u32 %v10662_v32, %v2284_v9  ;;  %v2290_v14 = vshll.u32 %v10659_v13, %v2284_v9  ;;  %v2293_v54 = vshll.u32 %v10661_v41, %v2284_v9 }
 0x13c   : > { %v2301_v3 = vor.u32 %v2300_v48, %v2299_v62  ;;  %v4873_v36 = vmin.u32 %v1608_v55, %v6376_v8  ;;  %v1909_v22 = vmul.u32 %v6301_v27, %v1893_v59  ;;  %vm2015_vm13 = vc.u32 %v6387_v24, %v6390_v18 }
 0x13d   : > { %v2016_v49 = vadd.s32 1, %v6391_v56  ;;  %v6443_v17 = vor.u32 %v2288_v47, %v2287_v4  ;;  %v6445_v1 = vor.u32 %v2291_v23, %v2290_v14  ;;  %v2295_v63 = vor.u32 %v2294_v37, %v2293_v54 }
 0x13e   : > { %vm2305_vm15 = vcmp.lt.s32.totalorder %v6418_v15, 4  ;;  %v6448_v9 = vadd.s32 %v1913_v51, %v1909_v22  ;;  %v1997_v55 = vsel %vm1991_vm10, %v1994_v34, %v1996_v38  ;;  %v2386_v59 = vsel %vm2385_vm12, %v2384_v10, 0 }
 0x13f   : > { %v2311_v27 = vsel %vm2305_vm15, %v2298_v40, 920167782  ;;  %v2278_v48 = vor.u32 8388608, %v2277_v11  ;;  %v2315_v12 = vsel %vm2305_vm15, %v2301_v3, 1326507024  ;;  %v6460_v23 = vadd.f32 %v6441_v35, %v5714_v43 }
 0x140   : > { %v10376_v47 = vand.u32 2147483647, %v6264_v61  ;;  %v2017_v51 = vsel %vm2015_vm13, %v2016_v49, %v6391_v56  ;;  %vm2302_vm0 = vcmp.lt.s32.totalorder %v6418_v15, 1  ;;  %vm2304_vm1 = vcmp.lt.s32.totalorder %v6418_v15, 3 }
 0x141   : > { %10687 = vst [vmem:[#allocation52_spill] sm:$0xff] %v6460_v23  ;;  %v2388_v6 = vand.u32 31, %v2386_v59  ;;  %v1610_v34 = vclz %v4873_v36  ;;  %v2013_v10 = vmul.u32 %v6371_v31, %v1997_v55  ;;  %v2310_v37 = vsel %vm2302_vm0, %v6443_v17, %v6445_v1 }
 0x142   : > { %v2312_v62 = vsel %vm2304_vm1, %v2295_v63, %v2311_v27  ;;  %v1915_v43 = vadd.s32 536870912, %v6448_v9  ;;  %v2314_v56 = vsel %vm2302_vm0, %v6445_v1, %v2295_v63  ;;  %v2316_v38 = vsel %vm2304_vm1, %v2298_v40, %v2315_v12 }
 0x143   : > { %v6478_v11 = vsub.s32 32, %v2388_v6  ;;  %v6480_v31 = vadd.s32 %v2017_v51, %v2013_v10  ;;  %vm2303_vm2 = vcmp.lt.s32.totalorder %v6418_v15, 2  ;;  %v6483_v4 = vshll.u32 %v2278_v48, 8 }
 0x144   : > { %v2381_v14 = vand.u32 8388607, %v10376_v47  ;;  %v2313_v54 = vsel %vm2303_vm2, %v2310_v37, %v2312_v62  ;;  %v1649_v36 = vand.u32 2139095040, %v6460_v23  ;;  %v2317_v22 = vsel %vm2303_vm2, %v2314_v56, %v2316_v38 }
 0x145   : > { %v2392_v3 = vshrl.u32 %v10659_v13, %v6478_v11  ;;  %v2395_v40 = vshrl.u32 %v10661_v41, %v6478_v11  ;;  %v6496_v49 = vshrl.u32 %v2386_v59, 5  ;;  %v2391_v55 = vshll.u32 %v10662_v32, %v2388_v6 }
 0x146   : > { %v2398_v27 = vshrl.u32 %v10660_v30, %v6478_v11  ;;  %v2394_v48 = vshll.u32 %v10659_v13, %v2388_v6  ;;  %v2397_v12 = vshll.u32 %v10661_v41, %v2388_v6  ;;  %v2400_v51 = vshll.u32 %v10660_v30, %v2388_v6 }
 0x147   : > { %v2401_v10 = vshrl.u32 %v10657_v2, %v6478_v11  ;;  %v6507_v37 = vmul.u32.u64.low %v6483_v4, %v2313_v54  ;;  %v6508_v62 = vmul.u32.u64.high %v6483_v4, %v2313_v54, %v6507_v37  ;;  %v2403_v59 = vshll.u32 %v10657_v2, %v2388_v6 }
 0x148   : > { %v2404_v56 = vshrl.u32 %v10658_v46, %v6478_v11  ;;  %v6514_v38 = vor.u32 %v2392_v3, %v2391_v55  ;;  %v6516_v47 = vor.u32 %v2395_v40, %v2394_v48  ;;  %v2399_v19 = vor.u32 %v2398_v27, %v2397_v12 }
 0x149   : > { %v2402_v21 = vor.u32 %v2401_v10, %v2400_v51  ;;  %v6519_v7 = vmul.u32.u64.low %v6483_v4, %v2317_v22  ;;  %v6520_v50 = vmul.u32.u64.high %v6483_v4, %v2317_v22, %v6519_v7  ;;  %vm2409_vm3 = vcmp.lt.s32.totalorder %v6496_v49, 4 }
 0x14a   : > { %v2405_v58 = vor.u32 %v2404_v56, %v2403_v59  ;;  %v4874_v54 = vadd.s32 4294967294, %v1610_v34  ;;  %v6523_v28 = vshrl.u32 %v1915_v43, 30  ;;  %v2019_v6 = vadd.s32 536870912, %v6480_v31 }
 0x14b   : > { %v2415_v3 = vsel %vm2409_vm3, %v2402_v21, 920167782  ;;  %v2382_v55 = vor.u32 8388608, %v2381_v14  ;;  %vm2406_vm4 = vcmp.lt.s32.totalorder %v6496_v49, 1  ;;  %vm2408_vm5 = vcmp.lt.s32.totalorder %v6496_v49, 3 }
 0x14c   : > { %10688 = vst [vmem:[#allocation53_spill] sm:$0xff] %v6523_v28  ;;  %v1650_v40 = vshrl.u32 %v1649_v36, 23  ;;  %v2307_v7 = vsel %vm2305_vm15, %v2295_v63, 2102212464  ;;  %v2414_v34 = vsel %vm2406_vm4, %v6514_v38, %v6516_v47  ;;  %v2416_v43 = vsel %vm2408_vm5, %v2399_v19, %v2415_v3 }
 0x14d   : > { %v2419_v22 = vsel %vm2409_vm3, %v2405_v58, 1326507024  ;;  %v1510_v14 = vsub.s32 32, %v6369_v16  ;;  %v2286_v27 = vshrl.u32 %v10662_v32, %v6373_v5  ;;  %v2418_v63 = vsel %vm2406_vm4, %v6516_v47, %v2399_v19 }
 0x14e   : > { %v2420_v36 = vsel %vm2408_vm5, %v2402_v21, %v2419_v22  ;;  %vm10436_vm6 = vcmp.lt.s32.totalorder %v5728_v60, 0  ;;  %vm4875_vm7 = vcmp.lt.s32.totalorder %v4874_v54, 0  ;;  %v1917_v48 = vshll.u32 %v6523_v28, 30 }
 0x14f   : > { %v6550_v12 = vshrl.u32 %v2019_v6, 30  ;;  %vm2407_vm8 = vcmp.lt.s32.totalorder %v6496_v49, 2  ;;  %v2306_v58 = vsel %vm2302_vm0, %v2286_v27, %v6443_v17  ;;  %v2308_v5 = vsel %vm2304_vm1, %v6445_v1, %v2307_v7 }
 0x150   : > { %v2417_v21 = vsel %vm2407_vm8, %v2414_v34, %v2416_v43  ;;  %v4876_v51 = vadd.s32 4294967169, %v1650_v40  ;;  %v10690_v10 = vsub.s32 4294967266, %v6369_v16  ;;  %v2328_v56 = vadd.s32 1, %v6508_v62 }
 0x151   : > { %10689 = vst [vmem:[#allocation54_spill] sm:$0xff] %v6550_v12  ;;  %v2421_v6 = vsel %vm2407_vm8, %v2418_v63, %v2420_v36  ;;  %v6566_v3 = vshll.u32 %v2382_v55, 8  ;;  %v6568_v22 = vsel %vm4875_vm7, 0, %v4874_v54  ;;  %vm2327_vm9 = vc.u32 %v6520_v50, %v6507_v37 }
 0x152   : > { %v1515_v59 = vadd.s32 127, %v10690_v10  ;;  %v6574_v17 = vadd.f32 %v6441_v35, %v5716_v44  ;;  %v1656_v1 = vadd.s32 1, %v4876_v51  ;;  %v6577_v40 = vsub.s32 %v6448_v9, %v1917_v48 }
 0x153   : > { %v2309_v7 = vsel %vm2303_vm2, %v2306_v58, %v2308_v5  ;;  %v6582_v34 = vmul.u32.u64.low %v6566_v3, %v2417_v21  ;;  %v6583_v55 = vmul.u32.u64.high %v6566_v3, %v2417_v21, %v6582_v34  ;;  %v2021_v54 = vshll.u32 %v6550_v12, 30 }
 0x154   : > { %10691 = vst [vmem:[#allocation55_spill] sm:$0xff] %v6574_v17  ;;  %v6588_v43 = vmul.u32.u64.low %v6566_v3, %v2421_v6  ;;  %v6589_v27 = vmul.u32.u64.high %v6566_v3, %v2421_v6, %v6588_v43  ;;  %vm1657_vm10 = vcmp.gt.s32.totalorder %v1656_v1, 0  ;;  %v10692_v44 = vand.u32 2147483647, %v5728_v60 }
 0x155   : > { %v10693_v35 = vmov 0  ;;  %v1414_v15 = vand.u32 2147483647, %v6394_v42  ;;  %v1153_v9 = vshrl.u32 %v10657_v2, %v6183_v39  ;;  %v1516_v63 = vshll.u32 %v1515_v59, 23 }
 0x156   : > { %vm6593_vm11 = vcmp.le.f32.partialorder %v10692_v44, 0.7853982  ;;  %v2329_v36 = vsel %vm2327_vm9, %v2328_v56, %v6508_v62  ;;  %v1416_v48 = vcvt.s32.f32 %v6355_v33  ;;  %v1512_v58 = vshrl.u32 %v6398_v20, %v1510_v14 }
 0x157   : > { %v10694_v35 = vsel %vm6593_vm11, 4294967295, %v10693_v35  ;;  %v2325_v5 = vmul.u32 %v6483_v4, %v2309_v7  ;;  %v1753_v21 = vand.u32 2139095040, %v6574_v17  ;;  %v1618_v51 = vsub.s32 4294967266, %v6568_v22 }
 0x158   : > { %10695 = vst [vmem:[#allocation56_spill] sm:$0xff] %v10694_v35  ;;  %v1920_v10 = vsub.s32 0, %v6577_v40  ;;  %v2411_v42 = vsel %vm2409_vm3, %v2399_v19, 2102212464  ;;  %v1658_v6 = vsel %vm1657_vm10, %v1656_v1, 0  ;;  %v10696_v59 = vxor.u32 2147483648, %v6203_v26 }
 0x159   : > { %vm10438_vm12 = vcmp.lt.s32.totalorder %v5737_v0, 0  ;;  %v6616_v20 = vsub.s32 %v6480_v31, %v2021_v54  ;;  %v6618_v4 = vadd.s32 %v2329_v36, %v2325_v5  ;;  %v2390_v62 = vshrl.u32 %v10662_v32, %v6478_v11 }
 0x15a   : > { %v1315_v33 = vsel %vm10436_vm6, %v10696_v59, %v6203_v26  ;;  %v1417_v14 = vmul.f32 %v1416_v48, %v1414_v15  ;;  %v1511_v19 = vshll.u32 %v6142_v29, %v6369_v16  ;;  %v1517_v56 = vor.u32 4788187, %v1516_v63  ;;  %v10697_v29 = vld [vmem:[#allocation41_spill] sm:$0xff]  ;;  %v10698_v16 = vld [vmem:[#allocation40_spill] sm:$0xff] }
 0x15b   : > { %v1614_v1 = vsub.s32 32, %v6568_v22  ;;  %v2410_v26 = vsel %vm2406_vm4, %v2390_v62, %v6514_v38  ;;  %v2412_v31 = vsel %vm2408_vm5, %v6516_v47, %v2411_v42  ;;  %v1660_v7 = vand.u32 31, %v1658_v6 }
 0x15c   : > { %v1754_v54 = vshrl.u32 %v1753_v21, 23  ;;  %v1513_v43 = vor.u32 %v1512_v58, %v1511_v19  ;;  %v1619_v44 = vadd.s32 127, %v1618_v51  ;;  %v4885_v11 = vmin.u32 %v1920_v10, %v6577_v40 }
 0x15d   : > { %v2432_v15 = vadd.s32 1, %v6583_v55  ;;  %v1598_v63 = vadd.s32 %v10698_v16, %v10697_v29  ;;  %v2024_v36 = vsub.s32 0, %v6616_v20  ;;  %v2331_v48 = vadd.s32 536870912, %v6618_v4 }
 0x15e   : > { %vm2431_vm13 = vc.u32 %v6589_v27, %v6582_v34  ;;  %v1418_v38 = vxor.u32 2147483648, %v1417_v14  ;;  %v6641_v47 = vshrl.u32 %v10658_v46, %v6183_v39  ;;  %v1518_v58 = vand.u32 2147483647, %v1517_v56 }
 0x15f   : > { %v2413_v5 = vsel %vm2407_vm8, %v2410_v26, %v2412_v31  ;;  %v6648_v21 = vsel %vm6593_vm11, %v5728_v60, %v1315_v33  ;;  %v1616_v51 = vshrl.u32 %v1598_v63, %v1614_v1  ;;  %v6650_v10 = vsub.s32 32, %v1660_v7  ;;  %v10700_v1 = vld [vmem:[#allocation46_spill] sm:$0xff] }
 0x160   : > { %v4880_v42 = vadd.s32 4294967169, %v1754_v54  ;;  %v1520_v59 = vcvt.s32.f32 %v1513_v43  ;;  %v1620_v62 = vshll.u32 %v1619_v44, 23  ;;  %v1922_v19 = vclz %v4885_v11 }
 0x161   : > { %v2433_v29 = vsel %vm2431_vm13, %v2432_v15, %v6583_v55  ;;  %v1615_v56 = vshll.u32 %v6376_v8, %v6568_v22  ;;  %v4889_v49 = vmin.u32 %v2024_v36, %v6616_v20  ;;  %v6656_v26 = vshrl.u32 %v2331_v48, 30 }
 0x162   : > { %v2429_v31 = vmul.u32 %v6566_v3, %v2413_v5  ;;  %5238 = vcosq.f32 %v6648_v21  ;;  %v6662_v33 = vsel %vm10438_vm12, %v1418_v38, %v1417_v14  ;;  %v6665_v54 = vor.u32 %v1153_v9, %v10700_v1 }
 0x163   : > { %10699 = vst [vmem:[#allocation41_spill] sm:$0xff] %v6656_v26  ;;  %v6667_v43 = vmul.f32 %v1520_v59, %v1518_v58  ;;  %v1617_v55 = vor.u32 %v1616_v51, %v1615_v56  ;;  %v1673_v8 = vshrl.u32 %v10657_v2, %v6650_v10  ;;  %v1760_v22 = vadd.s32 1, %v4880_v42  ;;  %v6691_v56 = vpop.permute.xlu1 %451 }
 0x164   : > { %10701 = vst [vmem:[#allocation40_spill] sm:$0xff] %v6665_v54  ;;  %v6669_v44 = vadd.s32 %v2433_v29, %v2429_v31  ;;  %v1621_v11 = vor.u32 4788187, %v1620_v62  ;;  %v4886_v3 = vadd.s32 4294967294, %v1922_v19  ;;  %v1676_v14 = vshrl.u32 %v10658_v46, %v6650_v10  ;;  %10702 = vst [vmem:[#allocation46_spill] sm:$0xff] %v6691_v56 }
 0x165   : > { %v2026_v16 = vclz %v4889_v49  ;;  %v2333_v9 = vshll.u32 %v6656_v26, 30  ;;  %v6677_v63 = vshrl.u32 %v1658_v6, 5  ;;  %v1672_v36 = vshll.u32 %v10660_v30, %v1660_v7 }
 0x166   : > { %v1664_v48 = vshrl.u32 %v10659_v13, %v6650_v10  ;;  %v1667_v38 = vshrl.u32 %v10661_v41, %v6650_v10  ;;  %v1670_v58 = vshrl.u32 %v10660_v30, %v6650_v10  ;;  %v1675_v5 = vshll.u32 %v10657_v2, %v1660_v7 }
 0x167   : > { %v2435_v51 = vadd.s32 536870912, %v6669_v44  ;;  %v1663_v42 = vshll.u32 %v10662_v32, %v1660_v7  ;;  %v1674_v59 = vor.u32 %v1673_v8, %v1672_v36  ;;  %vm1761_vm15 = vcmp.gt.s32.totalorder %v1760_v22, 0 }
 0x168   : > { %v1666_v6 = vshll.u32 %v10659_v13, %v1660_v7  ;;  %v1669_v62 = vshll.u32 %v10661_v41, %v1660_v7  ;;  %v1677_v19 = vor.u32 %v1676_v14, %v1675_v5  ;;  %v1762_v29 = vsel %vm1761_vm15, %v1760_v22, 0 }
 0x169   : > { %vm4887_vm0 = vcmp.lt.s32.totalorder %v4886_v3, 0  ;;  %v4890_v49 = vadd.s32 4294967294, %v2026_v16  ;;  %v6694_v31 = vsub.s32 %v6618_v4, %v2333_v9  ;;  %v1764_v1 = vand.u32 31, %v1762_v29 }
 0x16a   : > { %v6696_v15 = vor.u32 %v1664_v48, %v1663_v42  ;;  %v6698_v26 = vor.u32 %v1667_v38, %v1666_v6  ;;  %v6700_v8 = vor.u32 %v1670_v58, %v1669_v62  ;;  %vm1681_vm1 = vcmp.lt.s32.totalorder %v6677_v63, 4  ;;  %v6730_v42 = vpop.permute.xlu1 %456 }
 0x16b   : > { %v1622_v14 = vand.u32 2147483647, %v1621_v11  ;;  %v1624_v22 = vcvt.s32.f32 %v1617_v55  ;;  %v1687_v36 = vsel %vm1681_vm1, %v1674_v59, 920167782  ;;  %v6708_v4 = vsel %vm4887_vm0, 0, %v4886_v3 }
 0x16c   : > { %v6706_v16 = vpop.eup %5238  ;;  %v6710_v9 = vshrl.u32 %v2435_v51, 30  ;;  %v10705_v48 = vand.u32 2147483647, %v6460_v23  ;;  %v1691_v58 = vsel %vm1681_vm1, %v1677_v19, 1326507024  ;;  %v2336_v5 = vsub.s32 0, %v6694_v31 }
 0x16d   : > { %10703 = vst [vmem:[#allocation57_spill] sm:$0xff] %v6706_v16  ;;  %vm1678_vm2 = vcmp.lt.s32.totalorder %v6677_v63, 1  ;;  %vm1680_vm3 = vcmp.lt.s32.totalorder %v6677_v63, 3  ;;  %v6719_v55 = vsub.s32 32, %v1764_v1  ;;  %v1910_v11 = vadd.s32 %v6313_v53, %v6323_v25 }
 0x16e   : > { %10704 = vst [vmem:[#allocation58_spill] sm:$0xff] %v6710_v9  ;;  %v1653_v38 = vand.u32 8388607, %v10705_v48  ;;  %vm4891_vm4 = vcmp.lt.s32.totalorder %v4890_v49, 0  ;;  %v1686_v3 = vsel %vm1678_vm2, %v6696_v15, %v6698_v26  ;;  %v1688_v51 = vsel %vm1680_vm3, %v6700_v8, %v1687_v36  ;;  %v6772_v16 = vpop.permute.xlu1 %577 }
 0x16f   : > { %v6732_v6 = vmul.f32 %v1624_v22, %v1622_v14  ;;  %v1930_v62 = vsub.s32 4294967266, %v6708_v4  ;;  %v1690_v53 = vsel %vm1678_vm2, %v6698_v26, %v6700_v8  ;;  %v1692_v25 = vsel %vm1680_vm3, %v1674_v59, %v1691_v58 }
 0x170   : > { %v2437_v19 = vshll.u32 %v6710_v9, 30  ;;  %v1654_v48 = vor.u32 8388608, %v1653_v38  ;;  %vm1679_vm5 = vcmp.lt.s32.totalorder %v6677_v63, 2  ;;  %v6744_v7 = vsel %vm4891_vm4, 0, %v4890_v49 }
 0x171   : > { %v4901_v14 = vmin.u32 %v2336_v5, %v6694_v31  ;;  %v1689_v22 = vsel %vm1679_vm5, %v1686_v3, %v1688_v51  ;;  %v1777_v28 = vshrl.u32 %v10657_v2, %v6719_v55  ;;  %v1693_v59 = vsel %vm1679_vm5, %v1690_v53, %v1692_v25 }
 0x172   : > { %v6753_v58 = vshrl.u32 %v1762_v29, 5  ;;  %v1776_v38 = vshll.u32 %v10660_v30, %v1764_v1  ;;  %v1780_v36 = vshrl.u32 %v10658_v46, %v6719_v55  ;;  %v1768_v49 = vshrl.u32 %v10659_v13, %v6719_v55 }
 0x173   : > { %v1771_v5 = vshrl.u32 %v10661_v41, %v6719_v55  ;;  %v1774_v3 = vshrl.u32 %v10660_v30, %v6719_v55  ;;  %v1779_v51 = vshll.u32 %v10657_v2, %v1764_v1  ;;  %v6766_v53 = vsub.s32 %v6669_v44, %v2437_v19 }
 0x174   : > { %v6768_v29 = vshll.u32 %v1654_v48, 8  ;;  %v10706_v25 = vand.u32 2147483647, %v6574_v17  ;;  %v1778_v12 = vor.u32 %v1777_v28, %v1776_v38  ;;  %v1767_v35 = vshll.u32 %v10662_v32, %v1764_v1 }
 0x175   : > { %v1770_v60 = vshll.u32 %v10659_v13, %v1764_v1  ;;  %v1773_v45 = vshll.u32 %v10661_v41, %v1764_v1  ;;  %v1781_v39 = vor.u32 %v1780_v36, %v1779_v51  ;;  %vm1785_vm7 = vcmp.lt.s32.totalorder %v6753_v58, 4 }
 0x176   : > { %v1757_v9 = vand.u32 8388607, %v10706_v25  ;;  %v6778_v23 = vmul.u32.u64.low %v6768_v29, %v1693_v59  ;;  %v6779_v61 = vmul.u32.u64.high %v6768_v29, %v1693_v59, %v6778_v23  ;;  %v6786_v48 = vor.u32 %v1768_v49, %v1767_v35 }
 0x177   : > { %v6782_v44 = vmul.u32.u64.low %v6768_v29, %v1689_v22  ;;  %v6783_v19 = vmul.u32.u64.high %v6768_v29, %v1689_v22, %v6782_v44  ;;  %v6788_v28 = vor.u32 %v1771_v5, %v1770_v60  ;;  %v1775_v38 = vor.u32 %v1774_v3, %v1773_v45 }
 0x178   : > { %v1926_v25 = vsub.s32 32, %v6708_v4  ;;  %v1927_v1 = vshll.u32 %v6577_v40, %v6708_v4  ;;  %v1931_v36 = vadd.s32 127, %v1930_v62  ;;  %v1791_v23 = vsel %vm1785_vm7, %v1778_v12, 920167782  ;;  %v6806_v40 = vpop.permute.xlu1 %734  ;;  %v10711_v62 = vld [vmem:[#allocation27_spill] sm:$0xff] }
 0x179   : > { %v2034_v22 = vsub.s32 4294967266, %v6744_v7  ;;  %v2338_v59 = vclz %v4901_v14  ;;  %v1758_v51 = vor.u32 8388608, %v1757_v9  ;;  %v1795_v60 = vsel %vm1785_vm7, %v1781_v39, 1326507024  ;;  %v10712_v14 = vld [vmem:[#allocation14_spill] sm:$0xff] }
 0x17a   : > { %v1662_v45 = vshrl.u32 %v10662_v32, %v6650_v10  ;;  %v1683_v35 = vsel %vm1681_vm1, %v6700_v8, 2102212464  ;;  %vm1782_vm8 = vcmp.lt.s32.totalorder %v6753_v58, 1  ;;  %vm1784_vm9 = vcmp.lt.s32.totalorder %v6753_v58, 3 }
 0x17b   : > { %v10707_v4 = vand.u32 2147483647, %v5737_v0  ;;  %v10708_v9 = vmov 0  ;;  %v2440_v39 = vsub.s32 0, %v6766_v53  ;;  %v1790_v10 = vsel %vm1782_vm8, %v6786_v48, %v6788_v28 }
 0x17c   : > { %v1792_v8 = vsel %vm1784_vm9, %v1775_v38, %v1791_v23  ;;  %v666_v49 = vadd.f32 %v10712_v14, %v10711_v62  ;;  %v1928_v5 = vshrl.u32 %v1910_v11, %v1926_v25  ;;  %v1932_v3 = vshll.u32 %v1931_v36, 23 }
 0x17d   : > { %vm6810_vm10 = vcmp.le.f32.partialorder %v10707_v4, 0.7853982  ;;  %v1794_v4 = vsel %vm1782_vm8, %v6788_v28, %v1775_v38  ;;  %v1796_v17 = vsel %vm1784_vm9, %v1778_v12, %v1795_v60  ;;  %vm10435_vm13 = vcmp.lt.s32.totalorder %v10713_v52, 0 }
 0x17e   : > { %v10709_v9 = vsel %vm6810_vm10, 4294967295, %v10708_v9  ;;  %v1682_v56 = vsel %vm1678_vm2, %v1662_v45, %v6696_v15  ;;  %v1684_v23 = vsel %vm1680_vm3, %v6698_v26, %v1683_v35  ;;  %vm1783_vm15 = vcmp.lt.s32.totalorder %v6753_v58, 2 }
 0x17f   : > { %10710 = vst [vmem:[#allocation59_spill] sm:$0xff] %v10709_v9  ;;  %v6837_v11 = vadd.f32 %v6806_v40, %v666_v49  ;;  %v2035_v25 = vadd.s32 127, %v2034_v22  ;;  %v4902_v36 = vadd.s32 4294967294, %v2338_v59  ;;  %v1704_v62 = vadd.s32 1, %v6783_v19 }
 0x180   : > { %v1793_v12 = vsel %vm1783_vm15, %v1790_v10, %v1792_v8  ;;  %v4905_v60 = vmin.u32 %v2440_v39, %v6766_v53  ;;  %vm1703_vm0 = vc.u32 %v6779_v61, %v6782_v44  ;;  %v1797_v26 = vsel %vm1783_vm15, %v1794_v4, %v1796_v17  ;;  %v10719_v8 = vld [vmem:[#allocation11_spill] sm:$0xff] }
 0x181   : > { %10714 = vst [vmem:[#allocation27_spill] sm:$0xff] %v6837_v11  ;;  %v6847_v15 = vshll.u32 %v1758_v51, 8  ;;  %v10715_v45 = vand.u32 2147483647, %v10713_v52  ;;  %v10716_v22 = vmov 0  ;;  %v2014_v59 = vadd.s32 %v6390_v18, %v6387_v24 }
 0x182   : > { %v2030_v35 = vsub.s32 32, %v6744_v7  ;;  %v1685_v39 = vsel %vm1679_vm5, %v1682_v56, %v1684_v23  ;;  %v2065_v10 = vand.u32 2139095040, %v6837_v11  ;;  %vm10437_vm2 = vcmp.lt.s32.totalorder %v10719_v8, 0 }
 0x183   : > { %vm6851_vm1 = vcmp.le.f32.partialorder %v10715_v45, 0.7853982  ;;  %v1929_v17 = vor.u32 %v1928_v5, %v1927_v1  ;;  %v1933_v51 = vor.u32 4788187, %v1932_v3  ;;  %vm4903_vm3 = vcmp.lt.s32.totalorder %v4902_v36, 0 }
 0x184   : > { %v10717_v22 = vsel %vm6851_vm1, 4294967295, %v10716_v22  ;;  %v6863_v14 = vmul.u32.u64.low %v6847_v15, %v1793_v12  ;;  %v6864_v49 = vmul.u32.u64.high %v6847_v15, %v1793_v12, %v6863_v14  ;;  %v1705_v4 = vsel %vm1703_vm0, %v1704_v62, %v6783_v19 }
 0x185   : > { %10718 = vst [vmem:[#allocation14_spill] sm:$0xff] %v10717_v22  ;;  %v6869_v24 = vmul.u32.u64.low %v6847_v15, %v1797_v26  ;;  %v6870_v18 = vmul.u32.u64.high %v6847_v15, %v1797_v26, %v6869_v24  ;;  %v2036_v63 = vshll.u32 %v2035_v25, 23  ;;  %v2442_v56 = vclz %v4905_v60 }
 0x186   : > { %v1701_v23 = vmul.u32 %v6768_v29, %v1685_v39  ;;  %v2066_v45 = vshrl.u32 %v2065_v10, 23  ;;  %5240 = vsinq.f32 %v6648_v21  ;;  %v1422_v1 = vsel %vm6810_vm10, %v5737_v0, %v6662_v33 }
 0x187   : > { %v10720_v19 = vand.u32 2147483647, %v10719_v8  ;;  %v10721_v3 = vmov 0  ;;  %v2032_v25 = vshrl.u32 %v2014_v59, %v2030_v35  ;;  %v6886_v62 = vsel %vm4903_vm3, 0, %v4902_v36 }
 0x188   : > { %v6888_v29 = vadd.s32 %v1705_v4, %v1701_v23  ;;  %v1787_v21 = vsel %vm1785_vm7, %v1775_v38, 2102212464  ;;  %v4892_v12 = vadd.s32 4294967169, %v2066_v45  ;;  %v10724_v33 = vxor.u32 2147483648, %v6667_v43  ;;  %v10725_v23 = vld [vmem:[#allocation44_spill] sm:$0xff] }
 0x189   : > { %vm6882_vm4 = vcmp.le.f32.partialorder %v10720_v19, 0.7853982  ;;  %v1626_v26 = vxor.u32 2147483648, %v6732_v6  ;;  %v1934_v39 = vand.u32 2147483647, %v1933_v51  ;;  %v1766_v59 = vshrl.u32 %v10662_v32, %v6719_v55 }
 0x18a   : > { %v10722_v3 = vsel %vm6882_vm4, 4294967295, %v10721_v3  ;;  %v1523_v60 = vsel %vm10435_vm13, %v10724_v33, %v6667_v43  ;;  %v1936_v36 = vcvt.s32.f32 %v1929_v17  ;;  %v2031_v35 = vshll.u32 %v6616_v20, %v6744_v7 }
 0x18b   : > { %10723 = vst [vmem:[#allocation60_spill] sm:$0xff] %v10722_v3  ;;  %v2037_v10 = vor.u32 4788187, %v2036_v63  ;;  %v4906_v4 = vadd.s32 4294967294, %v2442_v56  ;;  %v2346_v38 = vsub.s32 4294967266, %v6886_v62  ;;  %v1786_v24 = vsel %vm1782_vm8, %v1766_v59, %v6786_v48 }
 0x18c   : > { %v1788_v43 = vsel %vm1784_vm9, %v6788_v28, %v1787_v21  ;;  %v2072_v51 = vadd.s32 1, %v4892_v12  ;;  %vm10463_vm5 = vcmp.lt.s32.totalorder %v10725_v23, 4  ;;  %v1526_v55 = vsel %vm6851_vm1, %v10713_v52, %v1523_v60 }
 0x18d   : > { %v2033_v20 = vor.u32 %v2032_v25, %v2031_v35  ;;  %v1707_v7 = vadd.s32 536870912, %v6888_v29  ;;  %v1808_v17 = vadd.s32 1, %v6864_v49  ;;  %5242 = vcosq.f32 %v1422_v1 }
 0x18e   : > { %v1627_v48 = vsel %vm10437_vm2, %v1626_v26, %v6732_v6  ;;  %v1937_v63 = vmul.f32 %v1936_v36, %v1934_v39  ;;  %vm1807_vm7 = vc.u32 %v6870_v18, %v6863_v14  ;;  %5244 = vsinq.f32 %v1422_v1  ;;  %v10728_v39 = vld [vmem:[#allocation26_spill] sm:$0xff] }
 0x18f   : > { %v2038_v28 = vand.u32 2147483647, %v2037_v10  ;;  %vm4907_vm8 = vcmp.lt.s32.totalorder %v4906_v4, 0  ;;  %v1789_v56 = vsel %vm1783_vm15, %v1786_v24, %v1788_v43  ;;  %5246 = vcosq.f32 %v1526_v55 }
 0x190   : > { %v2342_v45 = vsub.s32 32, %v6886_v62  ;;  %v2347_v19 = vadd.s32 127, %v2346_v38  ;;  %vm2073_vm9 = vcmp.gt.s32.totalorder %v2072_v51, 0  ;;  %v1630_v25 = vsel %vm6882_vm4, %v10719_v8, %v1627_v48  ;;  %v6929_v1 = vpop.eup %5240 }
 0x191   : > { %v2040_v6 = vcvt.s32.f32 %v2033_v20  ;;  %v6926_v21 = vshrl.u32 %v1707_v7, 30  ;;  %v1809_v12 = vsel %vm1807_vm7, %v1808_v17, %v6864_v49  ;;  %10727 = vst [vmem:[#allocation61_spill] sm:$0xff] %v6929_v1  ;;  %v1938_v33 = vxor.u32 2147483648, %v1937_v63  ;;  %v10730_v20 = vld [vmem:[#allocation3_spill] sm:$0xff] }
 0x192   : > { %v2326_v58 = vadd.s32 %v6507_v37, %v6520_v50  ;;  %v6933_v60 = vsel %vm4907_vm8, 0, %v4906_v4  ;;  %v1805_v26 = vmul.u32 %v6847_v15, %v1789_v56  ;;  %5248 = vsinq.f32 %v1526_v55 }
 0x193   : > { %10726 = vst [vmem:[#allocation44_spill] sm:$0xff] %v6926_v21  ;;  %vm10434_vm15 = vcmp.lt.s32.totalorder %v10728_v39, 0  ;;  %v6937_v59 = vmul.f32 %v2040_v6, %v2038_v28  ;;  %v2074_v36 = vsel %vm2073_vm9, %v2072_v51, 0  ;;  %5250 = vcosq.f32 %v1630_v25 }
 0x194   : > { %v2344_v35 = vshrl.u32 %v2326_v58, %v2342_v45  ;;  %v2348_v10 = vshll.u32 %v2347_v19, 23  ;;  %v6939_v49 = vadd.s32 %v1809_v12, %v1805_v26  ;;  %v2446_v38 = vsub.s32 32, %v6933_v60  ;;  %v10737_v58 = vld [vmem:[#allocation15_spill] sm:$0xff] }
 0x195   : > { %v2450_v24 = vsub.s32 4294967266, %v6933_v60  ;;  %v1709_v50 = vshll.u32 %v6926_v21, 30  ;;  %v2076_v37 = vand.u32 31, %v2074_v36  ;;  %v6947_v15 = vsel %vm10463_vm5, %v6665_v54, 920167782 }
 0x196   : > { %10729 = vst [vmem:[#allocation62_spill] sm:$0xff] %v6947_v15  ;;  %5252 = vsinq.f32 %v1630_v25  ;;  %v6951_v4 = vsel %vm10434_vm15, %v1938_v33, %v1937_v63  ;;  %v2343_v43 = vshll.u32 %v6694_v31, %v6886_v62  ;;  %v2430_v55 = vadd.s32 %v6582_v34, %v6589_v27  ;;  %v10732_v31 = vld [vmem:[#allocation4_spill] sm:$0xff]  ;;  %v10734_v25 = vld [vmem:[#allocation2_spill] sm:$0xff] }
 0x197   : > { %v526_v7 = vmul.f32 %v10730_v20, %v6730_v42  ;;  %v6960_v17 = vsub.s32 32, %v2076_v37  ;;  %v6962_v48 = vpop.eup %5242  ;;  %v6966_v56 = vor.u32 4788187, %v2348_v10  ;;  %v1811_v63 = vadd.s32 536870912, %v6939_v49  ;;  %v10736_v33 = vld [vmem:[#allocation30_spill] sm:$0xff] }
 0x198   : > { %10731 = vst [vmem:[#allocation3_spill] sm:$0xff] %v6962_v48  ;;  %v6964_v28 = vor.u32 %v2344_v35, %v2343_v43  ;;  %v6971_v62 = vmul.f32 %v10732_v31, %v6730_v42  ;;  %v6973_v45 = vpop.eup %5244  ;;  %v2448_v34 = vshrl.u32 %v2430_v55, %v2446_v38  ;;  %v2451_v27 = vadd.s32 127, %v2450_v24 }
 0x199   : > { %10733 = vst [vmem:[#allocation4_spill] sm:$0xff] %v6973_v45  ;;  %v6976_v19 = vsub.s32 %v6888_v29, %v1709_v50  ;;  %v640_v6 = vmul.f32 %v10734_v25, %v6772_v16  ;;  %v6980_v12 = vpop.eup %5246  ;;  %v667_v26 = vadd.f32 %v10737_v58, %v10736_v33  ;;  %v6985_v10 = vshrl.u32 %v2074_v36, 5 }
 0x19a   : > { %10735 = vst [vmem:[#allocation63_spill] sm:$0xff] %v6980_v12  ;;  %v2080_v42 = vshrl.u32 %v10659_v13, %v6960_v17  ;;  %v2083_v38 = vshrl.u32 %v10661_v41, %v6960_v17  ;;  %v2086_v29 = vshrl.u32 %v10660_v30, %v6960_v17  ;;  %v2088_v24 = vshll.u32 %v10660_v30, %v2076_v37 }
 0x19b   : > { %v2089_v50 = vshrl.u32 %v10657_v2, %v6960_v17  ;;  %v6996_v43 = vshrl.u32 %v1811_v63, 30  ;;  %v6999_v55 = vadd.f32 %v6806_v40, %v667_v26  ;;  %v2091_v36 = vshll.u32 %v10657_v2, %v2076_v37 }
 0x19c   : > { %v2092_v33 = vshrl.u32 %v10658_v46, %v6960_v17  ;;  %v7004_v58 = vpop.eup %5248  ;;  %v2079_v5 = vshll.u32 %v10662_v32, %v2076_v37  ;;  %v2082_v51 = vshll.u32 %v10659_v13, %v2076_v37  ;;  %v2085_v35 = vshll.u32 %v10661_v41, %v2076_v37 }
 0x19d   : > { %10738 = vst [vmem:[#allocation30_spill] sm:$0xff] %v6996_v43  ;;  %10739 = vst [vmem:[#allocation15_spill] sm:$0xff] %v6999_v55  ;;  %v2090_v21 = vor.u32 %v2089_v50, %v2088_v24  ;;  %v7009_v12 = vpop.eup %5250  ;;  %v2447_v40 = vshll.u32 %v6766_v53, %v6933_v60  ;;  %v2452_v63 = vshll.u32 %v2451_v27, 23  ;;  %v10742_v26 = vand.u32 2147483647, %v6837_v11  ;;  %v7022_v60 = vpop.permute.xlu1 %461 }
 0x19e   : > { %10740 = vst [vmem:[#allocation64_spill] sm:$0xff] %v7004_v58  ;;  %10741 = vst [vmem:[#allocation65_spill] sm:$0xff] %v7009_v12  ;;  %v2093_v52 = vor.u32 %v2092_v33, %v2091_v36  ;;  %v2081_v1 = vor.u32 %v2080_v42, %v2079_v5  ;;  %v2084_v48 = vor.u32 %v2083_v38, %v2082_v51  ;;  %vm2097_vm0 = vcmp.lt.s32.totalorder %v6985_v10, 4  ;;  %v10744_v5 = vld [vmem:[#allocation5_spill] sm:$0xff] }
 0x19f   : > { %v2069_v22 = vand.u32 8388607, %v10742_v26  ;;  %v2087_v58 = vor.u32 %v2086_v29, %v2085_v35  ;;  %v1712_v37 = vsub.s32 0, %v6976_v19  ;;  %v1813_v24 = vshll.u32 %v6996_v43, 30 }
 0x1a0   : > { %v7016_v45 = vpop.eup %5252  ;;  %v672_v50 = vadd.f32 %v640_v6, %v526_v7  ;;  %v2103_v53 = vsel %vm2097_vm0, %v2090_v21, 920167782  ;;  %v2352_v27 = vcvt.s32.f32 %v6964_v28  ;;  %v2449_v36 = vor.u32 %v2448_v34, %v2447_v40  ;;  %v750_v6 = vpop.permute.xlu0 %749 }
 0x1a1   : > { %10743 = vst [vmem:[#allocation66_spill] sm:$0xff] %v7016_v45  ;;  %v641_v51 = vmul.f32 %v10744_v5, %v6772_v16  ;;  %v2169_v35 = vand.u32 2139095040, %v6999_v55  ;;  %v2453_v42 = vor.u32 4788187, %v2452_v63  ;;  %vm2094_vm3 = vcmp.lt.s32.totalorder %v6985_v10, 1 }
 0x1a2   : > { %vm2096_vm7 = vcmp.lt.s32.totalorder %v6985_v10, 3  ;;  %v2107_v7 = vsel %vm2097_vm0, %v2093_v52, 1326507024  ;;  %v2070_v38 = vor.u32 8388608, %v2069_v22  ;;  %v2102_v29 = vsel %vm2094_vm3, %v2081_v1, %v2084_v48 }
 0x1a3   : > { %v2104_v28 = vsel %vm2096_vm7, %v2087_v58, %v2103_v53  ;;  %v2170_v34 = vshrl.u32 %v2169_v35, 23  ;;  %v2350_v16 = vand.u32 2147483647, %v6966_v56  ;;  %v4877_v33 = vmin.u32 %v1712_v37, %v6976_v19 }
 0x1a4   : > { %v7039_v40 = vsub.s32 %v6939_v49, %v1813_v24  ;;  %v7041_v63 = vadd.f32 %v750_v6, %v672_v50  ;;  %vm2095_vm8 = vcmp.lt.s32.totalorder %v6985_v10, 2  ;;  %v2106_v52 = vsel %vm2094_vm3, %v2084_v48, %v2087_v58  ;;  %v7051_v49 = vpop.permute.xlu1 %466 }
 0x1a5   : > { %v2108_v22 = vsel %vm2096_vm7, %v2090_v21, %v2107_v7  ;;  %v4896_v26 = vadd.s32 4294967169, %v2170_v34  ;;  %v2454_v53 = vand.u32 2147483647, %v2453_v42  ;;  %v2456_v35 = vcvt.s32.f32 %v2449_v36 }
 0x1a6   : > { %10745 = vst [vmem:[#allocation67_spill] sm:$0xff] %v7039_v40  ;;  %10746 = vst [vmem:[#allocation68_spill] sm:$0xff] %v7041_v63  ;;  %v2105_v56 = vsel %vm2095_vm8, %v2102_v29, %v2104_v28  ;;  %v10420_v37 = vand.u32 2147483647, %v6999_v55  ;;  %v673_v24 = vadd.f32 %v641_v51, %v6971_v62  ;;  %v2099_v50 = vsel %vm2097_vm0, %v2087_v58, 2102212464 }
 0x1a7   : > { %v7056_v43 = vshll.u32 %v2070_v38, 8  ;;  %v2176_v12 = vadd.s32 1, %v4896_v26  ;;  %v1714_v45 = vclz %v4877_v33  ;;  %v2689_v21 = vand.u32 2139095040, %v7041_v63  ;;  %v10747_v28 = vld [vmem:[#allocation46_spill] sm:$0xff] }
 0x1a8   : > { %v2078_v36 = vshrl.u32 %v10662_v32, %v6960_v17  ;;  %v2109_v42 = vsel %vm2095_vm8, %v2106_v52, %v2108_v22  ;;  %v1816_v7 = vsub.s32 0, %v7039_v40  ;;  %v2100_v51 = vsel %vm2096_vm7, %v2084_v48, %v2099_v50  ;;  %v7089_v48 = vpop.permute.xlu1 %585 }
 0x1a9   : > { %v7065_v29 = vmul.u32.u64.low %v7056_v43, %v2105_v56  ;;  %v7066_v62 = vmul.u32.u64.high %v7056_v43, %v2105_v56, %v7065_v29  ;;  %vm2177_vm9 = vcmp.gt.s32.totalorder %v2176_v12, 0  ;;  %v2173_v17 = vand.u32 8388607, %v10420_v37 }
 0x1aa   : > { %v2098_v58 = vsel %vm2094_vm3, %v2078_v36, %v2081_v1  ;;  %v2178_v38 = vsel %vm2177_vm9, %v2176_v12, 0  ;;  %v524_v34 = vmul.f32 %v10730_v20, %v10747_v28  ;;  %v7081_v26 = vmul.f32 %v2352_v27, %v2350_v16 }
 0x1ab   : > { %v7078_v33 = vmul.u32.u64.low %v7056_v43, %v2109_v42  ;;  %v7079_v52 = vmul.u32.u64.high %v7056_v43, %v2109_v42, %v7078_v33  ;;  %v2180_v22 = vand.u32 31, %v2178_v38  ;;  %v7083_v56 = vmul.f32 %v2456_v35, %v2454_v53  ;;  %v10753_v35 = vld [vmem:[#allocation33_spill] sm:$0xff] }
 0x1ac   : > { %v7085_v1 = vadd.s32 4294967294, %v1714_v45  ;;  %v7087_v36 = vadd.f32 %v750_v6, %v673_v24  ;;  %v7092_v12 = vmin.u32 %v1816_v7, %v7039_v40  ;;  %v7094_v50 = vshrl.u32 %v2689_v21, 23  ;;  %v7125_v55 = vpop.permute.xlu1 %744  ;;  %v10759_v40 = vld [vmem:[#allocation48_spill] sm:$0xff] }
 0x1ad   : > { %v2101_v42 = vsel %vm2095_vm8, %v2098_v58, %v2100_v51  ;;  %v2181_v33 = vsub.s32 32, %v2180_v22  ;;  %v2174_v37 = vor.u32 8388608, %v2173_v17  ;;  %v7098_v27 = vshrl.u32 %v2178_v38, 5 }
 0x1ae   : > { %10748 = vst [vmem:[#allocation46_spill] sm:$0xff] %v7087_v36  ;;  %v2183_v16 = vshll.u32 %v10662_v32, %v2180_v22  ;;  %v2186_v45 = vshll.u32 %v10659_v13, %v2180_v22  ;;  %v10749_v6 = vand.u32 2147483647, %v10728_v39  ;;  %v10750_v53 = vmov 0 }
 0x1af   : > { %vm10462_vm3 = vcmp.lt.s32.totalorder %v10753_v35, 0  ;;  %v2184_v24 = vshrl.u32 %v10659_v13, %v2181_v33  ;;  %v2187_v10 = vshrl.u32 %v10661_v41, %v2181_v33  ;;  %v2189_v21 = vshll.u32 %v10661_v41, %v2180_v22 }
 0x1b0   : > { %vm7104_vm0 = vcmp.le.f32.partialorder %v10749_v6, 0.7853982  ;;  %v2190_v7 = vshrl.u32 %v10660_v30, %v2181_v33  ;;  %v2192_v58 = vshll.u32 %v10660_v30, %v2180_v22  ;;  %v2193_v51 = vshrl.u32 %v10657_v2, %v2181_v33 }
 0x1b1   : > { %v10751_v53 = vsel %vm7104_vm0, 4294967295, %v10750_v53  ;;  %v2195_v17 = vshll.u32 %v10657_v2, %v2180_v22  ;;  %v2196_v38 = vshrl.u32 %v10658_v46, %v2181_v33  ;;  %v2120_v6 = vadd.s32 1, %v7066_v62  ;;  %v10758_v22 = vld [vmem:[#allocation17_spill] sm:$0xff] }
 0x1b2   : > { %10752 = vst [vmem:[#allocation69_spill] sm:$0xff] %v10751_v53  ;;  %v2185_v63 = vor.u32 %v2184_v24, %v2183_v16  ;;  %v2188_v3 = vor.u32 %v2187_v10, %v2186_v45  ;;  %v2191_v8 = vor.u32 %v2190_v7, %v2189_v21  ;;  %v10754_v9 = vand.u32 2147483647, %v10753_v35 }
 0x1b3   : > { %v10755_v0 = vmov 0  ;;  %v2194_v54 = vor.u32 %v2193_v51, %v2192_v58  ;;  %v2197_v15 = vor.u32 %v2196_v38, %v2195_v17  ;;  %vm2198_vm8 = vcmp.lt.s32.totalorder %v7098_v27, 1 }
 0x1b4   : > { %vm7120_vm7 = vcmp.le.f32.partialorder %v10754_v9, 0.7853982  ;;  %v670_v11 = vadd.f32 %v10758_v22, %v524_v34  ;;  %vm10457_vm9 = vcmp.lt.s32.totalorder %v10759_v40, 0  ;;  %vm2119_vm15 = vc.u32 %v7079_v52, %v7065_v29 }
 0x1b5   : > { %v10756_v0 = vsel %vm7120_vm7, 4294967295, %v10755_v0  ;;  %vm2201_vm13 = vcmp.lt.s32.totalorder %v7098_v27, 4  ;;  %v2206_v9 = vsel %vm2198_vm8, %v2185_v63, %v2188_v3  ;;  %v2210_v16 = vsel %vm2198_vm8, %v2188_v3, %v2191_v8 }
 0x1b6   : > { %10757 = vst [vmem:[#allocation70_spill] sm:$0xff] %v10756_v0  ;;  %vm2200_vm6 = vcmp.lt.s32.totalorder %v7098_v27, 3  ;;  %v2207_v45 = vsel %vm2201_vm13, %v2194_v54, 920167782  ;;  %v2211_v34 = vsel %vm2201_vm13, %v2197_v15, 1326507024  ;;  %v7149_v7 = vadd.f32 %v7125_v55, %v670_v11 }
 0x1b7   : > { %v7141_v24 = vshll.u32 %v2174_v37, 8  ;;  %vm2199_vm2 = vcmp.lt.s32.totalorder %v7098_v27, 2  ;;  %v2208_v10 = vsel %vm2200_vm6, %v2191_v8, %v2207_v45  ;;  %v2212_v21 = vsel %vm2200_vm6, %v2194_v54, %v2211_v34 }
 0x1b8   : > { %10760 = vst [vmem:[#allocation17_spill] sm:$0xff] %v7149_v7  ;;  %v2117_v58 = vmul.u32 %v7056_v43, %v2101_v42  ;;  %v2121_v51 = vsel %vm2119_vm15, %v2120_v6, %v7066_v62  ;;  %v2209_v15 = vsel %vm2199_vm2, %v2206_v9, %v2208_v10  ;;  %v2213_v37 = vsel %vm2199_vm2, %v2210_v16, %v2212_v21 }
 0x1b9   : > { %v10761_v17 = vand.u32 2147483647, %v10759_v40  ;;  %v10762_v38 = vmov 0  ;;  %v7164_v54 = vmul.u32.u64.low %v7141_v24, %v2213_v37  ;;  %v7165_v11 = vmul.u32.u64.high %v7141_v24, %v2213_v37, %v7164_v54 }
 0x1ba   : > { %v7168_v43 = vmul.u32.u64.low %v7141_v24, %v2209_v15  ;;  %v7169_v42 = vmul.u32.u64.high %v7141_v24, %v2209_v15, %v7168_v43  ;;  %v1942_v62 = vsel %vm7104_vm0, %v10728_v39, %v6951_v4  ;;  %v10765_v6 = vxor.u32 2147483648, %v6937_v59  ;;  %v10766_v4 = vld [vmem:[#allocation49_spill] sm:$0xff] }
 0x1bb   : > { %vm7159_vm12 = vcmp.le.f32.partialorder %v10761_v17, 0.7853982  ;;  %v2354_v9 = vxor.u32 2147483648, %v7081_v26  ;;  %vm4879_vm15 = vcmp.lt.s32.totalorder %v7085_v1, 0  ;;  %v1818_v16 = vclz %v7092_v12 }
 0x1bc   : > { %v10763_v38 = vsel %vm7159_vm12, 4294967295, %v10762_v38  ;;  %v2043_v22 = vsel %vm10462_vm3, %v10765_v6, %v6937_v59  ;;  %v7184_v45 = vadd.s32 %v2121_v51, %v2117_v58  ;;  %v2203_v34 = vsel %vm2201_vm13, %v2191_v8, 2102212464 }
 0x1bd   : > { %10764 = vst [vmem:[#allocation71_spill] sm:$0xff] %v10763_v38  ;;  %v2481_v10 = vand.u32 2139095040, %v7149_v7  ;;  %vm10461_vm14 = vcmp.lt.s32.totalorder %v10766_v4, 0  ;;  %v2458_v21 = vxor.u32 2147483648, %v7083_v56  ;;  %v2793_v15 = vand.u32 2139095040, %v7087_v36 }
 0x1be   : > { %v2182_v59 = vshrl.u32 %v10662_v32, %v2181_v33  ;;  %5254 = vcosq.f32 %v1942_v62  ;;  %v2046_v12 = vsel %vm7120_vm7, %v10753_v35, %v2043_v22  ;;  %v4916_v58 = vadd.s32 4294967169, %v7094_v50 }
 0x1bf   : > { %v2482_v51 = vshrl.u32 %v2481_v10, 23  ;;  %v2355_v8 = vsel %vm10457_vm9, %v2354_v9, %v7081_v26  ;;  %v1717_v37 = vsel %vm4879_vm15, 0, %v7085_v1  ;;  %v2204_v33 = vsel %vm2200_vm6, %v2188_v3, %v2203_v34 }
 0x1c0   : > { %v2202_v17 = vsel %vm2198_vm8, %v2182_v59, %v2185_v63  ;;  %v4882_v54 = vadd.s32 4294967294, %v1818_v16  ;;  %v2123_v6 = vadd.s32 536870912, %v7184_v45  ;;  %v2224_v50 = vadd.s32 1, %v7169_v42 }
 0x1c1   : > { %v4908_v22 = vadd.s32 4294967169, %v2482_v51  ;;  %5256 = vsinq.f32 %v1942_v62  ;;  %v2459_v26 = vsel %vm10461_vm14, %v2458_v21, %v7083_v56  ;;  %v2794_v9 = vshrl.u32 %v2793_v15, 23 }
 0x1c2   : > { %vm2223_vm13 = vc.u32 %v7165_v11, %v7168_v43  ;;  %v1718_v1 = vsub.s32 32, %v1717_v37  ;;  %v1722_v63 = vsub.s32 4294967266, %v1717_v37  ;;  %v2696_v10 = vadd.s32 1, %v4916_v58 }
 0x1c3   : > { %v2205_v3 = vsel %vm2199_vm2, %v2202_v17, %v2204_v33  ;;  %5258 = vcosq.f32 %v2046_v12  ;;  %v2358_v16 = vsel %vm7159_vm12, %v10759_v40, %v2355_v8  ;;  %v10767_v62 = vand.u32 2147483647, %v10766_v4 }
 0x1c4   : > { %v10768_v34 = vmov 0  ;;  %v2488_v56 = vadd.s32 1, %v4908_v22  ;;  %v1702_v21 = vadd.s32 %v6782_v44, %v6779_v61  ;;  %vm4883_vm8 = vcmp.lt.s32.totalorder %v4882_v54, 0 }
 0x1c5   : > { %vm7221_vm6 = vcmp.le.f32.partialorder %v10767_v62, 0.7853982  ;;  %v7227_v15 = vshrl.u32 %v2123_v6, 30  ;;  %v2225_v27 = vsel %vm2223_vm13, %v2224_v50, %v7169_v42  ;;  %5260 = vsinq.f32 %v2046_v12 }
 0x1c6   : > { %v10769_v34 = vsel %vm7221_vm6, 4294967295, %v10768_v34  ;;  %v2462_v59 = vsel %vm7221_vm6, %v10766_v4, %v2459_v26  ;;  %v4920_v58 = vadd.s32 4294967169, %v2794_v9  ;;  %v2221_v51 = vmul.u32 %v7141_v24, %v2205_v3 }
 0x1c7   : > { %10770 = vst [vmem:[#allocation72_spill] sm:$0xff] %v10769_v34  ;;  %10771 = vst [vmem:[#allocation73_spill] sm:$0xff] %v7227_v15  ;;  %v1720_v8 = vshrl.u32 %v1702_v21, %v1718_v1  ;;  %v1723_v17 = vadd.s32 127, %v1722_v63  ;;  %vm2697_vm2 = vcmp.gt.s32.totalorder %v2696_v10, 0  ;;  %vm2489_vm15 = vcmp.gt.s32.totalorder %v2488_v56, 0 }
 0x1c8   : > { %v10772_v61 = vor.u32 %v6641_v47, %v6346_v57  ;;  %5262 = vcosq.f32 %v2358_v16  ;;  %v7241_v42 = vsel %vm4883_vm8, 0, %v4882_v54  ;;  %v7243_v12 = vadd.s32 %v2225_v27, %v2221_v51  ;;  %v7245_v33 = vpop.eup %5254 }
 0x1c9   : > { %10773 = vst [vmem:[#allocation74_spill] sm:$0xff] %v7245_v33  ;;  %5264 = vsinq.f32 %v2358_v16  ;;  %v1719_v24 = vshll.u32 %v6976_v19, %v1717_v37  ;;  %v2125_v6 = vshll.u32 %v7227_v15, 30  ;;  %v2490_v50 = vsel %vm2489_vm15, %v2488_v56, 0 }
 0x1ca   : > { %v7239_v44 = vsel %vm10463_vm5, %v10772_v61, 1326507024  ;;  %5266 = vcosq.f32 %v2462_v59  ;;  %v525_v57 = vmul.f32 %v10732_v31, %v10747_v28  ;;  %v2698_v47 = vsel %vm2697_vm2, %v2696_v10, 0  ;;  %v10780_v61 = vld [vmem:[#allocation18_spill] sm:$0xff] }
 0x1cb   : > { %v2800_v22 = vadd.s32 1, %v4920_v58  ;;  %5268 = vsinq.f32 %v2462_v59  ;;  %v7251_v26 = vor.u32 %v1720_v8, %v1719_v24  ;;  %v1724_v54 = vshll.u32 %v1723_v17, 23  ;;  %v7254_v1 = vpop.eup %5256 }
 0x1cc   : > { %v1826_v9 = vsub.s32 4294967266, %v7241_v42  ;;  %10774 = vst [vmem:[#allocation75_spill] sm:$0xff] %v7254_v1  ;;  %v2227_v63 = vadd.s32 536870912, %v7243_v12  ;;  %v7259_v19 = vmul.f32 %v10730_v20, %v7022_v60  ;;  %v644_v37 = vmul.f32 %v10734_v25, %v7089_v48 }
 0x1cd   : > { %v2492_v28 = vand.u32 31, %v2490_v50  ;;  %v1806_v10 = vadd.s32 %v6863_v14, %v6870_v18  ;;  %v7265_v3 = vshrl.u32 %v2698_v47, 5  ;;  %v7267_v16 = vand.u32 31, %v2698_v47  ;;  %v7272_v56 = vpop.eup %5258 }
 0x1ce   : > { %v7270_v62 = vsub.s32 %v7184_v45, %v2125_v6  ;;  %10777 = vst [vmem:[#allocation78_spill] sm:$0xff] %v7272_v56  ;;  %vm2801_vm13 = vcmp.gt.s32.totalorder %v2800_v22, 0  ;;  %v530_v21 = vmul.f32 %v10730_v20, %v7051_v49  ;;  %v7279_v58 = vor.u32 4788187, %v1724_v54 }
 0x1cf   : > { %10775 = vst [vmem:[#allocation76_spill] sm:$0xff] %v7265_v3  ;;  %10776 = vst [vmem:[#allocation77_spill] sm:$0xff] %v7267_v16  ;;  %v7277_v59 = vsub.s32 32, %v2492_v28  ;;  %v1822_v18 = vsub.s32 32, %v7241_v42  ;;  %v1827_v51 = vadd.s32 127, %v1826_v9  ;;  %v7283_v8 = vpop.eup %5260  ;;  %v7285_v45 = vshrl.u32 %v2227_v63, 30 }
 0x1d0   : > { %10778 = vst [vmem:[#allocation79_spill] sm:$0xff] %v7283_v8  ;;  %v676_v17 = vadd.f32 %v644_v37, %v530_v21  ;;  %v671_v24 = vadd.f32 %v10780_v61, %v525_v57  ;;  %v2128_v47 = vsub.s32 0, %v7270_v62  ;;  %v2495_v54 = vshll.u32 %v10662_v32, %v2492_v28 }
 0x1d1   : > { %10779 = vst [vmem:[#allocation80_spill] sm:$0xff] %v7285_v45  ;;  %v2496_v6 = vshrl.u32 %v10659_v13, %v7277_v59  ;;  %v2498_v27 = vshll.u32 %v10659_v13, %v2492_v28  ;;  %v2499_v14 = vshrl.u32 %v10661_v41, %v7277_v59  ;;  %v10782_v63 = vand.u32 2147483647, %v7149_v7 }
 0x1d2   : > { %v7295_v9 = vpop.eup %5262  ;;  %v7299_v37 = vshrl.u32 %v2490_v50, 5  ;;  %v2501_v57 = vshll.u32 %v10661_v41, %v2492_v28  ;;  %v2502_v21 = vshrl.u32 %v10660_v30, %v7277_v59  ;;  %v2504_v15 = vshll.u32 %v10660_v30, %v2492_v28  ;;  %v760_v50 = vpop.permute.xlu0 %759 }
 0x1d3   : > { %10781 = vst [vmem:[#allocation18_spill] sm:$0xff] %v7295_v9  ;;  %v2485_v36 = vand.u32 8388607, %v10782_v63  ;;  %v7304_v61 = vpop.eup %5264  ;;  %v7306_v38 = vor.u32 %v2496_v6, %v2495_v54  ;;  %v7308_v40 = vor.u32 %v2499_v14, %v2498_v27  ;;  %v2505_v9 = vshrl.u32 %v10657_v2, %v7277_v59 }
 0x1d4   : > { %10783 = vst [vmem:[#allocation81_spill] sm:$0xff] %v7304_v61  ;;  %v7313_v34 = vpop.eup %5266  ;;  %v2229_v63 = vshll.u32 %v7285_v45, 30  ;;  %v2503_v4 = vor.u32 %v2502_v21, %v2501_v57  ;;  %v2507_v33 = vshll.u32 %v10657_v2, %v2492_v28  ;;  %v2508_v61 = vshrl.u32 %v10658_v46, %v7277_v59 }
 0x1d5   : > { %10784 = vst [vmem:[#allocation82_spill] sm:$0xff] %v7313_v34  ;;  %v7319_v6 = vpop.eup %5268  ;;  %v7322_v27 = vsel %vm2801_vm13, %v2800_v22, 0  ;;  %v7324_v14 = vadd.f32 %v760_v50, %v676_v17  ;;  %v7327_v54 = vadd.f32 %v7125_v55, %v671_v24  ;;  %v2506_v34 = vor.u32 %v2505_v9, %v2504_v15 }
 0x1d6   : > { %10785 = vst [vmem:[#allocation83_spill] sm:$0xff] %v7319_v6  ;;  %v4893_v1 = vmin.u32 %v2128_v47, %v7270_v62  ;;  %v2509_v45 = vor.u32 %v2508_v61, %v2507_v33  ;;  %vm2510_vm8 = vcmp.lt.s32.totalorder %v7299_v37, 1  ;;  %vm2513_vm2 = vcmp.lt.s32.totalorder %v7299_v37, 4 }
 0x1d7   : > { %10786 = vst [vmem:[#allocation84_spill] sm:$0xff] %v7324_v14  ;;  %10787 = vst [vmem:[#allocation85_spill] sm:$0xff] %v7327_v54  ;;  %v2486_v28 = vor.u32 8388608, %v2485_v36  ;;  %vm2512_vm15 = vcmp.lt.s32.totalorder %v7299_v37, 3  ;;  %v2518_v22 = vsel %vm2510_vm8, %v7306_v38, %v7308_v40  ;;  %v2519_v55 = vsel %vm2513_vm2, %v2506_v34, 920167782 }
 0x1d8   : > { %v1824_v17 = vshrl.u32 %v1806_v10, %v1822_v18  ;;  %v1828_v15 = vshll.u32 %v1827_v51, 23  ;;  %v7340_v24 = vsub.s32 %v7243_v12, %v2229_v63  ;;  %v2520_v33 = vsel %vm2512_vm15, %v2503_v4, %v2519_v55 }
 0x1d9   : > { %v645_v36 = vmul.f32 %v10744_v5, %v7089_v48  ;;  %vm2511_vm13 = vcmp.lt.s32.totalorder %v7299_v37, 2  ;;  %v2522_v47 = vsel %vm2510_vm8, %v7308_v40, %v2503_v4  ;;  %v2523_v9 = vsel %vm2513_vm2, %v2509_v45, 1326507024 }
 0x1da   : > { %v531_v10 = vmul.f32 %v10732_v31, %v7051_v49  ;;  %v3105_v12 = vand.u32 2139095040, %v7324_v14  ;;  %v2521_v18 = vsel %vm2511_vm13, %v2518_v22, %v2520_v33  ;;  %v2524_v48 = vsel %vm2512_vm15, %v2506_v34, %v2523_v9  ;;  %v10788_v49 = vld [vmem:[#allocation67_spill] sm:$0xff] }
 0x1db   : > { %v2130_v51 = vclz %v4893_v1  ;;  %v2525_v57 = vsel %vm2511_vm13, %v2522_v47, %v2524_v48  ;;  %v7361_v21 = vshll.u32 %v2486_v28, 8  ;;  %v2585_v61 = vand.u32 2139095040, %v7327_v54 }
 0x1dc   : > { %v1726_v45 = vand.u32 2147483647, %v7279_v58  ;;  %v1823_v63 = vshll.u32 %v10788_v49, %v7241_v42  ;;  %v1829_v55 = vor.u32 4788187, %v1828_v15  ;;  %v2232_v14 = vsub.s32 0, %v7340_v24 }
 0x1dd   : > { %v677_v22 = vadd.f32 %v645_v36, %v531_v10  ;;  %v7369_v33 = vmul.u32.u64.low %v7361_v21, %v2521_v18  ;;  %v7370_v34 = vmul.u32.u64.high %v7361_v21, %v2521_v18, %v7369_v33  ;;  %v2586_v1 = vshrl.u32 %v2585_v61, 23  ;;  %v7383_v10 = vpop.permute.xlu1 %471  ;;  %v10791_v18 = vld [vmem:[#allocation52_spill] sm:$0xff] }
 0x1de   : > { %v7374_v28 = vsub.s32 32, %v7267_v16  ;;  %v3106_v47 = vshrl.u32 %v3105_v12, 23  ;;  %v7377_v9 = vmul.u32.u64.low %v7361_v21, %v2525_v57  ;;  %v7378_v58 = vmul.u32.u64.high %v7361_v21, %v2525_v57, %v7377_v9 }
 0x1df   : > { %v1825_v48 = vor.u32 %v1824_v17, %v1823_v63  ;;  %v7381_v42 = vand.u32 31, %v7322_v27  ;;  %v4894_v15 = vadd.s32 4294967294, %v2130_v51  ;;  %v4912_v36 = vadd.s32 4294967169, %v2586_v1 }
 0x1e0   : > { %10789 = vst [vmem:[#allocation67_spill] sm:$0xff] %v7374_v28  ;;  %v10792_v61 = vcvt.s32.f32 %v7251_v26  ;;  %v2712_v12 = vshll.u32 %v10660_v30, %v7267_v16  ;;  %v2715_v57 = vshll.u32 %v10657_v2, %v7267_v16  ;;  %v4897_v17 = vmin.u32 %v2232_v14, %v7340_v24 }
 0x1e1   : > { %10790 = vst [vmem:[#allocation86_spill] sm:$0xff] %v7381_v42  ;;  %v1830_v63 = vand.u32 2147483647, %v1829_v55  ;;  %v7393_v9 = vadd.f32 %v760_v50, %v677_v22  ;;  %v2515_v51 = vsel %vm2513_vm2, %v2503_v4, 2102212464  ;;  %v2592_v1 = vadd.s32 1, %v4912_v36  ;;  %v7421_v39 = vpop.permute.xlu1 %476 }
 0x1e2   : > { %v1729_v49 = vmul.f32 %v10792_v61, %v1726_v45  ;;  %v2713_v6 = vshrl.u32 %v10657_v2, %v7374_v28  ;;  %v2716_v26 = vshrl.u32 %v10658_v46, %v7374_v28  ;;  %v4932_v45 = vadd.s32 4294967169, %v3106_v47  ;;  %v10799_v55 = vld [vmem:[#allocation55_spill] sm:$0xff] }
 0x1e3   : > { %10793 = vst [vmem:[#allocation87_spill] sm:$0xff] %v7393_v9  ;;  %v2494_v61 = vshrl.u32 %v10662_v32, %v7277_v59  ;;  %v10794_v16 = vand.u32 2147483647, %v10791_v18  ;;  %v10795_v14 = vmov 0  ;;  %v1832_v50 = vcvt.s32.f32 %v1825_v48 }
 0x1e4   : > { %v7410_v4 = vsub.s32 32, %v7381_v42  ;;  %vm4895_vm2 = vcmp.lt.s32.totalorder %v4894_v15, 0  ;;  %vm2593_vm3 = vcmp.gt.s32.totalorder %v2592_v1, 0  ;;  %v2234_v22 = vclz %v4897_v17 }
 0x1e5   : > { %vm7405_vm14 = vcmp.le.f32.partialorder %v10794_v16, 0.7853982  ;;  %v2514_v47 = vsel %vm2510_vm8, %v2494_v61, %v7306_v38  ;;  %v2516_v16 = vsel %vm2512_vm15, %v7308_v40, %v2515_v51  ;;  %v2594_v59 = vsel %vm2593_vm3, %v2592_v1, 0 }
 0x1e6   : > { %v10796_v14 = vsel %vm7405_vm14, 4294967295, %v10795_v14  ;;  %10798 = vst [vmem:[#allocation89_spill] sm:$0xff] %v7410_v4  ;;  %v1730_v36 = vxor.u32 2147483648, %v1729_v49  ;;  %v1833_v28 = vmul.f32 %v1832_v50, %v1830_v63  ;;  %v3209_v48 = vand.u32 2139095040, %v7393_v9 }
 0x1e7   : > { %10797 = vst [vmem:[#allocation88_spill] sm:$0xff] %v10796_v14  ;;  %v2536_v53 = vadd.s32 1, %v7370_v34  ;;  %vm10485_vm5 = vcmp.lt.s32.totalorder %v7265_v3, 4  ;;  %v3112_v17 = vadd.s32 1, %v4932_v45  ;;  %vm2535_vm9 = vc.u32 %v7378_v58, %v7369_v33 }
 0x1e8   : > { %v2596_v38 = vand.u32 31, %v2594_v59  ;;  %v7426_v61 = vor.u32 %v2713_v6, %v2712_v12  ;;  %v2717_v56 = vor.u32 %v2716_v26, %v2715_v57  ;;  %v7429_v40 = vsel %vm4895_vm2, 0, %v4894_v15 }
 0x1e9   : > { %v2517_v63 = vsel %vm2511_vm13, %v2514_v47, %v2516_v16  ;;  %v7434_v51 = vshrl.u32 %v7322_v27, 5  ;;  %v2816_v1 = vshll.u32 %v10660_v30, %v7381_v42  ;;  %v2817_v45 = vshrl.u32 %v10657_v2, %v7410_v4 }
 0x1ea   : > { %10800 = vst [vmem:[#allocation90_spill] sm:$0xff] %v7426_v61  ;;  %v4898_v50 = vadd.s32 4294967294, %v2234_v22  ;;  %vm10802_vm3 = vcmp.lt.s32.totalorder %v10791_v18, 0  ;;  %v1834_v12 = vxor.u32 2147483648, %v1833_v28  ;;  %v3210_v57 = vshrl.u32 %v3209_v48, 23 }
 0x1eb   : > { %10801 = vst [vmem:[#allocation91_spill] sm:$0xff] %v7434_v51  ;;  %v1731_v6 = vsel %vm10802_vm3, %v1730_v36, %v1729_v49  ;;  %v2537_v15 = vsel %vm2535_vm9, %v2536_v53, %v7370_v34  ;;  %v2138_v37 = vsub.s32 4294967266, %v7429_v40  ;;  %vm3113_vm8 = vcmp.gt.s32.totalorder %v3112_v17, 0 }
 0x1ec   : > { %v2533_v27 = vmul.u32 %v7361_v21, %v2517_v63  ;;  %v7445_v26 = vsub.s32 32, %v2596_v38  ;;  %v7450_v47 = vsel %vm10485_vm5, %v7426_v61, 920167782  ;;  %v7454_v22 = vsel %vm10485_vm5, %v2717_v56, 1326507024  ;;  %v7464_v21 = vpop.permute.xlu1 %593  ;;  %v10808_v61 = vld [vmem:[#allocation19_spill] sm:$0xff] }
 0x1ed   : > { %10803 = vst [vmem:[#allocation92_spill] sm:$0xff] %v7450_v47  ;;  %10804 = vst [vmem:[#allocation93_spill] sm:$0xff] %v7454_v22  ;;  %v7458_v49 = vshll.u32 %v10657_v2, %v7381_v42  ;;  %v7462_v53 = vshrl.u32 %v10658_v46, %v7410_v4  ;;  %v7469_v34 = vsel %vm7405_vm14, %v10791_v18, %v1731_v6  ;;  %vm4899_vm9 = vcmp.lt.s32.totalorder %v4898_v50, 0 }
 0x1ee   : > { %v7471_v16 = vor.u32 %v2817_v45, %v2816_v1  ;;  %v7473_v56 = vadd.s32 %v2537_v15, %v2533_v27  ;;  %vm10806_vm15 = vcmp.lt.s32.totalorder %v10799_v55, 0  ;;  %v2118_v48 = vadd.s32 %v7065_v29, %v7079_v52 }
 0x1ef   : > { %v7477_v36 = vsel %vm10806_vm15, %v1834_v12, %v1833_v28  ;;  %v7481_v63 = vsel %vm3113_vm8, %v3112_v17, 0  ;;  %v2139_v47 = vadd.s32 127, %v2138_v37  ;;  %v2222_v6 = vadd.s32 %v7168_v43, %v7165_v11 }
 0x1f0   : > { %10805 = vst [vmem:[#allocation94_spill] sm:$0xff] %v7471_v16  ;;  %v4936_v1 = vadd.s32 4294967169, %v3210_v57  ;;  %v2609_v45 = vshrl.u32 %v10657_v2, %v7445_v26  ;;  %v2134_v15 = vsub.s32 32, %v7429_v40  ;;  %v2135_v28 = vshll.u32 %v7270_v62, %v7429_v40  ;;  %v7509_v37 = vpop.permute.xlu1 %754 }
 0x1f1   : > { %v7491_v12 = vsel %vm4899_vm9, 0, %v4898_v50  ;;  %v2612_v29 = vshrl.u32 %v10658_v46, %v7445_v26  ;;  %v7496_v52 = vand.u32 31, %v7481_v63  ;;  %v2539_v17 = vadd.s32 536870912, %v7473_v56 }
 0x1f2   : > { %v7499_v11 = vshrl.u32 %v2594_v59, 5  ;;  %v2608_v43 = vshll.u32 %v10660_v30, %v2596_v38  ;;  %v2600_v57 = vshrl.u32 %v10659_v13, %v7445_v26  ;;  %v2603_v62 = vshrl.u32 %v10661_v41, %v7445_v26 }
 0x1f3   : > { %10807 = vst [vmem:[#allocation95_spill] sm:$0xff] %v7496_v52  ;;  %v2606_v40 = vshrl.u32 %v10660_v30, %v7445_v26  ;;  %v2611_v50 = vshll.u32 %v10657_v2, %v2596_v38  ;;  %v2140_v27 = vshll.u32 %v2139_v47, 23  ;;  %v2242_v9 = vsub.s32 4294967266, %v7491_v12 }
 0x1f4   : > { %v2610_v59 = vor.u32 %v2609_v45, %v2608_v43  ;;  %v674_v22 = vadd.f32 %v10808_v61, %v7259_v19  ;;  %v2599_v3 = vshll.u32 %v10662_v32, %v2596_v38  ;;  %v2602_v4 = vshll.u32 %v10659_v13, %v2596_v38 }
 0x1f5   : > { %v2605_v42 = vshll.u32 %v10661_v41, %v2596_v38  ;;  %v2613_v14 = vor.u32 %v2612_v29, %v2611_v50  ;;  %v2136_v18 = vshrl.u32 %v2118_v48, %v2134_v15  ;;  %v7517_v8 = vshrl.u32 %v2539_v17, 30 }
 0x1f6   : > { %v10810_v0 = vand.u32 2147483647, %v7327_v54  ;;  %v7522_v47 = vadd.f32 %v7509_v37, %v674_v22  ;;  %v7524_v45 = vor.u32 %v2600_v57, %v2599_v3  ;;  %v7526_v43 = vor.u32 %v2603_v62, %v2602_v4 }
 0x1f7   : > { %10809 = vst [vmem:[#allocation19_spill] sm:$0xff] %v7517_v8  ;;  %v2607_v19 = vor.u32 %v2606_v40, %v2605_v42  ;;  %vm2617_vm13 = vcmp.lt.s32.totalorder %v7499_v11, 4  ;;  %v2243_v61 = vadd.s32 127, %v2242_v9  ;;  %v3216_v7 = vadd.s32 1, %v4936_v1 }
 0x1f8   : > { %v2589_v35 = vand.u32 8388607, %v10810_v0  ;;  %10811 = vst [vmem:[#allocation96_spill] sm:$0xff] %v7522_v47  ;;  %v2623_v38 = vsel %vm2617_vm13, %v2610_v59, 920167782  ;;  %v648_v48 = vmul.f32 %v10734_v25, %v7464_v21  ;;  %v2238_v0 = vsub.s32 32, %v7491_v12 }
 0x1f9   : > { %v2141_v15 = vor.u32 4788187, %v2140_v27  ;;  %v2627_v3 = vsel %vm2617_vm13, %v2613_v14, 1326507024  ;;  %v534_v4 = vmul.f32 %v10730_v20, %v7421_v39  ;;  %vm10488_vm2 = vcmp.lt.s32.totalorder %v7434_v51, 4 }
 0x1fa   : > { %v2541_v42 = vshll.u32 %v7517_v8, 30  ;;  %vm2614_vm3 = vcmp.lt.s32.totalorder %v7499_v11, 1  ;;  %vm2616_vm8 = vcmp.lt.s32.totalorder %v7499_v11, 3  ;;  %v2897_v9 = vand.u32 2139095040, %v7522_v47  ;;  %v770_v8 = vpop.permute.xlu0 %769 }
 0x1fb   : > { %v10812_v22 = vand.u32 2147483647, %v10799_v55  ;;  %v10813_v1 = vmov 0  ;;  %v2137_v14 = vor.u32 %v2136_v18, %v2135_v28  ;;  %v2590_v29 = vor.u32 8388608, %v2589_v35 }
 0x1fc   : > { %v2622_v17 = vsel %vm2614_vm3, %v7524_v45, %v7526_v43  ;;  %v2624_v57 = vsel %vm2616_vm8, %v2607_v19, %v2623_v38  ;;  %v2244_v62 = vshll.u32 %v2243_v61, 23  ;;  %v2626_v40 = vsel %vm2614_vm3, %v7526_v43, %v2607_v19 }
 0x1fd   : > { %vm7545_vm9 = vcmp.le.f32.partialorder %v10812_v22, 0.7853982  ;;  %v2628_v50 = vsel %vm2616_vm8, %v2610_v59, %v2627_v3  ;;  %v680_v27 = vadd.f32 %v648_v48, %v534_v4  ;;  %v2240_v22 = vshrl.u32 %v2222_v6, %v2238_v0 }
 0x1fe   : > { %v10814_v1 = vsel %vm7545_vm9, 4294967295, %v10813_v1  ;;  %vm3217_vm15 = vcmp.gt.s32.totalorder %v3216_v7, 0  ;;  %vm2615_vm5 = vcmp.lt.s32.totalorder %v7499_v11, 2  ;;  %v649_v35 = vmul.f32 %v10744_v5, %v7464_v21 }
 0x1ff   : > { %10815 = vst [vmem:[#allocation97_spill] sm:$0xff] %v10814_v1  ;;  %v2142_v18 = vand.u32 2147483647, %v2141_v15  ;;  %v7564_v28 = vsub.s32 %v7473_v56, %v2541_v42  ;;  %v2625_v61 = vsel %vm2615_vm5, %v2622_v17, %v2624_v57  ;;  %v2898_v38 = vshrl.u32 %v2897_v9, 23 }
 0x200   : > { %v2239_v59 = vshll.u32 %v7340_v24, %v7491_v12  ;;  %v2629_v6 = vsel %vm2615_vm5, %v2626_v40, %v2628_v50  ;;  %v7572_v48 = vshll.u32 %v2590_v29, 8  ;;  %v535_v21 = vmul.f32 %v10732_v31, %v7421_v39 }
 0x201   : > { %v2144_v15 = vcvt.s32.f32 %v2137_v14  ;;  %v2245_v0 = vor.u32 4788187, %v2244_v62  ;;  %v3218_v56 = vsel %vm3217_vm15, %v3216_v7, 0  ;;  %v7576_v3 = vadd.f32 %v770_v8, %v680_v27  ;;  %v10818_v14 = vld [vmem:[#allocation27_spill] sm:$0xff] }
 0x202   : > { %v2241_v4 = vor.u32 %v2240_v22, %v2239_v59  ;;  %v7579_v42 = vmul.u32.u64.low %v7572_v48, %v2625_v61  ;;  %v7580_v9 = vmul.u32.u64.high %v7572_v48, %v2625_v61, %v7579_v42  ;;  %v681_v24 = vadd.f32 %v649_v35, %v535_v21 }
 0x203   : > { %10816 = vst [vmem:[#allocation98_spill] sm:$0xff] %v7576_v3  ;;  %v2544_v12 = vsub.s32 0, %v7564_v28  ;;  %v7585_v29 = vmul.u32.u64.low %v7572_v48, %v2629_v6  ;;  %v7586_v17 = vmul.u32.u64.high %v7572_v48, %v2629_v6, %v7585_v29  ;;  %v4924_v57 = vadd.s32 4294967169, %v2898_v38 }
 0x204   : > { %5270 = vcosq.f32 %v7469_v34  ;;  %v2821_v39 = vor.u32 %v7462_v53, %v7458_v49  ;;  %v7594_v7 = vsel %vm10488_vm2, %v7471_v16, 920167782  ;;  %v2145_v62 = vmul.f32 %v2144_v15, %v2142_v18 }
 0x205   : > { %10817 = vst [vmem:[#allocation99_spill] sm:$0xff] %v7594_v7  ;;  %5272 = vsinq.f32 %v7469_v34  ;;  %v1838_v40 = vsel %vm7545_vm9, %v10799_v55, %v7477_v36  ;;  %v2246_v50 = vand.u32 2147483647, %v2245_v0  ;;  %v3521_v27 = vand.u32 2139095040, %v7576_v3 }
 0x206   : > { %v7604_v49 = vsub.s32 32, %v7496_v52  ;;  %v7606_v53 = vand.u32 31, %v3218_v56  ;;  %v2619_v22 = vsel %vm2617_vm13, %v2607_v19, 2102212464  ;;  %v7610_v35 = vadd.f32 %v770_v8, %v681_v24  ;;  %v10827_v19 = vld [vmem:[#allocation15_spill] sm:$0xff] }
 0x207   : > { %v10822_v34 = vand.u32 2147483647, %v10818_v14  ;;  %v10823_v18 = vmov 0  ;;  %v2248_v36 = vcvt.s32.f32 %v2241_v4  ;;  %v4909_v61 = vmin.u32 %v2544_v12, %v7564_v28 }
 0x208   : > { %10819 = vst [vmem:[#allocation100_spill] sm:$0xff] %v7604_v49  ;;  %10820 = vst [vmem:[#allocation101_spill] sm:$0xff] %v7606_v53  ;;  %v2598_v38 = vshrl.u32 %v10662_v32, %v7445_v26  ;;  %v2904_v59 = vadd.s32 1, %v4924_v57  ;;  %5274 = vcosq.f32 %v1838_v40  ;;  %v7623_v6 = vsel %vm10488_vm2, %v2821_v39, 1326507024 }
 0x209   : > { %10821 = vst [vmem:[#allocation102_spill] sm:$0xff] %v7610_v35  ;;  %vm7614_vm15 = vcmp.le.f32.partialorder %v10822_v34, 0.7853982  ;;  %10826 = vst [vmem:[#allocation104_spill] sm:$0xff] %v7623_v6  ;;  %v2146_v8 = vxor.u32 2147483648, %v2145_v62  ;;  %v529_v21 = vmul.f32 %v10732_v31, %v7022_v60  ;;  %v2249_v15 = vmul.f32 %v2248_v36, %v2246_v50 }
 0x20a   : > { %v10824_v18 = vsel %vm7614_vm15, 4294967295, %v10823_v18  ;;  %v2618_v0 = vsel %vm2614_vm3, %v2598_v38, %v7524_v45  ;;  %v2620_v26 = vsel %vm2616_vm8, %v7526_v43, %v2619_v22  ;;  %v3522_v4 = vshrl.u32 %v3521_v27, 23 }
 0x20b   : > { %10825 = vst [vmem:[#allocation103_spill] sm:$0xff] %v10824_v18  ;;  %v7635_v24 = vshrl.u32 %v7481_v63, 5  ;;  %v7638_v12 = vsub.s32 32, %v7606_v53  ;;  %v2640_v29 = vadd.s32 1, %v7580_v9  ;;  %v3625_v60 = vand.u32 2139095040, %v7610_v35 }
 0x20c   : > { %v10830_v57 = vand.u32 2147483647, %v10827_v19  ;;  %v10831_v39 = vmov 0  ;;  %v3129_v45 = vshrl.u32 %v10657_v2, %v7604_v49  ;;  %v2546_v43 = vclz %v4909_v61 }
 0x20d   : > { %10828 = vst [vmem:[#allocation105_spill] sm:$0xff] %v7635_v24  ;;  %10829 = vst [vmem:[#allocation106_spill] sm:$0xff] %v7638_v12  ;;  %vm2639_vm3 = vc.u32 %v7586_v17, %v7579_v42  ;;  %vm2905_vm8 = vcmp.gt.s32.totalorder %v2904_v59, 0  ;;  %v3128_v63 = vshll.u32 %v10660_v30, %v7496_v52  ;;  %v3131_v50 = vshll.u32 %v10657_v2, %v7496_v52 }
 0x20e   : > { %vm7644_vm2 = vcmp.le.f32.partialorder %v10830_v57, 0.7853982  ;;  %v3132_v27 = vshrl.u32 %v10658_v46, %v7604_v49  ;;  %v2621_v22 = vsel %vm2615_vm5, %v2618_v0, %v2620_v26  ;;  %vm10834_vm13 = vcmp.lt.s32.totalorder %v10818_v14, 0  ;;  %v7664_v57 = vpop.eup %5270 }
 0x20f   : > { %v10832_v39 = vsel %vm7644_vm2, 4294967295, %v10831_v39  ;;  %v2147_v34 = vsel %vm10834_vm13, %v2146_v8, %v2145_v62  ;;  %v2250_v36 = vxor.u32 2147483648, %v2249_v15  ;;  %v7662_v61 = vshrl.u32 %v3218_v56, 5  ;;  %10836 = vst [vmem:[#allocation109_spill] sm:$0xff] %v7664_v57  ;;  %v7669_v49 = vpop.eup %5272 }
 0x210   : > { %10833 = vst [vmem:[#allocation107_spill] sm:$0xff] %v10832_v39  ;;  %v4948_v38 = vadd.s32 4294967169, %v3522_v4  ;;  %v3233_v3 = vshrl.u32 %v10657_v2, %v7638_v12  ;;  %v2641_v35 = vsel %vm2639_vm3, %v2640_v29, %v7580_v9  ;;  %v3626_v52 = vshrl.u32 %v3625_v60, 23  ;;  %10837 = vst [vmem:[#allocation110_spill] sm:$0xff] %v7669_v49 }
 0x211   : > { %10835 = vst [vmem:[#allocation108_spill] sm:$0xff] %v7662_v61  ;;  %v2906_v7 = vsel %vm2905_vm8, %v2904_v59, 0  ;;  %v7671_v11 = vor.u32 %v3129_v45, %v3128_v63  ;;  %v3236_v62 = vshrl.u32 %v10658_v46, %v7638_v12  ;;  %v4910_v8 = vadd.s32 4294967294, %v2546_v43 }
 0x212   : > { %v2637_v56 = vmul.u32 %v7572_v48, %v2621_v22  ;;  %v2150_v0 = vsel %vm7614_vm15, %v10818_v14, %v2147_v34  ;;  %v3133_v26 = vor.u32 %v3132_v27, %v3131_v50  ;;  %v3232_v9 = vshll.u32 %v10660_v30, %v7606_v53  ;;  %v7687_v43 = vpop.eup %5274 }
 0x213   : > { %10838 = vst [vmem:[#allocation111_spill] sm:$0xff] %v7671_v11  ;;  %v3235_v59 = vshll.u32 %v10657_v2, %v7606_v53  ;;  %vm10839_vm5 = vcmp.lt.s32.totalorder %v10827_v19, 0  ;;  %v3528_v60 = vadd.s32 1, %v4948_v38  ;;  %v2908_v45 = vand.u32 31, %v2906_v7  ;;  %10840 = vst [vmem:[#allocation112_spill] sm:$0xff] %v7687_v43 }
 0x214   : > { %v2251_v4 = vsel %vm10839_vm5, %v2250_v36, %v2249_v15  ;;  %v7685_v29 = vadd.s32 %v2641_v35, %v2637_v56  ;;  %5276 = vsinq.f32 %v1838_v40  ;;  %v7689_v48 = vor.u32 %v3233_v3, %v3232_v9  ;;  %v10844_v15 = vld [vmem:[#allocation20_spill] sm:$0xff]  ;;  %v7713_v36 = vpop.permute.xlu1 %481 }
 0x215   : > { %v7693_v63 = vmul.f32 %v10730_v20, %v7383_v10  ;;  %v4952_v50 = vadd.s32 4294967169, %v3626_v52  ;;  %vm10510_vm13 = vcmp.lt.s32.totalorder %v7635_v24, 4  ;;  %v3237_v27 = vor.u32 %v3236_v62, %v3235_v59 }
 0x216   : > { %10841 = vst [vmem:[#allocation113_spill] sm:$0xff] %v7689_v48  ;;  %vm10511_vm3 = vcmp.lt.s32.totalorder %v7662_v61, 4  ;;  %vm4911_vm8 = vcmp.lt.s32.totalorder %v4910_v8, 0  ;;  %5278 = vcosq.f32 %v2150_v0  ;;  %v2254_v35 = vsel %vm7644_vm2, %v10827_v19, %v2251_v4 }
 0x217   : > { %v7703_v3 = vsel %vm10510_vm13, %v7671_v11, 920167782  ;;  %v7707_v40 = vsel %vm10510_vm13, %v3133_v26, 1326507024  ;;  %v2643_v52 = vadd.s32 536870912, %v7685_v29  ;;  %vm3529_vm5 = vcmp.gt.s32.totalorder %v3528_v60, 0 }
 0x218   : > { %10842 = vst [vmem:[#allocation114_spill] sm:$0xff] %v7703_v3  ;;  %10843 = vst [vmem:[#allocation115_spill] sm:$0xff] %v7707_v40  ;;  %v675_v22 = vadd.f32 %v10844_v15, %v529_v21  ;;  %v7711_v34 = vsub.s32 32, %v2908_v45  ;;  %5280 = vsinq.f32 %v2150_v0  ;;  %v7718_v38 = vsel %vm10511_vm3, %v7689_v48, 920167782  ;;  %v7970_v1 = vpop.permute.xlu1 %486 }
 0x219   : > { %10845 = vst [vmem:[#allocation20_spill] sm:$0xff] %v7718_v38  ;;  %v2549_v62 = vsel %vm4911_vm8, 0, %v4910_v8  ;;  %v3632_v56 = vadd.s32 1, %v4952_v50  ;;  %5282 = vcosq.f32 %v2254_v35  ;;  %v7722_v26 = vsel %vm10511_vm3, %v3237_v27, 1326507024 }
 0x21a   : > { %10846 = vst [vmem:[#allocation116_spill] sm:$0xff] %v7722_v26  ;;  %v7726_v21 = vmul.f32 %v10732_v31, %v7383_v10  ;;  %v7729_v9 = vadd.f32 %v7509_v37, %v675_v22  ;;  %5284 = vsinq.f32 %v2254_v35  ;;  %v2534_v0 = vadd.s32 %v7369_v33, %v7378_v58 }
 0x21b   : > { %v3530_v59 = vsel %vm3529_vm5, %v3528_v60, 0  ;;  %v7735_v8 = vmul.f32 %v10730_v20, %v7713_v36  ;;  %v2550_v4 = vsub.s32 32, %v2549_v62  ;;  %v2554_v50 = vsub.s32 4294967266, %v2549_v62 }
 0x21c   : > { %10847 = vst [vmem:[#allocation117_spill] sm:$0xff] %v7729_v9  ;;  %v7737_v27 = vshrl.u32 %v2643_v52, 30  ;;  %v2921_v10 = vshrl.u32 %v10657_v2, %v7711_v34  ;;  %v2551_v15 = vshll.u32 %v7564_v28, %v2549_v62  ;;  %vm3633_vm8 = vcmp.gt.s32.totalorder %v3632_v56, 0 }
 0x21d   : > { %10848 = vst [vmem:[#allocation118_spill] sm:$0xff] %v7735_v8  ;;  %v2924_v33 = vshrl.u32 %v10658_v46, %v7711_v34  ;;  %v7745_v58 = vand.u32 31, %v3530_v59  ;;  %v7747_v60 = vshrl.u32 %v2906_v7, 5  ;;  %v2920_v35 = vshll.u32 %v10660_v30, %v2908_v45 }
 0x21e   : > { %10849 = vst [vmem:[#allocation119_spill] sm:$0xff] %v7737_v27  ;;  %v3001_v52 = vand.u32 2139095040, %v7729_v9  ;;  %v7751_v22 = vpop.eup %5276  ;;  %v2912_v11 = vshrl.u32 %v10659_v13, %v7711_v34  ;;  %v2915_v28 = vshrl.u32 %v10661_v41, %v7711_v34  ;;  %v2918_v62 = vshrl.u32 %v10660_v30, %v7711_v34 }
 0x21f   : > { %10850 = vst [vmem:[#allocation120_spill] sm:$0xff] %v7745_v58  ;;  %10851 = vst [vmem:[#allocation121_spill] sm:$0xff] %v7751_v22  ;;  %v2923_v37 = vshll.u32 %v10657_v2, %v2908_v45  ;;  %v2552_v40 = vshrl.u32 %v2534_v0, %v2550_v4  ;;  %v2555_v7 = vadd.s32 127, %v2554_v50  ;;  %v2645_v3 = vshll.u32 %v7737_v27, 30 }
 0x220   : > { %v2922_v24 = vor.u32 %v2921_v10, %v2920_v35  ;;  %v7761_v48 = vpop.eup %5278  ;;  %v2911_v26 = vshll.u32 %v10662_v32, %v2908_v45  ;;  %v2914_v38 = vshll.u32 %v10659_v13, %v2908_v45  ;;  %v2917_v61 = vshll.u32 %v10661_v41, %v2908_v45 }
 0x221   : > { %10852 = vst [vmem:[#allocation122_spill] sm:$0xff] %v7761_v48  ;;  %v2925_v53 = vor.u32 %v2924_v33, %v2923_v37  ;;  %v7767_v12 = vsub.s32 32, %v7745_v58  ;;  %v3634_v16 = vsel %vm3633_vm8, %v3632_v56, 0  ;;  %v10854_v0 = vand.u32 2147483647, %v7522_v47 }
 0x222   : > { %v3002_v50 = vshrl.u32 %v3001_v52, 23  ;;  %v7772_v27 = vpop.eup %5280  ;;  %v7774_v10 = vor.u32 %v2912_v11, %v2911_v26  ;;  %v7776_v35 = vor.u32 %v2915_v28, %v2914_v38  ;;  %v2919_v6 = vor.u32 %v2918_v62, %v2917_v61 }
 0x223   : > { %10853 = vst [vmem:[#allocation123_spill] sm:$0xff] %v7767_v12  ;;  %v2901_v4 = vand.u32 8388607, %v10854_v0  ;;  %10855 = vst [vmem:[#allocation124_spill] sm:$0xff] %v7772_v27  ;;  %vm2929_vm5 = vcmp.lt.s32.totalorder %v7747_v60, 4  ;;  %v7779_v45 = vpop.eup %5282  ;;  %v7783_v37 = vadd.s32 %v7579_v42, %v7586_v17  ;;  %v7786_v56 = vsub.s32 %v7685_v29, %v2645_v3  ;;  %v10866_v27 = vld [vmem:[#allocation12_spill] sm:$0xff] }
 0x224   : > { %10856 = vst [vmem:[#allocation125_spill] sm:$0xff] %v7779_v45  ;;  %v2935_v33 = vsel %vm2929_vm5, %v2922_v24, 920167782  ;;  %v7791_v26 = vpop.eup %5284  ;;  %v7793_v38 = vor.u32 %v2552_v40, %v2551_v15  ;;  %v2556_v61 = vshll.u32 %v2555_v7, 23  ;;  %v7795_v52 = vshrl.u32 %v3530_v59, 5 }
 0x225   : > { %10857 = vst [vmem:[#allocation126_spill] sm:$0xff] %v7791_v26  ;;  %v2939_v28 = vsel %vm2929_vm5, %v2925_v53, 1326507024  ;;  %v3545_v42 = vshrl.u32 %v10657_v2, %v7767_v12  ;;  %v7801_v17 = vand.u32 31, %v3634_v16  ;;  %vm2926_vm8 = vcmp.lt.s32.totalorder %v7747_v60, 1 }
 0x226   : > { %10858 = vst [vmem:[#allocation127_spill] sm:$0xff] %v7795_v52  ;;  %vm2928_vm13 = vcmp.lt.s32.totalorder %v7747_v60, 3  ;;  %v2902_v29 = vor.u32 8388608, %v2901_v4  ;;  %v2934_v3 = vsel %vm2926_vm8, %v7774_v10, %v7776_v35  ;;  %v4928_v59 = vadd.s32 4294967169, %v3002_v50 }
 0x227   : > { %10859 = vst [vmem:[#allocation128_spill] sm:$0xff] %v7801_v17  ;;  %v2936_v40 = vsel %vm2928_vm13, %v2919_v6, %v2935_v33  ;;  %v2648_v53 = vsub.s32 0, %v7786_v56  ;;  %v7814_v15 = vshrl.u32 %v10658_v46, %v7767_v12  ;;  %v2938_v62 = vsel %vm2926_vm8, %v7776_v35, %v2919_v6 }
 0x228   : > { %v2940_v7 = vsel %vm2928_vm13, %v2922_v24, %v2939_v28  ;;  %v3544_v0 = vshll.u32 %v10660_v30, %v7745_v58  ;;  %v7825_v4 = vshll.u32 %v10657_v2, %v7745_v58  ;;  %v7827_v50 = vshrl.u32 %v3634_v16, 5 }
 0x229   : > { %10860 = vst [vmem:[#allocation129_spill] sm:$0xff] %v7814_v15  ;;  %vm10521_vm3 = vcmp.lt.s32.totalorder %v7747_v60, 2  ;;  %v7830_v33 = vor.u32 4788187, %v2556_v61  ;;  %v7834_v12 = vsub.s32 32, %v7801_v17  ;;  %v7842_v51 = vshll.u32 %v2902_v29, 8 }
 0x22a   : > { %10861 = vst [vmem:[#allocation130_spill] sm:$0xff] %v7825_v4  ;;  %10862 = vst [vmem:[#allocation131_spill] sm:$0xff] %v7827_v50  ;;  %v2937_v24 = vsel %vm10521_vm3, %v2934_v3, %v2936_v40  ;;  %v7838_v28 = vor.u32 %v3545_v42, %v3544_v0  ;;  %v2941_v58 = vsel %vm10521_vm3, %v2938_v62, %v2940_v7  ;;  %v3008_v16 = vadd.s32 1, %v4928_v59  ;;  %v10868_v40 = vld [vmem:[#allocation35_spill] sm:$0xff]  ;;  %v10869_v61 = vld [vmem:[#allocation32_spill] sm:$0xff] }
 0x22b   : > { %10863 = vst [vmem:[#allocation132_spill] sm:$0xff] %v7834_v12  ;;  %v4913_v48 = vmin.u32 %v2648_v53, %v7786_v56  ;;  %v7849_v11 = vshll.u32 %v10660_v30, %v7801_v17  ;;  %v7853_v42 = vmul.u32.u64.low %v7842_v51, %v2937_v24  ;;  %v7854_v3 = vmul.u32.u64.high %v7842_v51, %v2937_v24, %v7853_v42  ;;  %v10878_v15 = vld [vmem:[#allocation42_spill] sm:$0xff] }
 0x22c   : > { %10864 = vst [vmem:[#allocation133_spill] sm:$0xff] %v7838_v28  ;;  %v936_v29 = vshrl.u32 %v10659_v13, %v10868_v40  ;;  %v939_v59 = vshrl.u32 %v10661_v41, %v10868_v40  ;;  %v2910_v53 = vshrl.u32 %v10662_v32, %v7711_v34  ;;  %v942_v0 = vshrl.u32 %v10660_v30, %v10868_v40 }
 0x22d   : > { %10865 = vst [vmem:[#allocation134_spill] sm:$0xff] %v7849_v11  ;;  %10867 = vst [vmem:[#allocation12_spill] sm:$0xff] %v7853_v42  ;;  %v7864_v62 = vmul.u32.u64.low %v7842_v51, %v2941_v58  ;;  %v7865_v7 = vmul.u32.u64.high %v7842_v51, %v2941_v58, %v7864_v62  ;;  %v2931_v24 = vsel %vm2929_vm5, %v2919_v6, 2102212464  ;;  %vm3009_vm3 = vcmp.gt.s32.totalorder %v3008_v16, 0 }
 0x22e   : > { %v935_v18 = vshll.u32 %v10662_v32, %v10869_v61  ;;  %v938_v14 = vshll.u32 %v10659_v13, %v10869_v61  ;;  %v10870_v45 = vand.u32 2147483647, %v10866_v27  ;;  %v941_v58 = vshll.u32 %v10661_v41, %v10869_v61 }
 0x22f   : > { %v944_v62 = vshll.u32 %v10660_v30, %v10869_v61  ;;  %v945_v26 = vshrl.u32 %v10657_v2, %v10868_v40  ;;  %v947_v19 = vshll.u32 %v10657_v2, %v10869_v61  ;;  %v948_v57 = vshrl.u32 %v10658_v46, %v10868_v40 }
 0x230   : > { %v925_v34 = vand.u32 8388607, %v10870_v45  ;;  %v937_v6 = vor.u32 %v936_v29, %v935_v18  ;;  %v940_v39 = vor.u32 %v939_v59, %v938_v14  ;;  %v7889_v45 = vshll.u32 %v10657_v2, %v7801_v17  ;;  %v10872_v29 = vld [vmem:[#allocation31_spill] sm:$0xff] }
 0x231   : > { %v3010_v49 = vsel %vm3009_vm3, %v3008_v16, 0  ;;  %v943_v43 = vor.u32 %v942_v0, %v941_v58  ;;  %v946_v22 = vor.u32 %v945_v26, %v944_v62  ;;  %v2930_v18 = vsel %vm2926_vm8, %v2910_v53, %v7774_v10 }
 0x232   : > { %10871 = vst [vmem:[#allocation35_spill] sm:$0xff] %v7889_v45  ;;  %v949_v14 = vor.u32 %v948_v57, %v947_v19  ;;  %vm953_vm5 = vcmp.lt.s32.totalorder %v10872_v29, 4  ;;  %v2932_v61 = vsel %vm2928_vm13, %v7776_v35, %v2931_v24  ;;  %v926_v59 = vor.u32 8388608, %v925_v34 }
 0x233   : > { %vm950_vm12 = vcmp.lt.s32.totalorder %v10872_v29, 1  ;;  %v959_v17 = vsel %vm953_vm5, %v946_v22, 920167782  ;;  %v2650_v16 = vclz %v4913_v48  ;;  %v3012_v0 = vand.u32 31, %v3010_v49 }
 0x234   : > { %vm952_vm3 = vcmp.lt.s32.totalorder %v10872_v29, 3  ;;  %v958_v26 = vsel %vm950_vm12, %v937_v6, %v940_v39  ;;  %v955_v58 = vsel %vm953_vm5, %v943_v43, 2102212464  ;;  %v962_v57 = vsel %vm950_vm12, %v940_v39, %v943_v43 }
 0x235   : > { %v960_v19 = vsel %vm952_vm3, %v943_v43, %v959_v17  ;;  %v963_v10 = vsel %vm953_vm5, %v949_v14, 1326507024  ;;  %vm10873_vm13 = vcmp.lt.s32.totalorder %v7747_v60, 2  ;;  %v2952_v53 = vadd.s32 1, %v7854_v3 }
 0x236   : > { %v2933_v35 = vsel %vm10873_vm13, %v2930_v18, %v2932_v61  ;;  %v934_v48 = vshrl.u32 %v10662_v32, %v10868_v40  ;;  %vm951_vm8 = vcmp.lt.s32.totalorder %v10872_v29, 2  ;;  %vm2951_vm15 = vc.u32 %v7865_v7, %v7853_v42  ;;  %v10876_v29 = vld [vmem:[#allocation16_spill] sm:$0xff] }
 0x237   : > { %v961_v17 = vsel %vm951_vm8, %v958_v26, %v960_v19  ;;  %v964_v43 = vsel %vm952_vm3, %v946_v22, %v963_v10  ;;  %v966_v24 = vshll.u32 %v926_v59, 8  ;;  %v7919_v34 = vsub.s32 32, %v3012_v0 }
 0x238   : > { %v954_v60 = vsel %vm950_vm12, %v934_v48, %v937_v6  ;;  %v956_v40 = vsel %vm952_vm3, %v940_v39, %v955_v58  ;;  %v965_v62 = vsel %vm951_vm8, %v962_v57, %v964_v43  ;;  %v7934_v22 = vadd.s32 4294967294, %v2650_v16 }
 0x239   : > { %v7927_v18 = vmul.u32.u64.low %v966_v24, %v965_v62  ;;  %v7928_v14 = vmul.u32.u64.high %v966_v24, %v965_v62, %v7927_v18  ;;  %v7930_v61 = vmul.u32.u64.low %v966_v24, %v961_v17  ;;  %v7931_v26 = vmul.u32.u64.high %v966_v24, %v961_v17, %v7930_v61  ;;  %v10877_v62 = vld [vmem:[#allocation45_spill] sm:$0xff] }
 0x23a   : > { %v7938_v59 = vshrl.u32 %v10657_v2, %v7834_v12  ;;  %v2949_v6 = vmul.u32 %v7842_v51, %v2933_v35  ;;  %v10875_v39 = vand.u32 2147483647, %v7729_v9  ;;  %v2953_v19 = vsel %vm2951_vm15, %v2952_v53, %v7854_v3 }
 0x23b   : > { %v7946_v57 = vshrl.u32 %v3010_v49, 5  ;;  %v3015_v10 = vshll.u32 %v10662_v32, %v3012_v0  ;;  %v957_v16 = vsel %vm951_vm8, %v954_v60, %v956_v40  ;;  %v3016_v48 = vshrl.u32 %v10659_v13, %v7919_v34 }
 0x23c   : > { %10874 = vst [vmem:[#allocation32_spill] sm:$0xff] %v7938_v59  ;;  %v7943_v58 = vand.u32 8388607, %v10875_v39  ;;  %v3018_v17 = vshll.u32 %v10659_v13, %v3012_v0  ;;  %v3019_v51 = vshrl.u32 %v10661_v41, %v7919_v34  ;;  %v3021_v35 = vshll.u32 %v10661_v41, %v3012_v0 }
 0x23d   : > { %v3022_v3 = vshrl.u32 %v10660_v30, %v7919_v34  ;;  %vm975_vm12 = vc.u32 %v7928_v14, %v7930_v61  ;;  %v976_v49 = vadd.s32 1, %v7931_v26  ;;  %v3024_v43 = vshll.u32 %v10660_v30, %v3012_v0 }
 0x23e   : > { %v3025_v60 = vshrl.u32 %v10657_v2, %v7919_v34  ;;  %v973_v40 = vmul.u32 %v966_v24, %v957_v16  ;;  %v1144_v18 = vshrl.u32 %v10659_v13, %v10877_v62  ;;  %v3028_v39 = vshrl.u32 %v10658_v46, %v7919_v34 }
 0x23f   : > { %v977_v55 = vsel %vm975_vm12, %v976_v49, %v7931_v26  ;;  %v1147_v45 = vshrl.u32 %v10661_v41, %v10877_v62  ;;  %v1150_v53 = vshrl.u32 %v10660_v30, %v10877_v62  ;;  %v1143_v24 = vshll.u32 %v10662_v32, %v10878_v15 }
 0x240   : > { %v978_v4 = vadd.s32 %v977_v55, %v973_v40  ;;  %v1146_v16 = vshll.u32 %v10659_v13, %v10878_v15  ;;  %v1149_v59 = vshll.u32 %v10661_v41, %v10878_v15  ;;  %v7983_v11 = vor.u32 %v3016_v48, %v3015_v10 }
 0x241   : > { %v7985_v9 = vor.u32 %v3019_v51, %v3018_v17  ;;  %v3027_v26 = vshll.u32 %v10657_v2, %v3012_v0  ;;  %v10879_v49 = vand.u32 2147483647, %v10876_v29  ;;  %v1145_v55 = vor.u32 %v1144_v18, %v1143_v24 }
 0x242   : > { %v979_v47 = vadd.s32 536870912, %v978_v4  ;;  %v1148_v40 = vor.u32 %v1147_v45, %v1146_v16  ;;  %v1151_v5 = vor.u32 %v1150_v53, %v1149_v59  ;;  %v10880_v8 = vand.u32 2147483647, %v7830_v33  ;;  %v8004_v45 = vpop.permute.xlu1 %601  ;;  %v10882_v59 = vld [vmem:[#allocation62_spill] sm:$0xff] }
 0x243   : > { %v1133_v50 = vand.u32 8388607, %v10879_v49  ;;  %v10881_v25 = vcvt.s32.f32 %v7793_v38  ;;  %v3006_v15 = vor.u32 8388608, %v7943_v58  ;;  %v3026_v10 = vor.u32 %v3025_v60, %v3024_v43 }
 0x244   : > { %v3029_v48 = vor.u32 %v3028_v39, %v3027_v26  ;;  %v7998_v0 = vadd.s32 %v2953_v19, %v2949_v6  ;;  %v8000_v17 = vor.u32 %v3022_v3, %v3021_v35  ;;  %vm10548_vm5 = vcmp.lt.s32.totalorder %v7946_v57, 1  ;;  %v10884_v3 = vld [vmem:[#allocation40_spill] sm:$0xff] }
 0x245   : > { %v7994_v42 = vmul.f32 %v10881_v25, %v10880_v8  ;;  %vm3032_vm3 = vcmp.lt.s32.totalorder %v7946_v57, 3  ;;  %v8006_v33 = vshrl.u32 %v979_v47, 30  ;;  %v1134_v25 = vor.u32 8388608, %v1133_v50 }
 0x246   : > { %vm1158_vm13 = vcmp.lt.s32.totalorder %v10725_v23, 1  ;;  %vm1160_vm8 = vcmp.lt.s32.totalorder %v10725_v23, 3  ;;  %vm10549_vm15 = vcmp.lt.s32.totalorder %v7946_v57, 4  ;;  %v3038_v8 = vsel %vm10548_vm5, %v7983_v11, %v7985_v9 }
 0x247   : > { %v1166_v38 = vsel %vm1158_vm13, %v1145_v55, %v1148_v40  ;;  %v1168_v47 = vsel %vm1160_vm8, %v1151_v5, %v10882_v59  ;;  %v3039_v50 = vsel %vm10549_vm15, %v3026_v10, 920167782  ;;  %v3043_v6 = vsel %vm10549_vm15, %v3029_v48, 1326507024  ;;  %v765_v48 = vpop.permute.xlu1 %764 }
 0x248   : > { %v981_v58 = vshll.u32 %v8006_v33, 30  ;;  %v1170_v19 = vsel %vm1158_vm13, %v1148_v40, %v1151_v5  ;;  %v1142_v51 = vshrl.u32 %v10662_v32, %v10877_v62  ;;  %vm1159_vm12 = vcmp.lt.s32.totalorder %v10725_v23, 2 }
 0x249   : > { %vm10883_vm5 = vcmp.lt.s32.totalorder %v10725_v23, 4  ;;  %v1172_v53 = vsel %vm1160_vm8, %v10884_v3, %v7239_v44  ;;  %v1169_v60 = vsel %vm1159_vm12, %v1166_v38, %v1168_v47  ;;  %v1174_v39 = vshll.u32 %v1134_v25, 8 }
 0x24a   : > { %v1163_v35 = vsel %vm10883_vm5, %v1151_v5, 2102212464  ;;  %v8037_v43 = vsub.s32 %v978_v4, %v981_v58  ;;  %v1173_v18 = vsel %vm1159_vm12, %v1170_v19, %v1172_v53  ;;  %v3040_v62 = vsel %vm3032_vm3, %v8000_v17, %v3039_v50 }
 0x24b   : > { %vm10885_vm5 = vcmp.lt.s32.totalorder %v7946_v57, 1  ;;  %v3044_v44 = vsel %vm3032_vm3, %v3026_v10, %v3043_v6  ;;  %v1162_v4 = vsel %vm1158_vm13, %v1142_v51, %v1145_v55  ;;  %v1164_v16 = vsel %vm1160_vm8, %v1148_v40, %v1163_v35  ;;  %v10886_v10 = vld [vmem:[#allocation21_spill] sm:$0xff] }
 0x24c   : > { %v3042_v5 = vsel %vm10885_vm5, %v7985_v9, %v8000_v17  ;;  %v984_v24 = vsub.s32 0, %v8037_v43  ;;  %v8057_v26 = vmul.u32.u64.low %v1174_v39, %v1173_v18  ;;  %v8058_v49 = vmul.u32.u64.high %v1174_v39, %v1173_v18, %v8057_v26 }
 0x24d   : > { %vm3031_vm15 = vcmp.lt.s32.totalorder %v7946_v57, 2  ;;  %v8061_v25 = vmul.u32.u64.low %v1174_v39, %v1169_v60  ;;  %v8062_v38 = vmul.u32.u64.high %v1174_v39, %v1169_v60, %v8061_v25  ;;  %v678_v59 = vadd.f32 %v10886_v10, %v7693_v63 }
 0x24e   : > { %v8069_v55 = vshrl.u32 %v10658_v46, %v7834_v12  ;;  %v3041_v40 = vsel %vm3031_vm15, %v3038_v8, %v3040_v62  ;;  %v8073_v47 = vshll.u32 %v3006_v15, 8  ;;  %v4849_v50 = vmin.u32 %v984_v24, %v8037_v43 }
 0x24f   : > { %v2955_v6 = vadd.s32 536870912, %v7998_v0  ;;  %v3045_v58 = vsel %vm3031_vm15, %v3042_v5, %v3044_v44  ;;  %v1165_v19 = vsel %vm1159_vm12, %v1162_v4, %v1164_v16  ;;  %v8081_v63 = vadd.f32 %v765_v48, %v678_v59  ;;  %v10893_v4 = vld [vmem:[#allocation22_spill] sm:$0xff] }
 0x250   : > { %10887 = vst [vmem:[#allocation31_spill] sm:$0xff] %v8069_v55  ;;  %vm10889_vm13 = vcmp.lt.s32.totalorder %v7934_v22, 0  ;;  %vm10890_vm8 = vcmp.lt.s32.totalorder %v7795_v52, 4  ;;  %v986_v35 = vclz %v4849_v50  ;;  %vm1183_vm12 = vc.u32 %v8058_v49, %v8061_v25 }
 0x251   : > { %10888 = vst [vmem:[#allocation16_spill] sm:$0xff] %v8081_v63  ;;  %v8087_v8 = vsel %vm10889_vm13, 0, %v7934_v22  ;;  %v8092_v15 = vsel %vm10890_vm8, %v7838_v28, 920167782  ;;  %v8095_v3 = vmul.u32.u64.low %v8073_v47, %v3041_v40  ;;  %v8096_v53 = vmul.u32.u64.high %v8073_v47, %v3041_v40, %v8095_v3 }
 0x252   : > { %10891 = vst [vmem:[#allocation45_spill] sm:$0xff] %v8092_v15  ;;  %v1184_v23 = vadd.s32 1, %v8062_v38  ;;  %v8103_v60 = vmul.u32.u64.low %v8073_v47, %v3045_v58  ;;  %v8104_v22 = vmul.u32.u64.high %v8073_v47, %v3045_v58, %v8103_v60  ;;  %v4850_v18 = vadd.s32 4294967294, %v986_v35 }
 0x253   : > { %v1181_v62 = vmul.u32 %v1174_v39, %v1165_v19  ;;  %v8106_v5 = vshrl.u32 %v2955_v6, 30  ;;  %v679_v24 = vadd.f32 %v10893_v4, %v7726_v21  ;;  %v3313_v16 = vand.u32 2139095040, %v8081_v63 }
 0x254   : > { %v1185_v44 = vsel %vm1183_vm12, %v1184_v23, %v8062_v38  ;;  %v2654_v26 = vsub.s32 32, %v8087_v8  ;;  %v3014_v10 = vshrl.u32 %v10662_v32, %v7919_v34  ;;  %vm4851_vm5 = vcmp.lt.s32.totalorder %v4850_v18, 0 }
 0x255   : > { %10892 = vst [vmem:[#allocation42_spill] sm:$0xff] %v8106_v5  ;;  %v1186_v59 = vadd.s32 %v1185_v44, %v1181_v62  ;;  %vm10894_vm13 = vcmp.lt.s32.totalorder %v7946_v57, 4  ;;  %v989_v40 = vsel %vm4851_vm5, 0, %v4850_v18  ;;  %v8118_v50 = vadd.f32 %v765_v48, %v679_v24 }
 0x256   : > { %v3035_v39 = vsel %vm10894_vm13, %v8000_v17, 2102212464  ;;  %v3314_v38 = vshrl.u32 %v3313_v16, 23  ;;  %v2658_v6 = vsub.s32 4294967266, %v8087_v8  ;;  %v974_v21 = vadd.s32 %v7930_v61, %v7928_v14 }
 0x257   : > { %10895 = vst [vmem:[#allocation62_spill] sm:$0xff] %v8118_v50  ;;  %v990_v58 = vsub.s32 32, %v989_v40  ;;  %v994_v19 = vsub.s32 4294967266, %v989_v40  ;;  %v2957_v35 = vshll.u32 %v8106_v5, 30  ;;  %vm10896_vm8 = vcmp.lt.s32.totalorder %v7946_v57, 1 }
 0x258   : > { %v3034_v34 = vsel %vm10896_vm8, %v3014_v10, %v7983_v11  ;;  %v1187_v23 = vadd.s32 536870912, %v1186_v59  ;;  %v4940_v60 = vadd.s32 4294967169, %v3314_v38  ;;  %v3036_v17 = vsel %vm3032_vm3, %v7985_v9, %v3035_v39 }
 0x259   : > { %v991_v48 = vshll.u32 %v8037_v43, %v989_v40  ;;  %v992_v18 = vshrl.u32 %v974_v21, %v990_v58  ;;  %v995_v62 = vadd.s32 127, %v994_v19  ;;  %v3056_v14 = vadd.s32 1, %v8096_v53 }
 0x25a   : > { %v8132_v61 = vshrl.u32 %v1187_v23, 30  ;;  %v3320_v44 = vadd.s32 1, %v4940_v60  ;;  %v3417_v4 = vand.u32 2139095040, %v8118_v50  ;;  %v8135_v24 = vadd.s32 127, %v2658_v6 }
 0x25b   : > { %vm3055_vm12 = vc.u32 %v8104_v22, %v8095_v3  ;;  %v993_v11 = vor.u32 %v992_v18, %v991_v48  ;;  %v996_v16 = vshll.u32 %v995_v62, 23  ;;  %v8140_v9 = vsub.s32 %v7998_v0, %v2957_v35 }
 0x25c   : > { %v3037_v43 = vsel %vm3031_vm15, %v3034_v34, %v3036_v17  ;;  %v1189_v10 = vshll.u32 %v8132_v61, 30  ;;  %vm3321_vm3 = vcmp.gt.s32.totalorder %v3320_v44, 0  ;;  %v1004_v40 = vsub.s32 4, %v8006_v33 }
 0x25d   : > { %v997_v39 = vor.u32 4788187, %v996_v16  ;;  %v10550_v38 = vand.u32 2147483647, %v8081_v63  ;;  %v3322_v6 = vsel %vm3321_vm3, %v3320_v44, 0  ;;  %v3057_v21 = vsel %vm3055_vm12, %v3056_v14, %v8096_v53 }
 0x25e   : > { %v8148_v58 = vsub.s32 %v1186_v59, %v1189_v10  ;;  %v3324_v19 = vand.u32 31, %v3322_v6  ;;  %v3418_v23 = vshrl.u32 %v3417_v4, 23  ;;  %v3053_v0 = vmul.u32 %v8073_v47, %v3037_v43 }
 0x25f   : > { %vm920_vm5 = vcmp.lt.s32.totalorder %v10866_v27, 0  ;;  %v998_v57 = vand.u32 2147483647, %v997_v39  ;;  %v1000_v35 = vcvt.s32.f32 %v993_v11  ;;  %v2960_v34 = vsub.s32 0, %v8140_v9 }
 0x260   : > { %v10897_v60 = vand.u32 2147483647, %v10866_v27  ;;  %v1192_v53 = vsub.s32 0, %v8148_v58  ;;  %v8160_v59 = vsub.s32 32, %v3324_v19  ;;  %v8162_v48 = vadd.s32 %v3057_v21, %v3053_v0 }
 0x261   : > { %v1001_v18 = vmul.f32 %v1000_v35, %v998_v57  ;;  %v8167_v47 = vsel %vm920_vm5, %v1004_v40, %v8006_v33  ;;  %v3317_v62 = vand.u32 8388607, %v10550_v38  ;;  %v1182_v14 = vadd.s32 %v8061_v25, %v8058_v49 }
 0x262   : > { %vm8155_vm15 = vcmp.le.f32.partialorder %v10897_v60, 0.7853982  ;;  %v4857_v44 = vmin.u32 %v1192_v53, %v8148_v58  ;;  %v3328_v4 = vshrl.u32 %v10659_v13, %v8160_v59  ;;  %v4944_v11 = vadd.s32 4294967169, %v3418_v23 }
 0x263   : > { %v1002_v16 = vxor.u32 2147483648, %v1001_v18  ;;  %v3331_v43 = vshrl.u32 %v10661_v41, %v8160_v59  ;;  %v3334_v33 = vshrl.u32 %v10660_v30, %v8160_v59  ;;  %v3337_v10 = vshrl.u32 %v10657_v2, %v8160_v59 }
 0x264   : > { %v1194_v39 = vclz %v4857_v44  ;;  %v8182_v40 = vshrl.u32 %v3322_v6, 5  ;;  %v3327_v49 = vshll.u32 %v10662_v32, %v3324_v19  ;;  %v3330_v25 = vshll.u32 %v10659_v13, %v3324_v19 }
 0x265   : > { %v1003_v21 = vsel %vm920_vm5, %v1002_v16, %v1001_v18  ;;  %v3318_v23 = vor.u32 8388608, %v3317_v62  ;;  %v3333_v0 = vshll.u32 %v10661_v41, %v3324_v19  ;;  %v3336_v57 = vshll.u32 %v10660_v30, %v3324_v19 }
 0x266   : > { %v1006_v35 = vsel %vm8155_vm15, %v10866_v27, %v1003_v21  ;;  %v4858_v60 = vadd.s32 4294967294, %v1194_v39  ;;  %v8193_v53 = vor.u32 %v3328_v4, %v3327_v49  ;;  %v8195_v6 = vor.u32 %v3331_v43, %v3330_v25 }
 0x267   : > { %v3335_v44 = vor.u32 %v3334_v33, %v3333_v0  ;;  %v3338_v38 = vor.u32 %v3337_v10, %v3336_v57  ;;  %v3339_v51 = vshll.u32 %v10657_v2, %v3324_v19  ;;  %v3340_v18 = vshrl.u32 %v10658_v46, %v8160_v59  ;;  %v10900_v19 = vld [vmem:[#allocation17_spill] sm:$0xff] }
 0x268   : > { %5286 = vcosq.f32 %v1006_v35  ;;  %vm4859_vm13 = vcmp.lt.s32.totalorder %v4858_v60, 0  ;;  %vm3342_vm8 = vcmp.lt.s32.totalorder %v8182_v40, 1  ;;  %v3424_v62 = vadd.s32 1, %v4944_v11 }
 0x269   : > { %5288 = vsinq.f32 %v1006_v35  ;;  %v1197_v16 = vsel %vm4859_vm13, 0, %v4858_v60  ;;  %v3341_v21 = vor.u32 %v3340_v18, %v3339_v51  ;;  %vm10552_vm12 = vcmp.lt.s32.totalorder %v8182_v40, 2 }
 0x26a   : > { %v1198_v4 = vsub.s32 32, %v1197_v16  ;;  %v1202_v43 = vsub.s32 4294967266, %v1197_v16  ;;  %vm3344_vm3 = vcmp.lt.s32.totalorder %v8182_v40, 3  ;;  %vm3345_vm5 = vcmp.lt.s32.totalorder %v8182_v40, 4 }
 0x26b   : > { %vm10571_vm6 = vcmp.lt.s32.totalorder %v10900_v19, 0  ;;  %v1199_v33 = vshll.u32 %v8148_v58, %v1197_v16  ;;  %v3350_v11 = vsel %vm3342_vm8, %v8193_v53, %v8195_v6  ;;  %v3351_v51 = vsel %vm3345_vm5, %v3338_v38, 920167782 }
 0x26c   : > { %v3354_v10 = vsel %vm3342_vm8, %v8195_v6, %v3335_v44  ;;  %v1200_v39 = vshrl.u32 %v1182_v14, %v1198_v4  ;;  %v1203_v49 = vadd.s32 127, %v1202_v43  ;;  %v3352_v25 = vsel %vm3344_vm3, %v3335_v44, %v3351_v51 }
 0x26d   : > { %v3355_v58 = vsel %vm3345_vm5, %v3341_v21, 1326507024  ;;  %v3059_v0 = vadd.s32 536870912, %v8162_v48  ;;  %v1212_v57 = vsub.s32 4, %v8132_v61  ;;  %v3353_v35 = vsel %vm10552_vm12, %v3350_v11, %v3352_v25 }
 0x26e   : > { %v3356_v60 = vsel %vm3344_vm3, %v3338_v38, %v3355_v58  ;;  %v1201_v18 = vor.u32 %v1200_v39, %v1199_v33  ;;  %v1204_v16 = vshll.u32 %v1203_v49, 23  ;;  %v8227_v4 = vshll.u32 %v3318_v23, 8 }
 0x26f   : > { %v3357_v14 = vsel %vm10552_vm12, %v3354_v10, %v3356_v60  ;;  %v2656_v21 = vshrl.u32 %v7783_v37, %v2654_v26  ;;  %v2660_v43 = vshll.u32 %v8135_v24, 23  ;;  %v1007_v11 = vsel %vm8155_vm15, 0, %v8167_v47 }
 0x270   : > { %vm1128_vm13 = vcmp.lt.s32.totalorder %v10876_v29, 0  ;;  %v1205_v38 = vor.u32 4788187, %v1204_v16  ;;  %v8238_v33 = vmul.u32.u64.low %v8227_v4, %v3353_v35  ;;  %v8239_v51 = vmul.u32.u64.high %v8227_v4, %v3353_v35, %v8238_v33 }
 0x271   : > { %vm3425_vm12 = vcmp.gt.s32.totalorder %v3424_v62, 0  ;;  %v8242_v23 = vshrl.u32 %v3059_v0, 30  ;;  %v1213_v37 = vsel %vm1128_vm13, %v1212_v57, %v8132_v61  ;;  %v4925_v47 = vmin.u32 %v2960_v34, %v8140_v9 }
 0x272   : > { %10901 = vst [vmem:[#allocation40_spill] sm:$0xff] %v8238_v33  ;;  %v8248_v26 = vmul.u32.u64.low %v8227_v4, %v3357_v14  ;;  %v8249_v24 = vmul.u32.u64.high %v8227_v4, %v3357_v14, %v8248_v26  ;;  %v5287_v17 = vpop.eup %5286  ;;  %v1011_v10 = vadd.s32 3, %v1007_v11  ;;  %v1206_v39 = vand.u32 2147483647, %v1205_v38 }
 0x273   : > { %10902 = vst [vmem:[#allocation21_spill] sm:$0xff] %v8242_v23  ;;  %v1208_v49 = vcvt.s32.f32 %v1201_v18  ;;  %v5289_v25 = vpop.eup %5288  ;;  %v2655_v58 = vshll.u32 %v7786_v56, %v8087_v8  ;;  %v8258_v0 = vmul.f32 %v10732_v31, %v7713_v36  ;;  %v10904_v61 = vand.u32 2147483647, %v10876_v29 }
 0x274   : > { %v3426_v35 = vsel %vm3425_vm12, %v3424_v62, 0  ;;  %v10907_v34 = vxor.u32 2147483648, %v7994_v42  ;;  %v3347_v36 = vsel %vm3345_vm5, %v3335_v44, 2102212464  ;;  %v8279_v16 = vor.u32 4788187, %v2660_v43 }
 0x275   : > { %10903 = vst [vmem:[#allocation22_spill] sm:$0xff] %v8258_v0  ;;  %vm8262_vm15 = vcmp.le.f32.partialorder %v10904_v61, 0.7853982  ;;  %v1209_v18 = vmul.f32 %v1208_v49, %v1206_v39  ;;  %v8277_v8 = vor.u32 %v2656_v21, %v2655_v58  ;;  %v3061_v62 = vshll.u32 %v8242_v23, 30 }
 0x276   : > { %v8271_v60 = vsel %vm10571_vm6, %v10907_v34, %v7994_v42  ;;  %v1215_v56 = vsel %vm8262_vm15, 0, %v1213_v37  ;;  %v3326_v14 = vshrl.u32 %v10662_v32, %v8160_v59  ;;  %v2962_v11 = vclz %v4925_v47 }
 0x277   : > { %v1012_v38 = vand.u32 3, %v1011_v10  ;;  %v1210_v42 = vxor.u32 2147483648, %v1209_v18  ;;  %v8284_v26 = vand.u32 31, %v3426_v35  ;;  %v1219_v39 = vadd.s32 3, %v1215_v56 }
 0x278   : > { %v3346_v37 = vsel %vm3342_vm8, %v3326_v14, %v8193_v53  ;;  %v3348_v44 = vsel %vm3344_vm3, %v8195_v6, %v3347_v36  ;;  %v10553_v21 = vand.u32 2147483647, %v8118_v50  ;;  %v1015_v43 = vxor.u32 2147483648, %v5289_v25  ;;  %v10908_v6 = vld [vmem:[#allocation6_spill] sm:$0xff] }
 0x279   : > { %v1018_v49 = vxor.u32 2147483648, %v5287_v17  ;;  %v1211_v59 = vsel %vm1128_vm13, %v1210_v42, %v1209_v18  ;;  %v3368_v47 = vadd.s32 1, %v8239_v51  ;;  %v8297_v10 = vsub.s32 %v8162_v48, %v3061_v62 }
 0x27a   : > { %v1214_v53 = vsel %vm8262_vm15, %v10876_v29, %v1211_v59  ;;  %vm3367_vm8 = vc.u32 %v8249_v24, %v8238_v33  ;;  %v10554_v58 = vand.u32 2147483647, %v10908_v6  ;;  %vm1014_vm12 = vcmp.eq.s32.totalorder %v1012_v38, 0 }
 0x27b   : > { %5290 = vcosq.f32 %v1214_v53  ;;  %vm10909_vm3 = vcmp.lt.s32.totalorder %v8182_v40, 2  ;;  %v8308_v34 = vsub.s32 32, %v8284_v26  ;;  %vm1017_vm5 = vcmp.eq.s32.totalorder %v1012_v38, 2 }
 0x27c   : > { %v3349_v61 = vsel %vm10909_vm3, %v3346_v37, %v3348_v44  ;;  %5292 = vsinq.f32 %v1214_v53  ;;  %v1220_v48 = vand.u32 3, %v1219_v39  ;;  %v8312_v57 = vand.u32 8388607, %v10553_v21 }
 0x27d   : > { %v8314_v18 = vadd.s32 4294967294, %v2962_v11  ;;  %v1016_v56 = vsel %vm1014_vm12, %v5287_v17, %v1015_v43  ;;  %v1019_v36 = vsel %vm1017_vm5, %v1018_v49, %v5289_v25  ;;  %v3369_v62 = vsel %vm3367_vm8, %v3368_v47, %v8239_v51  ;;  %v10910_v25 = vld [vmem:[#allocation34_spill] sm:$0xff]  ;;  %v10911_v47 = vld [vmem:[#allocation29_spill] sm:$0xff] }
 0x27e   : > { %vm1010_vm13 = vweird.f32 %v10866_v27  ;;  %v3365_v40 = vmul.u32 %v8227_v4, %v3349_v61  ;;  %v8322_v42 = vand.u32 8388607, %v10554_v58  ;;  %vm1013_vm15 = vcmp.lt.s32.totalorder %v1012_v38, 2 }
 0x27f   : > { %v3432_v39 = vshrl.u32 %v10659_v13, %v8308_v34  ;;  %v3435_v17 = vshrl.u32 %v10661_v41, %v8308_v34  ;;  %v8330_v51 = vshrl.u32 %v10662_v32, %v10910_v25  ;;  %v1020_v11 = vsel %vm1013_vm15, %v1016_v56, %v1019_v36 }
 0x280   : > { %vm1222_vm8 = vcmp.eq.s32.totalorder %v1220_v48, 0  ;;  %v8332_v37 = vadd.s32 %v3369_v62, %v3365_v40  ;;  %vm1221_vm12 = vcmp.lt.s32.totalorder %v1220_v48, 2  ;;  %vm1225_vm3 = vcmp.eq.s32.totalorder %v1220_v48, 2 }
 0x281   : > { %v3431_v38 = vshll.u32 %v10662_v32, %v8284_v26  ;;  %v3434_v44 = vshll.u32 %v10659_v13, %v8284_v26  ;;  %v3438_v43 = vshrl.u32 %v10660_v30, %v8308_v34  ;;  %vm1218_vm5 = vweird.f32 %v10876_v29 }
 0x282   : > { %v8342_v49 = vshrl.u32 %v3426_v35, 5  ;;  %v822_v59 = vor.u32 8388608, %v8322_v42  ;;  %v831_v53 = vshll.u32 %v10662_v32, %v10911_v47  ;;  %v832_v61 = vshrl.u32 %v10659_v13, %v10910_v25 }
 0x283   : > { %v1021_v56 = vsel %vm1010_vm13, nan, %v1020_v11  ;;  %v8351_v36 = vor.u32 %v3432_v39, %v3431_v38  ;;  %v8353_v62 = vor.u32 %v3435_v17, %v3434_v44  ;;  %v3437_v40 = vshll.u32 %v10661_v41, %v8284_v26 }
 0x284   : > { %v3371_v35 = vadd.s32 536870912, %v8332_v37  ;;  %v3440_v42 = vshll.u32 %v10660_v30, %v8284_v26  ;;  %v835_v21 = vshrl.u32 %v10661_v41, %v10910_v25  ;;  %v841_v58 = vshrl.u32 %v10657_v2, %v10910_v25 }
 0x285   : > { %v5291_v27 = vpop.eup %5290  ;;  %v8364_v11 = vor.u32 %v3438_v43, %v3437_v40  ;;  %v3441_v39 = vshrl.u32 %v10657_v2, %v8308_v34  ;;  %v3444_v17 = vshrl.u32 %v10658_v46, %v8308_v34  ;;  %v838_v38 = vshrl.u32 %v10660_v30, %v10910_v25 }
 0x286   : > { %v5293_v44 = vpop.eup %5292  ;;  %v1226_v4 = vxor.u32 2147483648, %v5291_v27  ;;  %v834_v14 = vshll.u32 %v10659_v13, %v10911_v47  ;;  %v840_v28 = vshll.u32 %v10660_v30, %v10911_v47  ;;  %v844_v43 = vshrl.u32 %v10658_v46, %v10910_v25 }
 0x287   : > { %v1223_v40 = vxor.u32 2147483648, %v5293_v44  ;;  %v3443_v15 = vshll.u32 %v10657_v2, %v8284_v26  ;;  %v833_v5 = vor.u32 %v832_v61, %v831_v53  ;;  %v837_v12 = vshll.u32 %v10661_v41, %v10911_v47 }
 0x288   : > { %v1227_v23 = vsel %vm1225_vm3, %v1226_v4, %v5293_v44  ;;  %v836_v50 = vor.u32 %v835_v21, %v834_v14  ;;  %v842_v63 = vor.u32 %v841_v58, %v840_v28  ;;  %v843_v55 = vshll.u32 %v10657_v2, %v10911_v47  ;;  %v10913_v28 = vld [vmem:[#allocation28_spill] sm:$0xff] }
 0x289   : > { %v1224_v52 = vsel %vm1222_vm8, %v5291_v27, %v1223_v40  ;;  %v8386_v0 = vshrl.u32 %v3371_v35, 30  ;;  %v3442_v25 = vor.u32 %v3441_v39, %v3440_v42  ;;  %v839_v46 = vor.u32 %v838_v38, %v837_v12  ;;  %v10918_v44 = vld [vmem:[#allocation8_spill] sm:$0xff] }
 0x28a   : > { %v1228_v33 = vsel %vm1221_vm12, %v1224_v52, %v1227_v23  ;;  %v3445_v26 = vor.u32 %v3444_v17, %v3443_v15  ;;  %vm3446_vm13 = vcmp.lt.s32.totalorder %v8342_v49, 1  ;;  %v845_v53 = vor.u32 %v844_v43, %v843_v55 }
 0x28b   : > { %10912 = vst [vmem:[#allocation6_spill] sm:$0xff] %v8386_v0  ;;  %v1229_v4 = vsel %vm1218_vm5, nan, %v1228_v33  ;;  %vm3448_vm15 = vcmp.lt.s32.totalorder %v8342_v49, 3  ;;  %vm846_vm3 = vcmp.lt.s32.totalorder %v10913_v28, 1  ;;  %vm849_vm6 = vcmp.lt.s32.totalorder %v10913_v28, 4 }
 0x28c   : > { %v4979_v21 = vpack.c.bf16 %v1229_v4, %v1021_v56  ;;  %vm848_vm8 = vcmp.lt.s32.totalorder %v10913_v28, 3  ;;  %v854_v12 = vsel %vm846_vm3, %v833_v5, %v836_v50  ;;  %v855_v52 = vsel %vm849_vm6, %v842_v63, 920167782 }
 0x28d   : > { %v3373_v15 = vshll.u32 %v8386_v0, 30  ;;  %vm3449_vm12 = vcmp.lt.s32.totalorder %v8342_v49, 4  ;;  %v851_v55 = vsel %vm849_vm6, %v839_v46, 2102212464  ;;  %v856_v29 = vsel %vm848_vm8, %v839_v46, %v855_v52 }
 0x28e   : > { %4980 = vmatprep.subr.bf16.mxu0 %v4979_v21  ;;  %v3455_v33 = vsel %vm3449_vm12, %v3442_v25, 920167782  ;;  %vm847_vm5 = vcmp.lt.s32.totalorder %v10913_v28, 2  ;;  %v858_v23 = vsel %vm846_vm3, %v836_v50, %v839_v46  ;;  %v859_v58 = vsel %vm849_vm6, %v845_v53, 1326507024  ;;  %v10921_v28 = vld [vmem:[#allocation38_spill] sm:$0xff] }
 0x28f   : > { %v3459_v48 = vsel %vm3449_vm12, %v3445_v26, 1326507024  ;;  %v857_v14 = vsel %vm847_vm5, %v854_v12, %v856_v29  ;;  %v860_v47 = vsel %vm848_vm8, %v842_v63, %v859_v58  ;;  %v862_v61 = vshll.u32 %v822_v59, 8  ;;  %v10922_v29 = vld [vmem:[#allocation36_spill] sm:$0xff] }
 0x290   : > { %v3454_v56 = vsel %vm3446_vm13, %v8351_v36, %v8353_v62  ;;  %v850_v46 = vsel %vm846_vm3, %v8330_v51, %v833_v5  ;;  %v852_v35 = vsel %vm848_vm8, %v836_v50, %v851_v55  ;;  %v861_v42 = vsel %vm847_vm5, %v858_v23, %v860_v47 }
 0x291   : > { %v10914_v27 = vand.u32 2147483647, %v10900_v19  ;;  %v10915_v63 = vmov 0  ;;  %v3456_v59 = vsel %vm3448_vm15, %v8364_v11, %v3455_v33  ;;  %v3458_v5 = vsel %vm3446_vm13, %v8353_v62, %v8364_v11 }
 0x292   : > { %v8437_v51 = vmul.u32.u64.low %v862_v61, %v861_v42  ;;  %v8438_v50 = vmul.u32.u64.high %v862_v61, %v861_v42, %v8437_v51  ;;  %v3460_v39 = vsel %vm3448_vm15, %v3442_v25, %v3459_v48  ;;  %v1022_v43 = vand.u32 2147483647, %v10918_v44 }
 0x293   : > { %vm8426_vm6 = vcmp.le.f32.partialorder %v10914_v27, 0.7853982  ;;  %v8442_v17 = vmul.u32.u64.low %v862_v61, %v857_v14  ;;  %v8443_v38 = vmul.u32.u64.high %v862_v61, %v857_v14, %v8442_v17  ;;  %v2662_v40 = vand.u32 2147483647, %v8279_v16 }
 0x294   : > { %v10916_v63 = vsel %vm8426_vm6, 4294967295, %v10915_v63  ;;  %v2664_v26 = vcvt.s32.f32 %v8277_v8  ;;  %vm4927_vm3 = vcmp.lt.s32.totalorder %v8314_v18, 0  ;;  %v853_v53 = vsel %vm847_vm5, %v850_v46, %v852_v35 }
 0x295   : > { %10917 = vst [vmem:[#allocation34_spill] sm:$0xff] %v10916_v63  ;;  %v10919_v4 = vsub.s32 0, %v8297_v10  ;;  %v8456_v25 = vsub.s32 %v8332_v37, %v3373_v15  ;;  %vm10572_vm8 = vcmp.lt.s32.totalorder %v8342_v49, 2  ;;  %v10920_v12 = vor.u32 8388608, %v8312_v57 }
 0x296   : > { %v3457_v8 = vsel %vm10572_vm8, %v3454_v56, %v3456_v59  ;;  %v3461_v16 = vsel %vm10572_vm8, %v3458_v5, %v3460_v39  ;;  %vm871_vm5 = vc.u32 %v8438_v50, %v8442_v17  ;;  %v1040_v55 = vshrl.u32 %v10659_v13, %v10921_v28 }
 0x297   : > { %v4929_v21 = vmin.u32 %v10919_v4, %v8297_v10  ;;  %v8461_v52 = vshll.u32 %v10920_v12, 8  ;;  %v869_v37 = vmul.u32 %v862_v61, %v853_v53  ;;  %v872_v15 = vadd.s32 1, %v8443_v38 }
 0x298   : > { %v1029_v57 = vand.u32 8388607, %v1022_v43  ;;  %v1039_v33 = vshll.u32 %v10662_v32, %v10922_v29  ;;  %v1042_v23 = vshll.u32 %v10659_v13, %v10922_v29  ;;  %v1043_v58 = vshrl.u32 %v10661_v41, %v10921_v28 }
 0x299   : > { %v1045_v48 = vshll.u32 %v10661_v41, %v10922_v29  ;;  %v1046_v14 = vshrl.u32 %v10660_v30, %v10921_v28  ;;  %v3066_v47 = vclz %v4929_v21  ;;  %v873_v46 = vsel %vm871_vm5, %v872_v15, %v8443_v38 }
 0x29a   : > { %v8485_v61 = vmul.u32.u64.low %v8461_v52, %v3457_v8  ;;  %v8486_v56 = vmul.u32.u64.high %v8461_v52, %v3457_v8, %v8485_v61  ;;  %v874_v35 = vadd.s32 %v873_v46, %v869_v37  ;;  %v1041_v42 = vor.u32 %v1040_v55, %v1039_v33  ;;  %v10924_v55 = vld [vmem:[#allocation39_spill] sm:$0xff] }
 0x29b   : > { %v1044_v27 = vor.u32 %v1043_v58, %v1042_v23  ;;  %v1047_v59 = vor.u32 %v1046_v14, %v1045_v48  ;;  %v2566_v5 = vsel %vm8426_vm6, %v10900_v19, %v8271_v60  ;;  %v3376_v51 = vsub.s32 0, %v8456_v25  ;;  %v10926_v33 = vld [vmem:[#allocation51_spill] sm:$0xff] }
 0x29c   : > { %10923 = vst [vmem:[#allocation29_spill] sm:$0xff] %v8485_v61  ;;  %v8496_v39 = vmul.u32.u64.low %v8461_v52, %v3461_v16  ;;  %v8497_v53 = vmul.u32.u64.high %v8461_v52, %v3461_v16, %v8496_v39  ;;  %v2665_v4 = vmul.f32 %v2664_v26, %v2662_v40  ;;  %v3451_v38 = vsel %vm3449_vm12, %v8364_v11, 2102212464  ;;  %v10925_v26 = vld [vmem:[#allocation47_spill] sm:$0xff] }
 0x29d   : > { %v875_v21 = vadd.s32 536870912, %v874_v35  ;;  %v1030_v12 = vor.u32 8388608, %v1029_v57  ;;  %v8505_v8 = vsel %vm4927_vm3, 0, %v8314_v18  ;;  %v3430_v60 = vshrl.u32 %v10662_v32, %v8308_v34  ;;  %v10927_v23 = vld [vmem:[#allocation43_spill] sm:$0xff] }
 0x29e   : > { %vm1054_vm5 = vcmp.lt.s32.totalorder %v10924_v55, 1  ;;  %vm1056_vm8 = vcmp.lt.s32.totalorder %v10924_v55, 3  ;;  %v4930_v16 = vadd.s32 4294967294, %v3066_v47  ;;  %v4941_v18 = vmin.u32 %v3376_v51, %v8456_v25 }
 0x29f   : > { %v8511_v40 = vshrl.u32 %v875_v21, 30  ;;  %v1062_v11 = vsel %vm1054_vm5, %v1041_v42, %v1044_v27  ;;  %v1064_v37 = vsel %vm1056_vm8, %v1047_v59, %v10925_v26  ;;  %v3450_v34 = vsel %vm3446_vm13, %v3430_v60, %v8351_v36 }
 0x2a0   : > { %v3452_v15 = vsel %vm3448_vm15, %v8353_v62, %v3451_v38  ;;  %v1066_v57 = vsel %vm1054_vm5, %v1044_v27, %v1047_v59  ;;  %vm10573_vm3 = vcmp.lt.s32.totalorder %v10924_v55, 2  ;;  %v1068_v58 = vsel %vm1056_vm8, %v10927_v23, %v10926_v33 }
 0x2a1   : > { %v877_v29 = vshll.u32 %v8511_v40, 30  ;;  %v1070_v48 = vshll.u32 %v1030_v12, 8  ;;  %v1038_v36 = vshrl.u32 %v10662_v32, %v10921_v28  ;;  %vm10928_vm13 = vcmp.lt.s32.totalorder %v10924_v55, 4 }
 0x2a2   : > { %v1059_v62 = vsel %vm10928_vm13, %v1047_v59, 2102212464  ;;  %v1065_v14 = vsel %vm10573_vm3, %v1062_v11, %v1064_v37  ;;  %v1069_v47 = vsel %vm10573_vm3, %v1066_v57, %v1068_v58  ;;  %v3472_v46 = vadd.s32 1, %v8486_v56 }
 0x2a3   : > { %v8543_v51 = vsub.s32 %v874_v35, %v877_v29  ;;  %v8545_v39 = vmul.u32.u64.low %v1070_v48, %v1069_v47  ;;  %v8546_v38 = vmul.u32.u64.high %v1070_v48, %v1069_v47, %v8545_v39  ;;  %v10929_v21 = vand.u32 2147483647, %v7327_v54 }
 0x2a4   : > { %v10930_v28 = vmov 0  ;;  %v2970_v59 = vsub.s32 4294967266, %v8505_v8  ;;  %vm10933_vm13 = vcmp.lt.s32.totalorder %v8342_v49, 2  ;;  %vm3471_vm12 = vc.u32 %v8497_v53, %v8485_v61 }
 0x2a5   : > { %vm8550_vm15 = vcmp.le.f32.partialorder %v10929_v21, 0.7853982  ;;  %v3453_v12 = vsel %vm10933_vm13, %v3450_v34, %v3452_v15  ;;  %v1058_v35 = vsel %vm1054_vm5, %v1038_v36, %v1041_v42  ;;  %v880_v60 = vsub.s32 0, %v8543_v51 }
 0x2a6   : > { %v10931_v28 = vsel %vm8550_vm15, 4294967295, %v10930_v28  ;;  %v1060_v11 = vsel %vm1056_vm8, %v1044_v27, %v1059_v62  ;;  %v8564_v26 = vmul.u32.u64.low %v1070_v48, %v1065_v14  ;;  %v8565_v37 = vmul.u32.u64.high %v1070_v48, %v1065_v14, %v8564_v26  ;;  %v10934_v27 = vld [vmem:[#allocation12_spill] sm:$0xff] }
 0x2a7   : > { %10932 = vst [vmem:[#allocation28_spill] sm:$0xff] %v10931_v28  ;;  %v2666_v57 = vxor.u32 2147483648, %v2665_v4  ;;  %v2966_v29 = vsub.s32 32, %v8505_v8  ;;  %vm4931_vm3 = vcmp.lt.s32.totalorder %v4930_v16, 0  ;;  %v8571_v49 = vmul.f32 %v10730_v20, %v7970_v1 }
 0x2a8   : > { %5294 = vcosq.f32 %v2566_v5  ;;  %v3378_v34 = vclz %v4941_v18  ;;  %v3473_v42 = vsel %vm3471_vm12, %v3472_v46, %v8486_v56  ;;  %v4845_v15 = vmin.u32 %v880_v60, %v8543_v51 }
 0x2a9   : > { %v2950_v33 = vadd.s32 %v10934_v27, %v7865_v7  ;;  %v2971_v23 = vadd.s32 127, %v2970_v59  ;;  %v3469_v58 = vmul.u32 %v8461_v52, %v3453_v12  ;;  %vm10935_vm8 = vcmp.lt.s32.totalorder %v10924_v55, 2  ;;  %v10937_v59 = vld [vmem:[#allocation2_spill] sm:$0xff] }
 0x2aa   : > { %v1061_v36 = vsel %vm10935_vm8, %v1058_v35, %v1060_v11  ;;  %5296 = vsinq.f32 %v2566_v5  ;;  %v8580_v62 = vsel %vm4931_vm3, 0, %v4930_v16  ;;  %v882_v20 = vclz %v4845_v15 }
 0x2ab   : > { %vm1079_vm5 = vc.u32 %v8546_v38, %v8564_v26  ;;  %vm10936_vm12 = vcmp.lt.s32.totalorder %v7327_v54, 0  ;;  %v2968_v18 = vshrl.u32 %v2950_v33, %v2966_v29  ;;  %v8586_v14 = vadd.s32 %v3473_v42, %v3469_v58 }
 0x2ac   : > { %v2667_v56 = vsel %vm10936_vm12, %v2666_v57, %v2665_v4  ;;  %v1080_v7 = vadd.s32 1, %v8565_v37  ;;  %v8591_v52 = vmul.f32 %v10732_v31, %v7970_v1  ;;  %v4942_v55 = vadd.s32 4294967294, %v3378_v34 }
 0x2ad   : > { %v4846_v5 = vadd.s32 4294967294, %v882_v20  ;;  %v1077_v16 = vmul.u32 %v1070_v48, %v1061_v36  ;;  %v2967_v47 = vshll.u32 %v8140_v9, %v8505_v8  ;;  %v2972_v46 = vshll.u32 %v2971_v23, 23 }
 0x2ae   : > { %v3074_v39 = vsub.s32 4294967266, %v8580_v62  ;;  %v1081_v4 = vsel %vm1079_vm5, %v1080_v7, %v8565_v37  ;;  %v8600_v21 = vsel %vm8550_vm15, %v7327_v54, %v2667_v56  ;;  %v8604_v31 = vmul.f32 %v10937_v59, %v8004_v45 }
 0x2af   : > { %vm4847_vm3 = vcmp.lt.s32.totalorder %v4846_v5, 0  ;;  %v1082_v1 = vadd.s32 %v1081_v4, %v1077_v16  ;;  %v2969_v48 = vor.u32 %v2968_v18, %v2967_v47  ;;  %v3054_v9 = vadd.s32 %v8095_v3, %v8104_v22  ;;  %v10941_v18 = vld [vmem:[#allocation23_spill] sm:$0xff] }
 0x2b0   : > { %v3475_v8 = vadd.s32 536870912, %v8586_v14  ;;  %v885_v12 = vsel %vm4847_vm3, 0, %v4846_v5  ;;  %vm4943_vm13 = vcmp.lt.s32.totalorder %v4942_v55, 0  ;;  %v870_v35 = vadd.s32 %v8442_v17, %v8438_v50  ;;  %v775_v17 = vpop.permute.xlu1 %774  ;;  %v10942_v5 = vld [vmem:[#allocation118_spill] sm:$0xff] }
 0x2b1   : > { %v886_v60 = vsub.s32 32, %v885_v12  ;;  %v890_v11 = vsub.s32 4294967266, %v885_v12  ;;  %v2973_v37 = vor.u32 4788187, %v2972_v46  ;;  %v3070_v57 = vsub.s32 32, %v8580_v62 }
 0x2b2   : > { %v3075_v29 = vadd.s32 127, %v3074_v39  ;;  %v1083_v34 = vadd.s32 536870912, %v1082_v1  ;;  %v8612_v42 = vpop.eup %5294  ;;  %v887_v15 = vshll.u32 %v8543_v51, %v885_v12  ;;  %v900_v22 = vsub.s32 4, %v8511_v40  ;;  %v10943_v51 = vld [vmem:[#allocation24_spill] sm:$0xff] }
 0x2b3   : > { %10938 = vst [vmem:[#allocation8_spill] sm:$0xff] %v8612_v42  ;;  %v888_v27 = vshrl.u32 %v870_v35, %v886_v60  ;;  %v891_v3 = vadd.s32 127, %v890_v11  ;;  %v2976_v33 = vcvt.s32.f32 %v2969_v48  ;;  %v8616_v23 = vsel %vm4943_vm13, 0, %v4942_v55 }
 0x2b4   : > { %v8618_v58 = vshrl.u32 %v3475_v8, 30  ;;  %v8620_v50 = vshrl.u32 %v1083_v34, 30  ;;  %v8622_v36 = vpop.eup %5296  ;;  %v1420_v7 = vsub.s32 4, %v10941_v18  ;;  %v682_v16 = vadd.f32 %v10943_v51, %v10942_v5 }
 0x2b5   : > { %10940 = vst [vmem:[#allocation36_spill] sm:$0xff] %v8622_v36  ;;  %v889_v20 = vor.u32 %v888_v27, %v887_v15  ;;  %v892_v56 = vshll.u32 %v891_v3, 23  ;;  %v2974_v47 = vand.u32 2147483647, %v2973_v37  ;;  %v3072_v46 = vshrl.u32 %v3054_v9, %v3070_v57  ;;  %v10950_v3 = vld [vmem:[#allocation50_spill] sm:$0xff]  ;;  %v10964_v9 = vld [vmem:[#allocation65_spill] sm:$0xff] }
 0x2b6   : > { %10939 = vst [vmem:[#allocation38_spill] sm:$0xff] %v8618_v58  ;;  %vm816_vm8 = vcmp.lt.s32.totalorder %v10908_v6, 0  ;;  %v1085_v55 = vshll.u32 %v8620_v50, 30  ;;  %v3076_v39 = vshll.u32 %v3075_v29, 23  ;;  %v8632_v48 = vadd.f32 %v775_v17, %v682_v16 }
 0x2b7   : > { %v893_v4 = vor.u32 4788187, %v892_v56  ;;  %v901_v59 = vsel %vm816_vm8, %v900_v22, %v8511_v40  ;;  %v3071_v8 = vshll.u32 %v8297_v10, %v8580_v62  ;;  %v3386_v12 = vsub.s32 4294967266, %v8616_v23  ;;  %v10948_v40 = vld [vmem:[#allocation9_spill] sm:$0xff] }
 0x2b8   : > { %10944 = vst [vmem:[#allocation39_spill] sm:$0xff] %v8632_v48  ;;  %v10945_v35 = vand.u32 2147483647, %v10908_v6  ;;  %v8643_v60 = vsub.s32 %v1082_v1, %v1085_v55  ;;  %v3477_v11 = vshll.u32 %v8618_v58, 30  ;;  %v896_v57 = vcvt.s32.f32 %v889_v20  ;;  %v10951_v56 = vld [vmem:[#allocation5_spill] sm:$0xff] }
 0x2b9   : > { %v894_v37 = vand.u32 2147483647, %v893_v4  ;;  %vm10949_vm12 = vcmp.lt.s32.totalorder %v10948_v40, 0  ;;  %v8649_v34 = vmul.f32 %v2976_v33, %v2974_v47  ;;  %v8651_v10 = vor.u32 %v3072_v46, %v3071_v8 }
 0x2ba   : > { %vm8639_vm5 = vcmp.le.f32.partialorder %v10945_v35, 0.7853982  ;;  %v1421_v29 = vsel %vm10949_vm12, %v1420_v7, %v10941_v18  ;;  %v1088_v15 = vsub.s32 0, %v8643_v60  ;;  %v8656_v27 = vor.u32 4788187, %v3076_v39  ;;  %v10953_v35 = vld [vmem:[#allocation11_spill] sm:$0xff] }
 0x2bb   : > { %v903_v62 = vsel %vm8639_vm5, 0, %v901_v59  ;;  %v897_v1 = vmul.f32 %v896_v57, %v894_v37  ;;  %v1628_v22 = vsub.s32 4, %v10950_v3  ;;  %v3729_v20 = vand.u32 2139095040, %v8632_v48  ;;  %v10955_v57 = vld [vmem:[#allocation40_spill] sm:$0xff] }
 0x2bc   : > { %5298 = vcosq.f32 %v8600_v21  ;;  %v8663_v33 = vmul.f32 %v10951_v56, %v8004_v45  ;;  %v4853_v18 = vmin.u32 %v1088_v15, %v8643_v60  ;;  %v1423_v5 = vsel %vm6810_vm10, 0, %v1421_v29  ;;  %v10957_v15 = vld [vmem:[#allocation25_spill] sm:$0xff]  ;;  %v10960_v56 = vld [vmem:[#allocation4_spill] sm:$0xff] }
 0x2bd   : > { %v8668_v51 = vadd.s32 127, %v3386_v12  ;;  %v8671_v16 = vsub.s32 %v8586_v14, %v3477_v11  ;;  %v907_v47 = vadd.s32 3, %v903_v62  ;;  %v3730_v46 = vshrl.u32 %v3729_v20, 23  ;;  %v10956_v62 = vld [vmem:[#allocation22_spill] sm:$0xff] }
 0x2be   : > { %v898_v4 = vxor.u32 2147483648, %v897_v1  ;;  %v1090_v59 = vclz %v4853_v18  ;;  %v1427_v8 = vadd.s32 3, %v1423_v5  ;;  %vm10954_vm3 = vcmp.lt.s32.totalorder %v10953_v35, 0 }
 0x2bf   : > { %v1629_v37 = vsel %vm10954_vm3, %v1628_v22, %v10950_v3  ;;  %v4956_v12 = vadd.s32 4294967169, %v3730_v46  ;;  %v8681_v14 = vadd.s32 %v10955_v57, %v8249_v24  ;;  %v683_v20 = vadd.f32 %v10957_v15, %v10956_v62 }
 0x2c0   : > { %v4854_v29 = vadd.s32 4294967294, %v1090_v59  ;;  %v8688_v7 = vand.u32 3, %v907_v47  ;;  %v899_v3 = vsel %vm816_vm8, %v898_v4, %v897_v1  ;;  %v1631_v24 = vsel %vm6882_vm4, 0, %v1629_v37 }
 0x2c1   : > { %v3736_v5 = vadd.s32 1, %v4956_v12  ;;  %v8694_v46 = vadd.f32 %v775_v17, %v683_v20  ;;  %v1078_v59 = vadd.s32 %v8564_v26, %v8546_v38  ;;  %v8698_v62 = vand.u32 3, %v1427_v8  ;;  %v10961_v17 = vld [vmem:[#allocation3_spill] sm:$0xff] }
 0x2c2   : > { %vm4855_vm10 = vcmp.lt.s32.totalorder %v4854_v29, 0  ;;  %v1431_v12 = vxor.u32 2147483648, %v10960_v56  ;;  %v902_v1 = vsel %vm8639_vm5, %v10908_v6, %v899_v3  ;;  %vm10587_vm4 = vcmp.lt.s32.totalorder %v10918_v44, 0 }
 0x2c3   : > { %10959 = vst [vmem:[#allocation47_spill] sm:$0xff] %v8694_v46  ;;  %v1093_v57 = vsel %vm4855_vm10, 0, %v4854_v29  ;;  %vm3737_vm13 = vcmp.gt.s32.totalorder %v3736_v5, 0  ;;  %v1434_v4 = vxor.u32 2147483648, %v10961_v17  ;;  %v1635_v37 = vadd.s32 3, %v1631_v24 }
 0x2c4   : > { %v1094_v15 = vsub.s32 32, %v1093_v57  ;;  %v1098_v47 = vsub.s32 4294967266, %v1093_v57  ;;  %v3738_v39 = vsel %vm3737_vm13, %v3736_v5, 0  ;;  %v1095_v26 = vshll.u32 %v8643_v60, %v1093_v57  ;;  %v10963_v5 = vld [vmem:[#allocation66_spill] sm:$0xff] }
 0x2c5   : > { %v3740_v20 = vand.u32 31, %v3738_v39  ;;  %v3833_v22 = vand.u32 2139095040, %v8694_v46  ;;  %vm1430_vm8 = vcmp.eq.s32.totalorder %v8698_v62, 0  ;;  %v1639_v45 = vxor.u32 2147483648, %v10963_v5 }
 0x2c6   : > { %v8706_v38 = vpop.eup %5298  ;;  %v1096_v8 = vshrl.u32 %v1078_v59, %v1094_v15  ;;  %v1099_v29 = vadd.s32 127, %v1098_v47  ;;  %v1642_v3 = vxor.u32 2147483648, %v10964_v9  ;;  %v8716_v24 = vsel %vm1430_vm8, %v10961_v17, %v1431_v12 }
 0x2c7   : > { %10962 = vst [vmem:[#allocation51_spill] sm:$0xff] %v8706_v38  ;;  %v8713_v55 = vsub.s32 32, %v3740_v20  ;;  %vm1433_vm5 = vcmp.eq.s32.totalorder %v8698_v62, 2  ;;  %5300 = vcosq.f32 %v902_v1  ;;  %vm8721_vm12 = vcmp.le.f32.partialorder %v1022_v43, 0.7853982 }
 0x2c8   : > { %v1097_v11 = vor.u32 %v1096_v8, %v1095_v26  ;;  %v1100_v18 = vshll.u32 %v1099_v29, 23  ;;  %v1108_v59 = vsub.s32 4, %v8620_v50  ;;  %v8726_v57 = vand.u32 3, %v1635_v37 }
 0x2c9   : > { %5302 = vsinq.f32 %v902_v1  ;;  %v3753_v12 = vshrl.u32 %v10657_v2, %v8713_v55  ;;  %v3834_v17 = vshrl.u32 %v3833_v22, 23  ;;  %v8731_v26 = vshrl.u32 %v3738_v39, 5 }
 0x2ca   : > { %v1101_v47 = vor.u32 4788187, %v1100_v18  ;;  %v3744_v43 = vshrl.u32 %v10659_v13, %v8713_v55  ;;  %v3752_v8 = vshll.u32 %v10660_v30, %v3740_v20  ;;  %v10967_v29 = vmov 1326507024  }
 0x2cb   : > { %v3756_v0 = vshrl.u32 %v10967_v29, %v8713_v55  ;;  %v1104_v58 = vcvt.s32.f32 %v1097_v11  ;;  %v3747_v1 = vshrl.u32 %v10661_v41, %v8713_v55  ;;  %v3750_v18 = vshrl.u32 %v10660_v30, %v8713_v55 }
 0x2cc   : > { %v1102_v37 = vand.u32 2147483647, %v1101_v47  ;;  %vm1638_vm3 = vcmp.eq.s32.totalorder %v8726_v57, 0  ;;  %v3743_v39 = vshll.u32 %v10662_v32, %v3740_v20  ;;  %v3754_v22 = vor.u32 %v3753_v12, %v3752_v8 }
 0x2cd   : > { %v3755_v15 = vshll.u32 %v10657_v2, %v3740_v20  ;;  %v1109_v36 = vsel %vm10587_vm4, %v1108_v59, %v8620_v50  ;;  %v3746_v11 = vshll.u32 %v10659_v13, %v3740_v20  ;;  %v3749_v47 = vshll.u32 %v10661_v41, %v3740_v20 }
 0x2ce   : > { %v1105_v42 = vmul.f32 %v1104_v58, %v1102_v37  ;;  %v10968_v63 = vand.u32 2147483647, %v8632_v48  ;;  %v3745_v38 = vor.u32 %v3744_v43, %v3743_v39  ;;  %v4960_v54 = vadd.s32 4294967169, %v3834_v17 }
 0x2cf   : > { %v3757_v28 = vor.u32 %v3756_v0, %v3755_v15  ;;  %v3748_v8 = vor.u32 %v3747_v1, %v3746_v11  ;;  %v3751_v61 = vor.u32 %v3750_v18, %v3749_v47  ;;  %vm3761_vm13 = vcmp.lt.s32.totalorder %v8731_v26, 4 }
 0x2d0   : > { %v3733_v19 = vand.u32 8388607, %v10968_v63  ;;  %v1106_v12 = vxor.u32 2147483648, %v1105_v42  ;;  %v1435_v58 = vsel %vm1433_vm5, %v1434_v4, %v10960_v56  ;;  %vm1634_vm8 = vweird.f32 %v10953_v35 }
 0x2d1   : > { %v1640_v50 = vsel %vm1638_vm3, %v10964_v9, %v1639_v45  ;;  %vm1641_vm10 = vcmp.eq.s32.totalorder %v8726_v57, 2  ;;  %v3767_v0 = vsel %vm3761_vm13, %v3754_v22, 920167782  ;;  %vm10969_vm15 = vcmp.lt.s32.totalorder %v10918_v44, 0  ;;  %v5301_v45 = vpop.eup %5300 }
 0x2d2   : > { %v1107_v63 = vsel %vm10969_vm15, %v1106_v12, %v1105_v42  ;;  %v1111_v56 = vsel %vm8721_vm12, 0, %v1109_v36  ;;  %v1643_v4 = vsel %vm1641_vm10, %v1642_v3, %v10963_v5  ;;  %vm3758_vm5 = vcmp.lt.s32.totalorder %v8731_v26, 1  ;;  %v10970_v3 = vld [vmem:[#allocation13_spill] sm:$0xff] }
 0x2d3   : > { %v1110_v20 = vsel %vm8721_vm12, %v10918_v44, %v1107_v63  ;;  %vm3760_vm3 = vcmp.lt.s32.totalorder %v8731_v26, 3  ;;  %v3771_v9 = vsel %vm3761_vm13, %v3757_v28, 1326507024  ;;  %v3840_v59 = vadd.s32 1, %v4960_v54  ;;  %v5303_v15 = vpop.eup %5302 }
 0x2d4   : > { %5304 = vcosq.f32 %v1110_v20  ;;  %v3734_v42 = vor.u32 8388608, %v3733_v19  ;;  %v3766_v36 = vsel %vm3758_vm5, %v3745_v38, %v3748_v8  ;;  %v3768_v5 = vsel %vm3760_vm3, %v3751_v61, %v3767_v0 }
 0x2d5   : > { %5306 = vsinq.f32 %v1110_v20  ;;  %vm1637_vm12 = vcmp.lt.s32.totalorder %v8726_v57, 2  ;;  %vm3841_vm10 = vcmp.gt.s32.totalorder %v3840_v59, 0  ;;  %v1316_v60 = vsub.s32 4, %v10970_v3 }
 0x2d6   : > { %v1115_v17 = vadd.s32 3, %v1111_v56  ;;  %vm3759_vm6 = vcmp.lt.s32.totalorder %v8731_v26, 2  ;;  %v3770_v54 = vsel %vm3758_vm5, %v3748_v8, %v3751_v61  ;;  %v3772_v19 = vsel %vm3760_vm3, %v3754_v22, %v3771_v9 }
 0x2d7   : > { %v911_v28 = vxor.u32 2147483648, %v5303_v15  ;;  %v914_v43 = vxor.u32 2147483648, %v5301_v45  ;;  %v1644_v37 = vsel %vm1637_vm12, %v1640_v50, %v1643_v4  ;;  %v3769_v1 = vsel %vm3759_vm6, %v3766_v36, %v3768_v5  ;;  %v10972_v50 = vld [vmem:[#allocation7_spill] sm:$0xff] }
 0x2d8   : > { %vm906_vm15 = vweird.f32 %v10908_v6  ;;  %vm10971_vm4 = vcmp.lt.s32.totalorder %v8698_v62, 2  ;;  %v8796_v18 = vshll.u32 %v3734_v42, 8  ;;  %v10591_v39 = vand.u32 2147483647, %v8694_v46 }
 0x2d9   : > { %v1436_v57 = vsel %vm10971_vm4, %v8716_v24, %v1435_v58  ;;  %v3842_v11 = vsel %vm3841_vm10, %v3840_v59, 0  ;;  %v3742_v22 = vshrl.u32 %v10662_v32, %v8713_v55  ;;  %v3763_v47 = vsel %vm3761_vm13, %v3751_v61, 2102212464  ;;  %v10982_v59 = vld [vmem:[#allocation10_spill] sm:$0xff] }
 0x2da   : > { %v3773_v12 = vsel %vm3759_vm6, %v3770_v54, %v3772_v19  ;;  %vm10973_vm12 = vcmp.lt.s32.totalorder %v10972_v50, 0  ;;  %v1116_v62 = vand.u32 3, %v1115_v17  ;;  %v1645_v24 = vsel %vm1634_vm8, nan, %v1644_v37 }
 0x2db   : > { %v1317_v0 = vsel %vm10973_vm12, %v1316_v60, %v10970_v3  ;;  %v8811_v58 = vmul.u32.u64.low %v8796_v18, %v3769_v1  ;;  %v8812_v63 = vmul.u32.u64.high %v8796_v18, %v3769_v1, %v8811_v58  ;;  %vm10974_vm4 = vcmp.eq.s32.totalorder %v8688_v7, 0 }
 0x2dc   : > { %v912_v55 = vsel %vm10974_vm4, %v5301_v45, %v911_v28  ;;  %vm10975_vm13 = vcmp.eq.s32.totalorder %v8688_v7, 2  ;;  %v3762_v56 = vsel %vm3758_vm5, %v3742_v22, %v3745_v38  ;;  %v3844_v4 = vand.u32 31, %v3842_v11  ;;  %v10979_v28 = vld [vmem:[#allocation37_spill] sm:$0xff] }
 0x2dd   : > { %v915_v61 = vsel %vm10975_vm13, %v914_v43, %v5303_v15  ;;  %v3764_v20 = vsel %vm3760_vm3, %v3748_v8, %v3763_v47  ;;  %v8824_v35 = vmul.u32.u64.low %v8796_v18, %v3773_v12  ;;  %v8825_v9 = vmul.u32.u64.high %v8796_v18, %v3773_v12, %v8824_v35  ;;  %v10980_v22 = vld [vmem:[#allocation61_spill] sm:$0xff] }
 0x2de   : > { %v1319_v42 = vsel %vm6593_vm11, 0, %v1317_v0  ;;  %v10977_v45 = vsub.s32 0, %v8671_v16  ;;  %vm909_vm8 = vcmp.lt.s32.totalorder %v8688_v7, 2  ;;  %vm10978_vm5 = vweird.f32 %v10948_v40  ;;  %v5305_v15 = vpop.eup %5304 }
 0x2df   : > { %v1437_v38 = vsel %vm10978_vm5, nan, %v1436_v57  ;;  %v8839_v8 = vand.u32 8388607, %v10591_v39  ;;  %v916_v5 = vsel %vm909_vm8, %v912_v55, %v915_v61  ;;  %vm1114_vm3 = vweird.f32 %v10918_v44  ;;  %v5307_v60 = vpop.eup %5306 }
 0x2e0   : > { %v8832_v36 = vmin.u32 %v10977_v45, %v8671_v16  ;;  %vm1117_vm10 = vcmp.lt.s32.totalorder %v1116_v62, 2  ;;  %v4983_v3 = vpack.c.bf16 %v1645_v24, %v1437_v38  ;;  %v1122_v17 = vxor.u32 2147483648, %v5305_v15  ;;  %v10981_v24 = vld [vmem:[#allocation57_spill] sm:$0xff] }
 0x2e1   : > { %v3765_v54 = vsel %vm3759_vm6, %v3762_v56, %v3764_v20  ;;  %v8844_v19 = vsub.s32 32, %v3844_v4  ;;  %v1323_v7 = vadd.s32 3, %v1319_v42  ;;  %vm1118_vm11 = vcmp.eq.s32.totalorder %v1116_v62, 0 }
 0x2e2   : > { %v1119_v40 = vxor.u32 2147483648, %v5307_v60  ;;  %vm1121_vm12 = vcmp.eq.s32.totalorder %v1116_v62, 2  ;;  %v1524_v43 = vsub.s32 4, %v10979_v28  ;;  %v917_v37 = vsel %vm906_vm15, nan, %v916_v5 }
 0x2e3   : > { %v1123_v1 = vsel %vm1121_vm12, %v1122_v17, %v5307_v60  ;;  %v3838_v57 = vor.u32 8388608, %v8839_v8  ;;  %v1327_v47 = vxor.u32 2147483648, %v10980_v22  ;;  %v3781_v26 = vmul.u32 %v8796_v18, %v3765_v54  ;;  %v10984_v60 = vld [vmem:[#allocation64_spill] sm:$0xff]  ;;  %v780_v54 = vpop.permute.xlu1 %779 }
 0x2e4   : > { %v1120_v12 = vsel %vm1118_vm11, %v5305_v15, %v1119_v40  ;;  %v3784_v0 = vadd.s32 1, %v8812_v63  ;;  %v1330_v55 = vxor.u32 2147483648, %v10981_v24  ;;  %v8855_v56 = vshrl.u32 %v3842_v11, 5 }
 0x2e5   : > { %v1124_v61 = vsel %vm1117_vm10, %v1120_v12, %v1123_v1  ;;  %v3857_v6 = vshrl.u32 %v10657_v2, %v8844_v19  ;;  %v1324_v20 = vand.u32 3, %v1323_v7  ;;  %vm3783_vm6 = vc.u32 %v8825_v9, %v8811_v58 }
 0x2e6   : > { %v1125_v35 = vsel %vm1114_vm3, nan, %v1124_v61  ;;  %v3856_v18 = vshll.u32 %v10660_v30, %v3844_v4  ;;  %vm10983_vm15 = vcmp.lt.s32.totalorder %v10982_v59, 0  ;;  %v3848_v11 = vshrl.u32 %v10659_v13, %v8844_v19 }
 0x2e7   : > { %v1525_v42 = vsel %vm10983_vm15, %v1524_v43, %v10979_v28  ;;  %v4981_v62 = vpack.c.bf16 %v1125_v35, %v917_v37  ;;  %v3851_v45 = vshrl.u32 %v10661_v41, %v8844_v19  ;;  %v3860_v44 = vshrl.u32 %v10967_v29, %v8844_v19 }
 0x2e8   : > { %v3847_v38 = vshll.u32 %v10662_v32, %v3844_v4  ;;  %v3850_v15 = vshll.u32 %v10659_v13, %v3844_v4  ;;  %v3854_v5 = vshrl.u32 %v10660_v30, %v8844_v19  ;;  %v1535_v17 = vxor.u32 2147483648, %v10984_v60 }
 0x2e9   : > { %4982 = vmatpush1.bf16.msra.mxu0 %v4981_v62  ;;  %v3858_v7 = vor.u32 %v3857_v6, %v3856_v18  ;;  %v3859_v40 = vshll.u32 %v10657_v2, %v3844_v4  ;;  %v1527_v43 = vsel %vm6851_vm1, 0, %v1525_v42  ;;  %v684_v37 = vadd.f32 %v8604_v31, %v8571_v49  ;;  %v10986_v6 = vld [vmem:[#allocation63_spill] sm:$0xff]  ;;  %v10988_v31 = vld [vmem:[#allocation96_spill] sm:$0xff] }
 0x2ea   : > { %4984 = vmatprep.subr.bf16.mxu0 %v4983_v3  ;;  %v3785_v1 = vsel %vm3783_vm6, %v3784_v0, %v8812_v63  ;;  %v3853_v12 = vshll.u32 %v10661_v41, %v3844_v4  ;;  %vm1322_vm4 = vweird.f32 %v10972_v50  ;;  %v1531_v61 = vadd.s32 3, %v1527_v43  ;;  %v10994_v50 = vld [vmem:[#allocation117_spill] sm:$0xff] }
 0x2eb   : > { %v1538_v35 = vxor.u32 2147483648, %v10986_v6  ;;  %v8890_v18 = vor.u32 %v3848_v11, %v3847_v38  ;;  %v8892_v62 = vor.u32 %v3851_v45, %v3850_v15  ;;  %v3861_v42 = vor.u32 %v3860_v44, %v3859_v40 }
 0x2ec   : > { %v8894_v28 = vadd.f32 %v780_v54, %v684_v37  ;;  %v3855_v49 = vor.u32 %v3854_v5, %v3853_v12  ;;  %vm10590_vm1 = vcmp.lt.s32.totalorder %v8855_v56, 4  ;;  %vm1326_vm13 = vcmp.eq.s32.totalorder %v1324_v20, 0 }
 0x2ed   : > { %vm1329_vm8 = vcmp.eq.s32.totalorder %v1324_v20, 2  ;;  %vm10604_vm5 = vcmp.lt.s32.totalorder %v10988_v31, 0  ;;  %v3871_v63 = vsel %vm10590_vm1, %v3858_v7, 920167782  ;;  %v1328_v4 = vsel %vm1326_vm13, %v10981_v24, %v1327_v47 }
 0x2ee   : > { %10987 = vst [vmem:[#allocation43_spill] sm:$0xff] %v8894_v28  ;;  %v1331_v3 = vsel %vm1329_vm8, %v1330_v55, %v10980_v22  ;;  %v1532_v0 = vand.u32 3, %v1531_v61  ;;  %v8902_v11 = vadd.s32 %v3785_v1, %v3781_v26  ;;  %vm3862_vm3 = vcmp.lt.s32.totalorder %v8855_v56, 1 }
 0x2ef   : > { %vm1530_vm10 = vweird.f32 %v10982_v59  ;;  %v3937_v45 = vand.u32 2139095040, %v8894_v28  ;;  %vm3864_vm11 = vcmp.lt.s32.totalorder %v8855_v56, 3  ;;  %v3870_v44 = vsel %vm3862_vm3, %v8890_v18, %v8892_v62 }
 0x2f0   : > { %v3875_v47 = vsel %vm10590_vm1, %v3861_v42, 1326507024  ;;  %vm1325_vm12 = vcmp.lt.s32.totalorder %v1324_v20, 2  ;;  %v10989_v22 = vand.u32 2147483647, %v10988_v31  ;;  %v3872_v24 = vsel %vm3864_vm11, %v3855_v49, %v3871_v63  ;;  %v10993_v42 = vld [vmem:[#allocation131_spill] sm:$0xff] }
 0x2f1   : > { %v1332_v55 = vsel %vm1325_vm12, %v1328_v4, %v1331_v3  ;;  %vm1534_vm15 = vcmp.eq.s32.totalorder %v1532_v0, 0  ;;  %vm1537_vm13 = vcmp.eq.s32.totalorder %v1532_v0, 2  ;;  %vm1533_vm8 = vcmp.lt.s32.totalorder %v1532_v0, 2 }
 0x2f2   : > { %vm8916_vm6 = vcmp.le.f32.partialorder %v10989_v22, 0.7853982  ;;  %v1536_v38 = vsel %vm1534_vm15, %v10986_v6, %v1535_v17  ;;  %v1539_v15 = vsel %vm1537_vm13, %v1538_v35, %v10984_v60  ;;  %v3938_v5 = vshrl.u32 %v3937_v45, 23 }
 0x2f3   : > { %vm3863_vm1 = vcmp.lt.s32.totalorder %v8855_v56, 2  ;;  %v3874_v20 = vsel %vm3862_vm3, %v8892_v62, %v3855_v49  ;;  %v3876_v40 = vsel %vm3864_vm11, %v3858_v7, %v3875_v47  ;;  %v1540_v43 = vsel %vm1533_vm8, %v1536_v38, %v1539_v15  ;;  %v11001_v38 = vld [vmem:[#allocation32_spill] sm:$0xff] }
 0x2f4   : > { %v1333_v37 = vsel %vm1322_vm4, nan, %v1332_v55  ;;  %v1541_v1 = vsel %vm1530_vm10, nan, %v1540_v43  ;;  %v685_v60 = vadd.f32 %v8663_v33, %v8591_v52  ;;  %v4964_v17 = vadd.s32 4294967169, %v3938_v5  ;;  %v11000_v55 = vld [vmem:[#allocation134_spill] sm:$0xff] }
 0x2f5   : > { %v10992_v12 = vsub.s32 32, %v8616_v23  ;;  %v3482_v6 = vclz %v8832_v36  ;;  %v3873_v7 = vsel %vm3863_vm1, %v3870_v44, %v3872_v24  ;;  %v4985_v35 = vpack.c.bf16 %v1541_v1, %v1333_v37 }
 0x2f6   : > { %vm10608_vm12 = vcmp.lt.s32.totalorder %v10993_v42, 4  ;;  %vm10605_vm4 = vcmp.lt.s32.totalorder %v10994_v50, 0  ;;  %v3877_v59 = vsel %vm3863_vm1, %v3874_v20, %v3876_v40  ;;  %v8948_v52 = vshll.u32 %v3838_v57, 8 }
 0x2f7   : > { %v3384_v61 = vshrl.u32 %v8681_v14, %v10992_v12  ;;  %v8950_v33 = vadd.f32 %v780_v54, %v685_v60  ;;  %v3944_v14 = vadd.s32 1, %v4964_v17  ;;  %v10996_v36 = vxor.u32 2147483648, %v8649_v34  ;;  %4986 = vmatpush1.bf16.msra.mxu0 %v4985_v35  ;;  %v11004_v60 = vld [vmem:[#allocation129_spill] sm:$0xff]  ;;  %v11005_v17 = vld [vmem:[#allocation130_spill] sm:$0xff] }
 0x2f8   : > { %v10997_v4 = vand.u32 2147483647, %v8656_v27  ;;  %v10998_v3 = vcvt.s32.f32 %v8651_v10  ;;  %v3383_v45 = vshll.u32 %v8456_v25, %v8616_v23  ;;  %v10999_v8 = vshll.u32 %v8668_v51, 23 }
 0x2f9   : > { %10995 = vst [vmem:[#allocation12_spill] sm:$0xff] %v8950_v33  ;;  %v2979_v63 = vsel %vm10604_vm5, %v10996_v36, %v8649_v34  ;;  %v3787_v54 = vadd.s32 536870912, %v8902_v11  ;;  %v8967_v44 = vmul.u32.u64.low %v8948_v52, %v3873_v7  ;;  %v8968_v47 = vmul.u32.u64.high %v8948_v52, %v3873_v7, %v8967_v44  ;;  %v11011_v7 = vld [vmem:[#allocation31_spill] sm:$0xff] }
 0x2fa   : > { %v3081_v0 = vmul.f32 %v10998_v3, %v10997_v4  ;;  %v3389_v57 = vor.u32 4788187, %v10999_v8  ;;  %vm3945_vm10 = vcmp.gt.s32.totalorder %v3944_v14, 0  ;;  %v4946_v34 = vadd.s32 4294967294, %v3482_v6  ;;  %v11010_v6 = vld [vmem:[#allocation35_spill] sm:$0xff]  ;;  %v11012_v4 = vld [vmem:[#allocation29_spill] sm:$0xff] }
 0x2fb   : > { %v8972_v27 = vmul.u32.u64.low %v8948_v52, %v3877_v59  ;;  %v8973_v10 = vmul.u32.u64.high %v8948_v52, %v3877_v59, %v8972_v27  ;;  %v3946_v22 = vsel %vm3945_vm10, %v3944_v14, 0  ;;  %v2982_v25 = vsel %vm8916_vm6, %v10988_v31, %v2979_v63 }
 0x2fc   : > { %v3385_v23 = vor.u32 %v3384_v61, %v3383_v45  ;;  %v3948_v51 = vand.u32 31, %v3946_v22  ;;  %v4041_v24 = vand.u32 2139095040, %v8950_v33  ;;  %5308 = vsinq.f32 %v8600_v21  ;;  %v11007_v21 = vld [vmem:[#allocation127_spill] sm:$0xff] }
 0x2fd   : > { %v8982_v15 = vor.u32 %v11001_v38, %v11000_v55  ;;  %v3082_v5 = vxor.u32 2147483648, %v3081_v0  ;;  %vm11002_vm15 = vcmp.lt.s32.totalorder %v8855_v56, 4  ;;  %v3390_v40 = vand.u32 2147483647, %v3389_v57 }
 0x2fe   : > { %v3867_v20 = vsel %vm11002_vm15, %v3855_v49, 2102212464  ;;  %v8986_v43 = vshrl.u32 %v3787_v54, 30  ;;  %v3846_v37 = vshrl.u32 %v10662_v32, %v8844_v19  ;;  %v8990_v1 = vsub.s32 32, %v3948_v51 }
 0x2ff   : > { %v11006_v12 = vor.u32 %v11004_v60, %v11005_v17  ;;  %vm11008_vm13 = vcmp.lt.s32.totalorder %v11007_v21, 4  ;;  %5310 = vcosq.f32 %v2982_v25  ;;  %vm4947_vm8 = vcmp.lt.s32.totalorder %v4946_v34, 0 }
 0x300   : > { %11003 = vst [vmem:[#allocation2_spill] sm:$0xff] %v8986_v43  ;;  %v3392_v49 = vcvt.s32.f32 %v3385_v23  ;;  %v3866_v59 = vsel %vm3862_vm3, %v3846_v37, %v8890_v18  ;;  %v3868_v19 = vsel %vm3864_vm11, %v8892_v62, %v3867_v20  ;;  %v4042_v14 = vshrl.u32 %v4041_v24, 23 }
 0x301   : > { %v8997_v61 = vsel %vm11008_vm13, %v11006_v12, 1326507024  ;;  %v9010_v36 = vsel %vm10608_vm12, %v8982_v15, 920167782  ;;  %5312 = vsinq.f32 %v2982_v25  ;;  %v3083_v63 = vsel %vm10605_vm4, %v3082_v5, %v3081_v0 }
 0x302   : > { %11009 = vst [vmem:[#allocation23_spill] sm:$0xff] %v8997_v61  ;;  %v3470_v3 = vadd.s32 %v11012_v4, %v8497_v53  ;;  %v3393_v45 = vmul.f32 %v3392_v49, %v3390_v40  ;;  %v9016_v8 = vsel %vm4947_vm8, 0, %v4946_v34  ;;  %v3789_v18 = vshll.u32 %v8986_v43, 30 }
 0x303   : > { %v3961_v62 = vshrl.u32 %v10657_v2, %v8990_v1  ;;  %v3869_v57 = vsel %vm3863_vm1, %v3866_v59, %v3868_v19  ;;  %vm3887_vm3 = vc.u32 %v8973_v10, %v8967_v44  ;;  %v3888_v54 = vadd.s32 1, %v8968_v47 }
 0x304   : > { %v3964_v0 = vshrl.u32 %v10967_v29, %v8990_v1  ;;  %v10592_v53 = vand.u32 2147483647, %v8894_v28  ;;  %v9029_v34 = vshrl.u32 %v3946_v22, 5  ;;  %v3960_v27 = vshll.u32 %v10660_v30, %v3948_v51  ;;  %v11016_v22 = vld [vmem:[#allocation16_spill] sm:$0xff] }
 0x305   : > { %v4968_v25 = vadd.s32 4294967169, %v4042_v14  ;;  %v3952_v23 = vshrl.u32 %v10659_v13, %v8990_v1  ;;  %v3955_v56 = vshrl.u32 %v10661_v41, %v8990_v1  ;;  %v3958_v24 = vshrl.u32 %v10660_v30, %v8990_v1 }
 0x306   : > { %v3963_v55 = vshll.u32 %v10657_v2, %v3948_v51  ;;  %v11013_v38 = vand.u32 2147483647, %v10994_v50  ;;  %vm10603_vm11 = vcmp.lt.s32.totalorder %v11016_v22, 0  ;;  %v3486_v20 = vsub.s32 32, %v9016_v8  ;;  %v9051_v17 = vpop.eup %5308 }
 0x307   : > { %v3490_v40 = vsub.s32 4294967266, %v9016_v8  ;;  %v9049_v37 = vsub.s32 %v8902_v11, %v3789_v18  ;;  %v3962_v60 = vor.u32 %v3961_v62, %v3960_v27  ;;  %v3951_v12 = vshll.u32 %v10662_v32, %v3948_v51 }
 0x308   : > { %vm9041_vm1 = vcmp.le.f32.partialorder %v11013_v38, 0.7853982  ;;  %v3954_v49 = vshll.u32 %v10659_v13, %v3948_v51  ;;  %v3957_v59 = vshll.u32 %v10661_v41, %v3948_v51  ;;  %v3965_v19 = vor.u32 %v3964_v0, %v3963_v55 }
 0x309   : > { %v3885_v14 = vmul.u32 %v8948_v52, %v3869_v57  ;;  %v3889_v4 = vsel %vm3887_vm3, %v3888_v54, %v8968_v47  ;;  %v3941_v11 = vand.u32 8388607, %v10592_v53  ;;  %v4048_v18 = vadd.s32 1, %v4968_v25  ;;  %v9063_v62 = vpop.eup %5310 }
 0x30a   : > { %11017 = vst [vmem:[#allocation118_spill] sm:$0xff] %v9063_v62  ;;  %v3953_v27 = vor.u32 %v3952_v23, %v3951_v12  ;;  %v3956_v38 = vor.u32 %v3955_v56, %v3954_v49  ;;  %v3959_v39 = vor.u32 %v3958_v24, %v3957_v59  ;;  %vm3969_vm10 = vcmp.lt.s32.totalorder %v9029_v34, 4 }
 0x30b   : > { %v3394_v51 = vxor.u32 2147483648, %v3393_v45  ;;  %v3488_v0 = vshrl.u32 %v3470_v3, %v3486_v20  ;;  %v3792_v52 = vsub.s32 0, %v9049_v37  ;;  %v3975_v57 = vsel %vm3969_vm10, %v3962_v60, 920167782  ;;  %v9069_v55 = vpop.eup %5312  ;;  %v11019_v3 = vld [vmem:[#allocation30_spill] sm:$0xff] }
 0x30c   : > { %11018 = vst [vmem:[#allocation24_spill] sm:$0xff] %v9069_v55  ;;  %v3491_v47 = vadd.s32 127, %v3490_v40  ;;  %v9071_v54 = vadd.s32 %v3889_v4, %v3885_v14  ;;  %v3979_v25 = vsel %vm3969_vm10, %v3965_v19, 1326507024  ;;  %vm4049_vm15 = vcmp.gt.s32.totalorder %v4048_v18, 0 }
 0x30d   : > { %vm3966_vm13 = vcmp.lt.s32.totalorder %v9029_v34, 1  ;;  %vm3968_vm8 = vcmp.lt.s32.totalorder %v9029_v34, 3  ;;  %v4050_v23 = vsel %vm4049_vm15, %v4048_v18, 0  ;;  %v1836_v56 = vsub.s32 4, %v11019_v3 }
 0x30e   : > { %v3942_v24 = vor.u32 8388608, %v3941_v11  ;;  %v3974_v20 = vsel %vm3966_vm13, %v3953_v27, %v3956_v38  ;;  %v3976_v40 = vsel %vm3968_vm8, %v3959_v39, %v3975_v57  ;;  %v4052_v12 = vand.u32 31, %v4050_v23 }
 0x30f   : > { %v4957_v49 = vmin.u32 %v3792_v52, %v9049_v37  ;;  %v3978_v59 = vsel %vm3966_vm13, %v3956_v38, %v3959_v39  ;;  %v3980_v19 = vsel %vm3968_vm8, %v3962_v60, %v3979_v25  ;;  %v9091_v4 = vsel %vm9041_vm1, %v10994_v50, %v3083_v63  ;;  %v11020_v25 = vld [vmem:[#allocation55_spill] sm:$0xff] }
 0x310   : > { %v9095_v11 = vsel %vm10603_vm11, %v3394_v51, %v3393_v45  ;;  %v3891_v18 = vadd.s32 536870912, %v9071_v54  ;;  %vm3967_vm3 = vcmp.lt.s32.totalorder %v9029_v34, 2  ;;  %v3487_v52 = vshll.u32 %v8671_v16, %v9016_v8 }
 0x311   : > { %v3492_v57 = vshll.u32 %v3491_v47, 23  ;;  %v3977_v60 = vsel %vm3967_vm3, %v3974_v20, %v3976_v40  ;;  %vm11021_vm15 = vcmp.lt.s32.totalorder %v11020_v25, 0  ;;  %v3971_v53 = vsel %vm3969_vm10, %v3959_v39, 2102212464 }
 0x312   : > { %v1837_v63 = vsel %vm11021_vm15, %v1836_v56, %v11019_v3  ;;  %v3981_v45 = vsel %vm3967_vm3, %v3978_v59, %v3980_v19  ;;  %v9110_v51 = vshll.u32 %v3942_v24, 8  ;;  %v9112_v35 = vsub.s32 32, %v4052_v12 }
 0x313   : > { %v9114_v14 = vor.u32 %v3488_v0, %v3487_v52  ;;  %v3794_v16 = vclz %v4957_v49  ;;  %v3950_v8 = vshrl.u32 %v10662_v32, %v8990_v1  ;;  %v11022_v47 = vand.u32 2147483647, %v8950_v33 }
 0x314   : > { %v9120_v3 = vshrl.u32 %v3891_v18, 30  ;;  %v9123_v39 = vmul.u32.u64.low %v9110_v51, %v3977_v60  ;;  %v9124_v56 = vmul.u32.u64.high %v9110_v51, %v3977_v60, %v9123_v39  ;;  %v1839_v40 = vsel %vm7545_vm9, 0, %v1837_v63 }
 0x315   : > { %v4045_v20 = vand.u32 8388607, %v11022_v47  ;;  %v3970_v0 = vsel %vm3966_vm13, %v3950_v8, %v3953_v27  ;;  %v3972_v49 = vsel %vm3968_vm8, %v3956_v38, %v3971_v53  ;;  %v9137_v19 = vor.u32 4788187, %v3492_v57 }
 0x316   : > { %11023 = vst [vmem:[#allocation9_spill] sm:$0xff] %v9120_v3  ;;  %v9134_v1 = vmul.u32.u64.low %v9110_v51, %v3981_v45  ;;  %v9135_v59 = vmul.u32.u64.high %v9110_v51, %v3981_v45, %v9134_v1  ;;  %v4056_v18 = vshrl.u32 %v10659_v13, %v9112_v35  ;;  %v4059_v52 = vshrl.u32 %v10661_v41, %v9112_v35 }
 0x317   : > { %v4065_v60 = vshrl.u32 %v10657_v2, %v9112_v35  ;;  %v9145_v63 = vadd.s32 4294967294, %v3794_v16  ;;  %v4046_v27 = vor.u32 8388608, %v4045_v20  ;;  %v4068_v53 = vshrl.u32 %v10967_v29, %v9112_v35 }
 0x318   : > { %v1843_v38 = vadd.s32 3, %v1839_v40  ;;  %v9151_v57 = vsel %vm3967_vm3, %v3970_v0, %v3972_v49  ;;  %v4055_v45 = vshll.u32 %v10662_v32, %v4052_v12  ;;  %v4058_v8 = vshll.u32 %v10659_v13, %v4052_v12  ;;  %v11025_v0 = vld [vmem:[#allocation54_spill] sm:$0xff] }
 0x319   : > { %v4064_v47 = vshll.u32 %v10660_v30, %v4052_v12  ;;  %v3893_v24 = vshll.u32 %v9120_v3, 30  ;;  %v9157_v1 = vshrl.u32 %v4050_v23, 5  ;;  %v4062_v16 = vshrl.u32 %v10660_v30, %v9112_v35 }
 0x31a   : > { %v4067_v29 = vshll.u32 %v10657_v2, %v4052_v12  ;;  %v9162_v20 = vor.u32 %v4056_v18, %v4055_v45  ;;  %v9164_v34 = vor.u32 %v4059_v52, %v4058_v8  ;;  %v2044_v49 = vsub.s32 4, %v11025_v0  ;;  %v11026_v2 = vld [vmem:[#allocation121_spill] sm:$0xff]  ;;  %v11027_v52 = vld [vmem:[#allocation112_spill] sm:$0xff] }
 0x31b   : > { %v4066_v40 = vor.u32 %v4065_v60, %v4064_v47  ;;  %vm4959_vm9 = vcmp.lt.s32.totalorder %v9145_v63, 0  ;;  %v3989_v43 = vmul.u32 %v9110_v51, %v9151_v57  ;;  %v4061_v23 = vshll.u32 %v10661_v41, %v4052_v12 }
 0x31c   : > { %v4069_v3 = vor.u32 %v4068_v53, %v4067_v29  ;;  %v1844_v33 = vand.u32 3, %v1843_v38  ;;  %v3992_v28 = vadd.s32 1, %v9124_v56  ;;  %v9172_v46 = vshll.u32 %v4046_v27, 8  ;;  %v11028_v27 = vld [vmem:[#allocation33_spill] sm:$0xff] }
 0x31d   : > { %v1847_v18 = vxor.u32 2147483648, %v11026_v2  ;;  %v1850_v45 = vxor.u32 2147483648, %v11027_v52  ;;  %vm3991_vm10 = vc.u32 %v9135_v59, %v9123_v39  ;;  %v9178_v60 = vor.u32 %v4062_v16, %v4061_v23  ;;  %v11031_v23 = vld [vmem:[#allocation44_spill] sm:$0xff] }
 0x31e   : > { %vm4070_vm13 = vcmp.lt.s32.totalorder %v9157_v1, 1  ;;  %vm4073_vm8 = vcmp.lt.s32.totalorder %v9157_v1, 4  ;;  %vm1842_vm3 = vweird.f32 %v11020_v25  ;;  %vm10611_vm15 = vcmp.lt.s32.totalorder %v9157_v1, 3 }
 0x31f   : > { %v4078_v12 = vsel %vm4070_vm13, %v9162_v20, %v9164_v34  ;;  %v4079_v51 = vsel %vm4073_vm8, %v4066_v40, 920167782  ;;  %vm11029_vm11 = vcmp.lt.s32.totalorder %v11028_v27, 0  ;;  %v4083_v38 = vsel %vm4073_vm8, %v4069_v3, 1326507024 }
 0x320   : > { %v2045_v53 = vsel %vm11029_vm11, %v2044_v49, %v11025_v0  ;;  %vm1846_vm5 = vcmp.eq.s32.totalorder %v1844_v33, 0  ;;  %vm1849_vm4 = vcmp.eq.s32.totalorder %v1844_v33, 2  ;;  %v1732_v48 = vsub.s32 4, %v11031_v23  ;;  %v11036_v49 = vld [vmem:[#allocation79_spill] sm:$0xff] }
 0x321   : > { %v2047_v8 = vsel %vm7120_vm7, 0, %v2045_v53  ;;  %v1848_v47 = vsel %vm1846_vm5, %v11027_v52, %v1847_v18  ;;  %v1851_v16 = vsel %vm1849_vm4, %v1850_v45, %v11026_v2  ;;  %v11032_v61 = vand.u32 2147483647, %v11016_v22  ;;  %v11037_v18 = vld [vmem:[#allocation78_spill] sm:$0xff]  ;;  %v11038_v53 = vld [vmem:[#allocation52_spill] sm:$0xff] }
 0x322   : > { %v2051_v29 = vadd.s32 3, %v2047_v8  ;;  %v11033_v21 = vmov 0  ;;  %v4080_v3 = vsel %vm10611_vm15, %v9178_v60, %v4079_v51  ;;  %v4082_v0 = vsel %vm4070_vm13, %v9164_v34, %v9178_v60 }
 0x323   : > { %vm9202_vm12 = vcmp.le.f32.partialorder %v11032_v61, 0.7853982  ;;  %v2055_v2 = vxor.u32 2147483648, %v11036_v49  ;;  %v2058_v52 = vxor.u32 2147483648, %v11037_v18  ;;  %v4084_v45 = vsel %vm10611_vm15, %v4066_v40, %v4083_v38 }
 0x324   : > { %v11034_v21 = vsel %vm9202_vm12, 4294967295, %v11033_v21  ;;  %vm1845_vm7 = vcmp.lt.s32.totalorder %v1844_v33, 2  ;;  %v2052_v61 = vand.u32 3, %v2051_v29  ;;  %vm11039_vm5 = vcmp.lt.s32.totalorder %v11038_v53, 0 }
 0x325   : > { %11035 = vst [vmem:[#allocation50_spill] sm:$0xff] %v11034_v21  ;;  %v1733_v57 = vsel %vm11039_vm5, %v1732_v48, %v11031_v23  ;;  %v3993_v51 = vsel %vm3991_vm10, %v3992_v28, %v9124_v56  ;;  %vm4071_vm4 = vcmp.lt.s32.totalorder %v9157_v1, 2  ;;  %v1852_v8 = vsel %vm1845_vm7, %v1848_v47, %v1851_v16 }
 0x326   : > { %v1735_v55 = vsel %vm7405_vm14, 0, %v1733_v57  ;;  %v4081_v40 = vsel %vm4071_vm4, %v4078_v12, %v4080_v3  ;;  %vm2054_vm11 = vcmp.eq.s32.totalorder %v2052_v61, 0  ;;  %vm2057_vm15 = vcmp.eq.s32.totalorder %v2052_v61, 2 }
 0x327   : > { %v1739_v33 = vadd.s32 3, %v1735_v55  ;;  %v4085_v48 = vsel %vm4071_vm4, %v4082_v0, %v4084_v45  ;;  %vm2053_vm5 = vcmp.lt.s32.totalorder %v2052_v61, 2  ;;  %v2056_v38 = vsel %vm2054_vm11, %v11037_v18, %v2055_v2  ;;  %v11041_v0 = vld [vmem:[#allocation110_spill] sm:$0xff]  ;;  %v11044_v18 = vld [vmem:[#allocation53_spill] sm:$0xff] }
 0x328   : > { %v2059_v28 = vsel %vm2057_vm15, %v2058_v52, %v11036_v49  ;;  %v9236_v56 = vsel %vm4959_vm9, 0, %v9145_v63  ;;  %v9238_v62 = vadd.s32 %v3993_v51, %v3989_v43  ;;  %v1853_v12 = vsel %vm1842_vm3, nan, %v1852_v8 }
 0x329   : > { %v2060_v47 = vsel %vm2053_vm5, %v2056_v38, %v2059_v28  ;;  %v9243_v55 = vsub.s32 %v9071_v54, %v3893_v24  ;;  %v9246_v16 = vmul.u32.u64.low %v9172_v46, %v4081_v40  ;;  %v9247_v29 = vmul.u32.u64.high %v9172_v46, %v4081_v40, %v9246_v16  ;;  %v11042_v54 = vld [vmem:[#allocation109_spill] sm:$0xff] }
 0x32a   : > { %vm2050_vm14 = vweird.f32 %v11028_v27  ;;  %v9252_v23 = vmul.u32.u64.low %v9172_v46, %v4085_v48  ;;  %v9253_v63 = vmul.u32.u64.high %v9172_v46, %v4085_v48, %v9252_v23  ;;  %v1740_v3 = vand.u32 3, %v1739_v33 }
 0x32b   : > { %v2061_v43 = vsel %vm2050_vm14, nan, %v2060_v47  ;;  %5314 = vcosq.f32 %v9091_v4  ;;  %v1743_v49 = vxor.u32 2147483648, %v11041_v0  ;;  %v1746_v24 = vxor.u32 2147483648, %v11042_v54  ;;  %v11050_v23 = vld [vmem:[#allocation75_spill] sm:$0xff] }
 0x32c   : > { %v4987_v25 = vpack.c.bf16 %v2061_v43, %v1853_v12  ;;  %5316 = vsinq.f32 %v9091_v4  ;;  %v9263_v27 = vsel %vm9202_vm12, %v11016_v22, %v9095_v11  ;;  %v3995_v2 = vadd.s32 536870912, %v9238_v62  ;;  %v11045_v11 = vld [vmem:[#allocation26_spill] sm:$0xff]  ;;  %v11049_v12 = vld [vmem:[#allocation80_spill] sm:$0xff] }
 0x32d   : > { %11043 = vst [vmem:[#allocation5_spill] sm:$0xff] %v9263_v27  ;;  %v1940_v52 = vsub.s32 4, %v11044_v18  ;;  %v3494_v45 = vand.u32 2147483647, %v9137_v19  ;;  %v3496_v61 = vcvt.s32.f32 %v9114_v14  ;;  %v3802_v57 = vsub.s32 4294967266, %v9236_v56 }
 0x32e   : > { %v3896_v51 = vsub.s32 0, %v9243_v55  ;;  %4988 = vmatprep.subr.bf16.mxu0 %v4987_v25  ;;  %v4054_v4 = vshrl.u32 %v10662_v32, %v9112_v35  ;;  %vm1742_vm9 = vcmp.eq.s32.totalorder %v1740_v3, 0  ;;  %vm1745_vm10 = vcmp.eq.s32.totalorder %v1740_v3, 2 }
 0x32f   : > { %vm11046_vm3 = vcmp.lt.s32.totalorder %v11045_v11, 0  ;;  %v4075_v19 = vsel %vm4073_vm8, %v9178_v60, 2102212464  ;;  %v1744_v14 = vsel %vm1742_vm9, %v11042_v54, %v1743_v49  ;;  %v1747_v40 = vsel %vm1745_vm10, %v1746_v24, %v11041_v0  ;;  %v11051_v60 = vld [vmem:[#allocation74_spill] sm:$0xff] }
 0x330   : > { %v1941_v8 = vsel %vm11046_vm3, %v1940_v52, %v11044_v18  ;;  %v9283_v38 = vshrl.u32 %v3995_v2, 30  ;;  %v4074_v35 = vsel %vm4070_vm13, %v4054_v4, %v9162_v20  ;;  %v2252_v47 = vsub.s32 4, %v11049_v12  ;;  %v11052_v49 = vld [vmem:[#allocation58_spill] sm:$0xff]  ;;  %v11054_v18 = vld [vmem:[#allocation15_spill] sm:$0xff] }
 0x331   : > { %v1943_v48 = vsel %vm7104_vm0, 0, %v1941_v8  ;;  %vm1741_vm15 = vcmp.lt.s32.totalorder %v1740_v3, 2  ;;  %v1951_v43 = vxor.u32 2147483648, %v11050_v23  ;;  %v1954_v25 = vxor.u32 2147483648, %v11051_v60  ;;  %v11057_v8 = vld [vmem:[#allocation49_spill] sm:$0xff] }
 0x332   : > { %11048 = vst [vmem:[#allocation59_spill] sm:$0xff] %v9283_v38  ;;  %v1947_v28 = vadd.s32 3, %v1943_v48  ;;  %v2460_v54 = vsub.s32 4, %v11052_v49  ;;  %vm11053_vm8 = vcmp.lt.s32.totalorder %v9157_v1, 3  ;;  %v1748_v24 = vsel %vm1741_vm15, %v1744_v14, %v1747_v40 }
 0x333   : > { %v4076_v0 = vsel %vm11053_vm8, %v9164_v34, %v4075_v19  ;;  %vm11055_vm0 = vcmp.lt.s32.totalorder %v11054_v18, 0  ;;  %vm4095_vm13 = vc.u32 %v9253_v63, %v9246_v16  ;;  %v4096_v3 = vadd.s32 1, %v9247_v29 }
 0x334   : > { %v1948_v2 = vand.u32 3, %v1947_v28  ;;  %v2253_v20 = vsel %vm11055_vm0, %v2252_v47, %v11049_v12  ;;  %vm11058_vm7 = vcmp.lt.s32.totalorder %v11057_v8, 0  ;;  %vm1738_vm11 = vweird.f32 %v11038_v53 }
 0x335   : > { %v2255_v4 = vsel %vm7644_vm2, 0, %v2253_v20  ;;  %v2461_v33 = vsel %vm11058_vm7, %v2460_v54, %v11052_v49  ;;  %v9307_v19 = vpop.eup %5314  ;;  %v1749_v14 = vsel %vm1738_vm11, nan, %v1748_v24  ;;  %vm1946_vm2 = vweird.f32 %v11045_v11  ;;  %v11059_v49 = vld [vmem:[#allocation72_spill] sm:$0xff]  ;;  %v11061_v20 = vld [vmem:[#allocation126_spill] sm:$0xff] }
 0x336   : > { %vm1950_vm5 = vcmp.eq.s32.totalorder %v1948_v2, 0  ;;  %vm1953_vm14 = vcmp.eq.s32.totalorder %v1948_v2, 2  ;;  %v2259_v34 = vadd.s32 3, %v2255_v4  ;;  %vm1949_vm9 = vcmp.lt.s32.totalorder %v1948_v2, 2  ;;  %v9311_v28 = vpop.eup %5316  ;;  %v11062_v4 = vld [vmem:[#allocation125_spill] sm:$0xff] }
 0x337   : > { %v1952_v40 = vsel %vm1950_vm5, %v11051_v60, %v1951_v43  ;;  %v1955_v48 = vsel %vm1953_vm14, %v1954_v25, %v11050_v23  ;;  %vm11060_vm10 = vnez %v11059_v49  ;;  %v2263_v52 = vxor.u32 2147483648, %v11061_v20 }
 0x338   : > { %v1956_v12 = vsel %vm1949_vm9, %v1952_v40, %v1955_v48  ;;  %v2260_v47 = vand.u32 3, %v2259_v34  ;;  %v2463_v53 = vsel %vm11060_vm10, 0, %v2461_v33  ;;  %v2266_v21 = vxor.u32 2147483648, %v11062_v4  ;;  %v11063_v34 = vld [vmem:[#allocation83_spill] sm:$0xff]  ;;  %v11064_v48 = vld [vmem:[#allocation82_spill] sm:$0xff] }
 0x339   : > { %v1957_v54 = vsel %vm1946_vm2, nan, %v1956_v12  ;;  %v2467_v24 = vadd.s32 3, %v2463_v53  ;;  %v4961_v2 = vmin.u32 %v3896_v51, %v9243_v55  ;;  %v3997_v43 = vshll.u32 %v9283_v38, 30 }
 0x33a   : > { %v4077_v23 = vsel %vm4071_vm4, %v4074_v35, %v4076_v0  ;;  %v4989_v60 = vpack.c.bf16 %v1957_v54, %v1749_v14  ;;  %v9322_v11 = vmul.f32 %v3496_v61, %v3494_v45  ;;  %v3803_v25 = vadd.s32 127, %v3802_v57 }
 0x33b   : > { %v4097_v33 = vsel %vm4095_vm13, %v4096_v3, %v9247_v29  ;;  %v2471_v40 = vxor.u32 2147483648, %v11063_v34  ;;  %vm2262_vm3 = vcmp.eq.s32.totalorder %v2260_v47, 0  ;;  %vm2265_vm15 = vcmp.eq.s32.totalorder %v2260_v47, 2 }
 0x33c   : > { %4990 = vmatpush1.bf16.msra.mxu0 %v4989_v60  ;;  %v2468_v51 = vand.u32 3, %v2467_v24  ;;  %v2474_v12 = vxor.u32 2147483648, %v11064_v48  ;;  %v4093_v1 = vmul.u32 %v9172_v46, %v4077_v23  ;;  %vm2261_vm4 = vcmp.lt.s32.totalorder %v2260_v47, 2  ;;  %v11065_v47 = vld [vmem:[#allocation73_spill] sm:$0xff]  ;;  %v11069_v60 = vld [vmem:[#allocation103_spill] sm:$0xff] }
 0x33d   : > { %v2264_v45 = vsel %vm2262_vm3, %v11062_v4, %v2263_v52  ;;  %v2267_v61 = vsel %vm2265_vm15, %v2266_v21, %v11061_v20  ;;  %v3898_v57 = vclz %v4961_v2  ;;  %v9334_v35 = vsub.s32 %v9238_v62, %v3997_v43  ;;  %v11068_v4 = vld [vmem:[#allocation41_spill] sm:$0xff] }
 0x33e   : > { %v2268_v29 = vsel %vm2261_vm4, %v2264_v45, %v2267_v61  ;;  %vm2470_vm8 = vcmp.eq.s32.totalorder %v2468_v51, 0  ;;  %v9336_v0 = vadd.s32 %v4097_v33, %v4093_v1  ;;  %vm2258_vm0 = vweird.f32 %v11054_v18  ;;  %v11066_v18 = vld [vmem:[#allocation27_spill] sm:$0xff]  ;;  %v11075_v45 = vld [vmem:[#allocation122_spill] sm:$0xff] }
 0x33f   : > { %v2472_v3 = vsel %vm2470_vm8, %v11064_v48, %v2471_v40  ;;  %vm2473_vm13 = vcmp.eq.s32.totalorder %v2468_v51, 2  ;;  %v2269_v14 = vsel %vm2258_vm0, nan, %v2268_v29  ;;  %vm2469_vm7 = vcmp.lt.s32.totalorder %v2468_v51, 2  ;;  %v11072_v40 = vld [vmem:[#allocation48_spill] sm:$0xff] }
 0x340   : > { %v2475_v46 = vsel %vm2473_vm13, %v2474_v12, %v11063_v34  ;;  %v2148_v49 = vsub.s32 4, %v11065_v47  ;;  %v3798_v21 = vsub.s32 32, %v9236_v56  ;;  %v3804_v53 = vshll.u32 %v3803_v25, 23  ;;  %v11074_v12 = vld [vmem:[#allocation124_spill] sm:$0xff] }
 0x341   : > { %vm2466_vm11 = vweird.f32 %v11057_v8  ;;  %v2476_v62 = vsel %vm2469_vm7, %v2472_v3, %v2475_v46  ;;  %v4000_v54 = vsub.s32 0, %v9334_v35  ;;  %vm11067_vm5 = vcmp.lt.s32.totalorder %v11066_v18, 0  ;;  %v11071_v8 = vld [vmem:[#allocation62_spill] sm:$0xff] }
 0x342   : > { %v2477_v20 = vsel %vm2466_vm11, nan, %v2476_v62  ;;  %v2149_v52 = vsel %vm11067_vm5, %v2148_v49, %v11065_v47  ;;  %v2356_v24 = vsub.s32 4, %v11068_v4  ;;  %v4962_v2 = vadd.s32 4294967294, %v3898_v57  ;;  %v11076_v57 = vld [vmem:[#allocation71_spill] sm:$0xff]  ;;  %v11079_v49 = vld [vmem:[#allocation81_spill] sm:$0xff] }
 0x343   : > { %v4099_v43 = vadd.s32 536870912, %v9336_v0  ;;  %v4991_v23 = vpack.c.bf16 %v2477_v20, %v2269_v14  ;;  %vm11070_vm14 = vnez %v11069_v60  ;;  %5318 = vcosq.f32 %v9263_v27 }
 0x344   : > { %v2151_v33 = vsel %vm11070_vm14, 0, %v2149_v52  ;;  %vm3416_vm9 = vcmp.lt.s32.totalorder %v11071_v8, 0  ;;  %v3782_v25 = vadd.s32 %v8811_v58, %v8825_v9  ;;  %vm11073_vm2 = vcmp.lt.s32.totalorder %v11072_v40, 0  ;;  %v11080_v52 = vld [vmem:[#allocation18_spill] sm:$0xff] }
 0x345   : > { %v2155_v34 = vadd.s32 3, %v2151_v33  ;;  %v2357_v51 = vsel %vm11073_vm2, %v2356_v24, %v11068_v4  ;;  %v3498_v48 = vxor.u32 2147483648, %v9322_v11  ;;  %4992 = vmatprep.subr.bf16.mxu0 %v4991_v23  ;;  %v2159_v1 = vxor.u32 2147483648, %v11074_v12 }
 0x346   : > { %v2162_v61 = vxor.u32 2147483648, %v11075_v45  ;;  %vm11077_vm10 = vnez %v11076_v57  ;;  %v3800_v3 = vshrl.u32 %v3782_v25, %v3798_v21  ;;  %v4965_v14 = vmin.u32 %v4000_v54, %v9334_v35  ;;  %v11081_v54 = vld [vmem:[#allocation46_spill] sm:$0xff] }
 0x347   : > { %v2359_v29 = vsel %vm11077_vm10, 0, %v2357_v51  ;;  %v2156_v46 = vand.u32 3, %v2155_v34  ;;  %v9365_v9 = vor.u32 4788187, %v3804_v53  ;;  %vm4963_vm3 = vcmp.lt.s32.totalorder %v4962_v2, 0 }
 0x348   : > { %v2363_v58 = vadd.s32 3, %v2359_v29  ;;  %v9367_v47 = vshrl.u32 %v4099_v43, 30  ;;  %v2367_v62 = vxor.u32 2147483648, %v11079_v49  ;;  %v2370_v4 = vxor.u32 2147483648, %v11080_v52 }
 0x349   : > { %vm2158_vm15 = vcmp.eq.s32.totalorder %v2156_v46, 0  ;;  %vm2161_vm4 = vcmp.eq.s32.totalorder %v2156_v46, 2  ;;  %vm2157_vm8 = vcmp.lt.s32.totalorder %v2156_v46, 2  ;;  %v10614_v23 = vand.u32 2147483647, %v11081_v54 }
 0x34a   : > { %11078 = vst [vmem:[#allocation11_spill] sm:$0xff] %v9367_v47  ;;  %v2364_v20 = vand.u32 3, %v2363_v58  ;;  %v2160_v24 = vsel %vm2158_vm15, %v11075_v45, %v2159_v1  ;;  %v2163_v21 = vsel %vm2161_vm4, %v2162_v61, %v11074_v12  ;;  %v9374_v60 = vsel %vm4963_vm3, 0, %v4962_v2  ;;  %v11084_v58 = vld [vmem:[#allocation89_spill] sm:$0xff] }
 0x34b   : > { %v4002_v53 = vclz %v4965_v14  ;;  %v2164_v33 = vsel %vm2157_vm8, %v2160_v24, %v2163_v21  ;;  %v4101_v43 = vshll.u32 %v9367_v47, 30  ;;  %vm2154_vm13 = vweird.f32 %v11066_v18 }
 0x34c   : > { %vm2366_vm0 = vcmp.eq.s32.totalorder %v2364_v20, 0  ;;  %vm2369_vm7 = vcmp.eq.s32.totalorder %v2364_v20, 2  ;;  %v3799_v34 = vshll.u32 %v9049_v37, %v9236_v56  ;;  %v2165_v51 = vsel %vm2154_vm13, nan, %v2164_v33 }
 0x34d   : > { %v2368_v25 = vsel %vm2366_vm0, %v11080_v52, %v2367_v62  ;;  %vm2365_vm11 = vcmp.lt.s32.totalorder %v2364_v20, 2  ;;  %v2371_v12 = vsel %vm2369_vm7, %v2370_v4, %v11079_v49  ;;  %v3499_v2 = vsel %vm3416_vm9, %v3498_v48, %v9322_v11  ;;  %v9388_v45 = vpop.eup %5318  ;;  %v11083_v48 = vld [vmem:[#allocation86_spill] sm:$0xff] }
 0x34e   : > { %vm2362_vm5 = vweird.f32 %v11072_v40  ;;  %v2372_v1 = vsel %vm2365_vm11, %v2368_v25, %v2371_v12  ;;  %v2797_v18 = vand.u32 8388607, %v10614_v23  ;;  %11082 = vst [vmem:[#allocation40_spill] sm:$0xff] %v9388_v45  ;;  %v3801_v61 = vor.u32 %v3800_v3, %v3799_v34  ;;  %v11091_v25 = vld [vmem:[#allocation94_spill] sm:$0xff] }
 0x34f   : > { %v3886_v37 = vadd.s32 %v8967_v44, %v8973_v10  ;;  %v3906_v56 = vsub.s32 4294967266, %v9374_v60  ;;  %v2373_v57 = vsel %vm2362_vm5, nan, %v2372_v1  ;;  %v3806_v29 = vand.u32 2147483647, %v9365_v9 }
 0x350   : > { %v4966_v14 = vadd.s32 4294967294, %v4002_v53  ;;  %v9395_v11 = vsub.s32 %v9336_v0, %v4101_v43  ;;  %v4993_v40 = vpack.c.bf16 %v2373_v57, %v2165_v51  ;;  %v2807_v46 = vshll.u32 %v10662_v32, %v11083_v48  ;;  %v11089_v53 = vld [vmem:[#allocation91_spill] sm:$0xff]  ;;  %v11090_v43 = vld [vmem:[#allocation104_spill] sm:$0xff] }
 0x351   : > { %v2808_v49 = vshrl.u32 %v10659_v13, %v11084_v58  ;;  %v2810_v3 = vshll.u32 %v10659_v13, %v11083_v48  ;;  %v2811_v44 = vshrl.u32 %v10661_v41, %v11084_v58  ;;  %v11085_v10 = vand.u32 2147483647, %v11071_v8 }
 0x352   : > { %v11086_v9 = vmov 0  ;;  %v3902_v0 = vsub.s32 32, %v9374_v60  ;;  %4994 = vmatpush1.bf16.msra.mxu0 %v4993_v40  ;;  %v2798_v62 = vor.u32 8388608, %v2797_v18  ;;  %v2813_v20 = vshll.u32 %v10661_v41, %v11083_v48 }
 0x353   : > { %vm9407_vm14 = vcmp.le.f32.partialorder %v11085_v10, 0.7853982  ;;  %v2814_v52 = vshrl.u32 %v10660_v30, %v11084_v58  ;;  %v3907_v4 = vadd.s32 127, %v3906_v56  ;;  %v2809_v24 = vor.u32 %v2808_v49, %v2807_v46  ;;  %v11093_v56 = vld [vmem:[#allocation99_spill] sm:$0xff] }
 0x354   : > { %v11087_v9 = vsel %vm9407_vm14, 4294967295, %v11086_v9  ;;  %v2812_v21 = vor.u32 %v2811_v44, %v2810_v3  ;;  %vm2824_vm2 = vcmp.lt.s32.totalorder %v11089_v53, 3  ;;  %vm4967_vm10 = vcmp.lt.s32.totalorder %v4966_v14, 0 }
 0x355   : > { %11088 = vst [vmem:[#allocation22_spill] sm:$0xff] %v11087_v9  ;;  %v2815_v33 = vor.u32 %v2814_v52, %v2813_v20  ;;  %vm2822_vm3 = vcmp.lt.s32.totalorder %v11089_v53, 1  ;;  %v2836_v34 = vsel %vm2824_vm2, %v11091_v25, %v11090_v43  ;;  %v4104_v51 = vsub.s32 0, %v9395_v11 }
 0x356   : > { %v2806_v12 = vshrl.u32 %v10662_v32, %v11084_v58  ;;  %vm2823_vm15 = vcmp.lt.s32.totalorder %v11089_v53, 2  ;;  %v2830_v1 = vsel %vm2822_vm3, %v2809_v24, %v2812_v21  ;;  %vm11092_vm4 = vcmp.lt.s32.totalorder %v11089_v53, 4 }
 0x357   : > { %v2827_v18 = vsel %vm11092_vm4, %v2815_v33, 2102212464  ;;  %v2832_v57 = vsel %vm2824_vm2, %v2815_v33, %v11093_v56  ;;  %v2834_v40 = vsel %vm2822_vm3, %v2812_v21, %v2815_v33  ;;  %v2838_v48 = vshll.u32 %v2798_v62, 8  ;;  %v11097_v56 = vld [vmem:[#allocation77_spill] sm:$0xff] }
 0x358   : > { %v3904_v46 = vshrl.u32 %v3886_v37, %v3902_v0  ;;  %v9431_v49 = vsel %vm4967_vm10, 0, %v4966_v14  ;;  %v2833_v3 = vsel %vm2823_vm15, %v2830_v1, %v2832_v57  ;;  %v2837_v58 = vsel %vm2823_vm15, %v2834_v40, %v2836_v34 }
 0x359   : > { %v2826_v44 = vsel %vm2822_vm3, %v2806_v12, %v2809_v24  ;;  %v2828_v10 = vsel %vm2824_vm2, %v2812_v21, %v2827_v18  ;;  %v9439_v20 = vmul.u32.u64.low %v2838_v48, %v2837_v58  ;;  %v9440_v52 = vmul.u32.u64.high %v2838_v48, %v2837_v58, %v9439_v20  ;;  %v11094_v24 = vld [vmem:[#allocation68_spill] sm:$0xff] }
 0x35a   : > { %v3808_v43 = vcvt.s32.f32 %v3801_v61  ;;  %v3903_v62 = vshll.u32 %v9243_v55, %v9374_v60  ;;  %v9444_v37 = vmul.u32.u64.low %v2838_v48, %v2833_v3  ;;  %v9445_v14 = vmul.u32.u64.high %v2838_v48, %v2833_v3, %v9444_v37  ;;  %v11095_v60 = vld [vmem:[#allocation67_spill] sm:$0xff] }
 0x35b   : > { %v3908_v0 = vshll.u32 %v3907_v4, 23  ;;  %v4006_v33 = vsub.s32 32, %v9431_v49  ;;  %v4969_v25 = vmin.u32 %v4104_v51, %v9395_v11  ;;  %v10613_v34 = vand.u32 2147483647, %v11094_v24 }
 0x35c   : > { %v9454_v21 = vsel %vm9407_vm14, %v11071_v8, %v3499_v2  ;;  %v9456_v61 = vmul.f32 %v3808_v43, %v3806_v29  ;;  %v2829_v55 = vsel %vm2823_vm15, %v2826_v44, %v2828_v10  ;;  %v2704_v12 = vshrl.u32 %v10659_v13, %v11095_v60  ;;  %v11096_v2 = vld [vmem:[#allocation119_spill] sm:$0xff] }
 0x35d   : > { %v9462_v4 = vor.u32 %v3904_v46, %v3903_v62  ;;  %v3990_v51 = vadd.s32 %v9123_v39, %v9135_v59  ;;  %v4010_v1 = vsub.s32 4294967266, %v9431_v49  ;;  %vm2847_vm8 = vc.u32 %v9440_v52, %v9444_v37 }
 0x35e   : > { %v2668_v18 = vsub.s32 4, %v11096_v2  ;;  %v2848_v29 = vadd.s32 1, %v9445_v14  ;;  %v2693_v53 = vand.u32 8388607, %v10613_v34  ;;  %v2703_v57 = vshll.u32 %v10662_v32, %v11097_v56 }
 0x35f   : > { %v3909_v40 = vor.u32 4788187, %v3908_v0  ;;  %v4008_v46 = vshrl.u32 %v3990_v51, %v4006_v33  ;;  %v4106_v3 = vclz %v4969_v25  ;;  %v2845_v58 = vmul.u32 %v2838_v48, %v2829_v55  ;;  %v11098_v33 = vld [vmem:[#allocation85_spill] sm:$0xff]  ;;  %v11100_v55 = vld [vmem:[#allocation76_spill] sm:$0xff] }
 0x360   : > { %v2849_v39 = vsel %vm2847_vm8, %v2848_v29, %v9445_v14  ;;  %v2705_v59 = vor.u32 %v2704_v12, %v2703_v57  ;;  %v2706_v44 = vshll.u32 %v10659_v13, %v11097_v56  ;;  %v2707_v10 = vshrl.u32 %v10661_v41, %v11095_v60  ;;  %v11102_v29 = vld [vmem:[#allocation90_spill] sm:$0xff] }
 0x361   : > { %v4011_v20 = vadd.s32 127, %v4010_v1  ;;  %v2850_v43 = vadd.s32 %v2849_v39, %v2845_v58  ;;  %v2709_v62 = vshll.u32 %v10661_v41, %v11097_v56  ;;  %v2710_v0 = vshrl.u32 %v10660_v30, %v11095_v60  ;;  %v11101_v1 = vld [vmem:[#allocation93_spill] sm:$0xff]  ;;  %v11104_v39 = vld [vmem:[#allocation92_spill] sm:$0xff] }
 0x362   : > { %vm11099_vm0 = vcmp.lt.s32.totalorder %v11098_v33, 0  ;;  %v2694_v14 = vor.u32 8388608, %v2693_v53  ;;  %v2708_v25 = vor.u32 %v2707_v10, %v2706_v44  ;;  %vm2720_vm13 = vcmp.lt.s32.totalorder %v11100_v55, 3  ;;  %v11105_v10 = vld [vmem:[#allocation28_spill] sm:$0xff] }
 0x363   : > { %v2669_v48 = vsel %vm11099_vm0, %v2668_v18, %v11096_v2  ;;  %v2851_v12 = vadd.s32 536870912, %v2850_v43  ;;  %v2711_v51 = vor.u32 %v2710_v0, %v2709_v62  ;;  %vm2718_vm7 = vcmp.lt.s32.totalorder %v11100_v55, 1 }
 0x364   : > { %v2732_v56 = vsel %vm2720_vm13, %v11102_v29, %v11101_v1  ;;  %v4970_v57 = vadd.s32 4294967294, %v4106_v3  ;;  %v2702_v58 = vshrl.u32 %v10662_v32, %v11095_v60  ;;  %vm2719_vm11 = vcmp.lt.s32.totalorder %v11100_v55, 2 }
 0x365   : > { %v2726_v2 = vsel %vm2718_vm7, %v2705_v59, %v2708_v25  ;;  %v9498_v18 = vshrl.u32 %v2851_v12, 30  ;;  %vm11103_vm5 = vcmp.lt.s32.totalorder %v11100_v55, 4  ;;  %v2728_v44 = vsel %vm2720_vm13, %v2711_v51, %v11104_v39 }
 0x366   : > { %v2723_v53 = vsel %vm11103_vm5, %v2711_v51, 2102212464  ;;  %v2730_v3 = vsel %vm2718_vm7, %v2708_v25, %v2711_v51  ;;  %vm11106_vm2 = vnez %v11105_v10  ;;  %v2729_v62 = vsel %vm2719_vm11, %v2726_v2, %v2728_v44 }
 0x367   : > { %v2671_v60 = vsel %vm11106_vm2, 0, %v2669_v48  ;;  %v2733_v0 = vsel %vm2719_vm11, %v2730_v3, %v2732_v56  ;;  %v2734_v12 = vshll.u32 %v2694_v14, 8  ;;  %v4012_v1 = vshll.u32 %v4011_v20, 23 }
 0x368   : > { %v2853_v29 = vshll.u32 %v9498_v18, 30  ;;  %v2722_v34 = vsel %vm2718_vm7, %v2702_v58, %v2705_v59  ;;  %v2724_v39 = vsel %vm2720_vm13, %v2708_v25, %v2723_v53  ;;  %v3910_v2 = vand.u32 2147483647, %v3909_v40 }
 0x369   : > { %v9518_v51 = vmul.u32.u64.low %v2734_v12, %v2733_v0  ;;  %v9519_v23 = vmul.u32.u64.high %v2734_v12, %v2733_v0, %v9518_v51  ;;  %v9521_v48 = vmul.u32.u64.low %v2734_v12, %v2729_v62  ;;  %v9522_v10 = vmul.u32.u64.high %v2734_v12, %v2729_v62, %v9521_v48 }
 0x36a   : > { %v4007_v14 = vshll.u32 %v9334_v35, %v9431_v49  ;;  %v2675_v20 = vadd.s32 3, %v2671_v60  ;;  %v9527_v56 = vsub.s32 %v2850_v43, %v2853_v29  ;;  %v11107_v59 = vor.u32 %v11011_v7, %v11010_v6  ;;  %v11110_v51 = vld [vmem:[#allocation51_spill] sm:$0xff]  ;;  %v11115_v29 = vld [vmem:[#allocation17_spill] sm:$0xff] }
 0x36b   : > { %vm11108_vm10 = vcmp.lt.s32.totalorder %v10993_v42, 4  ;;  %5320 = vcosq.f32 %v9454_v21  ;;  %v3912_v58 = vcvt.s32.f32 %v9462_v4  ;;  %vm4971_vm3 = vcmp.lt.s32.totalorder %v4970_v57, 0 }
 0x36c   : > { %v9534_v25 = vsel %vm11108_vm10, %v11107_v59, 1326507024  ;;  %v9538_v53 = vor.u32 %v4008_v46, %v4007_v14  ;;  %v9540_v40 = vor.u32 4788187, %v4012_v1  ;;  %v2856_v35 = vsub.s32 0, %v9527_v56  ;;  %v11112_v59 = vld [vmem:[#allocation106_spill] sm:$0xff] }
 0x36d   : > { %v2725_v49 = vsel %vm2719_vm11, %v2722_v34, %v2724_v39  ;;  %5322 = vsinq.f32 %v9454_v21  ;;  %vm2743_vm15 = vc.u32 %v9519_v23, %v9521_v48  ;;  %v2744_v7 = vadd.s32 1, %v9522_v10 }
 0x36e   : > { %v9550_v4 = vmul.f32 %v3912_v58, %v3910_v2  ;;  %v9552_v46 = vsel %vm4971_vm3, 0, %v4970_v57  ;;  %v9554_v43 = vand.u32 3, %v2675_v20  ;;  %v4921_v44 = vmin.u32 %v2856_v35, %v9527_v56  ;;  %v11109_v57 = vld [vmem:[#allocation87_spill] sm:$0xff] }
 0x36f   : > { %v9559_v34 = vadd.s32 %v9246_v16, %v9253_v63  ;;  %v2679_v21 = vxor.u32 2147483648, %v9051_v17  ;;  %v2741_v55 = vmul.u32 %v2734_v12, %v2725_v49  ;;  %v2745_v3 = vsel %vm2743_vm15, %v2744_v7, %v9522_v10  ;;  %v11111_v12 = vld [vmem:[#allocation19_spill] sm:$0xff]  ;;  %v11113_v7 = vld [vmem:[#allocation101_spill] sm:$0xff] }
 0x370   : > { %v2858_v0 = vclz %v4921_v44  ;;  %v10615_v1 = vand.u32 2147483647, %v11109_v57  ;;  %v2682_v2 = vxor.u32 2147483648, %v11110_v51  ;;  %vm2678_vm4 = vcmp.eq.s32.totalorder %v9554_v43, 0 }
 0x371   : > { %v2746_v16 = vadd.s32 %v2745_v3, %v2741_v55  ;;  %vm2681_vm8 = vcmp.eq.s32.totalorder %v9554_v43, 2  ;;  %v2564_v10 = vsub.s32 4, %v11111_v12  ;;  %v2680_v14 = vsel %vm2678_vm4, %v11110_v51, %v2679_v21 }
 0x372   : > { %v4922_v63 = vadd.s32 4294967294, %v2858_v0  ;;  %vm2792_vm0 = vcmp.lt.s32.totalorder %v11081_v54, 0  ;;  %v3224_v58 = vshrl.u32 %v10659_v13, %v11112_v59  ;;  %v3227_v35 = vshrl.u32 %v10661_v41, %v11112_v59 }
 0x373   : > { %v2747_v20 = vadd.s32 536870912, %v2746_v16  ;;  %v3213_v49 = vand.u32 8388607, %v10615_v1  ;;  %v3223_v44 = vshll.u32 %v10662_v32, %v11113_v7  ;;  %v3230_v55 = vshrl.u32 %v10660_v30, %v11112_v59 }
 0x374   : > { %vm4923_vm13 = vcmp.lt.s32.totalorder %v4922_v63, 0  ;;  %v3226_v51 = vshll.u32 %v10659_v13, %v11113_v7  ;;  %v3229_v6 = vshll.u32 %v10661_v41, %v11113_v7  ;;  %vm2677_vm7 = vcmp.lt.s32.totalorder %v9554_v43, 2 }
 0x375   : > { %v9584_v21 = vpop.eup %5320  ;;  %v2861_v3 = vsel %vm4923_vm13, 0, %v4922_v63  ;;  %v9586_v0 = vshrl.u32 %v2747_v20, 30  ;;  %v2846_v62 = vadd.s32 %v9444_v37, %v9440_v52  ;;  %vm11116_vm11 = vcmp.lt.s32.totalorder %v11115_v29, 0 }
 0x376   : > { %11114 = vst [vmem:[#allocation25_spill] sm:$0xff] %v9584_v21  ;;  %v2862_v60 = vsub.s32 32, %v2861_v3  ;;  %v2866_v1 = vsub.s32 4294967266, %v2861_v3  ;;  %v2565_v39 = vsel %vm11116_vm11, %v2564_v10, %v11111_v12  ;;  %v3225_v45 = vor.u32 %v3224_v58, %v3223_v44  ;;  %v11121_v10 = vld [vmem:[#allocation34_spill] sm:$0xff] }
 0x377   : > { %v9598_v63 = vpop.eup %5322  ;;  %v2749_v20 = vshll.u32 %v9586_v0, 30  ;;  %v3228_v38 = vor.u32 %v3227_v35, %v3226_v51  ;;  %v3231_v47 = vor.u32 %v3230_v55, %v3229_v6  ;;  %v11118_v7 = vand.u32 2147483647, %v11081_v54  ;;  %v11123_v51 = vld [vmem:[#allocation108_spill] sm:$0xff] }
 0x378   : > { %11117 = vst [vmem:[#allocation60_spill] sm:$0xff] %v9598_v63  ;;  %v2863_v52 = vshll.u32 %v9527_v56, %v2861_v3  ;;  %v2864_v37 = vshrl.u32 %v2846_v62, %v2862_v60  ;;  %v2867_v21 = vadd.s32 127, %v2866_v1  ;;  %v2876_v9 = vsub.s32 4, %v9498_v18  ;;  %v11124_v62 = vld [vmem:[#allocation20_spill] sm:$0xff] }
 0x379   : > { %vm9603_vm5 = vcmp.le.f32.partialorder %v11118_v7, 0.7853982  ;;  %vm2674_vm2 = vweird.f32 %v11098_v33  ;;  %v2683_v12 = vsel %vm2681_vm8, %v2682_v2, %v9051_v17  ;;  %vm11122_vm10 = vnez %v11121_v10 }
 0x37a   : > { %v2567_v6 = vsel %vm11122_vm10, 0, %v2565_v39  ;;  %v9615_v58 = vsub.s32 %v2746_v16, %v2749_v20  ;;  %v3214_v35 = vor.u32 8388608, %v3213_v49  ;;  %v2865_v44 = vor.u32 %v2864_v37, %v2863_v52  ;;  %v11125_v16 = vld [vmem:[#allocation116_spill] sm:$0xff]  ;;  %v11126_v49 = vld [vmem:[#allocation113_spill] sm:$0xff] }
 0x37b   : > { %v2868_v55 = vshll.u32 %v2867_v21, 23  ;;  %vm3238_vm3 = vcmp.lt.s32.totalorder %v11123_v51, 1  ;;  %vm3240_vm15 = vcmp.lt.s32.totalorder %v11123_v51, 3  ;;  %v2877_v2 = vsel %vm2792_vm0, %v2876_v9, %v9498_v18 }
 0x37c   : > { %v2752_v56 = vsub.s32 0, %v9615_v58  ;;  %v3246_v60 = vsel %vm3238_vm3, %v3225_v45, %v3228_v38  ;;  %v3248_v17 = vsel %vm3240_vm15, %v3231_v47, %v11124_v62  ;;  %v3250_v1 = vsel %vm3238_vm3, %v3228_v38, %v3231_v47 }
 0x37d   : > { %v2869_v39 = vor.u32 4788187, %v2868_v55  ;;  %vm3239_vm4 = vcmp.lt.s32.totalorder %v11123_v51, 2  ;;  %v3252_v21 = vsel %vm3240_vm15, %v11126_v49, %v11125_v16  ;;  %v3222_v20 = vshrl.u32 %v10662_v32, %v11112_v59 }
 0x37e   : > { %v4917_v3 = vmin.u32 %v2752_v56, %v9615_v58  ;;  %vm11127_vm8 = vcmp.lt.s32.totalorder %v11123_v51, 4  ;;  %v3253_v52 = vsel %vm3239_vm4, %v3250_v1, %v3252_v21  ;;  %v2872_v9 = vcvt.s32.f32 %v2865_v44  ;;  %v11130_v21 = vld [vmem:[#allocation8_spill] sm:$0xff] }
 0x37f   : > { %v3243_v7 = vsel %vm11127_vm8, %v3231_v47, 2102212464  ;;  %v2870_v37 = vand.u32 2147483647, %v2869_v39  ;;  %v3249_v18 = vsel %vm3239_vm4, %v3246_v60, %v3248_v17  ;;  %v3254_v10 = vshll.u32 %v3214_v35, 8 }
 0x380   : > { %v2684_v55 = vsel %vm2677_vm7, %v2680_v14, %v2683_v12  ;;  %v2571_v62 = vadd.s32 3, %v2567_v6  ;;  %v2754_v56 = vclz %v4917_v3  ;;  %v3242_v59 = vsel %vm3238_vm3, %v3222_v20, %v3225_v45  ;;  %v11129_v12 = vld [vmem:[#allocation36_spill] sm:$0xff] }
 0x381   : > { %v2873_v16 = vmul.f32 %v2872_v9, %v2870_v37  ;;  %v3244_v47 = vsel %vm3240_vm15, %v3228_v38, %v3243_v7  ;;  %v9650_v49 = vmul.u32.u64.low %v3254_v10, %v3253_v52  ;;  %v9651_v1 = vmul.u32.u64.high %v3254_v10, %v3253_v52, %v9650_v49 }
 0x382   : > { %v2879_v44 = vsel %vm9603_vm5, 0, %v2877_v2  ;;  %v4918_v60 = vadd.s32 4294967294, %v2754_v56  ;;  %v9655_v35 = vmul.u32.u64.low %v3254_v10, %v3249_v18  ;;  %v9656_v17 = vmul.u32.u64.high %v3254_v10, %v3249_v18, %v9655_v35 }
 0x383   : > { %v11128_v43 = vsub.s32 4294967266, %v9552_v46  ;;  %v9665_v45 = vsel %vm2674_vm2, nan, %v2684_v55  ;;  %v2874_v38 = vxor.u32 2147483648, %v2873_v16  ;;  %v2575_v6 = vxor.u32 2147483648, %v11129_v12 }
 0x384   : > { %v9668_v39 = vand.u32 3, %v2571_v62  ;;  %v2578_v2 = vxor.u32 2147483648, %v11130_v21  ;;  %vm4919_vm13 = vcmp.lt.s32.totalorder %v4918_v60, 0  ;;  %v3245_v3 = vsel %vm3239_vm4, %v3242_v59, %v3244_v47 }
 0x385   : > { %v9661_v14 = vadd.s32 127, %v11128_v43  ;;  %v2875_v20 = vsel %vm2792_vm0, %v2874_v38, %v2873_v16  ;;  %v2883_v7 = vadd.s32 3, %v2879_v44  ;;  %v2742_v33 = vadd.s32 %v9521_v48, %v9519_v23  ;;  %v11134_v43 = vld [vmem:[#allocation84_spill] sm:$0xff] }
 0x386   : > { %v2757_v52 = vsel %vm4919_vm13, 0, %v4918_v60  ;;  %v2878_v37 = vsel %vm9603_vm5, %v11081_v54, %v2875_v20  ;;  %vm3263_vm7 = vc.u32 %v9651_v1, %v9655_v35  ;;  %v2772_v51 = vsub.s32 4, %v9586_v0 }
 0x387   : > { %v2758_v9 = vsub.s32 32, %v2757_v52  ;;  %v2762_v18 = vsub.s32 4294967266, %v2757_v52  ;;  %5324 = vcosq.f32 %v2878_v37  ;;  %v3261_v55 = vmul.u32 %v3254_v10, %v3245_v3 }
 0x388   : > { %v3264_v62 = vadd.s32 1, %v9656_v17  ;;  %5326 = vsinq.f32 %v2878_v37  ;;  %v2759_v56 = vshll.u32 %v9615_v58, %v2757_v52  ;;  %vm2574_vm0 = vcmp.eq.s32.totalorder %v9668_v39, 0 }
 0x389   : > { %v2760_v23 = vshrl.u32 %v2742_v33, %v2758_v9  ;;  %v2763_v48 = vadd.s32 127, %v2762_v18  ;;  %v11131_v22 = vand.u32 2147483647, %v11094_v24  ;;  %vm2688_vm5 = vcmp.lt.s32.totalorder %v11094_v24, 0  ;;  %v11135_v33 = vld [vmem:[#allocation95_spill] sm:$0xff]  ;;  %v11136_v9 = vld [vmem:[#allocation100_spill] sm:$0xff] }
 0x38a   : > { %v3265_v16 = vsel %vm3263_vm7, %v3264_v62, %v9656_v17  ;;  %vm2577_vm2 = vcmp.eq.s32.totalorder %v9668_v39, 2  ;;  %v2884_v58 = vand.u32 3, %v2883_v7  ;;  %v9696_v44 = vsel %vm2574_vm0, %v11130_v21, %v2575_v6 }
 0x38b   : > { %vm9688_vm11 = vcmp.le.f32.partialorder %v11131_v22, 0.7853982  ;;  %v2761_v10 = vor.u32 %v2760_v23, %v2759_v56  ;;  %v2764_v47 = vshll.u32 %v2763_v48, 23  ;;  %v3266_v49 = vadd.s32 %v3265_v16, %v3261_v55 }
 0x38c   : > { %v9699_v60 = vsel %vm2577_vm2, %v2578_v2, %v11129_v12  ;;  %v3102_v38 = vand.u32 2147483647, %v11134_v43  ;;  %v2773_v20 = vsel %vm2688_vm5, %v2772_v51, %v9586_v0  ;;  %v3119_v52 = vshll.u32 %v10662_v32, %v11135_v33  ;;  %v11137_v51 = vld [vmem:[#allocation21_spill] sm:$0xff] }
 0x38d   : > { %v2765_v3 = vor.u32 4788187, %v2764_v47  ;;  %v3267_v17 = vadd.s32 536870912, %v3266_v49  ;;  %v2768_v37 = vcvt.s32.f32 %v2761_v10  ;;  %v3120_v7 = vshrl.u32 %v10659_v13, %v11136_v9 }
 0x38e   : > { %v3122_v6 = vshll.u32 %v10659_v13, %v11135_v33  ;;  %v3123_v12 = vshrl.u32 %v10661_v41, %v11136_v9  ;;  %vm2882_vm10 = vweird.f32 %v11081_v54  ;;  %v3125_v0 = vshll.u32 %v10661_v41, %v11135_v33  ;;  %v11142_v54 = vld [vmem:[#allocation115_spill] sm:$0xff] }
 0x38f   : > { %v2766_v21 = vand.u32 2147483647, %v2765_v3  ;;  %v9714_v2 = vshrl.u32 %v3267_v17, 30  ;;  %v3126_v18 = vshrl.u32 %v10660_v30, %v11136_v9  ;;  %v3084_v55 = vsub.s32 4, %v11137_v51  ;;  %v11138_v3 = vld [vmem:[#allocation105_spill] sm:$0xff] }
 0x390   : > { %v3109_v62 = vand.u32 8388607, %v3102_v38  ;;  %v3121_v56 = vor.u32 %v3120_v7, %v3119_v52  ;;  %v3124_v23 = vor.u32 %v3123_v12, %v3122_v6  ;;  %vm2885_vm3 = vcmp.lt.s32.totalorder %v2884_v58, 2  ;;  %v11139_v6 = vld [vmem:[#allocation114_spill] sm:$0xff] }
 0x391   : > { %v2769_v48 = vmul.f32 %v2768_v37, %v2766_v21  ;;  %v3269_v22 = vshll.u32 %v9714_v2, 30  ;;  %v3127_v16 = vor.u32 %v3126_v18, %v3125_v0  ;;  %v5325_v10 = vpop.eup %5324  ;;  %vm2886_vm15 = vcmp.eq.s32.totalorder %v2884_v58, 0 }
 0x392   : > { %vm2889_vm4 = vcmp.eq.s32.totalorder %v2884_v58, 2  ;;  %v2775_v47 = vsel %vm9688_vm11, 0, %v2773_v20  ;;  %vm3134_vm8 = vcmp.lt.s32.totalorder %v11138_v3, 1  ;;  %v5327_v17 = vpop.eup %5326  ;;  %v2890_v33 = vxor.u32 2147483648, %v5325_v10 }
 0x393   : > { %v2770_v63 = vxor.u32 2147483648, %v2769_v48  ;;  %v9727_v27 = vsub.s32 %v3266_v49, %v3269_v22  ;;  %vm3136_vm13 = vcmp.lt.s32.totalorder %v11138_v3, 3  ;;  %v2887_v52 = vxor.u32 2147483648, %v5327_v17 }
 0x394   : > { %v3110_v37 = vor.u32 8388608, %v3109_v62  ;;  %v3142_v7 = vsel %vm3134_vm8, %v3121_v56, %v3124_v23  ;;  %v3144_v12 = vsel %vm3136_vm13, %v3127_v16, %v11139_v6  ;;  %v2891_v21 = vsel %vm2889_vm4, %v2890_v33, %v5327_v17 }
 0x395   : > { %v2771_v20 = vsel %vm2688_vm5, %v2770_v63, %v2769_v48  ;;  %v3272_v0 = vsub.s32 0, %v9727_v27  ;;  %v3118_v49 = vshrl.u32 %v10662_v32, %v11136_v9  ;;  %v2888_v18 = vsel %vm2886_vm15, %v5325_v10, %v2887_v52 }
 0x396   : > { %v2774_v62 = vsel %vm9688_vm11, %v11094_v24, %v2771_v20  ;;  %vm3135_vm7 = vcmp.lt.s32.totalorder %v11138_v3, 2  ;;  %vm11140_vm0 = vcmp.lt.s32.totalorder %v11138_v3, 4  ;;  %v2892_v17 = vsel %vm2885_vm3, %v2888_v18, %v2891_v21 }
 0x397   : > { %v3139_v22 = vsel %vm11140_vm0, %v3127_v16, 2102212464  ;;  %5328 = vcosq.f32 %v2774_v62  ;;  %v4937_v63 = vmin.u32 %v3272_v0, %v9727_v27  ;;  %v3145_v48 = vsel %vm3135_vm7, %v3142_v7, %v3144_v12  ;;  %v11143_v12 = vld [vmem:[#allocation111_spill] sm:$0xff] }
 0x398   : > { %v2893_v9 = vsel %vm2882_vm10, nan, %v2892_v17  ;;  %5330 = vsinq.f32 %v2774_v62  ;;  %v3146_v59 = vsel %vm3134_vm8, %v3124_v23, %v3127_v16  ;;  %v3150_v10 = vshll.u32 %v3110_v37, 8 }
 0x399   : > { %v4995_v33 = vpack.c.bf16 %v2893_v9, %v9665_v45  ;;  %vm11141_vm11 = vcmp.lt.s32.totalorder %v10994_v50, 0  ;;  %v3274_v52 = vclz %v4937_v63  ;;  %v3138_v6 = vsel %vm3134_vm8, %v3118_v49, %v3121_v56 }
 0x39a   : > { %v3085_v58 = vsel %vm11141_vm11, %v3084_v55, %v11137_v51  ;;  %v3140_v7 = vsel %vm3136_vm13, %v3124_v23, %v3139_v22  ;;  %v3148_v21 = vsel %vm3136_vm13, %v11143_v12, %v11142_v54  ;;  %v4111_v45 = vshll.u32 %v9395_v11, %v9552_v46 }
 0x39b   : > { %v9767_v16 = vmul.u32.u64.low %v3150_v10, %v3145_v48  ;;  %v9768_v37 = vmul.u32.u64.high %v3150_v10, %v3145_v48, %v9767_v16  ;;  %4996 = vmatprep.subr.bf16.mxu0 %v4995_v33  ;;  %v2779_v51 = vadd.s32 3, %v2775_v47  ;;  %v4938_v55 = vadd.s32 4294967294, %v3274_v52 }
 0x39c   : > { %v3149_v56 = vsel %vm3135_vm7, %v3146_v59, %v3148_v21  ;;  %v11144_v23 = vsub.s32 32, %v9552_v46  ;;  %vm2573_vm5 = vcmp.lt.s32.totalorder %v9668_v39, 2  ;;  %v3087_v47 = vsel %vm9041_vm1, 0, %v3085_v58 }
 0x39d   : > { %v9781_v0 = vmul.u32.u64.low %v3150_v10, %v3149_v56  ;;  %v9782_v49 = vmul.u32.u64.high %v3150_v10, %v3149_v56, %v9781_v0  ;;  %v2580_v18 = vsel %vm2573_vm5, %v9696_v44, %v9699_v60  ;;  %vm4939_vm2 = vcmp.lt.s32.totalorder %v4938_v55, 0 }
 0x39e   : > { %v9778_v20 = vshrl.u32 %v9559_v34, %v11144_v23  ;;  %v3141_v62 = vsel %vm3135_vm7, %v3138_v6, %v3140_v7  ;;  %v4116_v22 = vshll.u32 %v9661_v14, 23  ;;  %vm2570_vm10 = vweird.f32 %v11115_v29 }
 0x39f   : > { %v3277_v34 = vsel %vm4939_vm2, 0, %v4938_v55  ;;  %v3160_v39 = vadd.s32 1, %v9768_v37  ;;  %v2780_v17 = vand.u32 3, %v2779_v51  ;;  %v3262_v63 = vadd.s32 %v9655_v35, %v9651_v1 }
 0x3a0   : > { %v3278_v48 = vsub.s32 32, %v3277_v34  ;;  %v3282_v44 = vsub.s32 4294967266, %v3277_v34  ;;  %v2581_v60 = vsel %vm2570_vm10, nan, %v2580_v18  ;;  %v3091_v5 = vadd.s32 3, %v3087_v47 }
 0x3a1   : > { %v3157_v9 = vmul.u32 %v3150_v10, %v3141_v62  ;;  %vm3159_vm1 = vc.u32 %v9782_v49, %v9767_v16  ;;  %v5329_v3 = vpop.eup %5328  ;;  %v3279_v59 = vshll.u32 %v9727_v27, %v3277_v34  ;;  %vm2778_vm3 = vweird.f32 %v11094_v24 }
 0x3a2   : > { %v3280_v33 = vshrl.u32 %v3262_v63, %v3278_v48  ;;  %v3283_v29 = vadd.s32 127, %v3282_v44  ;;  %v3161_v58 = vsel %vm3159_vm1, %v3160_v39, %v9768_v37  ;;  %v5331_v52 = vpop.eup %5330  ;;  %v2786_v6 = vxor.u32 2147483648, %v5329_v3  ;;  %v11145_v37 = vld [vmem:[#allocation102_spill] sm:$0xff]  ;;  %v11146_v39 = vld [vmem:[#allocation132_spill] sm:$0xff] }
 0x3a3   : > { %v3095_v1 = vxor.u32 2147483648, %v9311_v28  ;;  %v3162_v35 = vadd.s32 %v3161_v58, %v3157_v9  ;;  %v2783_v7 = vxor.u32 2147483648, %v5331_v52  ;;  %vm2785_vm15 = vcmp.eq.s32.totalorder %v2780_v17, 2 }
 0x3a4   : > { %v3281_v10 = vor.u32 %v3280_v33, %v3279_v59  ;;  %v3284_v54 = vshll.u32 %v3283_v29, 23  ;;  %vm2782_vm4 = vcmp.eq.s32.totalorder %v2780_v17, 0  ;;  %v2787_v12 = vsel %vm2785_vm15, %v2786_v6, %v5331_v52  ;;  %v11150_v59 = vld [vmem:[#allocation128_spill] sm:$0xff] }
 0x3a5   : > { %v9801_v21 = vand.u32 3, %v3091_v5  ;;  %v3163_v27 = vadd.s32 536870912, %v3162_v35  ;;  %vm2781_vm8 = vcmp.lt.s32.totalorder %v2780_v17, 2  ;;  %v2784_v51 = vsel %vm2782_vm4, %v5329_v3, %v2783_v7 }
 0x3a6   : > { %v3285_v55 = vor.u32 4788187, %v3284_v54  ;;  %v3622_v56 = vand.u32 2147483647, %v11145_v37  ;;  %v2788_v23 = vsel %vm2781_vm8, %v2784_v51, %v2787_v12  ;;  %v3098_v0 = vxor.u32 2147483648, %v9307_v19  ;;  %v11151_v12 = vld [vmem:[#allocation42_spill] sm:$0xff] }
 0x3a7   : > { %vm3208_vm13 = vcmp.lt.s32.totalorder %v11109_v57, 0  ;;  %v9806_v18 = vshrl.u32 %v3163_v27, 30  ;;  %v2789_v47 = vsel %vm2778_vm3, nan, %v2788_v23  ;;  %v3288_v34 = vcvt.s32.f32 %v3281_v10 }
 0x3a8   : > { %v3286_v62 = vand.u32 2147483647, %v3285_v55  ;;  %v3640_v63 = vshrl.u32 %v10659_v13, %v11146_v39  ;;  %v4997_v17 = vpack.c.bf16 %v2789_v47, %v2581_v60  ;;  %vm3094_vm7 = vcmp.eq.s32.totalorder %v9801_v21, 0 }
 0x3a9   : > { %v11147_v48 = vand.u32 2147483647, %v11109_v57  ;;  %v3165_v5 = vshll.u32 %v9806_v18, 30  ;;  %v3292_v24 = vsub.s32 4, %v9714_v2  ;;  %v3629_v3 = vand.u32 8388607, %v3622_v56 }
 0x3aa   : > { %v3289_v9 = vmul.f32 %v3288_v34, %v3286_v62  ;;  %v3639_v33 = vshll.u32 %v10662_v32, %v11150_v59  ;;  %4998 = vmatpush1.bf16.msra.mxu0 %v4997_v17  ;;  %v3096_v60 = vsel %vm3094_vm7, %v9307_v19, %v3095_v1  ;;  %v3642_v58 = vshll.u32 %v10659_v13, %v11150_v59 }
 0x3ab   : > { %vm9815_vm0 = vcmp.le.f32.partialorder %v11147_v48, 0.7853982  ;;  %v9826_v29 = vsub.s32 %v3162_v35, %v3165_v5  ;;  %v3643_v52 = vshrl.u32 %v10661_v41, %v11146_v39  ;;  %v3645_v10 = vshll.u32 %v10661_v41, %v11150_v59 }
 0x3ac   : > { %v3290_v6 = vxor.u32 2147483648, %v3289_v9  ;;  %v3641_v7 = vor.u32 %v3640_v63, %v3639_v33  ;;  %v3646_v54 = vshrl.u32 %v10660_v30, %v11146_v39  ;;  %vm3097_vm11 = vcmp.eq.s32.totalorder %v9801_v21, 2 }
 0x3ad   : > { %v2980_v19 = vsub.s32 4, %v11151_v12  ;;  %v3168_v1 = vsub.s32 0, %v9826_v29  ;;  %v3644_v35 = vor.u32 %v3643_v52, %v3642_v58  ;;  %v3293_v51 = vsel %vm3208_vm13, %v3292_v24, %v9714_v2 }
 0x3ae   : > { %v3291_v27 = vsel %vm3208_vm13, %v3290_v6, %v3289_v9  ;;  %v3630_v55 = vor.u32 8388608, %v3629_v3  ;;  %v3647_v23 = vor.u32 %v3646_v54, %v3645_v10  ;;  %vm3654_vm5 = vcmp.lt.s32.totalorder %v10993_v42, 1 }
 0x3af   : > { %v3294_v47 = vsel %vm9815_vm0, %v11109_v57, %v3291_v27  ;;  %v4933_v62 = vmin.u32 %v3168_v1, %v9826_v29  ;;  %vm3656_vm2 = vcmp.lt.s32.totalorder %v10993_v42, 3  ;;  %v3662_v34 = vsel %vm3654_vm5, %v3641_v7, %v3644_v35 }
 0x3b0   : > { %5332 = vcosq.f32 %v3294_v47  ;;  %v3664_v2 = vsel %vm3656_vm2, %v3647_v23, %v9010_v36  ;;  %v3666_v63 = vsel %vm3654_vm5, %v3644_v35, %v3647_v23  ;;  %v3099_v17 = vsel %vm3097_vm11, %v3098_v0, %v9311_v28 }
 0x3b1   : > { %v3295_v48 = vsel %vm9815_vm0, 0, %v3293_v51  ;;  %5334 = vsinq.f32 %v3294_v47  ;;  %v3170_v5 = vclz %v4933_v62  ;;  %v3638_v9 = vshrl.u32 %v10662_v32, %v11146_v39 }
 0x3b2   : > { %vm3655_vm10 = vcmp.lt.s32.totalorder %v10993_v42, 2  ;;  %vm11152_vm1 = vcmp.lt.s32.totalorder %v10993_v42, 4  ;;  %v3668_v24 = vsel %vm3656_vm2, %v8982_v15, %v9534_v25  ;;  %v3670_v44 = vshll.u32 %v3630_v55, 8 }
 0x3b3   : > { %v3659_v36 = vsel %vm11152_vm1, %v3647_v23, 2102212464  ;;  %v4934_v3 = vadd.s32 4294967294, %v3170_v5  ;;  %v3665_v28 = vsel %vm3655_vm10, %v3662_v34, %v3664_v2  ;;  %v3669_v0 = vsel %vm3655_vm10, %v3666_v63, %v3668_v24  ;;  %v11154_v5 = vld [vmem:[#allocation98_spill] sm:$0xff] }
 0x3b4   : > { %vm3093_vm3 = vcmp.lt.s32.totalorder %v9801_v21, 2  ;;  %v3299_v39 = vadd.s32 3, %v3295_v48  ;;  %vm11153_vm15 = vcmp.lt.s32.totalorder %v10988_v31, 0  ;;  %v3658_v33 = vsel %vm3654_vm5, %v3638_v9, %v3641_v7 }
 0x3b5   : > { %v2981_v59 = vsel %vm11153_vm15, %v2980_v19, %v11151_v12  ;;  %vm4935_vm4 = vcmp.lt.s32.totalorder %v4934_v3, 0  ;;  %v3660_v15 = vsel %vm3656_vm2, %v3644_v35, %v3659_v36  ;;  %v3100_v52 = vsel %vm3093_vm3, %v3096_v60, %v3099_v17 }
 0x3b6   : > { %v9883_v25 = vmul.u32.u64.low %v3670_v44, %v3669_v0  ;;  %v9884_v58 = vmul.u32.u64.high %v3670_v44, %v3669_v0, %v9883_v25  ;;  %v3173_v6 = vsel %vm4935_vm4, 0, %v4934_v3  ;;  %v2983_v21 = vsel %vm8916_vm6, 0, %v2981_v59 }
 0x3b7   : > { %v9886_v10 = vmul.u32.u64.low %v3670_v44, %v3665_v28  ;;  %v9887_v54 = vmul.u32.u64.high %v3670_v44, %v3665_v28, %v9886_v10  ;;  %v3158_v12 = vadd.s32 %v9767_v16, %v9782_v49  ;;  %v3174_v7 = vsub.s32 32, %v3173_v6 }
 0x3b8   : > { %v3178_v19 = vsub.s32 4294967266, %v3173_v6  ;;  %v9896_v1 = vor.u32 4788187, %v4116_v22  ;;  %vm3090_vm8 = vweird.f32 %v10994_v50  ;;  %v3300_v60 = vand.u32 3, %v3299_v39  ;;  %v11157_v39 = vld [vmem:[#allocation120_spill] sm:$0xff] }
 0x3b9   : > { %v3661_v35 = vsel %vm3655_vm10, %v3658_v33, %v3660_v15  ;;  %v3175_v27 = vshll.u32 %v9826_v29, %v3173_v6  ;;  %v3176_v51 = vshrl.u32 %v3158_v12, %v3174_v7  ;;  %vm3679_vm6 = vc.u32 %v9884_v58, %v9886_v10  ;;  %v11158_v33 = vld [vmem:[#allocation123_spill] sm:$0xff] }
 0x3ba   : > { %v3179_v26 = vadd.s32 127, %v3178_v19  ;;  %v5333_v16 = vpop.eup %5332  ;;  %v3101_v49 = vsel %vm3090_vm8, nan, %v3100_v52  ;;  %vm3298_vm13 = vweird.f32 %v11109_v57  ;;  %v2987_v14 = vadd.s32 3, %v2983_v21 }
 0x3bb   : > { %v3680_v22 = vadd.s32 1, %v9887_v54  ;;  %v5335_v55 = vpop.eup %5334  ;;  %v3306_v50 = vxor.u32 2147483648, %v5333_v16  ;;  %v3177_v23 = vor.u32 %v3176_v51, %v3175_v27  ;;  %v3677_v42 = vmul.u32 %v3670_v44, %v3661_v35  ;;  %v11159_v35 = vld [vmem:[#allocation24_spill] sm:$0xff]  ;;  %v11160_v51 = vld [vmem:[#allocation118_spill] sm:$0xff] }
 0x3bc   : > { %v3180_v47 = vshll.u32 %v3179_v26, 23  ;;  %vm3302_vm7 = vcmp.eq.s32.totalorder %v3300_v60, 0  ;;  %v3303_v62 = vxor.u32 2147483648, %v5335_v55  ;;  %vm3305_vm0 = vcmp.eq.s32.totalorder %v3300_v60, 2 }
 0x3bd   : > { %v3681_v29 = vsel %vm3679_vm6, %v3680_v22, %v9887_v54  ;;  %v3307_v34 = vsel %vm3305_vm0, %v3306_v50, %v5335_v55  ;;  %v3188_v63 = vsub.s32 4, %v9806_v18  ;;  %vm3301_vm11 = vcmp.lt.s32.totalorder %v3300_v60, 2  ;;  %v11161_v50 = vld [vmem:[#allocation127_spill] sm:$0xff] }
 0x3be   : > { %v3181_v2 = vor.u32 4788187, %v3180_v47  ;;  %v3682_v17 = vadd.s32 %v3681_v29, %v3677_v42  ;;  %v3304_v48 = vsel %vm3302_vm7, %v5333_v16, %v3303_v62  ;;  %vm3104_vm5 = vcmp.lt.s32.totalorder %v11134_v43, 0 }
 0x3bf   : > { %v3518_v9 = vand.u32 2147483647, %v11154_v5  ;;  %v3308_v36 = vsel %vm3301_vm11, %v3304_v48, %v3307_v34  ;;  %v3184_v3 = vcvt.s32.f32 %v3177_v23  ;;  %vm9914_vm2 = vcmp.le.f32.partialorder %v3102_v38, 0.7853982 }
 0x3c0   : > { %v3182_v24 = vand.u32 2147483647, %v3181_v2  ;;  %v3683_v28 = vadd.s32 536870912, %v3682_v17  ;;  %v3309_v0 = vsel %vm3298_vm13, nan, %v3308_v36  ;;  %v3535_v59 = vshll.u32 %v10662_v32, %v11157_v39  ;;  %v11165_v36 = vld [vmem:[#allocation133_spill] sm:$0xff] }
 0x3c1   : > { %v3536_v15 = vshrl.u32 %v10659_v13, %v11158_v33  ;;  %v4999_v25 = vpack.c.bf16 %v3309_v0, %v3101_v49  ;;  %v3189_v6 = vsel %vm3104_vm5, %v3188_v63, %v9806_v18  ;;  %v3525_v38 = vand.u32 8388607, %v3518_v9 }
 0x3c2   : > { %v3185_v52 = vmul.f32 %v3184_v3, %v3182_v24  ;;  %v9925_v57 = vshrl.u32 %v3683_v28, 30  ;;  %v3538_v21 = vshll.u32 %v10659_v13, %v11157_v39  ;;  %v3539_v12 = vshrl.u32 %v10661_v41, %v11158_v33 }
 0x3c3   : > { %v3537_v54 = vor.u32 %v3536_v15, %v3535_v59  ;;  %5000 = vmatprep.subr.bf16.mxu0 %v4999_v25  ;;  %v3541_v60 = vshll.u32 %v10661_v41, %v11157_v39  ;;  %v3542_v18 = vshrl.u32 %v10660_v30, %v11158_v33  ;;  %v2991_v27 = vxor.u32 2147483648, %v11159_v35 }
 0x3c4   : > { %v3186_v7 = vxor.u32 2147483648, %v3185_v52  ;;  %v3685_v19 = vshll.u32 %v9925_v57, 30  ;;  %v2994_v26 = vxor.u32 2147483648, %v11160_v51  ;;  %v3191_v13 = vsel %vm9914_vm2, 0, %v3189_v6 }
 0x3c5   : > { %v3540_v16 = vor.u32 %v3539_v12, %v3538_v21  ;;  %v3543_v55 = vor.u32 %v3542_v18, %v3541_v60  ;;  %vm3550_vm10 = vcmp.lt.s32.totalorder %v11161_v50, 1  ;;  %v2988_v41 = vand.u32 3, %v2987_v14  ;;  %v11162_v14 = vld [vmem:[#allocation45_spill] sm:$0xff] }
 0x3c6   : > { %v3187_v49 = vsel %vm3104_vm5, %v3186_v7, %v3185_v52  ;;  %v9944_v22 = vsub.s32 %v3682_v17, %v3685_v19  ;;  %v3526_v23 = vor.u32 8388608, %v3525_v38  ;;  %v3195_v42 = vadd.s32 3, %v3191_v13 }
 0x3c7   : > { %v3190_v30 = vsel %vm9914_vm2, %v11134_v43, %v3187_v49  ;;  %v3558_v47 = vsel %vm3550_vm10, %v3537_v54, %v3540_v16  ;;  %vm3552_vm1 = vcmp.lt.s32.totalorder %v11161_v50, 3  ;;  %v3534_v29 = vshrl.u32 %v10662_v32, %v11158_v33  ;;  %v11164_v32 = vld [vmem:[#allocation23_spill] sm:$0xff] }
 0x3c8   : > { %5336 = vcosq.f32 %v3190_v30  ;;  %v3688_v62 = vsub.s32 0, %v9944_v22  ;;  %vm3551_vm3 = vcmp.lt.s32.totalorder %v11161_v50, 2  ;;  %v3560_v34 = vsel %vm3552_vm1, %v3543_v55, %v11162_v14 }
 0x3c9   : > { %5338 = vsinq.f32 %v3190_v30  ;;  %vm11163_vm15 = vcmp.lt.s32.totalorder %v11161_v50, 4  ;;  %v3561_v17 = vsel %vm3551_vm3, %v3558_v47, %v3560_v34  ;;  %v3562_v48 = vsel %vm3550_vm10, %v3540_v16, %v3543_v55 }
 0x3ca   : > { %v4953_v2 = vmin.u32 %v3688_v62, %v9944_v22  ;;  %v3555_v63 = vsel %vm11163_vm15, %v3543_v55, 2102212464  ;;  %vm2990_vm4 = vcmp.eq.s32.totalorder %v2988_v41, 0  ;;  %vm2993_vm8 = vcmp.eq.s32.totalorder %v2988_v41, 2 }
 0x3cb   : > { %v3564_v24 = vsel %vm3552_vm1, %v11165_v36, %v11164_v32  ;;  %v3566_v3 = vshll.u32 %v3526_v23, 8  ;;  %v2992_v28 = vsel %vm2990_vm4, %v11160_v51, %v2991_v27  ;;  %v2995_v0 = vsel %vm2993_vm8, %v2994_v26, %v11159_v35  ;;  %v11168_v35 = vld [vmem:[#allocation39_spill] sm:$0xff] }
 0x3cc   : > { %v3690_v44 = vclz %v4953_v2  ;;  %v3554_v39 = vsel %vm3550_vm10, %v3534_v29, %v3537_v54  ;;  %v3556_v59 = vsel %vm3552_vm1, %v3540_v16, %v3555_v63  ;;  %v3565_v33 = vsel %vm3551_vm3, %v3562_v48, %v3564_v24  ;;  %v11170_v2 = vld [vmem:[#allocation47_spill] sm:$0xff] }
 0x3cd   : > { %v9979_v15 = vmul.u32.u64.low %v3566_v3, %v3561_v17  ;;  %v9980_v25 = vmul.u32.u64.high %v3566_v3, %v3561_v17, %v9979_v15  ;;  %v3196_v52 = vand.u32 3, %v3195_v42  ;;  %v3914_v12 = vxor.u32 2147483648, %v9550_v4 }
 0x3ce   : > { %v4954_v6 = vadd.s32 4294967294, %v3690_v44  ;;  %v9983_v38 = vmul.u32.u64.low %v3566_v3, %v3565_v33  ;;  %v9984_v21 = vmul.u32.u64.high %v3566_v3, %v3565_v33, %v9983_v38  ;;  %v11166_v7 = vand.u32 2147483647, %v9540_v40 }
 0x3cf   : > { %v11167_v54 = vcvt.s32.f32 %v9538_v53  ;;  %v4113_v60 = vor.u32 %v9778_v20, %v4111_v45  ;;  %v4118_v18 = vand.u32 2147483647, %v9896_v1  ;;  %vm3728_vm6 = vcmp.lt.s32.totalorder %v11168_v35, 0  ;;  %v11169_v53 = vld [vmem:[#allocation38_spill] sm:$0xff] }
 0x3d0   : > { %vm2986_vm13 = vweird.f32 %v10988_v31  ;;  %vm2989_vm7 = vcmp.lt.s32.totalorder %v2988_v41, 2  ;;  %vm4955_vm0 = vcmp.lt.s32.totalorder %v4954_v6, 0  ;;  %v3557_v40 = vsel %vm3551_vm3, %v3554_v39, %v3556_v59  ;;  %v11172_v39 = vld [vmem:[#allocation5_spill] sm:$0xff] }
 0x3d1   : > { %v9991_v19 = vmul.f32 %v11167_v54, %v11166_v7  ;;  %v2996_v27 = vsel %vm2989_vm7, %v2992_v28, %v2995_v0  ;;  %v3500_v51 = vsub.s32 4, %v11169_v53  ;;  %v3693_v26 = vsel %vm4955_vm0, 0, %v4954_v6 }
 0x3d2   : > { %v3576_v13 = vadd.s32 1, %v9980_v25  ;;  %v5337_v11 = vpop.eup %5336  ;;  %vm3201_vm11 = vcmp.eq.s32.totalorder %v3196_v52, 2  ;;  %v3678_v46 = vadd.s32 %v9886_v10, %v9884_v58  ;;  %v3694_v45 = vsub.s32 32, %v3693_v26 }
 0x3d3   : > { %v3698_v20 = vsub.s32 4294967266, %v3693_v26  ;;  %v5339_v1 = vpop.eup %5338  ;;  %v3202_v16 = vxor.u32 2147483648, %v5337_v11  ;;  %v3695_v49 = vshll.u32 %v9944_v22, %v3693_v26  ;;  %v3573_v55 = vmul.u32 %v3566_v3, %v3557_v40 }
 0x3d4   : > { %vm3575_vm5 = vc.u32 %v9984_v21, %v9979_v15  ;;  %v3199_v50 = vxor.u32 2147483648, %v5339_v1  ;;  %v3696_v41 = vshrl.u32 %v3678_v46, %v3694_v45  ;;  %v2997_v47 = vsel %vm2986_vm13, nan, %v2996_v27 }
 0x3d5   : > { %v3699_v30 = vadd.s32 127, %v3698_v20  ;;  %v3577_v23 = vsel %vm3575_vm5, %v3576_v13, %v9980_v25  ;;  %vm3198_vm2 = vcmp.eq.s32.totalorder %v3196_v52, 0  ;;  %v3203_v58 = vsel %vm3201_vm11, %v3202_v16, %v5339_v1 }
 0x3d6   : > { %v3578_v10 = vadd.s32 %v3577_v23, %v3573_v55  ;;  %vm3197_vm10 = vcmp.lt.s32.totalorder %v3196_v52, 2  ;;  %v3200_v42 = vsel %vm3198_vm2, %v5337_v11, %v3199_v50  ;;  %v3697_v62 = vor.u32 %v3696_v41, %v3695_v49  ;;  %v11184_v11 = vld [vmem:[#allocation12_spill] sm:$0xff] }
 0x3d7   : > { %v3700_v29 = vshll.u32 %v3699_v30, 23  ;;  %v4120_v22 = vcvt.s32.f32 %v4113_v60  ;;  %vm3194_vm1 = vweird.f32 %v11134_v43  ;;  %v3204_v14 = vsel %vm3197_vm10, %v3200_v42, %v3203_v58  ;;  %v11180_v60 = vld [vmem:[#allocation43_spill] sm:$0xff]  ;;  %v11187_v50 = vld [vmem:[#allocation60_spill] sm:$0xff]  ;;  %v11188_v30 = vld [vmem:[#allocation6_spill] sm:$0xff] }
 0x3d8   : > { %v3579_v34 = vadd.s32 536870912, %v3578_v10  ;;  %vm3832_vm3 = vcmp.lt.s32.totalorder %v11170_v2, 0  ;;  %v3205_v63 = vsel %vm3194_vm1, nan, %v3204_v14  ;;  %v3501_v31 = vsel %vm3416_vm9, %v3500_v51, %v11169_v53 }
 0x3d9   : > { %v3701_v17 = vor.u32 4788187, %v3700_v29  ;;  %v11171_v48 = vxor.u32 2147483648, %v9456_v61  ;;  %v4121_v36 = vmul.f32 %v4120_v22, %v4118_v18  ;;  %v5001_v24 = vpack.c.bf16 %v3205_v63, %v2997_v47  ;;  %v11193_v63 = vld [vmem:[#allocation16_spill] sm:$0xff] }
 0x3da   : > { %v10022_v3 = vshrl.u32 %v3579_v34, 30  ;;  %v3915_v43 = vsel %vm3832_vm3, %v3914_v12, %v9550_v4  ;;  %v4018_v28 = vxor.u32 2147483648, %v9991_v19  ;;  %v3704_v44 = vcvt.s32.f32 %v3697_v62 }
 0x3db   : > { %v3811_v32 = vsel %vm3728_vm6, %v11171_v48, %v9456_v61  ;;  %v3702_v0 = vand.u32 2147483647, %v3701_v17  ;;  %5340 = vsinq.f32 %v11172_v39  ;;  %v11173_v59 = vand.u32 2147483647, %v11168_v35  ;;  %5002 = vmatpush1.bf16.msra.mxu0 %v5001_v24 }
 0x3dc   : > { %v3503_v25 = vsel %vm9407_vm14, 0, %v3501_v31  ;;  %v3581_v52 = vshll.u32 %v10022_v3, 30  ;;  %v11177_v6 = vand.u32 2147483647, %v11170_v2  ;;  %v3708_v7 = vsub.s32 4, %v9925_v57 }
 0x3dd   : > { %vm10031_vm9 = vcmp.le.f32.partialorder %v11173_v59, 0.7853982  ;;  %v3705_v12 = vmul.f32 %v3704_v44, %v3702_v0  ;;  %vm3936_vm14 = vcmp.lt.s32.totalorder %v11180_v60, 0  ;;  %v4122_v18 = vxor.u32 2147483648, %v4121_v36 }
 0x3de   : > { %v10041_v4 = vsel %vm10031_vm9, %v11168_v35, %v3811_v32  ;;  %vm10045_vm15 = vcmp.le.f32.partialorder %v11177_v6, 0.7853982  ;;  %v10054_v40 = vsub.s32 %v3578_v10, %v3581_v52  ;;  %v11181_v27 = vand.u32 2147483647, %v11180_v60 }
 0x3df   : > { %v3918_v54 = vsel %vm10045_vm15, %v11170_v2, %v3915_v43  ;;  %v4019_v51 = vsel %vm3936_vm14, %v4018_v28, %v9991_v19  ;;  %v3507_v26 = vadd.s32 3, %v3503_v25  ;;  %v3706_v13 = vxor.u32 2147483648, %v3705_v12 }
 0x3e0   : > { %vm10058_vm4 = vcmp.le.f32.partialorder %v11181_v27, 0.7853982  ;;  %5342 = vcosq.f32 %v10041_v4  ;;  %vm4040_vm8 = vcmp.lt.s32.totalorder %v11184_v11, 0  ;;  %vm3624_vm13 = vcmp.lt.s32.totalorder %v11145_v37, 0 }
 0x3e1   : > { %v3584_v46 = vsub.s32 0, %v10054_v40  ;;  %5344 = vcosq.f32 %v3918_v54  ;;  %vm10071_vm7 = vcmp.le.f32.partialorder %v3622_v56, 0.7853982  ;;  %v3707_v20 = vsel %vm3624_vm13, %v3706_v13, %v3705_v12  ;;  %v11197_v13 = vld [vmem:[#allocation11_spill] sm:$0xff] }
 0x3e2   : > { %v3709_v19 = vsel %vm3624_vm13, %v3708_v7, %v9925_v57  ;;  %v4022_v1 = vsel %vm10058_vm4, %v11180_v60, %v4019_v51  ;;  %v4123_v16 = vsel %vm4040_vm8, %v4122_v18, %v4121_v36  ;;  %v3710_v49 = vsel %vm10071_vm7, %v11145_v37, %v3707_v20  ;;  %v11189_v57 = vld [vmem:[#allocation25_spill] sm:$0xff] }
 0x3e3   : > { %v4949_v55 = vmin.u32 %v3584_v46, %v10054_v40  ;;  %v3508_v56 = vand.u32 3, %v3507_v26  ;;  %v3511_v41 = vxor.u32 2147483648, %v11187_v50  ;;  %5346 = vcosq.f32 %v3710_v49  ;;  %v11196_v7 = vld [vmem:[#allocation9_spill] sm:$0xff] }
 0x3e4   : > { %v3396_v23 = vsub.s32 4, %v11188_v30  ;;  %v3514_v47 = vxor.u32 2147483648, %v11189_v57  ;;  %v3711_v58 = vsel %vm10071_vm7, 0, %v3709_v19  ;;  %5348 = vsinq.f32 %v3710_v49 }
 0x3e5   : > { %v3586_v10 = vclz %v4949_v55  ;;  %5350 = vsinq.f32 %v3918_v54  ;;  %v11190_v42 = vand.u32 2147483647, %v11184_v11  ;;  %v10096_v29 = vpop.eup %5340  ;;  %vm3510_vm11 = vcmp.eq.s32.totalorder %v3508_v56, 0 }
 0x3e6   : > { %5352 = vcosq.f32 %v4022_v1  ;;  %vm3513_vm5 = vcmp.eq.s32.totalorder %v3508_v56, 2  ;;  %v3715_v34 = vadd.s32 3, %v3711_v58  ;;  %vm11194_vm2 = vcmp.lt.s32.totalorder %v11193_v63, 0 }
 0x3e7   : > { %vm10092_vm0 = vcmp.le.f32.partialorder %v11190_v42, 0.7853982  ;;  %v4950_v14 = vadd.s32 4294967294, %v3586_v10  ;;  %v3397_v31 = vsel %vm11194_vm2, %v3396_v23, %v11188_v30  ;;  %v3512_v17 = vsel %vm3510_vm11, %v11189_v57, %v3511_v41 }
 0x3e8   : > { %v4126_v22 = vsel %vm10092_vm0, %v11184_v11, %v4123_v16  ;;  %v3515_v48 = vsel %vm3513_vm5, %v3514_v47, %v11187_v50  ;;  %5354 = vsinq.f32 %v4022_v1  ;;  %vm3509_vm1 = vcmp.lt.s32.totalorder %v3508_v56, 2  ;;  %v11198_v56 = vld [vmem:[#allocation59_spill] sm:$0xff] }
 0x3e9   : > { %vm4951_vm10 = vcmp.lt.s32.totalorder %v4950_v14, 0  ;;  %v5398_v36 = vmov 0.0   ;;  %v3399_v28 = vsel %vm9202_vm12, 0, %v3397_v31  ;;  %v3574_v0 = vadd.s32 %v9979_v15, %v9984_v21 }
 0x3ea   : > { %v3589_v32 = vsel %vm4951_vm10, 0, %v4950_v14  ;;  %4318 = vmatprep.mubr.f32.mxu0 %v5398_v36  ;;  %4567 = vmatprep.mubr.f32.mxu1 %v5398_v36  ;;  %v10108_v24 = vpop.eup %5342  ;;  %5356 = vcosq.f32 %v4126_v22  ;;  %v3516_v61 = vsel %vm3509_vm1, %v3512_v17, %v3515_v48  ;;  %v3716_v25 = vand.u32 3, %v3715_v34 }
 0x3eb   : > { %v3590_v44 = vsub.s32 32, %v3589_v32  ;;  %v3594_v39 = vsub.s32 4294967266, %v3589_v32  ;;  %v10114_v59 = vpop.eup %5344  ;;  %v3591_v52 = vshll.u32 %v10054_v40, %v3589_v32  ;;  %v3916_v54 = vsub.s32 4, %v11196_v7  ;;  %v11200_v32 = vld [vmem:[#allocation40_spill] sm:$0xff] }
 0x3ec   : > { %5358 = vsinq.f32 %v4126_v22  ;;  %vm3506_vm12 = vweird.f32 %v11071_v8  ;;  %v3403_v27 = vadd.s32 3, %v3399_v28  ;;  %v4124_v46 = vsub.s32 4, %v11197_v13  ;;  %v11199_v22 = vld [vmem:[#allocation2_spill] sm:$0xff] }
 0x3ed   : > { %v3592_v6 = vshrl.u32 %v3574_v0, %v3590_v44  ;;  %v3595_v12 = vadd.s32 127, %v3594_v39  ;;  %v5347_v18 = vpop.eup %5346  ;;  %v3517_v20 = vsel %vm3506_vm12, nan, %v3516_v61  ;;  %vm3714_vm13 = vweird.f32 %v11145_v37  ;;  %v4148_v44 = vld [vmem:[%s10309_s4 + $0x30] sm:$0xff] }
 0x3ee   : > { %v5349_v51 = vpop.eup %5348  ;;  %v3722_v15 = vxor.u32 2147483648, %v5347_v18  ;;  %vm3721_vm7 = vcmp.eq.s32.totalorder %v3716_v25, 2  ;;  %vm3718_vm11 = vcmp.eq.s32.totalorder %v3716_v25, 0  ;;  %v3917_v8 = vsel %vm3832_vm3, %v3916_v54, %v11196_v7 }
 0x3ef   : > { %v3593_v21 = vor.u32 %v3592_v6, %v3591_v52  ;;  %v3596_v26 = vshll.u32 %v3595_v12, 23  ;;  %v10120_v45 = vpop.eup %5350  ;;  %v3719_v40 = vxor.u32 2147483648, %v5349_v51  ;;  %vm3717_vm5 = vcmp.lt.s32.totalorder %v3716_v25, 2 }
 0x3f0   : > { %v10123_v19 = vpop.eup %5352  ;;  %v3723_v1 = vsel %vm3721_vm7, %v3722_v15, %v5349_v51  ;;  %v3404_v55 = vand.u32 3, %v3403_v27  ;;  %v4020_v50 = vsub.s32 4, %v11198_v56  ;;  %v4125_v57 = vsel %vm4040_vm8, %v4124_v46, %v11197_v13 }
 0x3f1   : > { %v3597_v16 = vor.u32 4788187, %v3596_v26  ;;  %v3720_v49 = vsel %vm3718_vm11, %v5347_v18, %v3719_v40  ;;  %v3600_v23 = vcvt.s32.f32 %v3593_v21  ;;  %v3604_v10 = vsub.s32 4, %v10022_v3 }
 0x3f2   : > { %v3724_v41 = vsel %vm3717_vm5, %v3720_v49, %v3723_v1  ;;  %v10132_v47 = vpop.eup %5354  ;;  %v3919_v42 = vsel %vm10045_vm15, 0, %v3917_v8  ;;  %v3812_v14 = vsub.s32 4, %v11199_v22  ;;  %5360 = vsinq.f32 %v10041_v4 }
 0x3f3   : > { %v3598_v30 = vand.u32 2147483647, %v3597_v16  ;;  %v3725_v58 = vsel %vm3714_vm13, nan, %v3724_v41  ;;  %v3407_v48 = vxor.u32 2147483648, %v10096_v29  ;;  %v3410_v43 = vxor.u32 2147483648, %v11200_v32 }
 0x3f4   : > { %v5003_v34 = vpack.c.bf16 %v3725_v58, %v3517_v20  ;;  %v5357_v17 = vpop.eup %5356  ;;  %v4127_v37 = vsel %vm10092_vm0, 0, %v4125_v57  ;;  %v4021_v28 = vsel %vm3936_vm14, %v4020_v50, %v11198_v56  ;;  %vm3520_vm3 = vcmp.lt.s32.totalorder %v11154_v5, 0 }
 0x3f5   : > { %v3601_v31 = vmul.f32 %v3600_v23, %v3598_v30  ;;  %v3923_v0 = vadd.s32 3, %v3919_v42  ;;  %vm3406_vm15 = vcmp.eq.s32.totalorder %v3404_v55, 0  ;;  %vm10151_vm8 = vcmp.le.f32.partialorder %v3518_v9, 0.7853982 }
 0x3f6   : > { %5004 = vmatprep.subr.bf16.mxu0 %v5003_v34  ;;  %v5359_v4 = vpop.eup %5358  ;;  %v3605_v62 = vsel %vm3520_vm3, %v3604_v10, %v10022_v3  ;;  %v3813_v39 = vsel %vm3728_vm6, %v3812_v14, %v11199_v22  ;;  %vm3409_vm14 = vcmp.eq.s32.totalorder %v3404_v55, 2  ;;  %v4131_v25 = vadd.s32 3, %v4127_v37 }
 0x3f7   : > { %v3602_v38 = vxor.u32 2147483648, %v3601_v31  ;;  %v4023_v52 = vsel %vm10058_vm4, 0, %v4021_v28  ;;  %vm3405_vm0 = vcmp.lt.s32.totalorder %v3404_v55, 2  ;;  %v3408_v6 = vsel %vm3406_vm15, %v11200_v32, %v3407_v48 }
 0x3f8   : > { %v3411_v9 = vsel %vm3409_vm14, %v3410_v43, %v10096_v29  ;;  %v3607_v3 = vsel %vm10151_vm8, 0, %v3605_v62  ;;  %v3924_v7 = vand.u32 3, %v3923_v0  ;;  %v3815_v54 = vsel %vm10031_vm9, 0, %v3813_v39  ;;  %v4146_v0 = vld [vmem:[%s10309_s4 + $0x20] sm:$0xff]  ;;  %v4149_v62 = vld [vmem:[%s10309_s4 + $0x38] sm:$0xff] }
 0x3f9   : > { %v3603_v61 = vsel %vm3520_vm3, %v3602_v38, %v3601_v31  ;;  %v3927_v53 = vxor.u32 2147483648, %v10120_v45  ;;  %v3930_v18 = vxor.u32 2147483648, %v10114_v59  ;;  %v4027_v27 = vadd.s32 3, %v4023_v52  ;;  %v4150_v39 = vld [vmem:[%s10309_s4 + $0x40] sm:$0xff]  ;;  %v4153_v52 = vld [vmem:[%s10309_s4 + $0x58] sm:$0xff] }
 0x3fa   : > { %v3606_v12 = vsel %vm10151_vm8, %v11154_v5, %v3603_v61  ;;  %v3412_v51 = vsel %vm3405_vm0, %v3408_v6, %v3411_v9  ;;  %v4132_v29 = vand.u32 3, %v4131_v25  ;;  %v3611_v15 = vadd.s32 3, %v3607_v3  ;;  %v4151_v61 = vld [vmem:[%s10309_s4 + $0x48] sm:$0xff]  ;;  %v4152_v25 = vld [vmem:[%s10309_s4 + $0x50] sm:$0xff]  ;;  %v4154_v6 = vld [vmem:[%s10309_s4 + $0x60] sm:$0xff] }
 0x3fb   : > { %5362 = vcosq.f32 %v3606_v12  ;;  %v4135_v21 = vxor.u32 2147483648, %v5359_v4  ;;  %v4138_v26 = vxor.u32 2147483648, %v5357_v17  ;;  %v3819_v13 = vadd.s32 3, %v3815_v54  ;;  %v4155_v9 = vld [vmem:[%s10309_s4 + $0x68] sm:$0xff]  ;;  %v4157_v3 = vld [vmem:[%s10309_s4 + $0x78] sm:$0xff] }
 0x3fc   : > { %5364 = vsinq.f32 %v3606_v12  ;;  %v5361_v46 = vpop.eup %5360  ;;  %vm3402_vm6 = vweird.f32 %v11193_v63  ;;  %vm3926_vm4 = vcmp.eq.s32.totalorder %v3924_v7, 0  ;;  %vm3929_vm2 = vcmp.eq.s32.totalorder %v3924_v7, 2  ;;  %v4156_v12 = vld [vmem:[%s10309_s4 + $0x70] sm:$0xff] }
 0x3fd   : > { %v3413_v20 = vsel %vm3402_vm6, nan, %v3412_v51  ;;  %v3928_v33 = vsel %vm3926_vm4, %v10114_v59, %v3927_v53  ;;  %v3931_v40 = vsel %vm3929_vm2, %v3930_v18, %v10120_v45  ;;  %v4028_v1 = vand.u32 3, %v4027_v27  ;;  %v4177_v53 = vpop.permute.xlu0 %4176  ;;  %v4182_v27 = vpop.permute.xlu1 %4181 }
 0x3fe   : > { %vm4134_vm9 = vcmp.eq.s32.totalorder %v4132_v29, 0  ;;  %vm4137_vm10 = vcmp.eq.s32.totalorder %v4132_v29, 2  ;;  %v4031_v16 = vxor.u32 2147483648, %v10132_v47  ;;  %v4034_v8 = vxor.u32 2147483648, %v10123_v19 }
 0x3ff   : > { %v3612_v49 = vand.u32 3, %v3611_v15  ;;  %v4136_v55 = vsel %vm4134_vm9, %v5357_v17, %v4135_v21  ;;  %v4139_v56 = vsel %vm4137_vm10, %v4138_v26, %v5359_v4  ;;  %v3820_v50 = vand.u32 3, %v3819_v13  ;;  %v4147_v4 = vld [vmem:[%s10309_s4 + $0x28] sm:$0xff] }
 0x400   : > { %vm3610_vm1 = vweird.f32 %v11154_v5  ;;  %vm4130_vm12 = vweird.f32 %v11184_v11  ;;  %v3823_v63 = vxor.u32 2147483648, %v5361_v46  ;;  %v3826_v59 = vxor.u32 2147483648, %v10108_v24  ;;  %v4143_v5 = vld [vmem:[%s10309_s4 + $0x8] sm:$0xff] }
 0x401   : > { %vm3925_vm13 = vcmp.lt.s32.totalorder %v3924_v7, 2  ;;  %vm4133_vm7 = vcmp.lt.s32.totalorder %v4132_v29, 2  ;;  %vm4030_vm11 = vcmp.eq.s32.totalorder %v4028_v1, 0  ;;  %vm4033_vm5 = vcmp.eq.s32.totalorder %v4028_v1, 2 }
 0x402   : > { %v3932_v41 = vsel %vm3925_vm13, %v3928_v33, %v3931_v40  ;;  %v4140_v30 = vsel %vm4133_vm7, %v4136_v55, %v4139_v56  ;;  %v4032_v23 = vsel %vm4030_vm11, %v10123_v19, %v4031_v16  ;;  %v4035_v57 = vsel %vm4033_vm5, %v4034_v8, %v10132_v47  ;;  %v4187_v8 = vpop.permute.xlu0 %4186  ;;  %v4192_v56 = vpop.permute.xlu1 %4191 }
 0x403   : > { %vm3617_vm3 = vcmp.eq.s32.totalorder %v3612_v49, 2  ;;  %vm3822_vm15 = vcmp.eq.s32.totalorder %v3820_v50, 0  ;;  %vm3825_vm8 = vcmp.eq.s32.totalorder %v3820_v50, 2  ;;  %vm4029_vm14 = vcmp.lt.s32.totalorder %v4028_v1, 2 }
 0x404   : > { %v3824_v22 = vsel %vm3822_vm15, %v10108_v24, %v3823_v63  ;;  %v3827_v14 = vsel %vm3825_vm8, %v3826_v59, %v5361_v46  ;;  %vm3614_vm0 = vcmp.eq.s32.totalorder %v3612_v49, 0  ;;  %v4141_v31 = vsel %vm4130_vm12, nan, %v4140_v30 }
 0x405   : > { %v5363_v45 = vpop.eup %5362  ;;  %v4036_v17 = vsel %vm4029_vm14, %v4032_v23, %v4035_v57  ;;  %vm3613_vm6 = vcmp.lt.s32.totalorder %v3612_v49, 2  ;;  %vm3922_vm4 = vweird.f32 %v11170_v2  ;;  %vm3821_vm2 = vcmp.lt.s32.totalorder %v3820_v50, 2  ;;  %v4142_v2 = vld [vmem:[%s10309_s4] sm:$0xff] }
 0x406   : > { %v5365_v58 = vpop.eup %5364  ;;  %v3618_v10 = vxor.u32 2147483648, %v5363_v45  ;;  %v3933_v48 = vsel %vm3922_vm4, nan, %v3932_v41  ;;  %v3828_v32 = vsel %vm3821_vm2, %v3824_v22, %v3827_v14  ;;  %vm4026_vm9 = vweird.f32 %v11180_v60  ;;  %v4145_v60 = vld [vmem:[%s10309_s4 + $0x18] sm:$0xff]  ;;  %v4197_v14 = vpop.permute.xlu0 %4196 }
 0x407   : > { %v3615_v42 = vxor.u32 2147483648, %v5365_v58  ;;  %v5007_v43 = vpack.c.bf16 %v4141_v31, %v3933_v48  ;;  %v4037_v37 = vsel %vm4026_vm9, nan, %v4036_v17  ;;  %vm3818_vm10 = vweird.f32 %v11168_v35  ;;  %v4144_v35 = vld [vmem:[%s10309_s4 + $0x10] sm:$0xff]  ;;  %v4202_v17 = vpop.permute.xlu1 %4201 }
 0x408   : > { %v3619_v34 = vsel %vm3617_vm3, %v3618_v10, %v5365_v58  ;;  %v3829_v11 = vsel %vm3818_vm10, nan, %v3828_v32 }
 0x409   : > { %v3616_v19 = vsel %vm3614_vm0, %v5363_v45, %v3615_v42  ;;  %v5009_v38 = vpack.c.bf16 %v4037_v37, %v3829_v11 }
 0x40a   : > { %v3620_v47 = vsel %vm3613_vm6, %v3616_v19, %v3619_v34 }
 0x40b   : > { %v3621_v24 = vsel %vm3610_vm1, nan, %v3620_v47  ;;  %vm4646_vm1 = vcmask 523264  }
 0x40c   : > { %v5005_v28 = vpack.c.bf16 %v3621_v24, %v3413_v20 }
 0x40e   : > { %5006 = vmatpush1.bf16.msra.mxu0 %v5005_v28 }
 0x40f   : > { %5008 = vmatprep.subr.bf16.mxu0 %v5007_v43 }
 0x412   : > { %5010 = vmatpush1.bf16.msra.mxu0 %v5009_v38 }
 0x415   : > { %4319 = vmatmul.mubr.f32.vlgmr.msra.gmra.mrb[0].mxu0 %v4142_v2 }
 0x416   : > { %4324 = vmatprep.mubr.f32.mxu0 %v5398_v36 }
 0x419   : > { %4325 = vmatmul.mubr.f32.gmra.mrb[2].mxu0 %v4143_v5 }
 0x41a   : > { %4330 = vmatprep.mubr.f32.mxu0 %v5398_v36 }
 0x41d   : > { %4331 = vmatmul.mubr.f32.gmra.mrb[4].mxu0 %v4144_v35  ;;  %v4207_v35 = vpop.permute.xlu0 %4206 }
 0x41e   : > { %4336 = vmatprep.mubr.f32.mxu0 %v5398_v36 }
 0x421   : > { %4337 = vmatmul.mubr.f32.gmra.mrb[6].mxu0 %v4145_v60 }
 0x422   : > { %4342 = vmatprep.mubr.f32.mxu0 %v5398_v36 }
 0x425   : > { %4343 = vmatmul.mubr.f32.gmra.mrb[8].mxu0 %v4146_v0 }
 0x426   : > { %4348 = vmatprep.mubr.f32.mxu0 %v5398_v36 }
 0x429   : > { %4349 = vmatmul.mubr.f32.gmra.mrb[10].mxu0 %v4147_v4  ;;  %v4212_v4 = vpop.permute.xlu1 %4211 }
 0x42a   : > { %4354 = vmatprep.mubr.f32.mxu0 %v5398_v36 }
 0x42d   : > { %4355 = vmatmul.mubr.f32.gmra.mrb[12].mxu0 %v4148_v44 }
 0x42e   : > { %4360 = vmatprep.mubr.f32.mxu0 %v5398_v36 }
 0x431   : > { %4361 = vmatmul.mubr.f32.gmra.mrb[14].mxu0 %v4149_v62 }
 0x432   : > { %4366 = vmatprep.mubr.f32.mxu0 %v5398_v36 }
 0x435   : > { %4367 = vmatmul.mubr.f32.gmra.mrb[16].mxu0 %v4150_v39 }
 0x436   : > { %4372 = vmatprep.mubr.f32.mxu0 %v5398_v36 }
 0x439   : > { %4373 = vmatmul.mubr.f32.gmra.mrb[18].mxu0 %v4151_v61 }
 0x43a   : > { %4378 = vmatprep.mubr.f32.mxu0 %v5398_v36 }
 0x43d   : > { %4379 = vmatmul.mubr.f32.gmra.mrb[20].mxu0 %v4152_v25 }
 0x43e   : > { %4384 = vmatprep.mubr.f32.mxu0 %v5398_v36 }
 0x441   : > { %4385 = vmatmul.mubr.f32.gmra.mrb[22].mxu0 %v4153_v52 }
 0x442   : > { %4390 = vmatprep.mubr.f32.mxu0 %v5398_v36 }
 0x445   : > { %4391 = vmatmul.mubr.f32.gmra.mrb[24].mxu0 %v4154_v6 }
 0x446   : > { %4396 = vmatprep.mubr.f32.mxu0 %v5398_v36 }
 0x449   : > { %4397 = vmatmul.mubr.f32.gmra.mrb[26].mxu0 %v4155_v9 }
 0x44a   : > { %4402 = vmatprep.mubr.f32.mxu0 %v5398_v36 }
 0x44d   : > { %4403 = vmatmul.mubr.f32.gmra.mrb[28].mxu0 %v4156_v12 }
 0x44e   : > { %4408 = vmatprep.mubr.f32.mxu0 %v5398_v36 }
 0x451   : > { %4409 = vmatmul.mubr.f32.gmra.mrb[30].mxu0 %v4157_v3 }
 0x4e8   : > { %v4320_v7 = vpop.f32.mrb[0].mxu0 }
 0x4e9   : > { %v4322_v54 = vpop.f32.mrb[1].mxu0  ;;  %v4321_v18 = vadd.f32 %v4320_v7, %v4177_v53 }
 0x4ea   : > { %v4323_v51 = vadd.f32 %v4322_v54, %v4177_v53  ;;  %v4217_v53 = vpop.permute.xlu0 %4216 }
 0x4eb   : > { %v4415_v13 = vmax.f32 %v4321_v18, 0.0 }
 0x4ec   : > { %v4326_v29 = vpop.f32.mrb[2].mxu0  ;;  %v4416_v20 = vmax.f32 %v4323_v51, 0.0  ;;  %v4222_v51 = vpop.permute.xlu1 %4221 }
 0x4ed   : > { %v4327_v15 = vadd.f32 %v4326_v29, %v4182_v27  ;;  %v4328_v21 = vpop.f32.mrb[3].mxu0 }
 0x4ee   : > { %v4329_v26 = vadd.f32 %v4328_v21, %v4182_v27 }
 0x4ef   : > { %v4417_v46 = vmax.f32 %v4327_v15, 0.0 }
 0x4f0   : > { %v4418_v33 = vmax.f32 %v4329_v26, 0.0  ;;  %v4332_v40 = vpop.f32.mrb[4].mxu0 }
 0x4f1   : > { %v4334_v1 = vpop.f32.mrb[5].mxu0  ;;  %v5013_v16 = vpack.c.bf16 %v4417_v46, %v4415_v13  ;;  %v4333_v55 = vadd.f32 %v4332_v40, %v4187_v8 }
 0x4f2   : > { %v5011_v49 = vpack.c.bf16 %v4418_v33, %v4416_v20  ;;  %v4335_v50 = vadd.f32 %v4334_v1, %v4187_v8 }
 0x4f3   : > { %v4419_v30 = vmax.f32 %v4333_v55, 0.0 }
 0x4f4   : > { %v4338_v63 = vpop.f32.mrb[6].mxu0  ;;  %5012 = vmatprep.subr.bf16.mxu1 %v5011_v49  ;;  %v4420_v57 = vmax.f32 %v4335_v50, 0.0  ;;  %v4227_v49 = vpop.permute.xlu0 %4226 }
 0x4f5   : > { %v4339_v59 = vadd.f32 %v4338_v63, %v4192_v56  ;;  %v4340_v45 = vpop.f32.mrb[7].mxu0  ;;  %5014 = vmatpush1.bf16.msra.mxu1 %v5013_v16  ;;  %v4232_v50 = vpop.permute.xlu1 %4231 }
 0x4f6   : > { %v4341_v41 = vadd.f32 %v4340_v45, %v4192_v56 }
 0x4f7   : > { %v4421_v23 = vmax.f32 %v4339_v59, 0.0 }
 0x4f8   : > { %v4422_v58 = vmax.f32 %v4341_v41, 0.0  ;;  %v4344_v10 = vpop.f32.mrb[8].mxu0 }
 0x4f9   : > { %v5017_v42 = vpack.c.bf16 %v4421_v23, %v4419_v30  ;;  %v4346_v22 = vpop.f32.mrb[9].mxu0  ;;  %v4345_v31 = vadd.f32 %v4344_v10, %v4197_v14 }
 0x4fa   : > { %v5015_v34 = vpack.c.bf16 %v4422_v58, %v4420_v57  ;;  %v4347_v19 = vadd.f32 %v4346_v22, %v4197_v14 }
 0x4fb   : > { %v4423_v43 = vmax.f32 %v4345_v31, 0.0 }
 0x4fc   : > { %v4350_v47 = vpop.f32.mrb[10].mxu0  ;;  %5016 = vmatprep.subr.bf16.mxu1 %v5015_v34  ;;  %v4424_v28 = vmax.f32 %v4347_v19, 0.0  ;;  %v4237_v34 = vpop.permute.xlu0 %4236 }
 0x4fd   : > { %v4351_v48 = vadd.f32 %v4350_v47, %v4202_v17  ;;  %v4352_v32 = vpop.f32.mrb[11].mxu0  ;;  %5018 = vmatpush1.bf16.msra.mxu1 %v5017_v42  ;;  %v4242_v19 = vpop.permute.xlu1 %4241 }
 0x4fe   : > { %v4353_v24 = vadd.f32 %v4352_v32, %v4202_v17 }
 0x4ff   : > { %v4425_v37 = vmax.f32 %v4351_v48, 0.0 }
 0x500   : > { %v4426_v11 = vmax.f32 %v4353_v24, 0.0  ;;  %v4356_v38 = vpop.f32.mrb[12].mxu0 }
 0x501   : > { %v5021_v2 = vpack.c.bf16 %v4425_v37, %v4423_v43  ;;  %v4358_v5 = vpop.f32.mrb[13].mxu0  ;;  %v4357_v0 = vadd.f32 %v4356_v38, %v4207_v35 }
 0x502   : > { %v5019_v60 = vpack.c.bf16 %v4426_v11, %v4424_v28  ;;  %v4359_v44 = vadd.f32 %v4358_v5, %v4207_v35 }
 0x503   : > { %v4427_v52 = vmax.f32 %v4357_v0, 0.0 }
 0x504   : > { %v4362_v62 = vpop.f32.mrb[14].mxu0  ;;  %5020 = vmatprep.subr.bf16.mxu1 %v5019_v60  ;;  %v4428_v9 = vmax.f32 %v4359_v44, 0.0  ;;  %v4247_v60 = vpop.permute.xlu0 %4246 }
 0x505   : > { %v4363_v39 = vadd.f32 %v4362_v62, %v4212_v4  ;;  %v4364_v61 = vpop.f32.mrb[15].mxu0  ;;  %5022 = vmatpush1.bf16.msra.mxu1 %v5021_v2  ;;  %v4252_v44 = vpop.permute.xlu1 %4251 }
 0x506   : > { %v4365_v25 = vadd.f32 %v4364_v61, %v4212_v4 }
 0x507   : > { %v4429_v6 = vmax.f32 %v4363_v39, 0.0 }
 0x508   : > { %v4430_v12 = vmax.f32 %v4365_v25, 0.0  ;;  %v4368_v3 = vpop.f32.mrb[16].mxu0 }
 0x509   : > { %v5025_v7 = vpack.c.bf16 %v4429_v6, %v4427_v52  ;;  %v4370_v54 = vpop.f32.mrb[17].mxu0  ;;  %v4369_v27 = vadd.f32 %v4368_v3, %v4217_v53 }
 0x50a   : > { %v5023_v18 = vpack.c.bf16 %v4430_v12, %v4428_v9  ;;  %v4371_v29 = vadd.f32 %v4370_v54, %v4217_v53  ;;  %v4447_v53 = vld [vmem:[%s10310_s5] sm:$0xff] }
 0x50b   : > { %v4431_v46 = vmax.f32 %v4369_v27, 0.0  ;;  %v4449_v27 = vld [vmem:[%s10310_s5 + $0x10] sm:$0xff] }
 0x50c   : > { %v4374_v15 = vpop.f32.mrb[18].mxu0  ;;  %5024 = vmatprep.subr.bf16.mxu1 %v5023_v18  ;;  %v4432_v33 = vmax.f32 %v4371_v29, 0.0  ;;  %v4448_v18 = vld [vmem:[%s10310_s5 + $0x8] sm:$0xff]  ;;  %v4451_v29 = vld [vmem:[%s10310_s5 + $0x20] sm:$0xff] }
 0x50d   : > { %v4375_v21 = vadd.f32 %v4374_v15, %v4222_v51  ;;  %v4376_v26 = vpop.f32.mrb[19].mxu0  ;;  %5026 = vmatpush1.bf16.msra.mxu1 %v5025_v7  ;;  %v4452_v15 = vld [vmem:[%s10310_s5 + $0x28] sm:$0xff] }
 0x50e   : > { %v4377_v13 = vadd.f32 %v4376_v26, %v4222_v51  ;;  %v4450_v51 = vld [vmem:[%s10310_s5 + $0x18] sm:$0xff] }
 0x50f   : > { %v4433_v20 = vmax.f32 %v4375_v21, 0.0  ;;  %v4453_v21 = vld [vmem:[%s10310_s5 + $0x30] sm:$0xff]  ;;  %v4454_v26 = vld [vmem:[%s10310_s5 + $0x38] sm:$0xff] }
 0x510   : > { %v4434_v40 = vmax.f32 %v4377_v13, 0.0  ;;  %v4380_v1 = vpop.f32.mrb[20].mxu0 }
 0x511   : > { %v5029_v16 = vpack.c.bf16 %v4433_v20, %v4431_v46  ;;  %v4382_v8 = vpop.f32.mrb[21].mxu0  ;;  %v4381_v56 = vadd.f32 %v4380_v1, %v4227_v49  ;;  %v4466_v20 = vpop.permute.xlu0 %4465 }
 0x512   : > { %v5027_v55 = vpack.c.bf16 %v4434_v40, %v4432_v33  ;;  %v4383_v63 = vadd.f32 %v4382_v8, %v4227_v49  ;;  %v4471_v40 = vpop.permute.xlu1 %4470 }
 0x513   : > { %v4435_v23 = vmax.f32 %v4381_v56, 0.0 }
 0x514   : > { %v4386_v59 = vpop.f32.mrb[22].mxu0  ;;  %5028 = vmatprep.subr.bf16.mxu1 %v5027_v55  ;;  %v4436_v58 = vmax.f32 %v4383_v63, 0.0 }
 0x515   : > { %v4387_v45 = vadd.f32 %v4386_v59, %v4232_v50  ;;  %v4388_v41 = vpop.f32.mrb[23].mxu0  ;;  %5030 = vmatpush1.bf16.msra.mxu1 %v5029_v16 }
 0x516   : > { %v4389_v30 = vadd.f32 %v4388_v41, %v4232_v50 }
 0x517   : > { %v4437_v57 = vmax.f32 %v4387_v45, 0.0 }
 0x518   : > { %v4438_v10 = vmax.f32 %v4389_v30, 0.0  ;;  %v4392_v42 = vpop.f32.mrb[24].mxu0 }
 0x519   : > { %v5033_v22 = vpack.c.bf16 %v4437_v57, %v4435_v23  ;;  %v4394_v14 = vpop.f32.mrb[25].mxu0  ;;  %v4393_v17 = vadd.f32 %v4392_v42, %v4237_v34  ;;  %v4476_v23 = vpop.permute.xlu0 %4475 }
 0x51a   : > { %v5031_v31 = vpack.c.bf16 %v4438_v10, %v4436_v58  ;;  %v4395_v47 = vadd.f32 %v4394_v14, %v4237_v34  ;;  %v4481_v10 = vpop.permute.xlu1 %4480 }
 0x51b   : > { %v4439_v37 = vmax.f32 %v4393_v17, 0.0 }
 0x51c   : > { %v4398_v48 = vpop.f32.mrb[26].mxu0  ;;  %5032 = vmatprep.subr.bf16.mxu1 %v5031_v31  ;;  %v4440_v11 = vmax.f32 %v4395_v47, 0.0 }
 0x51d   : > { %v4399_v32 = vadd.f32 %v4398_v48, %v4242_v19  ;;  %v4400_v24 = vpop.f32.mrb[27].mxu0  ;;  %5034 = vmatpush1.bf16.msra.mxu1 %v5033_v22 }
 0x51e   : > { %v4401_v43 = vadd.f32 %v4400_v24, %v4242_v19 }
 0x51f   : > { %v4441_v28 = vmax.f32 %v4399_v32, 0.0 }
 0x520   : > { %v4442_v38 = vmax.f32 %v4401_v43, 0.0  ;;  %v4404_v2 = vpop.f32.mrb[28].mxu0 }
 0x521   : > { %v5037_v5 = vpack.c.bf16 %v4441_v28, %v4439_v37  ;;  %v4406_v35 = vpop.f32.mrb[29].mxu0  ;;  %v4405_v4 = vadd.f32 %v4404_v2, %v4247_v60  ;;  %v4486_v37 = vpop.permute.xlu0 %4485 }
 0x522   : > { %v5035_v0 = vpack.c.bf16 %v4442_v38, %v4440_v11  ;;  %v4407_v62 = vadd.f32 %v4406_v35, %v4247_v60  ;;  %v4491_v38 = vpop.permute.xlu1 %4490 }
 0x523   : > { %v4443_v6 = vmax.f32 %v4405_v4, 0.0 }
 0x524   : > { %v4410_v39 = vpop.f32.mrb[30].mxu0  ;;  %5036 = vmatprep.subr.bf16.mxu1 %v5035_v0  ;;  %v4444_v12 = vmax.f32 %v4407_v62, 0.0 }
 0x525   : > { %v4411_v61 = vadd.f32 %v4410_v39, %v4252_v44  ;;  %v4412_v25 = vpop.f32.mrb[31].mxu0  ;;  %5038 = vmatpush1.bf16.msra.mxu1 %v5037_v5 }
 0x526   : > { %v4413_v52 = vadd.f32 %v4412_v25, %v4252_v44 }
 0x527   : > { %v4445_v9 = vmax.f32 %v4411_v61, 0.0 }
 0x528   : > { %v4446_v3 = vmax.f32 %v4413_v52, 0.0 }
 0x529   : > { %v5041_v7 = vpack.c.bf16 %v4445_v9, %v4443_v6  ;;  %v4496_v6 = vpop.permute.xlu0 %4495 }
 0x52a   : > { %v5039_v54 = vpack.c.bf16 %v4446_v3, %v4444_v12  ;;  %v4501_v3 = vpop.permute.xlu1 %4500 }
 0x52c   : > { %5040 = vmatprep.subr.bf16.mxu1 %v5039_v54 }
 0x52d   : > { %5042 = vmatpush1.bf16.msra.mxu1 %v5041_v7 }
 0x530   : > { %4568 = vmatmul.mubr.f32.vlgmr.msra.gmra.mrb[0].mxu1 %v4447_v53 }
 0x531   : > { %4573 = vmatprep.mubr.f32.mxu1 %v5398_v36 }
 0x534   : > { %4574 = vmatmul.mubr.f32.gmra.mrb[2].mxu1 %v4448_v18 }
 0x535   : > { %4579 = vmatprep.mubr.f32.mxu1 %v5398_v36 }
 0x538   : > { %4580 = vmatmul.mubr.f32.gmra.mrb[4].mxu1 %v4449_v27 }
 0x539   : > { %4585 = vmatprep.mubr.f32.mxu1 %v5398_v36 }
 0x53c   : > { %4586 = vmatmul.mubr.f32.gmra.mrb[6].mxu1 %v4450_v51 }
 0x53d   : > { %4591 = vmatprep.mubr.f32.mxu1 %v5398_v36 }
 0x540   : > { %4592 = vmatmul.mubr.f32.gmra.mrb[8].mxu1 %v4451_v29 }
 0x541   : > { %4597 = vmatprep.mubr.f32.mxu1 %v5398_v36 }
 0x544   : > { %4598 = vmatmul.mubr.f32.gmra.mrb[10].mxu1 %v4452_v15 }
 0x545   : > { %4603 = vmatprep.mubr.f32.mxu1 %v5398_v36 }
 0x548   : > { %4604 = vmatmul.mubr.f32.gmra.mrb[12].mxu1 %v4453_v21 }
 0x549   : > { %4609 = vmatprep.mubr.f32.mxu1 %v5398_v36 }
 0x54c   : > { %4610 = vmatmul.mubr.f32.gmra.mrb[14].mxu1 %v4454_v26 }
 0x54d   : > { %4717 = vmatprep.mubr.f32.mxu1 %v5398_v36 }
 0x603   : > { %v4569_v13 = vpop.f32.mrb[0].mxu1 }
 0x604   : > { %v4571_v46 = vpop.f32.mrb[1].mxu1  ;;  %v4570_v33 = vadd.f32 %v4569_v13, %v4466_v20 }
 0x605   : > { %v4572_v1 = vadd.f32 %v4571_v46, %v4466_v20  ;;  %v4632_v46 = vld [vmem:[%s10312_s7] sm:$0xff]  ;;  %v4633_v20 = vld [vmem:[%s10312_s7 + $0x8] sm:$0xff] }
 0x606   : > { %v4616_v56 = vmax.f32 %v4570_v33, 0.0  ;;  %v4639_v33 = vpop.permute.xlu0 %4638 }
 0x607   : > { %v4575_v16 = vpop.f32.mrb[2].mxu1  ;;  %v4617_v63 = vmax.f32 %v4572_v1, 0.0 }
 0x608   : > { %v4576_v8 = vadd.f32 %v4575_v16, %v4471_v40  ;;  %v4577_v49 = vpop.f32.mrb[3].mxu1 }
 0x609   : > { %v4578_v55 = vadd.f32 %v4577_v49, %v4471_v40  ;;  %v4644_v49 = vpop.permute.xlu1 %4643 }
 0x60a   : > { %v4618_v50 = vmax.f32 %v4576_v8, 0.0 }
 0x60b   : > { %v4619_v59 = vmax.f32 %v4578_v55, 0.0  ;;  %v4581_v45 = vpop.f32.mrb[4].mxu1 }
 0x60c   : > { %v5045_v41 = vpack.c.bf16 %v4618_v50, %v4616_v56  ;;  %v4583_v30 = vpop.f32.mrb[5].mxu1  ;;  %v4582_v58 = vadd.f32 %v4581_v45, %v4476_v23 }
 0x60d   : > { %v5043_v57 = vpack.c.bf16 %v4619_v59, %v4617_v63  ;;  %v4584_v42 = vadd.f32 %v4583_v30, %v4476_v23 }
 0x60e   : > { %v4620_v17 = vmax.f32 %v4582_v58, 0.0 }
 0x60f   : > { %v4587_v22 = vpop.f32.mrb[6].mxu1  ;;  %5044 = vmatprep.subr.bf16.mxu1 %v5043_v57  ;;  %v4621_v47 = vmax.f32 %v4584_v42, 0.0 }
 0x610   : > { %v4588_v14 = vadd.f32 %v4587_v22, %v4481_v10  ;;  %v4589_v34 = vpop.f32.mrb[7].mxu1  ;;  %5046 = vmatpush1.bf16.msra.mxu1 %v5045_v41 }
 0x611   : > { %v4590_v31 = vadd.f32 %v4589_v34, %v4481_v10 }
 0x612   : > { %v4622_v19 = vmax.f32 %v4588_v14, 0.0 }
 0x613   : > { %v4623_v48 = vmax.f32 %v4590_v31, 0.0  ;;  %v4593_v32 = vpop.f32.mrb[8].mxu1 }
 0x614   : > { %v5049_v24 = vpack.c.bf16 %v4622_v19, %v4620_v17  ;;  %v4595_v43 = vpop.f32.mrb[9].mxu1  ;;  %v4594_v11 = vadd.f32 %v4593_v32, %v4486_v37 }
 0x615   : > { %v5047_v28 = vpack.c.bf16 %v4623_v48, %v4621_v47  ;;  %v4596_v2 = vadd.f32 %v4595_v43, %v4486_v37 }
 0x616   : > { %v4624_v4 = vmax.f32 %v4594_v11, 0.0 }
 0x617   : > { %v4599_v5 = vpop.f32.mrb[10].mxu1  ;;  %5048 = vmatprep.subr.bf16.mxu1 %v5047_v28  ;;  %v4625_v62 = vmax.f32 %v4596_v2, 0.0 }
 0x618   : > { %v4600_v35 = vadd.f32 %v4599_v5, %v4491_v38  ;;  %v4601_v60 = vpop.f32.mrb[11].mxu1  ;;  %5050 = vmatpush1.bf16.msra.mxu1 %v5049_v24 }
 0x619   : > { %v4602_v0 = vadd.f32 %v4601_v60, %v4491_v38 }
 0x61a   : > { %v4626_v44 = vmax.f32 %v4600_v35, 0.0 }
 0x61b   : > { %v4627_v39 = vmax.f32 %v4602_v0, 0.0  ;;  %v4605_v61 = vpop.f32.mrb[12].mxu1 }
 0x61c   : > { %v5053_v25 = vpack.c.bf16 %v4626_v44, %v4624_v4  ;;  %v4607_v52 = vpop.f32.mrb[13].mxu1  ;;  %v4606_v12 = vadd.f32 %v4605_v61, %v4496_v6 }
 0x61d   : > { %v5051_v9 = vpack.c.bf16 %v4627_v39, %v4625_v62  ;;  %v4608_v7 = vadd.f32 %v4607_v52, %v4496_v6 }
 0x61e   : > { %v4628_v51 = vmax.f32 %v4606_v12, 0.0 }
 0x61f   : > { %v4611_v54 = vpop.f32.mrb[14].mxu1  ;;  %5052 = vmatprep.subr.bf16.mxu1 %v5051_v9  ;;  %v4629_v15 = vmax.f32 %v4608_v7, 0.0 }
 0x620   : > { %v4612_v53 = vadd.f32 %v4611_v54, %v4501_v3  ;;  %v4613_v18 = vpop.f32.mrb[15].mxu1  ;;  %5054 = vmatpush1.bf16.msra.mxu1 %v5053_v25 }
 0x621   : > { %v4614_v27 = vadd.f32 %v4613_v18, %v4501_v3 }
 0x622   : > { %v4630_v29 = vmax.f32 %v4612_v53, 0.0 }
 0x623   : > { %v4631_v21 = vmax.f32 %v4614_v27, 0.0 }
 0x624   : > { %v5057_v26 = vpack.c.bf16 %v4630_v29, %v4628_v51 }
 0x625   : > { %v5055_v13 = vpack.c.bf16 %v4631_v21, %v4629_v15 }
 0x627   : > { %5056 = vmatprep.subr.bf16.mxu1 %v5055_v13 }
 0x628   : > { %5058 = vmatpush1.bf16.msra.mxu1 %v5057_v26 }
 0x62b   : > { %4972 = vmatmul.mubr.msk.f32.vlgmr.msra.gmra.mrb[16].mxu1 %vm4646_vm1, %v4632_v46 }
 0x62c   : > { %4723 = vmatprep.mubr.f32.mxu1 %v5398_v36 }
 0x62f   : > { %4973 = vmatmul.mubr.msk.f32.gmra.mrb[18].mxu1 %vm4646_vm1, %v4633_v20 }
 0x6fe   : > { %v4719_v40 = vpop.f32.mrb[16].mxu1 }
 0x6ff   : > { %v4720_v1 = vadd.f32 %v4719_v40, %v4639_v33  ;;  %v4721_v16 = vpop.f32.mrb[17].mxu1 }
 0x700   : > { %v4722_v8 = vadd.f32 %v4721_v16, %v4639_v33 }
 0x701   : > { %4730 = vst [vmem:[%s390_s25] sm:$0xff] %v4720_v1 }
 0x702   : > { %4731 = vst [vmem:[%s390_s25 + $0x8] sm:$0xff] %v4722_v8  ;;  %v4725_v55 = vpop.f32.mrb[18].mxu1 }
 0x703   : > { %v4726_v36 = vadd.f32 %v4725_v55, %v4644_v49  ;;  %v4727_v56 = vpop.f32.mrb[19].mxu1 }
 0x704   : > { %v4728_v50 = vadd.f32 %v4727_v56, %v4644_v49 }
 0x705   : > { %4732 = vst [vmem:[%s390_s25 + $0x10] sm:$0xff] %v4726_v36 }
 0x706   : > { %4733 = vst [vmem:[%s390_s25 + $0x18] sm:$0xff] %v4728_v50 }
 0x707 PF: > { %s19_s11 = sadd.s32 1, %s5388_s11   ;;  %s11203_s30 = smov %s5384_s10 }
 0x708   : > { %p16_p5 = scmp.ge.s32.totalorder %s19_s11, 4   ;;  %s11204_s10 = smov %s11206_s12 }
 0x70a   :  { %18 = sbr.rel (!%p16_p5) target bundleno = 2 (0x2), region = 89 }

</bundles_post_ra>
